<compile_context>
chip_gen: v7x
topology: tpu7x:2x2x1
jax: 0.10.0
libtpu: 0.0.40
codegen_flags: <defaults>
</compile_context>

<pallas_src>
import functools

import jax
import jax.numpy as jnp
from jax.experimental import pallas as pl
from jax.experimental.pallas import tpu as pltpu

LANES = 128


def _round_up(x, m):
    return ((x + m - 1) // m) * m


# ----------------------------------------------------------------------------
# Pallas kernels
# ----------------------------------------------------------------------------
def _gemm_bias_relu_kernel(x_ref, w_ref, b_ref, o_ref):
    # x: (TILE_M, K) bf16   w: (K, Cp) bf16   b: (1, Cp) f32   o: (TILE_M, Cp) f32
    acc = jnp.dot(x_ref[...], w_ref[...], preferred_element_type=jnp.float32)
    o_ref[...] = jnp.maximum(acc + b_ref[...], 0.0)


def _conv3x3_bn_relu_kernel(x_ref, w_ref, m_ref, b_ref, o_ref, *, H, W):
    # x: (1, (H+4)*W, C) bf16  -- one batch element, 2 zero rows padded top+bottom,
    #                             spatially flattened (row-major, NHWC channels last).
    # w: (9, C, Cp) bf16        -- tap (dy, dx) at index dy*3+dx, BN folded, Cout padded.
    # m: (2, H*W, 1) bf16       -- column-wrap masks for dx=0 (left) and dx=2 (right).
    # b: (1, Cp) f32            -- folded BN bias.
    # o: (1, H*W, Cp) f32
    HW = H * W
    cp = o_ref.shape[-1]
    acc = jnp.zeros((HW, cp), jnp.float32)
    for dy in range(3):
        for dx in range(3):
            # output pixel q=(h*W+w) reads padded flat row q + (dy+1)*W + (dx-1)
            start = (dy + 1) * W + dx - 1
            patch = x_ref[0, start:start + HW, :]
            if dx == 0:
                patch = patch * m_ref[0]        # drop wrapped w==0 contributions
            elif dx == 2:
                patch = patch * m_ref[1]        # drop wrapped w==W-1 contributions
            acc = acc + jnp.dot(patch, w_ref[dy * 3 + dx],
                                preferred_element_type=jnp.float32)
    o_ref[0] = jnp.maximum(acc + b_ref[...], 0.0)


def _maxpool3x3_kernel(x_ref, o_ref, *, H, W):
    # x: (1, H+2, W+2, C) f32 (-inf padded)   o: (1, H, W, C) f32
    acc = x_ref[0, 1:1 + H, 1:1 + W, :]          # center tap (always valid)
    for dy in range(3):
        for dx in range(3):
            if dy == 1 and dx == 1:
                continue
            acc = jnp.maximum(acc, x_ref[0, dy:dy + H, dx:dx + W, :])
    o_ref[0] = acc


def _tanh_heads_kernel(x_ref, w_ref, o_ref, *, beta):
    # x: (7, B, TILE_F) f32   w: (7, 1, TILE_F) f32   o: (7, B) f32 (resident accum)
    @pl.when(pl.program_id(0) == 0)
    def _():
        o_ref[...] = jnp.zeros_like(o_ref)
    t = jnp.tanh(beta * x_ref[...])
    o_ref[...] += jnp.sum(t * t * w_ref[...], axis=-1)


# ----------------------------------------------------------------------------
# Pallas wrappers
# ----------------------------------------------------------------------------
def gemm_bias_relu(x_flat, w, b, tile_m=256):
    """x_flat: (M, K) float; w: (K, Cp) bf16; b: (1, Cp) f32 -> (M, Cp) f32."""
    M, K = x_flat.shape
    cp = w.shape[1]
    tm = min(tile_m, _round_up(M, 8))
    m_pad = _round_up(M, tm)
    x_p = x_flat.astype(jnp.bfloat16)
    if m_pad != M:
        x_p = jnp.pad(x_p, ((0, m_pad - M), (0, 0)))
    out = pl.pallas_call(
        _gemm_bias_relu_kernel,
        grid=(m_pad // tm,),
        in_specs=[pl.BlockSpec((tm, K), lambda i: (i, 0)),
                  pl.BlockSpec((K, cp), lambda i: (0, 0)),
                  pl.BlockSpec((1, cp), lambda i: (0, 0))],
        out_specs=pl.BlockSpec((tm, cp), lambda i: (i, 0)),
        out_shape=jax.ShapeDtypeStruct((m_pad, cp), jnp.float32),
        compiler_params=pltpu.CompilerParams(dimension_semantics=("parallel",)),
    )(x_p, w, b)
    return out[:M]


def conv3x3_bn_relu(a_nhwc, w9, b, cout):
    """3x3 conv, stride 1, pad 1, folded BN + ReLU.  a: (B,H,W,C) f32 -> (B,H,W,cout)."""
    B, H, W, C = a_nhwc.shape
    cp = w9.shape[-1]
    hw = H * W
    # Pad 2 zero rows top & bottom, flatten spatially; halo handled in-kernel.
    xp = jnp.pad(a_nhwc, ((0, 0), (2, 2), (0, 0), (0, 0)))
    xp = xp.reshape(B, (H + 4) * W, C).astype(jnp.bfloat16)
    col = jnp.arange(hw, dtype=jnp.int32) % W
    masks = jnp.stack([(col != 0), (col != W - 1)]).astype(jnp.bfloat16)[:, :, None]
    out = pl.pallas_call(
        functools.partial(_conv3x3_bn_relu_kernel, H=H, W=W),
        grid=(B,),
        in_specs=[pl.BlockSpec((1, (H + 4) * W, C), lambda bb: (bb, 0, 0)),
                  pl.BlockSpec(w9.shape, lambda bb: (0, 0, 0)),
                  pl.BlockSpec((2, hw, 1), lambda bb: (0, 0, 0)),
                  pl.BlockSpec((1, cp), lambda bb: (0, 0))],
        out_specs=pl.BlockSpec((1, hw, cp), lambda bb: (bb, 0, 0)),
        out_shape=jax.ShapeDtypeStruct((B, hw, cp), jnp.float32),
        compiler_params=pltpu.CompilerParams(dimension_semantics=("parallel",)),
    )(xp, w9, masks, b)
    return out[:, :, :cout].reshape(B, H, W, cout)


def maxpool3x3_s1(x_nhwc):
    """3x3 max-pool, stride 1, padding 1 (NHWC in / NHWC out)."""
    B, H, W, C = x_nhwc.shape
    xp = jnp.pad(x_nhwc, ((0, 0), (1, 1), (1, 1), (0, 0)),
                 constant_values=-jnp.inf)
    return pl.pallas_call(
        functools.partial(_maxpool3x3_kernel, H=H, W=W),
        grid=(B,),
        in_specs=[pl.BlockSpec((1, H + 2, W + 2, C), lambda b: (b, 0, 0, 0))],
        out_specs=pl.BlockSpec((1, H, W, C), lambda b: (b, 0, 0, 0)),
        out_shape=jax.ShapeDtypeStruct((B, H, W, C), jnp.float32),
        compiler_params=pltpu.CompilerParams(dimension_semantics=("parallel",)),
    )(xp)


def tanh_heads(acts_nhwc, fc_ws, beta):
    """All 7 heads in one call: out[h, b] = sum_f tanh(beta*x_h[b,f])^2 * w_h[f]."""
    n_heads = len(acts_nhwc)
    B = acts_nhwc[0].shape[0]
    flats = [a.reshape(B, -1) for a in acts_nhwc]          # NHWC-flattened (weights permuted to match)
    f_max = max(f.shape[1] for f in flats)
    tile_f = min(2048, _round_up(f_max, LANES))
    f_pad = _round_up(f_max, tile_f)
    xs = jnp.stack([jnp.pad(f, ((0, 0), (0, f_pad - f.shape[1]))) for f in flats])
    ws = jnp.stack([jnp.pad(w, (0, f_pad - w.shape[0])) for w in fc_ws])[:, None, :]
    return pl.pallas_call(
        functools.partial(_tanh_heads_kernel, beta=beta),
        grid=(f_pad // tile_f,),
        in_specs=[pl.BlockSpec((n_heads, B, tile_f), lambda f: (0, 0, f)),
                  pl.BlockSpec((n_heads, 1, tile_f), lambda f: (0, 0, f))],
        out_specs=pl.BlockSpec((n_heads, B), lambda f: (0, 0)),
        out_shape=jax.ShapeDtypeStruct((n_heads, B), jnp.float32),
        compiler_params=pltpu.CompilerParams(dimension_semantics=("arbitrary",)),
    )(xs, ws)


# ----------------------------------------------------------------------------
# Parameter construction (deterministic, BN folded for eval)
# ----------------------------------------------------------------------------
def conv_bn_params(key, cin, cout, ksize, eps=1e-5):
    k = jax.random.split(key, 6)
    w = 0.2 * jax.random.normal(k[0], (cout, cin, ksize, ksize), jnp.float32)
    b = 0.1 * jax.random.normal(k[1], (cout,), jnp.float32)
    gamma = 1.0 + 0.1 * jax.random.normal(k[2], (cout,), jnp.float32)
    beta_bn = 0.1 * jax.random.normal(k[3], (cout,), jnp.float32)
    mean = 0.1 * jax.random.normal(k[4], (cout,), jnp.float32)
    var = jnp.abs(jax.random.normal(k[5], (cout,), jnp.float32)) + 0.5
    scale = gamma / jnp.sqrt(var + eps)
    eff_b = (b - mean) * scale + beta_bn
    if ksize == 1:
        eff_w = w[:, :, 0, 0].T * scale[None, :]                       # (cin, cout)
    else:  # tap order (dy, dx) -> index dy*3+dx, matching the kernel loop
        eff_w = (jnp.transpose(w, (2, 3, 1, 0)).reshape(9, cin, cout)
                 * scale[None, None, :])                               # (9, cin, cout)
    return eff_w, eff_b


def _pad_cout(eff_w, eff_b):
    cout = eff_w.shape[-1]
    cp = _round_up(cout, LANES)
    pad = [(0, 0)] * (eff_w.ndim - 1) + [(0, cp - cout)]
    w = jnp.pad(eff_w, pad).astype(jnp.bfloat16)
    b = jnp.pad(eff_b, (0, cp - cout))[None, :]                        # (1, cp) f32
    return w, b


def make_params(key, cfg):
    cin, n1x1, n3r, n3, n5r, n5, pp, fc_in = cfg
    keys = jax.random.split(key, 16)
    w1, b1 = conv_bn_params(keys[0], cin, n1x1, 1)
    w2a, b2a = conv_bn_params(keys[1], cin, n3r, 1)
    w3a, b3a = conv_bn_params(keys[3], cin, n5r, 1)
    params = {
        # three shared-input 1x1 convs fused along Cout
        'fused1x1': _pad_cout(jnp.concatenate([w1, w2a, w3a], axis=1),
                              jnp.concatenate([b1, b2a, b3a], axis=0)),
        'b2_1': _pad_cout(*conv_bn_params(keys[2], n3r, n3, 3)),
        'b3_1': _pad_cout(*conv_bn_params(keys[4], n5r, n5, 3)),
        'b3_2': _pad_cout(*conv_bn_params(keys[5], n5, n5, 3)),
        'b4_0': _pad_cout(*conv_bn_params(keys[6], cin, pp, 1)),
    }
    # tanh^2 heads: generate in PyTorch (C,H,W)-flat order, then fold the NCHW->NHWC
    # permutation into the weights so the kernel consumes NHWC-flat activations.
    head_ch = [cin, n1x1, n3r, n3, n5r, n5, cin]
    fcs = []
    for i, c in enumerate(head_ch):
        w_chw = 0.05 * jax.random.normal(keys[7 + i], (c * fc_in * fc_in,),
                                         jnp.float32)
        w_hwc = w_chw.reshape(c, fc_in, fc_in).transpose(1, 2, 0).reshape(-1)
        fcs.append(w_hwc)
    params['fc'] = fcs
    params['fc7'] = 0.05 * jax.random.normal(keys[14], (7, 1), jnp.float32)
    return params


# ----------------------------------------------------------------------------
# Forward pass (mirrors Inception.forward)
# ----------------------------------------------------------------------------
def inception_forward(x_nchw, params, *, cfg, beta=15.0):
    cin, n1x1, n3r, n3, n5r, n5, pp, fc_in = cfg
    B, C, H, W = x_nchw.shape
    x = jnp.transpose(x_nchw, (0, 2, 3, 1))                 # NHWC f32
    M = B * H * W

    # branch 4 pool (also feeds head y7)
    pooled = maxpool3x3_s1(x)

    # fused 1x1 convs (b1_0 | b2_0 | b3_0) on x: one lane-dense GEMM
    f1 = gemm_bias_relu(x.reshape(M, C), *params['fused1x1'])
    s = f1[:, :n1x1].reshape(B, H, W, n1x1)
    t1 = f1[:, n1x1:n1x1 + n3r].reshape(B, H, W, n3r)
    u1 = f1[:, n1x1 + n3r:n1x1 + n3r + n5r].reshape(B, H, W, n5r)

    # branch 4 projection (1x1 conv on pooled)
    v = gemm_bias_relu(pooled.reshape(M, C),
                       *params['b4_0'])[:, :pp].reshape(B, H, W, pp)

    # 3x3 convs (im2col done inside the kernels)
    t = conv3x3_bn_relu(t1, *params['b2_1'], n3)
    u2 = conv3x3_bn_relu(u1, *params['b3_1'], n5)
    u3 = conv3x3_bn_relu(u2, *params['b3_2'], n5)

    # all 7 tanh^2 heads in one kernel
    y_heads = tanh_heads([x, s, t1, t, u1, u2, pooled], params['fc'], beta)  # (7, B)
    y = jnp.dot(y_heads.T, params['fc7'])                   # final 7 -> 1 linear (no tanh)

    # single NHWC concat + one transpose back to NCHW (matches torch.cat(..., dim=1))
    feat = jnp.transpose(jnp.concatenate([s, t, u3, v], axis=-1), (0, 3, 1, 2))
    return feat, y


# ----------------------------------------------------------------------------
if __name__ == "__main__":
    B, Cin, H = 2, 4, 16
    n1x1, n3x3_red, n3x3 = 8, 8, 16
    n5x5_red, n5x5, pool_proj = 8, 16, 8
    fc_in = H  # module assumes spatial size == fc_in
    cfg = (Cin, n1x1, n3x3_red, n3x3, n5x5_red, n5x5, pool_proj, fc_in)

    key = jax.random.PRNGKey(0)
    kx, kp = jax.random.split(key)
    x = jax.random.normal(kx, (B, Cin, H, H), jnp.float32)  # NCHW input
    params = make_params(kp, cfg)

    fwd = jax.jit(functools.partial(inception_forward, cfg=cfg, beta=15.0))
    feat, y = fwd(x, params)
    jax.block_until_ready(feat)
    jax.block_until_ready(y)

    expected_c = n1x1 + n3x3 + n5x5 + pool_proj
    assert feat.shape == (B, expected_c, H, H), feat.shape
    assert y.shape == (B, 1), y.shape
    print("KERNEL_OK")
</pallas_src>

<mosaic_0001>
module attributes {stable_mosaic.version = 11 : i64} {
  func.func @_gemm_bias_relu_kernel(%arg0: i32, %arg1: memref<256x4xbf16, #tpu.memory_space<vmem>>, %arg2: memref<4x128xbf16, #tpu.memory_space<vmem>>, %arg3: memref<1x128xf32, #tpu.memory_space<vmem>>, %arg4: memref<256x128xf32, #tpu.memory_space<vmem>>) attributes {dimension_semantics = [#tpu.dimension_semantics<parallel>], iteration_bounds = array<i64: 2>, scalar_prefetch = 0 : i64, scratch_operands = 0 : i64, tpu.core_type = #tpu.core_type<tc>, window_params = [{transform_indices = @transform_0, window_bounds = array<i64: 256, 4>}, {pipeline_mode = #tpu.pipeline_mode<synchronous>, transform_indices = @transform_1, window_bounds = array<i64: 4, 128>}, {pipeline_mode = #tpu.pipeline_mode<synchronous>, transform_indices = @transform_2, window_bounds = array<i64: 1, 128>}, {transform_indices = @transform_3, window_bounds = array<i64: 256, 128>}]} {
    %c0 = arith.constant 0 : index
    %c0_0 = arith.constant 0 : index
    %0 = vector.load %arg1[%c0, %c0_0] : memref<256x4xbf16, #tpu.memory_space<vmem>>, vector<256x4xbf16>
    %c0_1 = arith.constant 0 : index
    %c0_2 = arith.constant 0 : index
    %1 = vector.load %arg2[%c0_1, %c0_2] : memref<4x128xbf16, #tpu.memory_space<vmem>>, vector<4x128xbf16>
    %cst = arith.constant dense<0.000000e+00> : vector<256x128xf32>
    %2 = tpu.matmul %0, %1, %cst {dimension_numbers = #tpu.dot_dimension_numbers<[1], [0], [0], [1], [0, 0, 1, 1], [], []>} : vector<256x4xbf16>, vector<4x128xbf16>, vector<256x128xf32> -> vector<256x128xf32>
    %c0_3 = arith.constant 0 : index
    %c0_4 = arith.constant 0 : index
    %3 = vector.load %arg3[%c0_3, %c0_4] : memref<1x128xf32, #tpu.memory_space<vmem>>, vector<1x128xf32>
    %4 = vector.broadcast %3 : vector<1x128xf32> to vector<256x128xf32>
    %5 = arith.addf %2, %4 : vector<256x128xf32>
    %cst_5 = arith.constant 0.000000e+00 : f32
    %6 = vector.broadcast %cst_5 : f32 to vector<256x128xf32>
    %7 = arith.maximumf %5, %6 : vector<256x128xf32>
    %c0_6 = arith.constant 0 : index
    %c0_7 = arith.constant 0 : index
    %8 = vector.load %arg4[%c0_6, %c0_7] : memref<256x128xf32, #tpu.memory_space<vmem>>, vector<256x128xf32>
    tpu.vector_store %arg4[%c0_6, %c0_7], %7 {strides = array<i32>} : memref<256x128xf32, #tpu.memory_space<vmem>>, vector<256x128xf32>,
    return
  }
  func.func @transform_0(%arg0: i32) -> (i32, i32) {
    %c0_i32 = arith.constant 0 : i32
    %c0_i32_0 = arith.constant 0 : i32
    return %arg0, %c0_i32 : i32, i32
  }
  func.func @transform_1(%arg0: i32) -> (i32, i32) {
    %c0_i32 = arith.constant 0 : i32
    %c0_i32_0 = arith.constant 0 : i32
    %c0_i32_1 = arith.constant 0 : i32
    return %c0_i32, %c0_i32_0 : i32, i32
  }
  func.func @transform_2(%arg0: i32) -> (i32, i32) {
    %c0_i32 = arith.constant 0 : i32
    %c0_i32_0 = arith.constant 0 : i32
    %c0_i32_1 = arith.constant 0 : i32
    return %c0_i32, %c0_i32_0 : i32, i32
  }
  func.func @transform_3(%arg0: i32) -> (i32, i32) {
    %c0_i32 = arith.constant 0 : i32
    %c0_i32_0 = arith.constant 0 : i32
    return %arg0, %c0_i32 : i32, i32
  }
}

module attributes {stable_mosaic.version = 11 : i64} {
  func.func @_conv3x3_bn_relu_kernel(%arg0: i32, %arg1: memref<1x320x8xbf16, #tpu.memory_space<vmem>>, %arg2: memref<9x8x128xbf16, #tpu.memory_space<vmem>>, %arg3: memref<2x256x1xbf16, #tpu.memory_space<vmem>>, %arg4: memref<1x128xf32, #tpu.memory_space<vmem>>, %arg5: memref<1x256x128xf32, #tpu.memory_space<vmem>>) attributes {dimension_semantics = [#tpu.dimension_semantics<parallel>], iteration_bounds = array<i64: 2>, scalar_prefetch = 0 : i64, scratch_operands = 0 : i64, tpu.core_type = #tpu.core_type<tc>, window_params = [{transform_indices = @transform_0, window_bounds = array<i64: 1, 320, 8>}, {pipeline_mode = #tpu.pipeline_mode<synchronous>, transform_indices = @transform_1, window_bounds = array<i64: 9, 8, 128>}, {pipeline_mode = #tpu.pipeline_mode<synchronous>, transform_indices = @transform_2, window_bounds = array<i64: 2, 256, 1>}, {pipeline_mode = #tpu.pipeline_mode<synchronous>, transform_indices = @transform_3, window_bounds = array<i64: 1, 128>}, {transform_indices = @transform_4, window_bounds = array<i64: 1, 256, 128>}]} {
    %cst = arith.constant 0.000000e+00 : f32
    %0 = vector.broadcast %cst : f32 to vector<256x128xf32>
    %c0 = arith.constant 0 : index
    %c15 = arith.constant 15 : index
    %c0_0 = arith.constant 0 : index
    %1 = vector.load %arg1[%c0, %c15, %c0_0] : memref<1x320x8xbf16, #tpu.memory_space<vmem>>, vector<1x256x8xbf16>
    %2 = vector.shape_cast %1 : vector<1x256x8xbf16> to vector<256x8xbf16>
    %c0_1 = arith.constant 0 : index
    %c0_2 = arith.constant 0 : index
    %c0_3 = arith.constant 0 : index
    %3 = vector.load %arg3[%c0_1, %c0_2, %c0_3] : memref<2x256x1xbf16, #tpu.memory_space<vmem>>, vector<1x256x1xbf16>
    %4 = vector.shape_cast %3 : vector<1x256x1xbf16> to vector<256x1xbf16>
    %5 = vector.broadcast %4 : vector<256x1xbf16> to vector<256x8xbf16>
    %6 = arith.mulf %2, %5 : vector<256x8xbf16>
    %c0_4 = arith.constant 0 : index
    %c0_5 = arith.constant 0 : index
    %c0_6 = arith.constant 0 : index
    %7 = vector.load %arg2[%c0_4, %c0_5, %c0_6] : memref<9x8x128xbf16, #tpu.memory_space<vmem>>, vector<1x8x128xbf16>
    %8 = vector.shape_cast %7 : vector<1x8x128xbf16> to vector<8x128xbf16>
    %cst_7 = arith.constant dense<0.000000e+00> : vector<256x128xf32>
    %9 = tpu.matmul %6, %8, %cst_7 {dimension_numbers = #tpu.dot_dimension_numbers<[1], [0], [0], [1], [0, 0, 1, 1], [], []>} : vector<256x8xbf16>, vector<8x128xbf16>, vector<256x128xf32> -> vector<256x128xf32>
    %10 = arith.addf %0, %9 : vector<256x128xf32>
    %c0_8 = arith.constant 0 : index
    %c16 = arith.constant 16 : index
    %c0_9 = arith.constant 0 : index
    %11 = vector.load %arg1[%c0_8, %c16, %c0_9] : memref<1x320x8xbf16, #tpu.memory_space<vmem>>, vector<1x256x8xbf16>
    %12 = vector.shape_cast %11 : vector<1x256x8xbf16> to vector<256x8xbf16>
    %c1 = arith.constant 1 : index
    %c0_10 = arith.constant 0 : index
    %c0_11 = arith.constant 0 : index
    %13 = vector.load %arg2[%c1, %c0_10, %c0_11] : memref<9x8x128xbf16, #tpu.memory_space<vmem>>, vector<1x8x128xbf16>
    %14 = vector.shape_cast %13 : vector<1x8x128xbf16> to vector<8x128xbf16>
    %cst_12 = arith.constant dense<0.000000e+00> : vector<256x128xf32>
    %15 = tpu.matmul %12, %14, %cst_12 {dimension_numbers = #tpu.dot_dimension_numbers<[1], [0], [0], [1], [0, 0, 1, 1], [], []>} : vector<256x8xbf16>, vector<8x128xbf16>, vector<256x128xf32> -> vector<256x128xf32>
    %16 = arith.addf %10, %15 : vector<256x128xf32>
    %c0_13 = arith.constant 0 : index
    %c17 = arith.constant 17 : index
    %c0_14 = arith.constant 0 : index
    %17 = vector.load %arg1[%c0_13, %c17, %c0_14] : memref<1x320x8xbf16, #tpu.memory_space<vmem>>, vector<1x256x8xbf16>
    %18 = vector.shape_cast %17 : vector<1x256x8xbf16> to vector<256x8xbf16>
    %c1_15 = arith.constant 1 : index
    %c0_16 = arith.constant 0 : index
    %c0_17 = arith.constant 0 : index
    %19 = vector.load %arg3[%c1_15, %c0_16, %c0_17] : memref<2x256x1xbf16, #tpu.memory_space<vmem>>, vector<1x256x1xbf16>
    %20 = vector.shape_cast %19 : vector<1x256x1xbf16> to vector<256x1xbf16>
    %21 = vector.broadcast %20 : vector<256x1xbf16> to vector<256x8xbf16>
    %22 = arith.mulf %18, %21 : vector<256x8xbf16>
    %c2 = arith.constant 2 : index
    %c0_18 = arith.constant 0 : index
    %c0_19 = arith.constant 0 : index
    %23 = vector.load %arg2[%c2, %c0_18, %c0_19] : memref<9x8x128xbf16, #tpu.memory_space<vmem>>, vector<1x8x128xbf16>
    %24 = vector.shape_cast %23 : vector<1x8x128xbf16> to vector<8x128xbf16>
    %cst_20 = arith.constant dense<0.000000e+00> : vector<256x128xf32>
    %25 = tpu.matmul %22, %24, %cst_20 {dimension_numbers = #tpu.dot_dimension_numbers<[1], [0], [0], [1], [0, 0, 1, 1], [], []>} : vector<256x8xbf16>, vector<8x128xbf16>, vector<256x128xf32> -> vector<256x128xf32>
    %26 = arith.addf %16, %25 : vector<256x128xf32>
    %c0_21 = arith.constant 0 : index
    %c31 = arith.constant 31 : index
    %c0_22 = arith.constant 0 : index
    %27 = vector.load %arg1[%c0_21, %c31, %c0_22] : memref<1x320x8xbf16, #tpu.memory_space<vmem>>, vector<1x256x8xbf16>
    %28 = vector.shape_cast %27 : vector<1x256x8xbf16> to vector<256x8xbf16>
    %c0_23 = arith.constant 0 : index
    %c0_24 = arith.constant 0 : index
    %c0_25 = arith.constant 0 : index
    %29 = vector.load %arg3[%c0_23, %c0_24, %c0_25] : memref<2x256x1xbf16, #tpu.memory_space<vmem>>, vector<1x256x1xbf16>
    %30 = vector.shape_cast %29 : vector<1x256x1xbf16> to vector<256x1xbf16>
    %31 = vector.broadcast %30 : vector<256x1xbf16> to vector<256x8xbf16>
    %32 = arith.mulf %28, %31 : vector<256x8xbf16>
    %c3 = arith.constant 3 : index
    %c0_26 = arith.constant 0 : index
    %c0_27 = arith.constant 0 : index
    %33 = vector.load %arg2[%c3, %c0_26, %c0_27] : memref<9x8x128xbf16, #tpu.memory_space<vmem>>, vector<1x8x128xbf16>
    %34 = vector.shape_cast %33 : vector<1x8x128xbf16> to vector<8x128xbf16>
    %cst_28 = arith.constant dense<0.000000e+00> : vector<256x128xf32>
    %35 = tpu.matmul %32, %34, %cst_28 {dimension_numbers = #tpu.dot_dimension_numbers<[1], [0], [0], [1], [0, 0, 1, 1], [], []>} : vector<256x8xbf16>, vector<8x128xbf16>, vector<256x128xf32> -> vector<256x128xf32>
    %36 = arith.addf %26, %35 : vector<256x128xf32>
    %c0_29 = arith.constant 0 : index
    %c32 = arith.constant 32 : index
    %c0_30 = arith.constant 0 : index
    %37 = vector.load %arg1[%c0_29, %c32, %c0_30] : memref<1x320x8xbf16, #tpu.memory_space<vmem>>, vector<1x256x8xbf16>
    %38 = vector.shape_cast %37 : vector<1x256x8xbf16> to vector<256x8xbf16>
    %c4 = arith.constant 4 : index
    %c0_31 = arith.constant 0 : index
    %c0_32 = arith.constant 0 : index
    %39 = vector.load %arg2[%c4, %c0_31, %c0_32] : memref<9x8x128xbf16, #tpu.memory_space<vmem>>, vector<1x8x128xbf16>
    %40 = vector.shape_cast %39 : vector<1x8x128xbf16> to vector<8x128xbf16>
    %cst_33 = arith.constant dense<0.000000e+00> : vector<256x128xf32>
    %41 = tpu.matmul %38, %40, %cst_33 {dimension_numbers = #tpu.dot_dimension_numbers<[1], [0], [0], [1], [0, 0, 1, 1], [], []>} : vector<256x8xbf16>, vector<8x128xbf16>, vector<256x128xf32> -> vector<256x128xf32>
    %42 = arith.addf %36, %41 : vector<256x128xf32>
    %c0_34 = arith.constant 0 : index
    %c33 = arith.constant 33 : index
    %c0_35 = arith.constant 0 : index
    %43 = vector.load %arg1[%c0_34, %c33, %c0_35] : memref<1x320x8xbf16, #tpu.memory_space<vmem>>, vector<1x256x8xbf16>
    %44 = vector.shape_cast %43 : vector<1x256x8xbf16> to vector<256x8xbf16>
    %c1_36 = arith.constant 1 : index
    %c0_37 = arith.constant 0 : index
    %c0_38 = arith.constant 0 : index
    %45 = vector.load %arg3[%c1_36, %c0_37, %c0_38] : memref<2x256x1xbf16, #tpu.memory_space<vmem>>, vector<1x256x1xbf16>
    %46 = vector.shape_cast %45 : vector<1x256x1xbf16> to vector<256x1xbf16>
    %47 = vector.broadcast %46 : vector<256x1xbf16> to vector<256x8xbf16>
    %48 = arith.mulf %44, %47 : vector<256x8xbf16>
    %c5 = arith.constant 5 : index
    %c0_39 = arith.constant 0 : index
    %c0_40 = arith.constant 0 : index
    %49 = vector.load %arg2[%c5, %c0_39, %c0_40] : memref<9x8x128xbf16, #tpu.memory_space<vmem>>, vector<1x8x128xbf16>
    %50 = vector.shape_cast %49 : vector<1x8x128xbf16> to vector<8x128xbf16>
    %cst_41 = arith.constant dense<0.000000e+00> : vector<256x128xf32>
    %51 = tpu.matmul %48, %50, %cst_41 {dimension_numbers = #tpu.dot_dimension_numbers<[1], [0], [0], [1], [0, 0, 1, 1], [], []>} : vector<256x8xbf16>, vector<8x128xbf16>, vector<256x128xf32> -> vector<256x128xf32>
    %52 = arith.addf %42, %51 : vector<256x128xf32>
    %c0_42 = arith.constant 0 : index
    %c47 = arith.constant 47 : index
    %c0_43 = arith.constant 0 : index
    %53 = vector.load %arg1[%c0_42, %c47, %c0_43] : memref<1x320x8xbf16, #tpu.memory_space<vmem>>, vector<1x256x8xbf16>
    %54 = vector.shape_cast %53 : vector<1x256x8xbf16> to vector<256x8xbf16>
    %c0_44 = arith.constant 0 : index
    %c0_45 = arith.constant 0 : index
    %c0_46 = arith.constant 0 : index
    %55 = vector.load %arg3[%c0_44, %c0_45, %c0_46] : memref<2x256x1xbf16, #tpu.memory_space<vmem>>, vector<1x256x1xbf16>
    %56 = vector.shape_cast %55 : vector<1x256x1xbf16> to vector<256x1xbf16>
    %57 = vector.broadcast %56 : vector<256x1xbf16> to vector<256x8xbf16>
    %58 = arith.mulf %54, %57 : vector<256x8xbf16>
    %c6 = arith.constant 6 : index
    %c0_47 = arith.constant 0 : index
    %c0_48 = arith.constant 0 : index
    %59 = vector.load %arg2[%c6, %c0_47, %c0_48] : memref<9x8x128xbf16, #tpu.memory_space<vmem>>, vector<1x8x128xbf16>
    %60 = vector.shape_cast %59 : vector<1x8x128xbf16> to vector<8x128xbf16>
    %cst_49 = arith.constant dense<0.000000e+00> : vector<256x128xf32>
    %61 = tpu.matmul %58, %60, %cst_49 {dimension_numbers = #tpu.dot_dimension_numbers<[1], [0], [0], [1], [0, 0, 1, 1], [], []>} : vector<256x8xbf16>, vector<8x128xbf16>, vector<256x128xf32> -> vector<256x128xf32>
    %62 = arith.addf %52, %61 : vector<256x128xf32>
    %c0_50 = arith.constant 0 : index
    %c48 = arith.constant 48 : index
    %c0_51 = arith.constant 0 : index
    %63 = vector.load %arg1[%c0_50, %c48, %c0_51] : memref<1x320x8xbf16, #tpu.memory_space<vmem>>, vector<1x256x8xbf16>
    %64 = vector.shape_cast %63 : vector<1x256x8xbf16> to vector<256x8xbf16>
    %c7 = arith.constant 7 : index
    %c0_52 = arith.constant 0 : index
    %c0_53 = arith.constant 0 : index
    %65 = vector.load %arg2[%c7, %c0_52, %c0_53] : memref<9x8x128xbf16, #tpu.memory_space<vmem>>, vector<1x8x128xbf16>
    %66 = vector.shape_cast %65 : vector<1x8x128xbf16> to vector<8x128xbf16>
    %cst_54 = arith.constant dense<0.000000e+00> : vector<256x128xf32>
    %67 = tpu.matmul %64, %66, %cst_54 {dimension_numbers = #tpu.dot_dimension_numbers<[1], [0], [0], [1], [0, 0, 1, 1], [], []>} : vector<256x8xbf16>, vector<8x128xbf16>, vector<256x128xf32> -> vector<256x128xf32>
    %68 = arith.addf %62, %67 : vector<256x128xf32>
    %c0_55 = arith.constant 0 : index
    %c49 = arith.constant 49 : index
    %c0_56 = arith.constant 0 : index
    %69 = vector.load %arg1[%c0_55, %c49, %c0_56] : memref<1x320x8xbf16, #tpu.memory_space<vmem>>, vector<1x256x8xbf16>
    %70 = vector.shape_cast %69 : vector<1x256x8xbf16> to vector<256x8xbf16>
    %c1_57 = arith.constant 1 : index
    %c0_58 = arith.constant 0 : index
    %c0_59 = arith.constant 0 : index
    %71 = vector.load %arg3[%c1_57, %c0_58, %c0_59] : memref<2x256x1xbf16, #tpu.memory_space<vmem>>, vector<1x256x1xbf16>
    %72 = vector.shape_cast %71 : vector<1x256x1xbf16> to vector<256x1xbf16>
    %73 = vector.broadcast %72 : vector<256x1xbf16> to vector<256x8xbf16>
    %74 = arith.mulf %70, %73 : vector<256x8xbf16>
    %c8 = arith.constant 8 : index
    %c0_60 = arith.constant 0 : index
    %c0_61 = arith.constant 0 : index
    %75 = vector.load %arg2[%c8, %c0_60, %c0_61] : memref<9x8x128xbf16, #tpu.memory_space<vmem>>, vector<1x8x128xbf16>
    %76 = vector.shape_cast %75 : vector<1x8x128xbf16> to vector<8x128xbf16>
    %cst_62 = arith.constant dense<0.000000e+00> : vector<256x128xf32>
    %77 = tpu.matmul %74, %76, %cst_62 {dimension_numbers = #tpu.dot_dimension_numbers<[1], [0], [0], [1], [0, 0, 1, 1], [], []>} : vector<256x8xbf16>, vector<8x128xbf16>, vector<256x128xf32> -> vector<256x128xf32>
    %78 = arith.addf %68, %77 : vector<256x128xf32>
    %c0_63 = arith.constant 0 : index
    %c0_64 = arith.constant 0 : index
    %79 = vector.load %arg4[%c0_63, %c0_64] : memref<1x128xf32, #tpu.memory_space<vmem>>, vector<1x128xf32>
    %80 = vector.broadcast %79 : vector<1x128xf32> to vector<256x128xf32>
    %81 = arith.addf %78, %80 : vector<256x128xf32>
    %cst_65 = arith.constant 0.000000e+00 : f32
    %82 = vector.broadcast %cst_65 : f32 to vector<256x128xf32>
    %83 = arith.maximumf %81, %82 : vector<256x128xf32>
    %c0_66 = arith.constant 0 : index
    %c0_67 = arith.constant 0 : index
    %c0_68 = arith.constant 0 : index
    %84 = vector.load %arg5[%c0_66, %c0_67, %c0_68] : memref<1x256x128xf32, #tpu.memory_space<vmem>>, vector<1x256x128xf32>
    %85 = vector.shape_cast %84 : vector<1x256x128xf32> to vector<256x128xf32>
    %86 = vector.shape_cast %83 : vector<256x128xf32> to vector<1x256x128xf32>
    tpu.vector_store %arg5[%c0_66, %c0_67, %c0_68], %86 {strides = array<i32>} : memref<1x256x128xf32, #tpu.memory_space<vmem>>, vector<1x256x128xf32>,
    return
  }
  func.func @transform_0(%arg0: i32) -> (i32, i32, i32) {
    %c0_i32 = arith.constant 0 : i32
    %c0_i32_0 = arith.constant 0 : i32
    %c0_i32_1 = arith.constant 0 : i32
    return %arg0, %c0_i32, %c0_i32_0 : i32, i32, i32
  }
  func.func @transform_1(%arg0: i32) -> (i32, i32, i32) {
    %c0_i32 = arith.constant 0 : i32
    %c0_i32_0 = arith.constant 0 : i32
    %c0_i32_1 = arith.constant 0 : i32
    %c0_i32_2 = arith.constant 0 : i32
    return %c0_i32, %c0_i32_0, %c0_i32_1 : i32, i32, i32
  }
  func.func @transform_2(%arg0: i32) -> (i32, i32, i32) {
    %c0_i32 = arith.constant 0 : i32
    %c0_i32_0 = arith.constant 0 : i32
    %c0_i32_1 = arith.constant 0 : i32
    %c0_i32_2 = arith.constant 0 : i32
    return %c0_i32, %c0_i32_0, %c0_i32_1 : i32, i32, i32
  }
  func.func @transform_3(%arg0: i32) -> (i32, i32) {
    %c0_i32 = arith.constant 0 : i32
    %c0_i32_0 = arith.constant 0 : i32
    %c0_i32_1 = arith.constant 0 : i32
    return %c0_i32, %c0_i32_0 : i32, i32
  }
  func.func @transform_4(%arg0: i32) -> (i32, i32, i32) {
    %c0_i32 = arith.constant 0 : i32
    %c0_i32_0 = arith.constant 0 : i32
    %c0_i32_1 = arith.constant 0 : i32
    return %arg0, %c0_i32, %c0_i32_0 : i32, i32, i32
  }
}

module attributes {stable_mosaic.version = 11 : i64} {
  func.func @_maxpool3x3_kernel(%arg0: i32, %arg1: memref<1x18x18x4xf32, #tpu.memory_space<vmem>>, %arg2: memref<1x16x16x4xf32, #tpu.memory_space<vmem>>) attributes {dimension_semantics = [#tpu.dimension_semantics<parallel>], iteration_bounds = array<i64: 2>, scalar_prefetch = 0 : i64, scratch_operands = 0 : i64, tpu.core_type = #tpu.core_type<tc>, window_params = [{transform_indices = @transform_0, window_bounds = array<i64: 1, 18, 18, 4>}, {transform_indices = @transform_1, window_bounds = array<i64: 1, 16, 16, 4>}]} {
    %c0 = arith.constant 0 : index
    %c1 = arith.constant 1 : index
    %c1_0 = arith.constant 1 : index
    %c0_1 = arith.constant 0 : index
    %0 = vector.load %arg1[%c0, %c1, %c1_0, %c0_1] : memref<1x18x18x4xf32, #tpu.memory_space<vmem>>, vector<1x16x16x4xf32>
    %1 = vector.shape_cast %0 : vector<1x16x16x4xf32> to vector<16x16x4xf32>
    %c0_2 = arith.constant 0 : index
    %c0_3 = arith.constant 0 : index
    %c0_4 = arith.constant 0 : index
    %c0_5 = arith.constant 0 : index
    %2 = vector.load %arg1[%c0_2, %c0_3, %c0_4, %c0_5] : memref<1x18x18x4xf32, #tpu.memory_space<vmem>>, vector<1x16x16x4xf32>
    %3 = vector.shape_cast %2 : vector<1x16x16x4xf32> to vector<16x16x4xf32>
    %4 = arith.maximumf %1, %3 : vector<16x16x4xf32>
    %c0_6 = arith.constant 0 : index
    %c0_7 = arith.constant 0 : index
    %c1_8 = arith.constant 1 : index
    %c0_9 = arith.constant 0 : index
    %5 = vector.load %arg1[%c0_6, %c0_7, %c1_8, %c0_9] : memref<1x18x18x4xf32, #tpu.memory_space<vmem>>, vector<1x16x16x4xf32>
    %6 = vector.shape_cast %5 : vector<1x16x16x4xf32> to vector<16x16x4xf32>
    %7 = arith.maximumf %4, %6 : vector<16x16x4xf32>
    %c0_10 = arith.constant 0 : index
    %c0_11 = arith.constant 0 : index
    %c2 = arith.constant 2 : index
    %c0_12 = arith.constant 0 : index
    %8 = vector.load %arg1[%c0_10, %c0_11, %c2, %c0_12] : memref<1x18x18x4xf32, #tpu.memory_space<vmem>>, vector<1x16x16x4xf32>
    %9 = vector.shape_cast %8 : vector<1x16x16x4xf32> to vector<16x16x4xf32>
    %10 = arith.maximumf %7, %9 : vector<16x16x4xf32>
    %c0_13 = arith.constant 0 : index
    %c1_14 = arith.constant 1 : index
    %c0_15 = arith.constant 0 : index
    %c0_16 = arith.constant 0 : index
    %11 = vector.load %arg1[%c0_13, %c1_14, %c0_15, %c0_16] : memref<1x18x18x4xf32, #tpu.memory_space<vmem>>, vector<1x16x16x4xf32>
    %12 = vector.shape_cast %11 : vector<1x16x16x4xf32> to vector<16x16x4xf32>
    %13 = arith.maximumf %10, %12 : vector<16x16x4xf32>
    %c0_17 = arith.constant 0 : index
    %c1_18 = arith.constant 1 : index
    %c2_19 = arith.constant 2 : index
    %c0_20 = arith.constant 0 : index
    %14 = vector.load %arg1[%c0_17, %c1_18, %c2_19, %c0_20] : memref<1x18x18x4xf32, #tpu.memory_space<vmem>>, vector<1x16x16x4xf32>
    %15 = vector.shape_cast %14 : vector<1x16x16x4xf32> to vector<16x16x4xf32>
    %16 = arith.maximumf %13, %15 : vector<16x16x4xf32>
    %c0_21 = arith.constant 0 : index
    %c2_22 = arith.constant 2 : index
    %c0_23 = arith.constant 0 : index
    %c0_24 = arith.constant 0 : index
    %17 = vector.load %arg1[%c0_21, %c2_22, %c0_23, %c0_24] : memref<1x18x18x4xf32, #tpu.memory_space<vmem>>, vector<1x16x16x4xf32>
    %18 = vector.shape_cast %17 : vector<1x16x16x4xf32> to vector<16x16x4xf32>
    %19 = arith.maximumf %16, %18 : vector<16x16x4xf32>
    %c0_25 = arith.constant 0 : index
    %c2_26 = arith.constant 2 : index
    %c1_27 = arith.constant 1 : index
    %c0_28 = arith.constant 0 : index
    %20 = vector.load %arg1[%c0_25, %c2_26, %c1_27, %c0_28] : memref<1x18x18x4xf32, #tpu.memory_space<vmem>>, vector<1x16x16x4xf32>
    %21 = vector.shape_cast %20 : vector<1x16x16x4xf32> to vector<16x16x4xf32>
    %22 = arith.maximumf %19, %21 : vector<16x16x4xf32>
    %c0_29 = arith.constant 0 : index
    %c2_30 = arith.constant 2 : index
    %c2_31 = arith.constant 2 : index
    %c0_32 = arith.constant 0 : index
    %23 = vector.load %arg1[%c0_29, %c2_30, %c2_31, %c0_32] : memref<1x18x18x4xf32, #tpu.memory_space<vmem>>, vector<1x16x16x4xf32>
    %24 = vector.shape_cast %23 : vector<1x16x16x4xf32> to vector<16x16x4xf32>
    %25 = arith.maximumf %22, %24 : vector<16x16x4xf32>
    %c0_33 = arith.constant 0 : index
    %c0_34 = arith.constant 0 : index
    %c0_35 = arith.constant 0 : index
    %c0_36 = arith.constant 0 : index
    %26 = vector.load %arg2[%c0_33, %c0_34, %c0_35, %c0_36] : memref<1x16x16x4xf32, #tpu.memory_space<vmem>>, vector<1x16x16x4xf32>
    %27 = vector.shape_cast %26 : vector<1x16x16x4xf32> to vector<16x16x4xf32>
    %28 = vector.shape_cast %25 : vector<16x16x4xf32> to vector<1x16x16x4xf32>
    tpu.vector_store %arg2[%c0_33, %c0_34, %c0_35, %c0_36], %28 {strides = array<i32>} : memref<1x16x16x4xf32, #tpu.memory_space<vmem>>, vector<1x16x16x4xf32>,
    return
  }
  func.func @transform_0(%arg0: i32) -> (i32, i32, i32, i32) {
    %c0_i32 = arith.constant 0 : i32
    %c0_i32_0 = arith.constant 0 : i32
    %c0_i32_1 = arith.constant 0 : i32
    %c0_i32_2 = arith.constant 0 : i32
    return %arg0, %c0_i32, %c0_i32_0, %c0_i32_1 : i32, i32, i32, i32
  }
  func.func @transform_1(%arg0: i32) -> (i32, i32, i32, i32) {
    %c0_i32 = arith.constant 0 : i32
    %c0_i32_0 = arith.constant 0 : i32
    %c0_i32_1 = arith.constant 0 : i32
    %c0_i32_2 = arith.constant 0 : i32
    return %arg0, %c0_i32, %c0_i32_0, %c0_i32_1 : i32, i32, i32, i32
  }
}

module attributes {stable_mosaic.version = 11 : i64} {
  func.func @_tanh_heads_kernel(%arg0: i32, %arg1: memref<7x2x2048xf32, #tpu.memory_space<vmem>>, %arg2: memref<7x1x2048xf32, #tpu.memory_space<vmem>>, %arg3: memref<7x2xf32, #tpu.memory_space<vmem>>) attributes {dimension_semantics = [#tpu.dimension_semantics<arbitrary>], iteration_bounds = array<i64: 2>, scalar_prefetch = 0 : i64, scratch_operands = 0 : i64, tpu.core_type = #tpu.core_type<tc>, window_params = [{transform_indices = @transform_0, window_bounds = array<i64: 7, 2, 2048>}, {transform_indices = @transform_1, window_bounds = array<i64: 7, 1, 2048>}, {pipeline_mode = #tpu.pipeline_mode<synchronous>, transform_indices = @transform_2, window_bounds = array<i64: 7, 2>}]} {
    %c0_i32 = arith.constant 0 : i32
    %0 = arith.cmpi eq, %arg0, %c0_i32 : i32
    %1 = arith.extui %0 : i1 to i32
    %c0_i32_0 = arith.constant 0 : i32
    %2 = arith.cmpi ne, %1, %c0_i32_0 : i32
    scf.if %2 {
      %cst_11 = arith.constant 0.000000e+00 : f32
      %15 = vector.broadcast %cst_11 : f32 to vector<7x2xf32>
      %c0_12 = arith.constant 0 : index
      %c0_13 = arith.constant 0 : index
      %16 = vector.load %arg3[%c0_12, %c0_13] : memref<7x2xf32, #tpu.memory_space<vmem>>, vector<7x2xf32>
      tpu.vector_store %arg3[%c0_12, %c0_13], %15 {strides = array<i32>} : memref<7x2xf32, #tpu.memory_space<vmem>>, vector<7x2xf32>,
    } else {
    }
    %c0 = arith.constant 0 : index
    %c0_1 = arith.constant 0 : index
    %c0_2 = arith.constant 0 : index
    %3 = vector.load %arg1[%c0, %c0_1, %c0_2] : memref<7x2x2048xf32, #tpu.memory_space<vmem>>, vector<7x2x2048xf32>
    %cst = arith.constant 1.500000e+01 : f32
    %4 = vector.broadcast %cst : f32 to vector<7x2x2048xf32>
    %5 = arith.mulf %4, %3 : vector<7x2x2048xf32>
    %6 = math.tanh %5 : vector<7x2x2048xf32>
    %c0_3 = arith.constant 0 : index
    %c0_4 = arith.constant 0 : index
    %7 = vector.load %arg3[%c0_3, %c0_4] : memref<7x2xf32, #tpu.memory_space<vmem>>, vector<7x2xf32>
    %8 = arith.mulf %6, %6 : vector<7x2x2048xf32>
    %c0_5 = arith.constant 0 : index
    %c0_6 = arith.constant 0 : index
    %c0_7 = arith.constant 0 : index
    %9 = vector.load %arg2[%c0_5, %c0_6, %c0_7] : memref<7x1x2048xf32, #tpu.memory_space<vmem>>, vector<7x1x2048xf32>
    %10 = vector.broadcast %9 : vector<7x1x2048xf32> to vector<7x2x2048xf32>
    %11 = arith.mulf %8, %10 : vector<7x2x2048xf32>
    %cst_8 = arith.constant dense<0.000000e+00> : vector<7x2xf32>
    %12 = vector.multi_reduction <add>, %11, %cst_8 [2] : vector<7x2x2048xf32> to vector<7x2xf32>
    %13 = arith.addf %7, %12 : vector<7x2xf32>
    %c0_9 = arith.constant 0 : index
    %c0_10 = arith.constant 0 : index
    %14 = vector.load %arg3[%c0_9, %c0_10] : memref<7x2xf32, #tpu.memory_space<vmem>>, vector<7x2xf32>
    tpu.vector_store %arg3[%c0_9, %c0_10], %13 {strides = array<i32>} : memref<7x2xf32, #tpu.memory_space<vmem>>, vector<7x2xf32>,
    return
  }
  func.func @transform_0(%arg0: i32) -> (i32, i32, i32) {
    %c0_i32 = arith.constant 0 : i32
    %c0_i32_0 = arith.constant 0 : i32
    %c0_i32_1 = arith.constant 0 : i32
    return %c0_i32, %c0_i32_0, %arg0 : i32, i32, i32
  }
  func.func @transform_1(%arg0: i32) -> (i32, i32, i32) {
    %c0_i32 = arith.constant 0 : i32
    %c0_i32_0 = arith.constant 0 : i32
    %c0_i32_1 = arith.constant 0 : i32
    return %c0_i32, %c0_i32_0, %arg0 : i32, i32, i32
  }
  func.func @transform_2(%arg0: i32) -> (i32, i32) {
    %c0_i32 = arith.constant 0 : i32
    %c0_i32_0 = arith.constant 0 : i32
    %c0_i32_1 = arith.constant 0 : i32
    return %c0_i32, %c0_i32_0 : i32, i32
  }
}

module attributes {stable_mosaic.version = 11 : i64} {
  func.func @_conv3x3_bn_relu_kernel(%arg0: i32, %arg1: memref<1x320x16xbf16, #tpu.memory_space<vmem>>, %arg2: memref<9x16x128xbf16, #tpu.memory_space<vmem>>, %arg3: memref<2x256x1xbf16, #tpu.memory_space<vmem>>, %arg4: memref<1x128xf32, #tpu.memory_space<vmem>>, %arg5: memref<1x256x128xf32, #tpu.memory_space<vmem>>) attributes {dimension_semantics = [#tpu.dimension_semantics<parallel>], iteration_bounds = array<i64: 2>, scalar_prefetch = 0 : i64, scratch_operands = 0 : i64, tpu.core_type = #tpu.core_type<tc>, window_params = [{transform_indices = @transform_0, window_bounds = array<i64: 1, 320, 16>}, {pipeline_mode = #tpu.pipeline_mode<synchronous>, transform_indices = @transform_1, window_bounds = array<i64: 9, 16, 128>}, {pipeline_mode = #tpu.pipeline_mode<synchronous>, transform_indices = @transform_2, window_bounds = array<i64: 2, 256, 1>}, {pipeline_mode = #tpu.pipeline_mode<synchronous>, transform_indices = @transform_3, window_bounds = array<i64: 1, 128>}, {transform_indices = @transform_4, window_bounds = array<i64: 1, 256, 128>}]} {
    %cst = arith.constant 0.000000e+00 : f32
    %0 = vector.broadcast %cst : f32 to vector<256x128xf32>
    %c0 = arith.constant 0 : index
    %c15 = arith.constant 15 : index
    %c0_0 = arith.constant 0 : index
    %1 = vector.load %arg1[%c0, %c15, %c0_0] : memref<1x320x16xbf16, #tpu.memory_space<vmem>>, vector<1x256x16xbf16>
    %2 = vector.shape_cast %1 : vector<1x256x16xbf16> to vector<256x16xbf16>
    %c0_1 = arith.constant 0 : index
    %c0_2 = arith.constant 0 : index
    %c0_3 = arith.constant 0 : index
    %3 = vector.load %arg3[%c0_1, %c0_2, %c0_3] : memref<2x256x1xbf16, #tpu.memory_space<vmem>>, vector<1x256x1xbf16>
    %4 = vector.shape_cast %3 : vector<1x256x1xbf16> to vector<256x1xbf16>
    %5 = vector.broadcast %4 : vector<256x1xbf16> to vector<256x16xbf16>
    %6 = arith.mulf %2, %5 : vector<256x16xbf16>
    %c0_4 = arith.constant 0 : index
    %c0_5 = arith.constant 0 : index
    %c0_6 = arith.constant 0 : index
    %7 = vector.load %arg2[%c0_4, %c0_5, %c0_6] : memref<9x16x128xbf16, #tpu.memory_space<vmem>>, vector<1x16x128xbf16>
    %8 = vector.shape_cast %7 : vector<1x16x128xbf16> to vector<16x128xbf16>
    %cst_7 = arith.constant dense<0.000000e+00> : vector<256x128xf32>
    %9 = tpu.matmul %6, %8, %cst_7 {dimension_numbers = #tpu.dot_dimension_numbers<[1], [0], [0], [1], [0, 0, 1, 1], [], []>} : vector<256x16xbf16>, vector<16x128xbf16>, vector<256x128xf32> -> vector<256x128xf32>
    %10 = arith.addf %0, %9 : vector<256x128xf32>
    %c0_8 = arith.constant 0 : index
    %c16 = arith.constant 16 : index
    %c0_9 = arith.constant 0 : index
    %11 = vector.load %arg1[%c0_8, %c16, %c0_9] : memref<1x320x16xbf16, #tpu.memory_space<vmem>>, vector<1x256x16xbf16>
    %12 = vector.shape_cast %11 : vector<1x256x16xbf16> to vector<256x16xbf16>
    %c1 = arith.constant 1 : index
    %c0_10 = arith.constant 0 : index
    %c0_11 = arith.constant 0 : index
    %13 = vector.load %arg2[%c1, %c0_10, %c0_11] : memref<9x16x128xbf16, #tpu.memory_space<vmem>>, vector<1x16x128xbf16>
    %14 = vector.shape_cast %13 : vector<1x16x128xbf16> to vector<16x128xbf16>
    %cst_12 = arith.constant dense<0.000000e+00> : vector<256x128xf32>
    %15 = tpu.matmul %12, %14, %cst_12 {dimension_numbers = #tpu.dot_dimension_numbers<[1], [0], [0], [1], [0, 0, 1, 1], [], []>} : vector<256x16xbf16>, vector<16x128xbf16>, vector<256x128xf32> -> vector<256x128xf32>
    %16 = arith.addf %10, %15 : vector<256x128xf32>
    %c0_13 = arith.constant 0 : index
    %c17 = arith.constant 17 : index
    %c0_14 = arith.constant 0 : index
    %17 = vector.load %arg1[%c0_13, %c17, %c0_14] : memref<1x320x16xbf16, #tpu.memory_space<vmem>>, vector<1x256x16xbf16>
    %18 = vector.shape_cast %17 : vector<1x256x16xbf16> to vector<256x16xbf16>
    %c1_15 = arith.constant 1 : index
    %c0_16 = arith.constant 0 : index
    %c0_17 = arith.constant 0 : index
    %19 = vector.load %arg3[%c1_15, %c0_16, %c0_17] : memref<2x256x1xbf16, #tpu.memory_space<vmem>>, vector<1x256x1xbf16>
    %20 = vector.shape_cast %19 : vector<1x256x1xbf16> to vector<256x1xbf16>
    %21 = vector.broadcast %20 : vector<256x1xbf16> to vector<256x16xbf16>
    %22 = arith.mulf %18, %21 : vector<256x16xbf16>
    %c2 = arith.constant 2 : index
    %c0_18 = arith.constant 0 : index
    %c0_19 = arith.constant 0 : index
    %23 = vector.load %arg2[%c2, %c0_18, %c0_19] : memref<9x16x128xbf16, #tpu.memory_space<vmem>>, vector<1x16x128xbf16>
    %24 = vector.shape_cast %23 : vector<1x16x128xbf16> to vector<16x128xbf16>
    %cst_20 = arith.constant dense<0.000000e+00> : vector<256x128xf32>
    %25 = tpu.matmul %22, %24, %cst_20 {dimension_numbers = #tpu.dot_dimension_numbers<[1], [0], [0], [1], [0, 0, 1, 1], [], []>} : vector<256x16xbf16>, vector<16x128xbf16>, vector<256x128xf32> -> vector<256x128xf32>
    %26 = arith.addf %16, %25 : vector<256x128xf32>
    %c0_21 = arith.constant 0 : index
    %c31 = arith.constant 31 : index
    %c0_22 = arith.constant 0 : index
    %27 = vector.load %arg1[%c0_21, %c31, %c0_22] : memref<1x320x16xbf16, #tpu.memory_space<vmem>>, vector<1x256x16xbf16>
    %28 = vector.shape_cast %27 : vector<1x256x16xbf16> to vector<256x16xbf16>
    %c0_23 = arith.constant 0 : index
    %c0_24 = arith.constant 0 : index
    %c0_25 = arith.constant 0 : index
    %29 = vector.load %arg3[%c0_23, %c0_24, %c0_25] : memref<2x256x1xbf16, #tpu.memory_space<vmem>>, vector<1x256x1xbf16>
    %30 = vector.shape_cast %29 : vector<1x256x1xbf16> to vector<256x1xbf16>
    %31 = vector.broadcast %30 : vector<256x1xbf16> to vector<256x16xbf16>
    %32 = arith.mulf %28, %31 : vector<256x16xbf16>
    %c3 = arith.constant 3 : index
    %c0_26 = arith.constant 0 : index
    %c0_27 = arith.constant 0 : index
    %33 = vector.load %arg2[%c3, %c0_26, %c0_27] : memref<9x16x128xbf16, #tpu.memory_space<vmem>>, vector<1x16x128xbf16>
    %34 = vector.shape_cast %33 : vector<1x16x128xbf16> to vector<16x128xbf16>
    %cst_28 = arith.constant dense<0.000000e+00> : vector<256x128xf32>
    %35 = tpu.matmul %32, %34, %cst_28 {dimension_numbers = #tpu.dot_dimension_numbers<[1], [0], [0], [1], [0, 0, 1, 1], [], []>} : vector<256x16xbf16>, vector<16x128xbf16>, vector<256x128xf32> -> vector<256x128xf32>
    %36 = arith.addf %26, %35 : vector<256x128xf32>
    %c0_29 = arith.constant 0 : index
    %c32 = arith.constant 32 : index
    %c0_30 = arith.constant 0 : index
    %37 = vector.load %arg1[%c0_29, %c32, %c0_30] : memref<1x320x16xbf16, #tpu.memory_space<vmem>>, vector<1x256x16xbf16>
    %38 = vector.shape_cast %37 : vector<1x256x16xbf16> to vector<256x16xbf16>
    %c4 = arith.constant 4 : index
    %c0_31 = arith.constant 0 : index
    %c0_32 = arith.constant 0 : index
    %39 = vector.load %arg2[%c4, %c0_31, %c0_32] : memref<9x16x128xbf16, #tpu.memory_space<vmem>>, vector<1x16x128xbf16>
    %40 = vector.shape_cast %39 : vector<1x16x128xbf16> to vector<16x128xbf16>
    %cst_33 = arith.constant dense<0.000000e+00> : vector<256x128xf32>
    %41 = tpu.matmul %38, %40, %cst_33 {dimension_numbers = #tpu.dot_dimension_numbers<[1], [0], [0], [1], [0, 0, 1, 1], [], []>} : vector<256x16xbf16>, vector<16x128xbf16>, vector<256x128xf32> -> vector<256x128xf32>
    %42 = arith.addf %36, %41 : vector<256x128xf32>
    %c0_34 = arith.constant 0 : index
    %c33 = arith.constant 33 : index
    %c0_35 = arith.constant 0 : index
    %43 = vector.load %arg1[%c0_34, %c33, %c0_35] : memref<1x320x16xbf16, #tpu.memory_space<vmem>>, vector<1x256x16xbf16>
    %44 = vector.shape_cast %43 : vector<1x256x16xbf16> to vector<256x16xbf16>
    %c1_36 = arith.constant 1 : index
    %c0_37 = arith.constant 0 : index
    %c0_38 = arith.constant 0 : index
    %45 = vector.load %arg3[%c1_36, %c0_37, %c0_38] : memref<2x256x1xbf16, #tpu.memory_space<vmem>>, vector<1x256x1xbf16>
    %46 = vector.shape_cast %45 : vector<1x256x1xbf16> to vector<256x1xbf16>
    %47 = vector.broadcast %46 : vector<256x1xbf16> to vector<256x16xbf16>
    %48 = arith.mulf %44, %47 : vector<256x16xbf16>
    %c5 = arith.constant 5 : index
    %c0_39 = arith.constant 0 : index
    %c0_40 = arith.constant 0 : index
    %49 = vector.load %arg2[%c5, %c0_39, %c0_40] : memref<9x16x128xbf16, #tpu.memory_space<vmem>>, vector<1x16x128xbf16>
    %50 = vector.shape_cast %49 : vector<1x16x128xbf16> to vector<16x128xbf16>
    %cst_41 = arith.constant dense<0.000000e+00> : vector<256x128xf32>
    %51 = tpu.matmul %48, %50, %cst_41 {dimension_numbers = #tpu.dot_dimension_numbers<[1], [0], [0], [1], [0, 0, 1, 1], [], []>} : vector<256x16xbf16>, vector<16x128xbf16>, vector<256x128xf32> -> vector<256x128xf32>
    %52 = arith.addf %42, %51 : vector<256x128xf32>
    %c0_42 = arith.constant 0 : index
    %c47 = arith.constant 47 : index
    %c0_43 = arith.constant 0 : index
    %53 = vector.load %arg1[%c0_42, %c47, %c0_43] : memref<1x320x16xbf16, #tpu.memory_space<vmem>>, vector<1x256x16xbf16>
    %54 = vector.shape_cast %53 : vector<1x256x16xbf16> to vector<256x16xbf16>
    %c0_44 = arith.constant 0 : index
    %c0_45 = arith.constant 0 : index
    %c0_46 = arith.constant 0 : index
    %55 = vector.load %arg3[%c0_44, %c0_45, %c0_46] : memref<2x256x1xbf16, #tpu.memory_space<vmem>>, vector<1x256x1xbf16>
    %56 = vector.shape_cast %55 : vector<1x256x1xbf16> to vector<256x1xbf16>
    %57 = vector.broadcast %56 : vector<256x1xbf16> to vector<256x16xbf16>
    %58 = arith.mulf %54, %57 : vector<256x16xbf16>
    %c6 = arith.constant 6 : index
    %c0_47 = arith.constant 0 : index
    %c0_48 = arith.constant 0 : index
    %59 = vector.load %arg2[%c6, %c0_47, %c0_48] : memref<9x16x128xbf16, #tpu.memory_space<vmem>>, vector<1x16x128xbf16>
    %60 = vector.shape_cast %59 : vector<1x16x128xbf16> to vector<16x128xbf16>
    %cst_49 = arith.constant dense<0.000000e+00> : vector<256x128xf32>
    %61 = tpu.matmul %58, %60, %cst_49 {dimension_numbers = #tpu.dot_dimension_numbers<[1], [0], [0], [1], [0, 0, 1, 1], [], []>} : vector<256x16xbf16>, vector<16x128xbf16>, vector<256x128xf32> -> vector<256x128xf32>
    %62 = arith.addf %52, %61 : vector<256x128xf32>
    %c0_50 = arith.constant 0 : index
    %c48 = arith.constant 48 : index
    %c0_51 = arith.constant 0 : index
    %63 = vector.load %arg1[%c0_50, %c48, %c0_51] : memref<1x320x16xbf16, #tpu.memory_space<vmem>>, vector<1x256x16xbf16>
    %64 = vector.shape_cast %63 : vector<1x256x16xbf16> to vector<256x16xbf16>
    %c7 = arith.constant 7 : index
    %c0_52 = arith.constant 0 : index
    %c0_53 = arith.constant 0 : index
    %65 = vector.load %arg2[%c7, %c0_52, %c0_53] : memref<9x16x128xbf16, #tpu.memory_space<vmem>>, vector<1x16x128xbf16>
    %66 = vector.shape_cast %65 : vector<1x16x128xbf16> to vector<16x128xbf16>
    %cst_54 = arith.constant dense<0.000000e+00> : vector<256x128xf32>
    %67 = tpu.matmul %64, %66, %cst_54 {dimension_numbers = #tpu.dot_dimension_numbers<[1], [0], [0], [1], [0, 0, 1, 1], [], []>} : vector<256x16xbf16>, vector<16x128xbf16>, vector<256x128xf32> -> vector<256x128xf32>
    %68 = arith.addf %62, %67 : vector<256x128xf32>
    %c0_55 = arith.constant 0 : index
    %c49 = arith.constant 49 : index
    %c0_56 = arith.constant 0 : index
    %69 = vector.load %arg1[%c0_55, %c49, %c0_56] : memref<1x320x16xbf16, #tpu.memory_space<vmem>>, vector<1x256x16xbf16>
    %70 = vector.shape_cast %69 : vector<1x256x16xbf16> to vector<256x16xbf16>
    %c1_57 = arith.constant 1 : index
    %c0_58 = arith.constant 0 : index
    %c0_59 = arith.constant 0 : index
    %71 = vector.load %arg3[%c1_57, %c0_58, %c0_59] : memref<2x256x1xbf16, #tpu.memory_space<vmem>>, vector<1x256x1xbf16>
    %72 = vector.shape_cast %71 : vector<1x256x1xbf16> to vector<256x1xbf16>
    %73 = vector.broadcast %72 : vector<256x1xbf16> to vector<256x16xbf16>
    %74 = arith.mulf %70, %73 : vector<256x16xbf16>
    %c8 = arith.constant 8 : index
    %c0_60 = arith.constant 0 : index
    %c0_61 = arith.constant 0 : index
    %75 = vector.load %arg2[%c8, %c0_60, %c0_61] : memref<9x16x128xbf16, #tpu.memory_space<vmem>>, vector<1x16x128xbf16>
    %76 = vector.shape_cast %75 : vector<1x16x128xbf16> to vector<16x128xbf16>
    %cst_62 = arith.constant dense<0.000000e+00> : vector<256x128xf32>
    %77 = tpu.matmul %74, %76, %cst_62 {dimension_numbers = #tpu.dot_dimension_numbers<[1], [0], [0], [1], [0, 0, 1, 1], [], []>} : vector<256x16xbf16>, vector<16x128xbf16>, vector<256x128xf32> -> vector<256x128xf32>
    %78 = arith.addf %68, %77 : vector<256x128xf32>
    %c0_63 = arith.constant 0 : index
    %c0_64 = arith.constant 0 : index
    %79 = vector.load %arg4[%c0_63, %c0_64] : memref<1x128xf32, #tpu.memory_space<vmem>>, vector<1x128xf32>
    %80 = vector.broadcast %79 : vector<1x128xf32> to vector<256x128xf32>
    %81 = arith.addf %78, %80 : vector<256x128xf32>
    %cst_65 = arith.constant 0.000000e+00 : f32
    %82 = vector.broadcast %cst_65 : f32 to vector<256x128xf32>
    %83 = arith.maximumf %81, %82 : vector<256x128xf32>
    %c0_66 = arith.constant 0 : index
    %c0_67 = arith.constant 0 : index
    %c0_68 = arith.constant 0 : index
    %84 = vector.load %arg5[%c0_66, %c0_67, %c0_68] : memref<1x256x128xf32, #tpu.memory_space<vmem>>, vector<1x256x128xf32>
    %85 = vector.shape_cast %84 : vector<1x256x128xf32> to vector<256x128xf32>
    %86 = vector.shape_cast %83 : vector<256x128xf32> to vector<1x256x128xf32>
    tpu.vector_store %arg5[%c0_66, %c0_67, %c0_68], %86 {strides = array<i32>} : memref<1x256x128xf32, #tpu.memory_space<vmem>>, vector<1x256x128xf32>,
    return
  }
  func.func @transform_0(%arg0: i32) -> (i32, i32, i32) {
    %c0_i32 = arith.constant 0 : i32
    %c0_i32_0 = arith.constant 0 : i32
    %c0_i32_1 = arith.constant 0 : i32
    return %arg0, %c0_i32, %c0_i32_0 : i32, i32, i32
  }
  func.func @transform_1(%arg0: i32) -> (i32, i32, i32) {
    %c0_i32 = arith.constant 0 : i32
    %c0_i32_0 = arith.constant 0 : i32
    %c0_i32_1 = arith.constant 0 : i32
    %c0_i32_2 = arith.constant 0 : i32
    return %c0_i32, %c0_i32_0, %c0_i32_1 : i32, i32, i32
  }
  func.func @transform_2(%arg0: i32) -> (i32, i32, i32) {
    %c0_i32 = arith.constant 0 : i32
    %c0_i32_0 = arith.constant 0 : i32
    %c0_i32_1 = arith.constant 0 : i32
    %c0_i32_2 = arith.constant 0 : i32
    return %c0_i32, %c0_i32_0, %c0_i32_1 : i32, i32, i32
  }
  func.func @transform_3(%arg0: i32) -> (i32, i32) {
    %c0_i32 = arith.constant 0 : i32
    %c0_i32_0 = arith.constant 0 : i32
    %c0_i32_1 = arith.constant 0 : i32
    return %c0_i32, %c0_i32_0 : i32, i32
  }
  func.func @transform_4(%arg0: i32) -> (i32, i32, i32) {
    %c0_i32 = arith.constant 0 : i32
    %c0_i32_0 = arith.constant 0 : i32
    %c0_i32_1 = arith.constant 0 : i32
    return %arg0, %c0_i32, %c0_i32_0 : i32, i32, i32
  }
}

</mosaic_0001>

<bundles_post_ra>
// kernel: inception_forward.8
= control target key start
LH: loop header
LB: loop body
LE: loop exit
PB: predicated region body
PF: predicated region fallthrough
CT: control target
= control target key end

     0   :  { %s780_s12 = smov 0   ;;  %s909_s0 = inlined_call_operand.vmem [shape: bf16[512,4], index: 0, kind: input, shape index: {}]   ;;  %s910_s1 = inlined_call_operand.vmem [shape: bf16[4,128], index: 1, kind: input, shape index: {}]   ;;  %s911_s2 = inlined_call_operand.vmem [shape: f32[1,128], index: 2, kind: input, shape index: {}]   ;;  %s912_s3 = inlined_call_operand.vmem [shape: f32[512,128], index: 3, kind: output, shape index: {}]  }
   0x1 LB: > { %s629_s13 = sadd.s32 4294967295, %s758_s12   ;;  %p633_p0 = scmp.ge.s32.totalorder %s758_s12, 1  ;;  %s758_s12 = sphi %s780_s12, %s13_s12  }
   0x2   : > { %p138_p1 = scmp.lt.s32.totalorder %s758_s12, 3 }
   0x4   : > { %p139_p2 = pnand %p633_p0, %p138_p1 }
   0x5   : > { %v207_v0 = vld [vmem:[%s910_s1] sm:$0x3] (!%p139_p2)  ;;  %vm344_vm0 = vcmask (!%p139_p2), 1041408   ;;  %s634_s16 = sshll.u32 (!%p139_p2), %s629_s13, 5  ;;  %vm295_vm1 = vcmask (!%p139_p2), 31744  }
   0x6   : > { %142 = sbr.rel (%p139_p2) target bundleno = 263 (0x107), region = 32  ;;  %726 = vmatprep.subr.msk.bf16.mxu0 (!%p139_p2), %vm344_vm0, %v207_v0  ;;  %727 = vmatprep.subr.msk.bf16.mxu1 (!%p139_p2), %vm344_vm0, %v207_v0  ;;  %v346_v1 = vsel (!%p139_p2), %vm344_vm0, %v207_v0, 0  ;;  %p163_p3 = scmp.lt.s32.totalorder (!%p139_p2), %s634_s16, 63  ;;  %v834_v18 = vld [vmem:[%s911_s2] ss:$0 sm:$0xff] (!%p139_p2) }
   0x7   : > { %691 = vmatpush3.bf16.msra.mxu0 (!%p139_p2), %v346_v1  ;;  %725 = vmatpush3.bf16.msra.mxu1 (!%p139_p2), %v346_v1 }
   0xd   : > { %s914_s16 = smov (!%p163_p3, %s634_s16), 63 }
   0xe   : > { %s635_s17 = sshll.u32 %s914_s16, 2  ;;  %s637_s23 = sshll.u32 %s914_s16, 3 }
   0xf   : > { %s797_s20 = scalar_lea.vmem %s909_s0, %s635_s17  ;;  %s841_s26 = scalar_lea.vmem %s912_s3, %s637_s23 }
  0x10   : > { %v736_v2 = vld [vmem:[%s797_s20] sm:$0xff]   ;;  %v738_v4 = vld [vmem:[%s797_s20 + $0x8] sm:$0xff]   ;;  %v740_v6 = vld [vmem:[%s797_s20 + $0x10] sm:$0xff]  }
  0x11   : > { %v737_v3 = vld [vmem:[%s797_s20 + $0x40] sm:$0xff]   ;;  %692 = vmatprep.mubr.msk.bf16.mxu0 %vm295_vm1, %v736_v2  ;;  %v739_v5 = vld [vmem:[%s797_s20 + $0x48] sm:$0xff]   ;;  %v741_v7 = vld [vmem:[%s797_s20 + $0x50] sm:$0xff]  }
  0x12   : > { %708 = vmatprep.mubr.msk.bf16.mxu1 %vm295_vm1, %v737_v3  ;;  %693 = vmatmul.mubr.msk.bf16.vlgmr.msra.gmra.mrb[0].mxu0 %vm295_vm1, %v738_v4  ;;  %v742_v8 = vld [vmem:[%s797_s20 + $0x18] sm:$0xff]   ;;  %v744_v10 = vld [vmem:[%s797_s20 + $0x20] sm:$0xff]   ;;  %v746_v12 = vld [vmem:[%s797_s20 + $0x28] sm:$0xff]  }
  0x13   : > { %709 = vmatmul.mubr.msk.bf16.vlgmr.msra.gmra.mrb[0].mxu1 %vm295_vm1, %v739_v5  ;;  %696 = vmatprep.mubr.msk.bf16.mxu0 %vm295_vm1, %v740_v6  ;;  %v743_v9 = vld [vmem:[%s797_s20 + $0x58] sm:$0xff]   ;;  %v745_v11 = vld [vmem:[%s797_s20 + $0x60] sm:$0xff]   ;;  %v747_v13 = vld [vmem:[%s797_s20 + $0x68] sm:$0xff]  }
  0x14   : > { %712 = vmatprep.mubr.msk.bf16.mxu1 %vm295_vm1, %v741_v7  ;;  %v748_v14 = vld [vmem:[%s797_s20 + $0x30] sm:$0xff]   ;;  %v750_v16 = vld [vmem:[%s797_s20 + $0x38] sm:$0xff]  }
  0x15   : > { %v749_v15 = vld [vmem:[%s797_s20 + $0x70] sm:$0xff]   ;;  %v751_v17 = vld [vmem:[%s797_s20 + $0x78] sm:$0xff]  }
  0x1a   : > { %697 = vmatmul.mubr.msk.bf16.gmra.mrb[4].mxu0 %vm295_vm1, %v742_v8 }
  0x1b   : > { %713 = vmatmul.mubr.msk.bf16.gmra.mrb[4].mxu1 %vm295_vm1, %v743_v9  ;;  %700 = vmatprep.mubr.msk.bf16.mxu0 %vm295_vm1, %v744_v10 }
  0x1c   : > { %716 = vmatprep.mubr.msk.bf16.mxu1 %vm295_vm1, %v745_v11 }
  0x22   : > { %701 = vmatmul.mubr.msk.bf16.gmra.mrb[8].mxu0 %vm295_vm1, %v746_v12 }
  0x23   : > { %717 = vmatmul.mubr.msk.bf16.gmra.mrb[8].mxu1 %vm295_vm1, %v747_v13  ;;  %704 = vmatprep.mubr.msk.bf16.mxu0 %vm295_vm1, %v748_v14 }
  0x24   : > { %720 = vmatprep.mubr.msk.bf16.mxu1 %vm295_vm1, %v749_v15 }
  0x2a   : > { %705 = vmatmul.mubr.msk.bf16.gmra.mrb[12].mxu0 %vm295_vm1, %v750_v16 }
  0x2b   : > { %721 = vmatmul.mubr.msk.bf16.gmra.mrb[12].mxu1 %vm295_vm1, %v751_v17 }
  0xe5   : > { %v694_v19 = vpop.f32.mrb[0].mxu0 }
  0xe6   : > { %v391_v20 = vadd.f32 %v694_v19, %v834_v18  ;;  %v710_v21 = vpop.f32.mrb[0].mxu1  ;;  %v382_v22 = vpop.f32.mrb[1].mxu0 }
  0xe7   : > { %v455_v23 = vadd.f32 %v710_v21, %v834_v18  ;;  %v383_v24 = vadd.f32 %v834_v18, %v382_v22  ;;  %v446_v25 = vpop.f32.mrb[1].mxu1  ;;  %v695_v26 = vpop.f32.mrb[2].mxu0 }
  0xe8   : > { %v511_v27 = vmax.f32 %v391_v20, 0.0  ;;  %v447_v28 = vadd.f32 %v834_v18, %v446_v25  ;;  %v394_v29 = vadd.f32 %v695_v26, %v834_v18  ;;  %v711_v30 = vpop.f32.mrb[2].mxu1  ;;  %v385_v31 = vpop.f32.mrb[3].mxu0 }
  0xe9   : > { %v527_v32 = vmax.f32 %v455_v23, 0.0  ;;  %v509_v33 = vmax.f32 %v383_v24, 0.0  ;;  %v458_v34 = vadd.f32 %v711_v30, %v834_v18  ;;  %v386_v35 = vadd.f32 %v834_v18, %v385_v31  ;;  %v449_v36 = vpop.f32.mrb[3].mxu1 }
  0xea   : > { %543 = vst [vmem:[%s841_s26 + $0x10] sm:$0xff] %v511_v27  ;;  %v525_v37 = vmax.f32 %v447_v28, 0.0  ;;  %v512_v38 = vmax.f32 %v394_v29, 0.0  ;;  %v450_v39 = vadd.f32 %v834_v18, %v449_v36 }
  0xeb   : > { %559 = vst [vmem:[%s841_s26 + $0x90] sm:$0xff] %v527_v32  ;;  %541 = vst [vmem:[%s841_s26] sm:$0xff] %v509_v33  ;;  %v528_v40 = vmax.f32 %v458_v34, 0.0  ;;  %v510_v41 = vmax.f32 %v386_v35, 0.0 }
  0xec   : > { %557 = vst [vmem:[%s841_s26 + $0x80] sm:$0xff] %v525_v37  ;;  %544 = vst [vmem:[%s841_s26 + $0x18] sm:$0xff] %v512_v38  ;;  %v526_v42 = vmax.f32 %v450_v39, 0.0 }
  0xed   : > { %560 = vst [vmem:[%s841_s26 + $0x98] sm:$0xff] %v528_v40  ;;  %542 = vst [vmem:[%s841_s26 + $0x8] sm:$0xff] %v510_v41  ;;  %v698_v43 = vpop.f32.mrb[4].mxu0 }
  0xee   : > { %558 = vst [vmem:[%s841_s26 + $0x88] sm:$0xff] %v526_v42  ;;  %v407_v44 = vadd.f32 %v698_v43, %v834_v18  ;;  %v714_v45 = vpop.f32.mrb[4].mxu1  ;;  %v398_v46 = vpop.f32.mrb[5].mxu0 }
  0xef   : > { %v471_v47 = vadd.f32 %v714_v45, %v834_v18  ;;  %v399_v48 = vadd.f32 %v834_v18, %v398_v46  ;;  %v462_v49 = vpop.f32.mrb[5].mxu1  ;;  %v699_v50 = vpop.f32.mrb[6].mxu0 }
  0xf0   : > { %v515_v51 = vmax.f32 %v407_v44, 0.0  ;;  %v463_v52 = vadd.f32 %v834_v18, %v462_v49  ;;  %v410_v53 = vadd.f32 %v699_v50, %v834_v18  ;;  %v715_v54 = vpop.f32.mrb[6].mxu1  ;;  %v401_v55 = vpop.f32.mrb[7].mxu0 }
  0xf1   : > { %v531_v56 = vmax.f32 %v471_v47, 0.0  ;;  %v513_v57 = vmax.f32 %v399_v48, 0.0  ;;  %v474_v58 = vadd.f32 %v715_v54, %v834_v18  ;;  %v402_v59 = vadd.f32 %v834_v18, %v401_v55  ;;  %v465_v60 = vpop.f32.mrb[7].mxu1 }
  0xf2   : > { %547 = vst [vmem:[%s841_s26 + $0x30] sm:$0xff] %v515_v51  ;;  %v529_v61 = vmax.f32 %v463_v52, 0.0  ;;  %v516_v62 = vmax.f32 %v410_v53, 0.0  ;;  %v466_v63 = vadd.f32 %v834_v18, %v465_v60 }
  0xf3   : > { %563 = vst [vmem:[%s841_s26 + $0xb0] sm:$0xff] %v531_v56  ;;  %545 = vst [vmem:[%s841_s26 + $0x20] sm:$0xff] %v513_v57  ;;  %v532_v0 = vmax.f32 %v474_v58, 0.0  ;;  %v514_v1 = vmax.f32 %v402_v59, 0.0 }
  0xf4   : > { %561 = vst [vmem:[%s841_s26 + $0xa0] sm:$0xff] %v529_v61  ;;  %548 = vst [vmem:[%s841_s26 + $0x38] sm:$0xff] %v516_v62  ;;  %v530_v2 = vmax.f32 %v466_v63, 0.0 }
  0xf5   : > { %564 = vst [vmem:[%s841_s26 + $0xb8] sm:$0xff] %v532_v0  ;;  %546 = vst [vmem:[%s841_s26 + $0x28] sm:$0xff] %v514_v1  ;;  %v702_v3 = vpop.f32.mrb[8].mxu0 }
  0xf6   : > { %562 = vst [vmem:[%s841_s26 + $0xa8] sm:$0xff] %v530_v2  ;;  %v423_v4 = vadd.f32 %v702_v3, %v834_v18  ;;  %v718_v5 = vpop.f32.mrb[8].mxu1  ;;  %v414_v6 = vpop.f32.mrb[9].mxu0 }
  0xf7   : > { %v487_v7 = vadd.f32 %v718_v5, %v834_v18  ;;  %v415_v8 = vadd.f32 %v834_v18, %v414_v6  ;;  %v478_v9 = vpop.f32.mrb[9].mxu1  ;;  %v703_v10 = vpop.f32.mrb[10].mxu0 }
  0xf8   : > { %v519_v11 = vmax.f32 %v423_v4, 0.0  ;;  %v479_v12 = vadd.f32 %v834_v18, %v478_v9  ;;  %v426_v13 = vadd.f32 %v703_v10, %v834_v18  ;;  %v719_v14 = vpop.f32.mrb[10].mxu1  ;;  %v417_v15 = vpop.f32.mrb[11].mxu0 }
  0xf9   : > { %v535_v16 = vmax.f32 %v487_v7, 0.0  ;;  %v517_v17 = vmax.f32 %v415_v8, 0.0  ;;  %v490_v19 = vadd.f32 %v719_v14, %v834_v18  ;;  %v418_v20 = vadd.f32 %v834_v18, %v417_v15  ;;  %v481_v21 = vpop.f32.mrb[11].mxu1 }
  0xfa   : > { %551 = vst [vmem:[%s841_s26 + $0x50] sm:$0xff] %v519_v11  ;;  %v533_v22 = vmax.f32 %v479_v12, 0.0  ;;  %v520_v23 = vmax.f32 %v426_v13, 0.0  ;;  %v482_v24 = vadd.f32 %v834_v18, %v481_v21 }
  0xfb   : > { %567 = vst [vmem:[%s841_s26 + $0xd0] sm:$0xff] %v535_v16  ;;  %549 = vst [vmem:[%s841_s26 + $0x40] sm:$0xff] %v517_v17  ;;  %v536_v25 = vmax.f32 %v490_v19, 0.0  ;;  %v518_v26 = vmax.f32 %v418_v20, 0.0 }
  0xfc   : > { %565 = vst [vmem:[%s841_s26 + $0xc0] sm:$0xff] %v533_v22  ;;  %552 = vst [vmem:[%s841_s26 + $0x58] sm:$0xff] %v520_v23  ;;  %v534_v27 = vmax.f32 %v482_v24, 0.0 }
  0xfd   : > { %568 = vst [vmem:[%s841_s26 + $0xd8] sm:$0xff] %v536_v25  ;;  %550 = vst [vmem:[%s841_s26 + $0x48] sm:$0xff] %v518_v26  ;;  %v706_v28 = vpop.f32.mrb[12].mxu0 }
  0xfe   : > { %566 = vst [vmem:[%s841_s26 + $0xc8] sm:$0xff] %v534_v27  ;;  %v439_v29 = vadd.f32 %v706_v28, %v834_v18  ;;  %v722_v30 = vpop.f32.mrb[12].mxu1  ;;  %v430_v31 = vpop.f32.mrb[13].mxu0 }
  0xff   : > { %v503_v32 = vadd.f32 %v722_v30, %v834_v18  ;;  %v431_v33 = vadd.f32 %v834_v18, %v430_v31  ;;  %v494_v34 = vpop.f32.mrb[13].mxu1  ;;  %v707_v35 = vpop.f32.mrb[14].mxu0 }
 0x100   : > { %v523_v36 = vmax.f32 %v439_v29, 0.0  ;;  %v495_v37 = vadd.f32 %v834_v18, %v494_v34  ;;  %v442_v38 = vadd.f32 %v707_v35, %v834_v18  ;;  %v723_v39 = vpop.f32.mrb[14].mxu1  ;;  %v433_v40 = vpop.f32.mrb[15].mxu0 }
 0x101   : > { %v539_v41 = vmax.f32 %v503_v32, 0.0  ;;  %v521_v42 = vmax.f32 %v431_v33, 0.0  ;;  %v506_v43 = vadd.f32 %v723_v39, %v834_v18  ;;  %v434_v44 = vadd.f32 %v834_v18, %v433_v40  ;;  %v497_v45 = vpop.f32.mrb[15].mxu1 }
 0x102   : > { %555 = vst [vmem:[%s841_s26 + $0x70] sm:$0xff] %v523_v36  ;;  %v537_v46 = vmax.f32 %v495_v37, 0.0  ;;  %v524_v47 = vmax.f32 %v442_v38, 0.0  ;;  %v498_v48 = vadd.f32 %v834_v18, %v497_v45 }
 0x103   : > { %571 = vst [vmem:[%s841_s26 + $0xf0] sm:$0xff] %v539_v41  ;;  %553 = vst [vmem:[%s841_s26 + $0x60] sm:$0xff] %v521_v42  ;;  %v540_v49 = vmax.f32 %v506_v43, 0.0  ;;  %v522_v50 = vmax.f32 %v434_v44, 0.0 }
 0x104   : > { %569 = vst [vmem:[%s841_s26 + $0xe0] sm:$0xff] %v537_v46  ;;  %556 = vst [vmem:[%s841_s26 + $0x78] sm:$0xff] %v524_v47  ;;  %v538_v51 = vmax.f32 %v498_v48, 0.0 }
 0x105   : > { %572 = vst [vmem:[%s841_s26 + $0xf8] sm:$0xff] %v540_v49  ;;  %554 = vst [vmem:[%s841_s26 + $0x68] sm:$0xff] %v522_v50 }
 0x106   : > { %570 = vst [vmem:[%s841_s26 + $0xe8] sm:$0xff] %v538_v51 }
 0x107 PF: > { %s13_s12 = sadd.s32 1, %s758_s12  }
 0x108   : > { %p10_p4 = scmp.ge.s32.totalorder %s13_s12, 4  }
 0x10a   :  { %12 = sbr.rel (!%p10_p4) target bundleno = 1 (0x1), region = 62 }

// kernel: inception_forward.7
= control target key start
LH: loop header
LB: loop body
LE: loop exit
PB: predicated region body
PF: predicated region fallthrough
CT: control target
= control target key end

     0   :  { %s981_s6 = smov 0   ;;  %s1291_s0 = inlined_call_operand.vmem [shape: f32[2,18,18,4], index: 0, kind: input, shape index: {}]   ;;  %s1292_s1 = inlined_call_operand.vmem [shape: f32[2,16,16,4], index: 1, kind: output, shape index: {}]  }
   0x1 LB: > { %s751_s7 = sadd.s32 4294967295, %s969_s6   ;;  %p755_p0 = scmp.ge.s32.totalorder %s969_s6, 1  ;;  %s969_s6 = sphi %s981_s6, %s11_s6  }
   0x2   : > { %p87_p1 = scmp.lt.s32.totalorder %s969_s6, 3 }
   0x4   : > { %p88_p2 = pnand %p755_p0, %p87_p1 }
   0x5   : > { %p107_p3 = scmp.lt.s32.totalorder (!%p88_p2), %s751_s7, 1  ;;  %vm663_vm0 = vcmask (!%p88_p2), 31744  }
   0x6   : > { %91 = sbr.rel (%p88_p2) target bundleno = 92 (0x5c), region = 24 }
   0xd   : > { %s1294_s7 = smov (!%p107_p3, %s751_s7), 1 }
   0xe   : > { %s954_s8 = smul.u32 432, %s1294_s7  ;;  %s953_s12 = sshll.u32 %s1294_s7, 8 }
   0xf   : > { %s1046_s15 = scalar_lea.vmem %s1292_s1, %s953_s12 }
  0x10   : > { %s995_s11 = scalar_lea.vmem %s1291_s0, %s954_s8 }
  0x11   : > { %v759_v0 = vld [vmem:[%s995_s11 + $0x19] sm:$0xff]  ;;  %v214_v2 = vld [vmem:[%s995_s11 + $0x1] sm:$0xff]  ;;  %v1003_v6 = vld [vmem:[%s995_s11 + $0x31] sm:$0xff] }
  0x12   : > { %v150_v1 = vld [vmem:[%s995_s11] sm:$0xff]  ;;  %v791_v4 = vld [vmem:[%s995_s11 + $0x18] sm:$0xff]  ;;  %v151_v9 = vld [vmem:[%s995_s11 + $0x8] sm:$0xff] }
  0x13   : > { %v182_v3 = vmax.f32 %v759_v0, %v150_v1  ;;  %v278_v5 = vld [vmem:[%s995_s11 + $0x2] sm:$0xff]  ;;  %v184_v11 = vmax.f32 %v1003_v6, %v791_v4  ;;  %v823_v12 = vld [vmem:[%s995_s11 + $0x1a] sm:$0xff]  ;;  %v855_v13 = vld [vmem:[%s995_s11 + $0x30] sm:$0xff] }
  0x14   : > { %v760_v8 = vld [vmem:[%s995_s11 + $0x21] sm:$0xff]  ;;  %v215_v10 = vld [vmem:[%s995_s11 + $0x9] sm:$0xff]  ;;  %v856_v18 = vld [vmem:[%s995_s11 + $0x38] sm:$0xff] }
  0x15   : > { %v246_v7 = vmax.f32 %v182_v3, %v214_v2  ;;  %v183_v14 = vmax.f32 %v760_v8, %v151_v9  ;;  %v792_v15 = vld [vmem:[%s995_s11 + $0x20] sm:$0xff]  ;;  %v279_v17 = vld [vmem:[%s995_s11 + $0xa] sm:$0xff]  ;;  %v248_v20 = vmax.f32 %v184_v11, %v759_v0  ;;  %v919_v31 = vld [vmem:[%s995_s11 + $0x32] sm:$0xff] }
  0x16   : > { %v1015_v19 = vld [vmem:[%s995_s11 + $0x39] sm:$0xff]  ;;  %v857_v22 = vld [vmem:[%s995_s11 + $0x48] sm:$0xff]  ;;  %v858_v28 = vld [vmem:[%s995_s11 + $0x50] sm:$0xff] }
  0x17   : > { %v310_v16 = vmax.f32 %v246_v7, %v278_v5  ;;  %v247_v21 = vmax.f32 %v183_v14, %v215_v10  ;;  %v889_v23 = vld [vmem:[%s995_s11 + $0x49] sm:$0xff]  ;;  %v185_v24 = vmax.f32 %v1015_v19, %v792_v15  ;;  %v312_v27 = vmax.f32 %v248_v20, %v823_v12  ;;  %v1023_v29 = vld [vmem:[%s995_s11 + $0x51] sm:$0xff]  ;;  %v1027_v34 = vld [vmem:[%s995_s11 + $0x61] sm:$0xff] }
  0x18   : > { %v824_v26 = vld [vmem:[%s995_s11 + $0x22] sm:$0xff]  ;;  %v186_v30 = vmax.f32 %v889_v23, %v855_v13  ;;  %v187_v35 = vmax.f32 %v1023_v29, %v856_v18  ;;  %v920_v37 = vld [vmem:[%s995_s11 + $0x3a] sm:$0xff]  ;;  %v188_v41 = vmax.f32 %v1027_v34, %v857_v22  ;;  %v921_v43 = vld [vmem:[%s995_s11 + $0x4a] sm:$0xff] }
  0x19   : > { %v374_v25 = vmax.f32 %v310_v16, %v791_v4  ;;  %v311_v32 = vmax.f32 %v247_v21, %v279_v17  ;;  %v249_v33 = vmax.f32 %v185_v24, %v760_v8  ;;  %v376_v38 = vmax.f32 %v312_v27, %v855_v13  ;;  %v1033_v40 = vld [vmem:[%s995_s11 + $0x69] sm:$0xff]  ;;  %v922_v49 = vld [vmem:[%s995_s11 + $0x52] sm:$0xff]  ;;  %v859_v62 = vld [vmem:[%s995_s11 + $0x60] sm:$0xff] }
  0x1a   : > { %v250_v39 = vmax.f32 %v186_v30, %v1003_v6  ;;  %v251_v45 = vmax.f32 %v187_v35, %v1015_v19  ;;  %v189_v46 = vmax.f32 %v1033_v40, %v858_v28  ;;  %v252_v51 = vmax.f32 %v188_v41, %v889_v23  ;;  %v893_v0 = vld [vmem:[%s995_s11 + $0x79] sm:$0xff]  ;;  %v860_v5 = vld [vmem:[%s995_s11 + $0x68] sm:$0xff]  ;;  %v1059_v20 = vld [vmem:[%s995_s11 + $0x91] sm:$0xff] }
  0x1b   : > { %v438_v36 = vmax.f32 %v374_v25, %v823_v12  ;;  %v375_v42 = vmax.f32 %v311_v32, %v792_v15  ;;  %v313_v44 = vmax.f32 %v249_v33, %v824_v26  ;;  %v440_v48 = vmax.f32 %v376_v38, %v919_v31  ;;  %v923_v9 = vld [vmem:[%s995_s11 + $0x62] sm:$0xff]  ;;  %v924_v15 = vld [vmem:[%s995_s11 + $0x6a] sm:$0xff]  ;;  %v861_v17 = vld [vmem:[%s995_s11 + $0x78] sm:$0xff] }
  0x1c   : > { %v314_v50 = vmax.f32 %v250_v39, %v919_v31  ;;  %v315_v54 = vmax.f32 %v251_v45, %v920_v37  ;;  %v253_v55 = vmax.f32 %v189_v46, %v1023_v29  ;;  %v316_v59 = vmax.f32 %v252_v51, %v921_v43  ;;  %v894_v12 = vld [vmem:[%s995_s11 + $0x81] sm:$0xff]  ;;  %v1068_v30 = vld [vmem:[%s995_s11 + $0x99] sm:$0xff]  ;;  %v863_v33 = vld [vmem:[%s995_s11 + $0x90] sm:$0xff] }
  0x1d   : > { %v503_v47 = vmax.f32 %v438_v36, %v855_v13  ;;  %v439_v52 = vmax.f32 %v375_v42, %v824_v26  ;;  %v377_v53 = vmax.f32 %v313_v44, %v856_v18  ;;  %v505_v57 = vmax.f32 %v440_v48, %v857_v22  ;;  %v862_v26 = vld [vmem:[%s995_s11 + $0x80] sm:$0xff]  ;;  %v1076_v36 = vld [vmem:[%s995_s11 + $0xa9] sm:$0xff]  ;;  %v864_v42 = vld [vmem:[%s995_s11 + $0x98] sm:$0xff] }
  0x1e   : > { %v378_v58 = vmax.f32 %v314_v50, %v857_v22  ;;  %v379_v63 = vmax.f32 %v315_v54, %v858_v28  ;;  %v317_v1 = vmax.f32 %v253_v55, %v922_v49  ;;  %v192_v35 = vmax.f32 %v1059_v20, %v861_v17  ;;  %v925_v38 = vld [vmem:[%s995_s11 + $0x7a] sm:$0xff]  ;;  %v926_v50 = vld [vmem:[%s995_s11 + $0x82] sm:$0xff] }
  0x1f   : > { %v567_v56 = vmax.f32 %v503_v47, %v1003_v6  ;;  %v504_v60 = vmax.f32 %v439_v52, %v856_v18  ;;  %v441_v61 = vmax.f32 %v377_v53, %v920_v37  ;;  %v569_v3 = vmax.f32 %v505_v57, %v889_v23  ;;  %v865_v47 = vld [vmem:[%s995_s11 + $0xa8] sm:$0xff]  ;;  %v866_v53 = vld [vmem:[%s995_s11 + $0xb0] sm:$0xff] }
  0x20   : > { %v442_v4 = vmax.f32 %v378_v58, %v921_v43  ;;  %v380_v6 = vmax.f32 %v316_v59, %v859_v62  ;;  %v443_v10 = vmax.f32 %v379_v63, %v922_v49  ;;  %v381_v11 = vmax.f32 %v317_v1, %v860_v5  ;;  %v1097_v55 = vld [vmem:[%s995_s11 + $0xc9] sm:$0xff]  ;;  %v927_v57 = vld [vmem:[%s995_s11 + $0x92] sm:$0xff]  ;;  %v928_v63 = vld [vmem:[%s995_s11 + $0x9a] sm:$0xff] }
  0x21   : > { %v631_v2 = vmax.f32 %v567_v56, %v919_v31  ;;  %v568_v7 = vmax.f32 %v504_v60, %v1015_v19  ;;  %v506_v8 = vmax.f32 %v441_v61, %v858_v28  ;;  %v633_v13 = vmax.f32 %v569_v3, %v921_v43  ;;  %v1082_v43 = vld [vmem:[%s995_s11 + $0xb1] sm:$0xff] }
  0x22   : > { %v507_v14 = vmax.f32 %v442_v4, %v859_v62  ;;  %v444_v16 = vmax.f32 %v380_v6, %v923_v9  ;;  %v190_v18 = vmax.f32 %v893_v0, %v859_v62  ;;  %v508_v22 = vmax.f32 %v443_v10, %v860_v5  ;;  %v929_v3 = vld [vmem:[%s995_s11 + $0xaa] sm:$0xff] }
  0x23   : > { %664 = vst.msk [vmem:[%s1046_s15] sm:$0xff] %vm663_vm0, %v631_v2  ;;  %v632_v19 = vmax.f32 %v568_v7, %v920_v37  ;;  %v570_v21 = vmax.f32 %v506_v8, %v1023_v29  ;;  %v445_v23 = vmax.f32 %v381_v11, %v924_v15  ;;  %666 = vst.msk [vmem:[%s1046_s15 + $0x10] sm:$0xff] %vm663_vm0, %v633_v13 }
  0x24   : > { %v571_v24 = vmax.f32 %v507_v14, %v1027_v34  ;;  %v509_v25 = vmax.f32 %v444_v16, %v861_v17  ;;  %v254_v27 = vmax.f32 %v190_v18, %v1027_v34  ;;  %v191_v28 = vmax.f32 %v894_v12, %v860_v5 }
  0x25   : > { %665 = vst.msk [vmem:[%s1046_s15 + $0x8] sm:$0xff] %vm663_vm0, %v632_v19  ;;  %v634_v29 = vmax.f32 %v570_v21, %v922_v49  ;;  %v572_v31 = vmax.f32 %v508_v22, %v1033_v40  ;;  %v510_v32 = vmax.f32 %v445_v23, %v862_v26  ;;  %v256_v46 = vmax.f32 %v192_v35, %v893_v0  ;;  %v1089_v49 = vld [vmem:[%s995_s11 + $0xc1] sm:$0xff] }
  0x26   : > { %v635_v34 = vmax.f32 %v571_v24, %v923_v9  ;;  %v573_v37 = vmax.f32 %v509_v25, %v893_v0  ;;  %v318_v39 = vmax.f32 %v254_v27, %v923_v9  ;;  %v255_v41 = vmax.f32 %v191_v28, %v1033_v40  ;;  %v930_v9 = vld [vmem:[%s995_s11 + $0xb2] sm:$0xff]  ;;  %v867_v23 = vld [vmem:[%s995_s11 + $0xc0] sm:$0xff] }
  0x27   : > { %667 = vst.msk [vmem:[%s1046_s15 + $0x18] sm:$0xff] %vm663_vm0, %v634_v29  ;;  %v636_v44 = vmax.f32 %v572_v31, %v924_v15  ;;  %v574_v45 = vmax.f32 %v510_v32, %v894_v12  ;;  %v193_v48 = vmax.f32 %v1068_v30, %v862_v26  ;;  %v194_v54 = vmax.f32 %v1076_v36, %v863_v33  ;;  %v901_v25 = vld [vmem:[%s995_s11 + $0xd9] sm:$0xff]  ;;  %v931_v35 = vld [vmem:[%s995_s11 + $0xc2] sm:$0xff] }
  0x28   : > { %668 = vst.msk [vmem:[%s1046_s15 + $0x20] sm:$0xff] %vm663_vm0, %v635_v34  ;;  %v637_v40 = vmax.f32 %v573_v37, %v925_v38  ;;  %v382_v51 = vmax.f32 %v318_v39, %v861_v17  ;;  %v319_v52 = vmax.f32 %v255_v41, %v924_v15  ;;  %v320_v58 = vmax.f32 %v256_v46, %v925_v38  ;;  %v1129_v46 = vld [vmem:[%s995_s11 + $0xf1] sm:$0xff] }
  0x29   : > { %669 = vst.msk [vmem:[%s1046_s15 + $0x28] sm:$0xff] %vm663_vm0, %v636_v44  ;;  %v638_v56 = vmax.f32 %v574_v45, %v926_v50  ;;  %v257_v59 = vmax.f32 %v193_v48, %v894_v12  ;;  %v195_v60 = vmax.f32 %v1082_v43, %v864_v42  ;;  %v258_v0 = vmax.f32 %v194_v54, %v1059_v20  ;;  %v869_v44 = vld [vmem:[%s995_s11 + $0xd8] sm:$0xff] }
  0x2a   : > { %670 = vst.msk [vmem:[%s1046_s15 + $0x30] sm:$0xff] %vm663_vm0, %v637_v40  ;;  %v446_v61 = vmax.f32 %v382_v51, %v925_v38  ;;  %v383_v62 = vmax.f32 %v319_v52, %v862_v26  ;;  %v196_v1 = vmax.f32 %v1089_v49, %v865_v47  ;;  %v384_v2 = vmax.f32 %v320_v58, %v863_v33  ;;  %v902_v38 = vld [vmem:[%s995_s11 + $0xe1] sm:$0xff] }
  0x2b   : > { %671 = vst.msk [vmem:[%s1046_s15 + $0x38] sm:$0xff] %vm663_vm0, %v638_v56  ;;  %v321_v4 = vmax.f32 %v257_v59, %v926_v50  ;;  %v259_v5 = vmax.f32 %v195_v60, %v1068_v30  ;;  %v197_v6 = vmax.f32 %v1097_v55, %v866_v53  ;;  %v322_v10 = vmax.f32 %v258_v0, %v927_v57  ;;  %v870_v52 = vld [vmem:[%s995_s11 + $0xe0] sm:$0xff]  ;;  %v871_v59 = vld [vmem:[%s995_s11 + $0xf0] sm:$0xff] }
  0x2c   : > { %v511_v7 = vmax.f32 %v446_v61, %v863_v33  ;;  %v447_v8 = vmax.f32 %v383_v62, %v926_v50  ;;  %v260_v11 = vmax.f32 %v196_v1, %v1076_v36  ;;  %v448_v12 = vmax.f32 %v384_v2, %v927_v57  ;;  %v1138_v56 = vld [vmem:[%s995_s11 + $0xf9] sm:$0xff]  ;;  %v1146_v61 = vld [vmem:[%s995_s11 + $0x109] sm:$0xff] }
  0x2d   : > { %v385_v13 = vmax.f32 %v321_v4, %v864_v42  ;;  %v323_v14 = vmax.f32 %v259_v5, %v928_v63  ;;  %v261_v15 = vmax.f32 %v197_v6, %v1082_v43  ;;  %v386_v18 = vmax.f32 %v322_v10, %v865_v47  ;;  %v872_v2 = vld [vmem:[%s995_s11 + $0xf8] sm:$0xff]  ;;  %v934_v10 = vld [vmem:[%s995_s11 + $0xe2] sm:$0xff] }
  0x2e   : > { %v575_v16 = vmax.f32 %v511_v7, %v1059_v20  ;;  %v512_v17 = vmax.f32 %v447_v8, %v864_v42  ;;  %v324_v19 = vmax.f32 %v260_v11, %v929_v3  ;;  %v513_v21 = vmax.f32 %v448_v12, %v865_v47  ;;  %v868_v20 = vld [vmem:[%s995_s11 + $0xc8] sm:$0xff] }
  0x2f   : > { %v449_v22 = vmax.f32 %v385_v13, %v928_v63  ;;  %v387_v24 = vmax.f32 %v323_v14, %v866_v53  ;;  %v325_v26 = vmax.f32 %v261_v15, %v930_v9  ;;  %v450_v29 = vmax.f32 %v386_v18, %v929_v3  ;;  %v932_v42 = vld [vmem:[%s995_s11 + $0xca] sm:$0xff] }
  0x30   : > { %v639_v27 = vmax.f32 %v575_v16, %v927_v57  ;;  %v576_v28 = vmax.f32 %v512_v17, %v1068_v30  ;;  %v388_v31 = vmax.f32 %v324_v19, %v867_v23  ;;  %v577_v32 = vmax.f32 %v513_v21, %v1076_v36  ;;  %v873_v7 = vld [vmem:[%s995_s11 + $0x108] sm:$0xff]  ;;  %v874_v13 = vld [vmem:[%s995_s11 + $0x110] sm:$0xff] }
  0x31   : > { %v514_v33 = vmax.f32 %v449_v22, %v866_v53  ;;  %v451_v34 = vmax.f32 %v387_v24, %v930_v9  ;;  %v389_v37 = vmax.f32 %v325_v26, %v868_v20  ;;  %v515_v41 = vmax.f32 %v450_v29, %v867_v23  ;;  %v1167_v15 = vld [vmem:[%s995_s11 + $0x129] sm:$0xff]  ;;  %v935_v17 = vld [vmem:[%s995_s11 + $0xf2] sm:$0xff]  ;;  %v936_v24 = vld [vmem:[%s995_s11 + $0xfa] sm:$0xff] }
  0x32   : > { %672 = vst.msk [vmem:[%s1046_s15 + $0x40] sm:$0xff] %vm663_vm0, %v639_v27  ;;  %v640_v39 = vmax.f32 %v576_v28, %v928_v63  ;;  %v452_v30 = vmax.f32 %v388_v31, %v931_v35  ;;  %v198_v45 = vmax.f32 %v901_v25, %v867_v23  ;;  %v641_v36 = vmax.f32 %v577_v32, %v929_v3  ;;  %v933_v63 = vld [vmem:[%s995_s11 + $0xda] sm:$0xff]  ;;  %v1152_v3 = vld [vmem:[%s995_s11 + $0x111] sm:$0xff] }
  0x33   : > { %v578_v47 = vmax.f32 %v514_v33, %v1082_v43  ;;  %v516_v48 = vmax.f32 %v451_v34, %v868_v20  ;;  %v453_v40 = vmax.f32 %v389_v37, %v932_v42  ;;  %v579_v50 = vmax.f32 %v515_v41, %v1089_v49  ;;  %v937_v28 = vld [vmem:[%s995_s11 + $0x10a] sm:$0xff] }
  0x34   : > { %673 = vst.msk [vmem:[%s1046_s15 + $0x48] sm:$0xff] %vm663_vm0, %v640_v39  ;;  %v517_v51 = vmax.f32 %v452_v30, %v869_v44  ;;  %v262_v53 = vmax.f32 %v198_v45, %v1089_v49  ;;  %v199_v54 = vmax.f32 %v902_v38, %v868_v20  ;;  %674 = vst.msk [vmem:[%s1046_s15 + $0x50] sm:$0xff] %vm663_vm0, %v641_v36 }
  0x35   : > { %v642_v43 = vmax.f32 %v578_v47, %v930_v9  ;;  %v580_v57 = vmax.f32 %v516_v48, %v1097_v55  ;;  %v518_v58 = vmax.f32 %v453_v40, %v870_v52  ;;  %v200_v60 = vmax.f32 %v1129_v46, %v869_v44  ;;  %v1159_v9 = vld [vmem:[%s995_s11 + $0x121] sm:$0xff] }
  0x36   : > { %v643_v49 = vmax.f32 %v579_v50, %v931_v35  ;;  %v581_v62 = vmax.f32 %v517_v51, %v901_v25  ;;  %v326_v0 = vmax.f32 %v262_v53, %v931_v35  ;;  %v263_v1 = vmax.f32 %v199_v54, %v1097_v55  ;;  %v938_v35 = vld [vmem:[%s995_s11 + $0x112] sm:$0xff]  ;;  %v875_v40 = vld [vmem:[%s995_s11 + $0x120] sm:$0xff] }
  0x37   : > { %675 = vst.msk [vmem:[%s1046_s15 + $0x58] sm:$0xff] %vm663_vm0, %v642_v43  ;;  %v644_v4 = vmax.f32 %v580_v57, %v932_v42  ;;  %v582_v5 = vmax.f32 %v518_v58, %v902_v38  ;;  %v264_v6 = vmax.f32 %v200_v60, %v901_v25  ;;  %v201_v8 = vmax.f32 %v1138_v56, %v870_v52  ;;  %v909_v51 = vld [vmem:[%s995_s11 + $0x139] sm:$0xff]  ;;  %v939_v60 = vld [vmem:[%s995_s11 + $0x122] sm:$0xff] }
  0x38   : > { %676 = vst.msk [vmem:[%s1046_s15 + $0x60] sm:$0xff] %vm663_vm0, %v643_v49  ;;  %v645_v55 = vmax.f32 %v581_v62, %v933_v63  ;;  %v390_v11 = vmax.f32 %v326_v0, %v869_v44  ;;  %v327_v12 = vmax.f32 %v263_v1, %v932_v42  ;;  %v202_v14 = vmax.f32 %v1146_v61, %v871_v59 }
  0x39   : > { %677 = vst.msk [vmem:[%s1046_s15 + $0x68] sm:$0xff] %vm663_vm0, %v644_v4  ;;  %v646_v16 = vmax.f32 %v582_v5, %v934_v10  ;;  %v328_v18 = vmax.f32 %v264_v6, %v933_v63  ;;  %v265_v19 = vmax.f32 %v201_v8, %v902_v38  ;;  %v203_v21 = vmax.f32 %v1152_v3, %v872_v2  ;;  %v877_v4 = vld [vmem:[%s995_s11 + $0x138] sm:$0xff] }
  0x3a   : > { %678 = vst.msk [vmem:[%s1046_s15 + $0x70] sm:$0xff] %vm663_vm0, %v645_v55  ;;  %v454_v22 = vmax.f32 %v390_v11, %v933_v63  ;;  %v391_v23 = vmax.f32 %v327_v12, %v870_v52  ;;  %v266_v25 = vmax.f32 %v202_v14, %v1129_v46  ;;  %v204_v26 = vmax.f32 %v1159_v9, %v873_v7  ;;  %v910_v63 = vld [vmem:[%s995_s11 + $0x141] sm:$0xff]  ;;  %v1199_v6 = vld [vmem:[%s995_s11 + $0x151] sm:$0xff] }
  0x3b   : > { %679 = vst.msk [vmem:[%s1046_s15 + $0x78] sm:$0xff] %vm663_vm0, %v646_v16  ;;  %v392_v27 = vmax.f32 %v328_v18, %v871_v59  ;;  %v329_v29 = vmax.f32 %v265_v19, %v934_v10  ;;  %v267_v20 = vmax.f32 %v203_v21, %v1138_v56  ;;  %v205_v31 = vmax.f32 %v1167_v15, %v874_v13  ;;  %v878_v12 = vld [vmem:[%s995_s11 + $0x140] sm:$0xff]  ;;  %v879_v19 = vld [vmem:[%s995_s11 + $0x150] sm:$0xff] }
  0x3c   : > { %v519_v32 = vmax.f32 %v454_v22, %v871_v59  ;;  %v455_v33 = vmax.f32 %v391_v23, %v934_v10  ;;  %v330_v34 = vmax.f32 %v266_v25, %v935_v17  ;;  %v268_v37 = vmax.f32 %v204_v26, %v1146_v61  ;;  %v1208_v16 = vld [vmem:[%s995_s11 + $0x159] sm:$0xff]  ;;  %v1216_v22 = vld [vmem:[%s995_s11 + $0x169] sm:$0xff] }
  0x3d   : > { %v456_v38 = vmax.f32 %v392_v27, %v935_v17  ;;  %v393_v39 = vmax.f32 %v329_v29, %v872_v2  ;;  %v331_v41 = vmax.f32 %v267_v20, %v936_v24  ;;  %v269_v42 = vmax.f32 %v205_v31, %v1152_v3  ;;  %v880_v27 = vld [vmem:[%s995_s11 + $0x158] sm:$0xff] }
  0x3e   : > { %v583_v30 = vmax.f32 %v519_v32, %v1129_v46  ;;  %v520_v44 = vmax.f32 %v455_v33, %v872_v2  ;;  %v394_v45 = vmax.f32 %v330_v34, %v873_v7  ;;  %v332_v36 = vmax.f32 %v268_v37, %v937_v28  ;;  %v876_v46 = vld [vmem:[%s995_s11 + $0x128] sm:$0xff] }
  0x3f   : > { %v521_v47 = vmax.f32 %v456_v38, %v873_v7  ;;  %v457_v48 = vmax.f32 %v393_v39, %v936_v24  ;;  %v395_v50 = vmax.f32 %v331_v41, %v874_v13  ;;  %v333_v52 = vmax.f32 %v269_v42, %v938_v35  ;;  %v940_v2 = vld [vmem:[%s995_s11 + $0x12a] sm:$0xff]  ;;  %v942_v34 = vld [vmem:[%s995_s11 + $0x142] sm:$0xff] }
  0x40   : > { %v647_v53 = vmax.f32 %v583_v30, %v935_v17  ;;  %v584_v54 = vmax.f32 %v520_v44, %v1138_v56  ;;  %v458_v43 = vmax.f32 %v394_v45, %v937_v28  ;;  %v396_v57 = vmax.f32 %v332_v36, %v875_v40  ;;  %v881_v32 = vld [vmem:[%s995_s11 + $0x168] sm:$0xff]  ;;  %v882_v39 = vld [vmem:[%s995_s11 + $0x170] sm:$0xff] }
  0x41   : > { %v585_v58 = vmax.f32 %v521_v47, %v1146_v61  ;;  %v522_v59 = vmax.f32 %v457_v48, %v874_v13  ;;  %v459_v49 = vmax.f32 %v395_v50, %v938_v35  ;;  %v397_v62 = vmax.f32 %v333_v52, %v876_v46  ;;  %v1237_v42 = vld [vmem:[%s995_s11 + $0x189] sm:$0xff]  ;;  %v943_v44 = vld [vmem:[%s995_s11 + $0x152] sm:$0xff]  ;;  %v944_v50 = vld [vmem:[%s995_s11 + $0x15a] sm:$0xff] }
  0x42   : > { %680 = vst.msk [vmem:[%s1046_s15 + $0x80] sm:$0xff] %vm663_vm0, %v647_v53  ;;  %v648_v0 = vmax.f32 %v584_v54, %v936_v24  ;;  %v523_v1 = vmax.f32 %v458_v43, %v875_v40  ;;  %v460_v56 = vmax.f32 %v396_v57, %v939_v60  ;;  %v206_v5 = vmax.f32 %v909_v51, %v875_v40  ;;  %v941_v24 = vld [vmem:[%s995_s11 + $0x13a] sm:$0xff]  ;;  %v945_v54 = vld [vmem:[%s995_s11 + $0x16a] sm:$0xff] }
  0x43   : > { %v649_v61 = vmax.f32 %v585_v58, %v937_v28  ;;  %v586_v7 = vmax.f32 %v522_v59, %v1152_v3  ;;  %v524_v8 = vmax.f32 %v459_v49, %v876_v46  ;;  %v461_v55 = vmax.f32 %v397_v62, %v940_v2  ;;  %v1222_v28 = vld [vmem:[%s995_s11 + $0x171] sm:$0xff] }
  0x44   : > { %681 = vst.msk [vmem:[%s1046_s15 + $0x88] sm:$0xff] %vm663_vm0, %v648_v0  ;;  %v587_v10 = vmax.f32 %v523_v1, %v1159_v9  ;;  %v525_v11 = vmax.f32 %v460_v56, %v877_v4  ;;  %v270_v13 = vmax.f32 %v206_v5, %v1159_v9  ;;  %v207_v14 = vmax.f32 %v910_v63, %v876_v46  ;;  %v883_v1 = vld [vmem:[%s995_s11 + $0x180] sm:$0xff] }
  0x45   : > { %682 = vst.msk [vmem:[%s1046_s15 + $0x90] sm:$0xff] %vm663_vm0, %v649_v61  ;;  %v650_v3 = vmax.f32 %v586_v7, %v938_v35  ;;  %v588_v17 = vmax.f32 %v524_v8, %v1167_v15  ;;  %v526_v18 = vmax.f32 %v461_v55, %v878_v12  ;;  %v208_v21 = vmax.f32 %v1199_v6, %v877_v4  ;;  %v1229_v35 = vld [vmem:[%s995_s11 + $0x181] sm:$0xff] }
  0x46   : > { %v651_v9 = vmax.f32 %v587_v10, %v939_v60  ;;  %v589_v23 = vmax.f32 %v525_v11, %v909_v51  ;;  %v334_v25 = vmax.f32 %v270_v13, %v939_v60  ;;  %v271_v26 = vmax.f32 %v207_v14, %v1167_v15  ;;  %v946_v60 = vld [vmem:[%s995_s11 + $0x172] sm:$0xff]  ;;  %v884_v7 = vld [vmem:[%s995_s11 + $0x188] sm:$0xff] }
  0x47   : > { %683 = vst.msk [vmem:[%s1046_s15 + $0x98] sm:$0xff] %vm663_vm0, %v650_v3  ;;  %v652_v29 = vmax.f32 %v588_v17, %v940_v2  ;;  %v590_v20 = vmax.f32 %v526_v18, %v910_v63  ;;  %v272_v31 = vmax.f32 %v208_v21, %v909_v51  ;;  %v209_v33 = vmax.f32 %v1208_v16, %v878_v12  ;;  %v947_v11 = vld [vmem:[%s995_s11 + $0x182] sm:$0xff]  ;;  %v948_v18 = vld [vmem:[%s995_s11 + $0x18a] sm:$0xff] }
  0x48   : > { %684 = vst.msk [vmem:[%s1046_s15 + $0xa0] sm:$0xff] %vm663_vm0, %v651_v9  ;;  %v653_v15 = vmax.f32 %v589_v23, %v941_v24  ;;  %v398_v37 = vmax.f32 %v334_v25, %v877_v4  ;;  %v335_v38 = vmax.f32 %v271_v26, %v940_v2  ;;  %v210_v41 = vmax.f32 %v1216_v22, %v879_v19  ;;  %v885_v23 = vld [vmem:[%s995_s11 + $0x198] sm:$0xff] }
  0x49   : > { %685 = vst.msk [vmem:[%s1046_s15 + $0xa8] sm:$0xff] %vm663_vm0, %v652_v29  ;;  %v654_v30 = vmax.f32 %v590_v20, %v942_v34  ;;  %v336_v45 = vmax.f32 %v272_v31, %v941_v24  ;;  %v273_v36 = vmax.f32 %v209_v33, %v910_v63  ;;  %v211_v47 = vmax.f32 %v1222_v28, %v880_v27 }
  0x4a   : > { %686 = vst.msk [vmem:[%s1046_s15 + $0xb0] sm:$0xff] %vm663_vm0, %v653_v15  ;;  %v462_v48 = vmax.f32 %v398_v37, %v941_v24  ;;  %v399_v40 = vmax.f32 %v335_v38, %v878_v12  ;;  %v274_v51 = vmax.f32 %v210_v41, %v1199_v6  ;;  %v212_v52 = vmax.f32 %v1229_v35, %v881_v32 }
  0x4b   : > { %687 = vst.msk [vmem:[%s1046_s15 + $0xb8] sm:$0xff] %vm663_vm0, %v654_v30  ;;  %v400_v53 = vmax.f32 %v336_v45, %v879_v19  ;;  %v337_v43 = vmax.f32 %v273_v36, %v942_v34  ;;  %v275_v46 = vmax.f32 %v211_v47, %v1208_v16  ;;  %v213_v57 = vmax.f32 %v1237_v42, %v882_v39 }
  0x4c   : > { %v527_v58 = vmax.f32 %v462_v48, %v879_v19  ;;  %v463_v59 = vmax.f32 %v399_v40, %v942_v34  ;;  %v338_v49 = vmax.f32 %v274_v51, %v943_v44  ;;  %v276_v62 = vmax.f32 %v212_v52, %v1216_v22  ;;  %v918_v34 = vld [vmem:[%s995_s11 + $0x1a1] sm:$0xff] }
  0x4d   : > { %v464_v63 = vmax.f32 %v400_v53, %v943_v44  ;;  %v401_v0 = vmax.f32 %v337_v43, %v880_v27  ;;  %v339_v2 = vmax.f32 %v275_v46, %v944_v50  ;;  %v277_v56 = vmax.f32 %v213_v57, %v1222_v28 }
  0x4e   : > { %v591_v4 = vmax.f32 %v527_v58, %v1199_v6  ;;  %v528_v5 = vmax.f32 %v463_v59, %v880_v27  ;;  %v402_v61 = vmax.f32 %v338_v49, %v881_v32  ;;  %v340_v8 = vmax.f32 %v276_v62, %v945_v54 }
  0x4f   : > { %v529_v55 = vmax.f32 %v464_v63, %v881_v32  ;;  %v465_v10 = vmax.f32 %v401_v0, %v944_v50  ;;  %v403_v12 = vmax.f32 %v339_v2, %v882_v39  ;;  %v341_v13 = vmax.f32 %v277_v56, %v946_v60 }
  0x50   : > { %v655_v14 = vmax.f32 %v591_v4, %v943_v44  ;;  %v592_v3 = vmax.f32 %v528_v5, %v1208_v16  ;;  %v466_v17 = vmax.f32 %v402_v61, %v945_v54  ;;  %v404_v19 = vmax.f32 %v340_v8, %v883_v1  ;;  %v886_v16 = vld [vmem:[%s995_s11 + $0x1a0] sm:$0xff] }
  0x51   : > { %v593_v6 = vmax.f32 %v529_v55, %v1216_v22  ;;  %v530_v21 = vmax.f32 %v465_v10, %v882_v39  ;;  %v467_v9 = vmax.f32 %v403_v12, %v946_v60  ;;  %v405_v24 = vmax.f32 %v341_v13, %v884_v7  ;;  %v917_v22 = vld [vmem:[%s995_s11 + $0x199] sm:$0xff]  ;;  %v950_v44 = vld [vmem:[%s995_s11 + $0x1a2] sm:$0xff] }
  0x52   : > { %688 = vst.msk [vmem:[%s1046_s15 + $0xc0] sm:$0xff] %vm663_vm0, %v655_v14  ;;  %v656_v25 = vmax.f32 %v592_v3, %v944_v50  ;;  %v531_v26 = vmax.f32 %v466_v17, %v883_v1  ;;  %v468_v27 = vmax.f32 %v404_v19, %v947_v11 }
  0x53   : > { %v657_v29 = vmax.f32 %v593_v6, %v945_v54  ;;  %v594_v20 = vmax.f32 %v530_v21, %v1222_v28  ;;  %v532_v31 = vmax.f32 %v467_v9, %v884_v7  ;;  %v469_v32 = vmax.f32 %v405_v24, %v948_v18  ;;  %v949_v28 = vld [vmem:[%s995_s11 + $0x19a] sm:$0xff] }
  0x54   : > { %689 = vst.msk [vmem:[%s1046_s15 + $0xc8] sm:$0xff] %vm663_vm0, %v656_v25  ;;  %v595_v33 = vmax.f32 %v531_v26, %v1229_v35  ;;  %v533_v15 = vmax.f32 %v468_v27, %v885_v23 }
  0x55   : > { %690 = vst.msk [vmem:[%s1046_s15 + $0xd0] sm:$0xff] %vm663_vm0, %v657_v29  ;;  %v658_v37 = vmax.f32 %v594_v20, %v946_v60  ;;  %v596_v38 = vmax.f32 %v532_v31, %v1237_v42  ;;  %v534_v39 = vmax.f32 %v469_v32, %v886_v16 }
  0x56   : > { %v659_v41 = vmax.f32 %v595_v33, %v947_v11  ;;  %v597_v30 = vmax.f32 %v533_v15, %v917_v22 }
  0x57   : > { %691 = vst.msk [vmem:[%s1046_s15 + $0xd8] sm:$0xff] %vm663_vm0, %v658_v37  ;;  %v660_v45 = vmax.f32 %v596_v38, %v948_v18  ;;  %v598_v36 = vmax.f32 %v534_v39, %v918_v34 }
  0x58   : > { %692 = vst.msk [vmem:[%s1046_s15 + $0xe0] sm:$0xff] %vm663_vm0, %v659_v41  ;;  %v661_v35 = vmax.f32 %v597_v30, %v949_v28 }
  0x59   : > { %693 = vst.msk [vmem:[%s1046_s15 + $0xe8] sm:$0xff] %vm663_vm0, %v660_v45  ;;  %v662_v47 = vmax.f32 %v598_v36, %v950_v44 }
  0x5a   : > { %694 = vst.msk [vmem:[%s1046_s15 + $0xf0] sm:$0xff] %vm663_vm0, %v661_v35 }
  0x5b   : > { %695 = vst.msk [vmem:[%s1046_s15 + $0xf8] sm:$0xff] %vm663_vm0, %v662_v47 }
  0x5c PF: > { %s11_s6 = sadd.s32 1, %s969_s6  }
  0x5d   : > { %p8_p4 = scmp.ge.s32.totalorder %s11_s6, 4  }
  0x5f   :  { %10 = sbr.rel (!%p8_p4) target bundleno = 1 (0x1), region = 56 }

// kernel: inception_forward.13
= control target key start
LH: loop header
LB: loop body
LE: loop exit
PB: predicated region body
PF: predicated region fallthrough
CT: control target
= control target key end

     0   :  { %s2488_s9 = smov 0   ;;  %s2490_s10 = smov 0   ;;  %s3158_s0 = inlined_call_operand.vmem [shape: f32[7,2,4096], index: 0, kind: input, shape index: {}]   ;;  %s3159_s1 = inlined_call_operand.vmem [shape: f32[7,1,4096], index: 1, kind: input, shape index: {}]   ;;  %s3160_s2 = inlined_call_operand.vmem [shape: f32[7,2], index: 2, kind: output, shape index: {}]  }
   0x1   :  { %s2492_s11 = smov 0  }
   0x2 LB: > { %s2350_s12 = sadd.s32 4294967295, %s2469_s11   ;;  %s2505_s13 = sadd.s32 1, %s2469_s11   ;;  %s2469_s11 = sphi %s2492_s11, %s3164_s11   ;;  %s2465_s10 = sphi %s2490_s10, %s3163_s10   ;;  %s2461_s9 = sphi %s2488_s9, %s3162_s9  }
   0x3   : > { %s16_s14 = ssub.s32 %s2469_s11, %s2505_s13  ;;  %s19_s15 = sadd.s32 1, %s2465_s10 }
   0x4   : > { %p17_p0 = scmp.eq.s32.totalorder %s16_s14, 0  ;;  %p26_p1 = scmp.ne.s32.totalorder %s2465_s10, %s2461_s9 }
   0x5   : > { %p27_p2 = scmp.eq.s32.totalorder %s2469_s11, 0  ;;  %p2352_p4 = scmp.ge.s32.totalorder %s2469_s11, 2 }
   0x6   : > { %s2514_s16 = scalar_select %p17_p0, %s2465_s10, %s19_s15  }
   0x7   : > { %p2516_p3 = por %p27_p2, %p26_p1  ;;  %99 = sbr.rel (%p2352_p4) target bundleno = 44 (0x2c), region = 16 }
   0xe   : > { %102 = sbr.rel (!%p2516_p3) target bundleno = 33 (0x21), region = 20  ;;  %s104_s18 = sand.u32 (%p2516_p3), 1, %s2465_s10  }
   0xf   : > { %s2360_s19 = sshll.u32 (%p2516_p3), %s2469_s11, 5  ;;  %s2361_s20 = smul.u32 (%p2516_p3), 224, %s104_s18 }
  0x10   : > { %s2528_s23 = scalar_lea.vmem (%p2516_p3), %s3158_s0, %s2360_s19 }
  0x11   : > { %v122_v0 = vld [vmem:[%s2528_s23] sm:$0xff] (%p2516_p3)  ;;  %v124_v1 = vld [vmem:[%s2528_s23 + $0x8] sm:$0xff] (%p2516_p3)  ;;  %v126_v2 = vld [vmem:[%s2528_s23 + $0x10] sm:$0xff] (%p2516_p3)  ;;  %s2536_s24 = scalar_lea.vmem (%p2516_p3), [#allocation2], %s2361_s20 }
  0x12   : > { %v128_v3 = vld [vmem:[%s2528_s23 + $0x18] sm:$0xff] (%p2516_p3)  ;;  %v130_v4 = vld [vmem:[%s2528_s23 + $0x40] sm:$0xff] (%p2516_p3)  ;;  %v132_v5 = vld [vmem:[%s2528_s23 + $0x48] sm:$0xff] (%p2516_p3)  ;;  %123 = vst [vmem:[%s2536_s24] sm:$0xff] (%p2516_p3), %v122_v0 }
  0x13   : > { %125 = vst [vmem:[%s2536_s24 + $0x8] sm:$0xff] (%p2516_p3), %v124_v1  ;;  %127 = vst [vmem:[%s2536_s24 + $0x10] sm:$0xff] (%p2516_p3), %v126_v2  ;;  %v134_v6 = vld [vmem:[%s2528_s23 + $0x50] sm:$0xff] (%p2516_p3)  ;;  %v136_v7 = vld [vmem:[%s2528_s23 + $0x58] sm:$0xff] (%p2516_p3) }
  0x14   : > { %129 = vst [vmem:[%s2536_s24 + $0x18] sm:$0xff] (%p2516_p3), %v128_v3  ;;  %131 = vst [vmem:[%s2536_s24 + $0x20] sm:$0xff] (%p2516_p3), %v130_v4  ;;  %v138_v8 = vld [vmem:[%s2528_s23 + $0x80] sm:$0xff] (%p2516_p3)  ;;  %v140_v9 = vld [vmem:[%s2528_s23 + $0x88] sm:$0xff] (%p2516_p3) }
  0x15   : > { %133 = vst [vmem:[%s2536_s24 + $0x28] sm:$0xff] %v132_v5  ;;  %135 = vst [vmem:[%s2536_s24 + $0x30] sm:$0xff] %v134_v6  ;;  %v142_v10 = vld [vmem:[%s2528_s23 + $0x90] sm:$0xff]  ;;  %v144_v11 = vld [vmem:[%s2528_s23 + $0x98] sm:$0xff] }
  0x16   : > { %137 = vst [vmem:[%s2536_s24 + $0x38] sm:$0xff] %v136_v7  ;;  %139 = vst [vmem:[%s2536_s24 + $0x40] sm:$0xff] %v138_v8  ;;  %v146_v12 = vld [vmem:[%s2528_s23 + $0xc0] sm:$0xff]  ;;  %v148_v13 = vld [vmem:[%s2528_s23 + $0xc8] sm:$0xff] }
  0x17   : > { %141 = vst [vmem:[%s2536_s24 + $0x48] sm:$0xff] %v140_v9  ;;  %143 = vst [vmem:[%s2536_s24 + $0x50] sm:$0xff] %v142_v10  ;;  %v150_v14 = vld [vmem:[%s2528_s23 + $0xd0] sm:$0xff]  ;;  %v152_v15 = vld [vmem:[%s2528_s23 + $0xd8] sm:$0xff] }
  0x18   : > { %145 = vst [vmem:[%s2536_s24 + $0x58] sm:$0xff] %v144_v11  ;;  %147 = vst [vmem:[%s2536_s24 + $0x60] sm:$0xff] %v146_v12  ;;  %v154_v16 = vld [vmem:[%s2528_s23 + $0x100] sm:$0xff]  ;;  %v156_v17 = vld [vmem:[%s2528_s23 + $0x108] sm:$0xff] }
  0x19   : > { %149 = vst [vmem:[%s2536_s24 + $0x68] sm:$0xff] %v148_v13  ;;  %151 = vst [vmem:[%s2536_s24 + $0x70] sm:$0xff] %v150_v14  ;;  %v158_v18 = vld [vmem:[%s2528_s23 + $0x110] sm:$0xff]  ;;  %v160_v19 = vld [vmem:[%s2528_s23 + $0x118] sm:$0xff] }
  0x1a   : > { %153 = vst [vmem:[%s2536_s24 + $0x78] sm:$0xff] %v152_v15  ;;  %155 = vst [vmem:[%s2536_s24 + $0x80] sm:$0xff] %v154_v16  ;;  %v162_v20 = vld [vmem:[%s2528_s23 + $0x140] sm:$0xff]  ;;  %v164_v21 = vld [vmem:[%s2528_s23 + $0x148] sm:$0xff] }
  0x1b   : > { %157 = vst [vmem:[%s2536_s24 + $0x88] sm:$0xff] %v156_v17  ;;  %159 = vst [vmem:[%s2536_s24 + $0x90] sm:$0xff] %v158_v18  ;;  %v166_v22 = vld [vmem:[%s2528_s23 + $0x150] sm:$0xff]  ;;  %v168_v23 = vld [vmem:[%s2528_s23 + $0x158] sm:$0xff] }
  0x1c   : > { %161 = vst [vmem:[%s2536_s24 + $0x98] sm:$0xff] %v160_v19  ;;  %163 = vst [vmem:[%s2536_s24 + $0xa0] sm:$0xff] %v162_v20  ;;  %v170_v24 = vld [vmem:[%s2528_s23 + $0x180] sm:$0xff]  ;;  %v172_v25 = vld [vmem:[%s2528_s23 + $0x188] sm:$0xff] }
  0x1d   : > { %165 = vst [vmem:[%s2536_s24 + $0xa8] sm:$0xff] %v164_v21  ;;  %167 = vst [vmem:[%s2536_s24 + $0xb0] sm:$0xff] %v166_v22  ;;  %v174_v26 = vld [vmem:[%s2528_s23 + $0x190] sm:$0xff]  ;;  %v176_v27 = vld [vmem:[%s2528_s23 + $0x198] sm:$0xff] }
  0x1e   : > { %169 = vst [vmem:[%s2536_s24 + $0xb8] sm:$0xff] %v168_v23  ;;  %171 = vst [vmem:[%s2536_s24 + $0xc0] sm:$0xff] %v170_v24 }
  0x1f   : > { %173 = vst [vmem:[%s2536_s24 + $0xc8] sm:$0xff] %v172_v25  ;;  %175 = vst [vmem:[%s2536_s24 + $0xd0] sm:$0xff] %v174_v26 }
  0x20   : > { %177 = vst [vmem:[%s2536_s24 + $0xd8] sm:$0xff] %v176_v27 }
  0x21 PF: > { %183 = sbr.rel (!%p2516_p3) target bundleno = 44 (0x2c), region = 43  ;;  %s185_s25 = sand.u32 (%p2516_p3), 1, %s2465_s10  }
  0x22   : > { %s2355_s26 = sshll.u32 (%p2516_p3), %s2469_s11, 4  ;;  %s2362_s27 = smul.u32 (%p2516_p3), 112, %s185_s25 }
  0x23   : > { %s189_s30 = scalar_lea.vmem (%p2516_p3), %s3159_s1, %s2355_s26 }
  0x24   : > { %v202_v28 = vld [vmem:[%s189_s30] sm:$0xff] (%p2516_p3)  ;;  %v204_v29 = vld [vmem:[%s189_s30 + $0x8] sm:$0xff] (%p2516_p3)  ;;  %s187_s3 = scalar_lea.vmem (%p2516_p3), [#allocation3], %s2362_s27 }
  0x25   : > { %v206_v30 = vld [vmem:[%s189_s30 + $0x20] sm:$0xff] (%p2516_p3)  ;;  %v208_v31 = vld [vmem:[%s189_s30 + $0x28] sm:$0xff] (%p2516_p3)  ;;  %203 = vst [vmem:[%s187_s3] sm:$0xff] (%p2516_p3), %v202_v28  ;;  %205 = vst [vmem:[%s187_s3 + $0x8] sm:$0xff] (%p2516_p3), %v204_v29 }
  0x26   : > { %v210_v32 = vld [vmem:[%s189_s30 + $0x40] sm:$0xff] (%p2516_p3)  ;;  %v212_v33 = vld [vmem:[%s189_s30 + $0x48] sm:$0xff] (%p2516_p3)  ;;  %207 = vst [vmem:[%s187_s3 + $0x10] sm:$0xff] (%p2516_p3), %v206_v30  ;;  %209 = vst [vmem:[%s187_s3 + $0x18] sm:$0xff] (%p2516_p3), %v208_v31 }
  0x27   : > { %211 = vst [vmem:[%s187_s3 + $0x20] sm:$0xff] (%p2516_p3), %v210_v32  ;;  %213 = vst [vmem:[%s187_s3 + $0x28] sm:$0xff] (%p2516_p3), %v212_v33  ;;  %v214_v34 = vld [vmem:[%s189_s30 + $0x60] sm:$0xff] (%p2516_p3)  ;;  %v216_v35 = vld [vmem:[%s189_s30 + $0x68] sm:$0xff] (%p2516_p3) }
  0x28   : > { %v218_v36 = vld [vmem:[%s189_s30 + $0x80] sm:$0xff]  ;;  %215 = vst [vmem:[%s187_s3 + $0x30] sm:$0xff] %v214_v34  ;;  %217 = vst [vmem:[%s187_s3 + $0x38] sm:$0xff] %v216_v35  ;;  %v220_v37 = vld [vmem:[%s189_s30 + $0x88] sm:$0xff] }
  0x29   : > { %219 = vst [vmem:[%s187_s3 + $0x40] sm:$0xff] %v218_v36  ;;  %v222_v38 = vld [vmem:[%s189_s30 + $0xa0] sm:$0xff]  ;;  %v224_v39 = vld [vmem:[%s189_s30 + $0xa8] sm:$0xff]  ;;  %221 = vst [vmem:[%s187_s3 + $0x48] sm:$0xff] %v220_v37 }
  0x2a   : > { %223 = vst [vmem:[%s187_s3 + $0x50] sm:$0xff] %v222_v38  ;;  %225 = vst [vmem:[%s187_s3 + $0x58] sm:$0xff] %v224_v39  ;;  %v226_v40 = vld [vmem:[%s189_s30 + $0xc0] sm:$0xff]  ;;  %v228_v41 = vld [vmem:[%s189_s30 + $0xc8] sm:$0xff] }
  0x2b   : > { %227 = vst [vmem:[%s187_s3 + $0x60] sm:$0xff] %v226_v40  ;;  %229 = vst [vmem:[%s187_s3 + $0x68] sm:$0xff] %v228_v41 }
  0x2c PF: > { %p2356_p5 = scmp.ge.s32.totalorder %s2469_s11, 1  ;;  %p234_p6 = scmp.lt.s32.totalorder %s2469_s11, 3 }
  0x2e   : > { %p235_p7 = pnand %p2356_p5, %p234_p6 }
  0x2f   : > { %s241_s4 = sand.u32 (!%p235_p7), 1, %s2461_s9   ;;  %p2357_p8 = scmp.ne.s32.totalorder (!%p235_p7), %s2350_s12, 0 }
  0x30   : > { %238 = sbr.rel (%p235_p7) target bundleno = 413 (0x19d), region = 66 }
  0x31   : > { %s2363_s5 = smul.u32 (!%p235_p7), 224, %s241_s4 }
  0x32   : > { %s2364_s6 = smul.u32 (!%p235_p7), 112, %s241_s4 }
  0x33   : > { %s2598_s7 = scalar_lea.vmem (!%p235_p7), [#allocation2], %s2363_s5 }
  0x34   : > { %s2600_s8 = scalar_lea.vmem (!%p235_p7), [#allocation3], %s2364_s6 }
  0x37   : > { %273 = sbr.rel (%p2357_p8) target bundleno = 62 (0x3e), region = 78  ;;  %vm274_vm0 = vcmask (!%p2357_p8), 14336   ;;  %v2471_v42 = vmov (!%p2357_p8), 0.0  }
  0x38   : > { %275 = vst.msk [vmem:[%s3160_s2] sm:$0x7f] (!%p2357_p8), %vm274_vm0, %v2471_v42 }
  0x3e PF: > { %v276_v43 = vld [vmem:[%s2598_s7] sm:$0xff]  ;;  %v277_v44 = vld [vmem:[%s2598_s7 + $0x8] sm:$0xff]  ;;  %v278_v45 = vld [vmem:[%s2598_s7 + $0x10] sm:$0xff]  ;;  %v417_v46 = vlaneseq  ;;  %v2472_v51 = vmov 1983009808   ;;  %vm2013_vm1 = vcmask 1041408  }
  0x3f   : > { %v279_v47 = vld [vmem:[%s2598_s7 + $0x18] sm:$0xff]  ;;  %v304_v48 = vmul.f32 15.0, %v276_v43  ;;  %v305_v49 = vmul.f32 15.0, %v277_v44  ;;  %v306_v50 = vmul.f32 15.0, %v278_v45  ;;  %v868_v52 = vunpack.c.l.s4 %v2472_v51  ;;  %v284_v55 = vld [vmem:[%s2598_s7 + $0x40] sm:$0xff]  ;;  %v285_v56 = vld [vmem:[%s2598_s7 + $0x48] sm:$0xff] }
  0x40   : > { %v307_v53 = vmul.f32 15.0, %v279_v47  ;;  %v2612_v54 = vshrl.u32 %v417_v46, 7  ;;  %v389_v57 = vld [vmem:[%s2600_s8] sm:$0xff]  ;;  %v312_v59 = vmul.f32 15.0, %v284_v55  ;;  %v2617_v60 = vmul.f32 15.0, %v285_v56  ;;  %v390_v0 = vld [vmem:[%s2600_s8 + $0x8] sm:$0xff] }
  0x41   : > { %2391 = vtanh.f32 %v304_v48  ;;  %v869_v58 = vunpack.c.0.s8 %v868_v52  ;;  %v286_v31 = vld [vmem:[%s2598_s7 + $0x50] sm:$0xff]  ;;  %vm2282_vm2 = vcmask 1041409   ;;  %vm2284_vm3 = vcmask 1042434  }
  0x42   : > { %2393 = vtanh.f32 %v305_v49  ;;  %v2620_v61 = vsub.s32 0, %v2612_v54  ;;  %v2623_v62 = vsub.s32 1, %v2612_v54  ;;  %v2626_v63 = vsub.s32 2, %v2612_v54 }
  0x43   : > { %2395 = vtanh.f32 %v306_v50  ;;  %v2630_v1 = vsub.s32 3, %v2612_v54  ;;  %v2633_v2 = vsub.s32 4, %v2612_v54  ;;  %v2636_v3 = vsub.s32 5, %v2612_v54 }
  0x44   : > { %2397 = vtanh.f32 %v307_v53  ;;  %v420_v4 = vrot.slane %v389_v57, %v2620_v61  ;;  %v424_v5 = vrot.slane %v389_v57, %v2623_v62  ;;  %v428_v6 = vrot.slane %v389_v57, %v2626_v63 }
  0x45   : > { %v432_v7 = vrot.slane %v389_v57, %v2630_v1  ;;  %v436_v8 = vrot.slane %v389_v57, %v2633_v2  ;;  %v440_v9 = vrot.slane %v389_v57, %v2636_v3  ;;  %v2645_v10 = vsub.s32 6, %v2612_v54 }
  0x46   : > { %v2648_v11 = vsub.s32 7, %v2612_v54  ;;  %v452_v12 = vrot.slane %v390_v0, %v2620_v61  ;;  %v456_v13 = vrot.slane %v390_v0, %v2623_v62  ;;  %v460_v14 = vrot.slane %v390_v0, %v2626_v63 }
  0x47   : > { %v444_v15 = vrot.slane %v389_v57, %v2645_v10  ;;  %v464_v16 = vrot.slane %v390_v0, %v2630_v1  ;;  %v468_v17 = vrot.slane %v390_v0, %v2633_v2  ;;  %v472_v18 = vrot.slane %v390_v0, %v2636_v3 }
  0x48   : > { %v448_v19 = vrot.slane %v389_v57, %v2648_v11  ;;  %v476_v20 = vrot.slane %v390_v0, %v2645_v10  ;;  %v480_v21 = vrot.slane %v390_v0, %v2648_v11  ;;  %v865_v22 = vcombine.low %v420_v4, %v424_v5 }
  0x49   : > { %v866_v23 = vcombine.low %v428_v6, %v432_v7  ;;  %v2661_v24 = vsub.s32 %v869_v58, %v2612_v54  ;;  %v882_v25 = vcombine.low %v436_v8, %v440_v9  ;;  %v899_v26 = vcombine.low %v452_v12, %v456_v13 }
  0x4a   : > { %v883_v27 = vcombine.low %v444_v15, %v448_v19  ;;  %v900_v28 = vcombine.low %v460_v14, %v464_v16  ;;  %v916_v29 = vcombine.low %v468_v17, %v472_v18  ;;  %v917_v30 = vcombine.low %v476_v20, %v480_v21  ;;  %v287_v15 = vld [vmem:[%s2598_s7 + $0x58] sm:$0xff]  ;;  %v393_v20 = vld [vmem:[%s2600_s8 + $0x20] sm:$0xff] }
  0x4b   : > { %v2392_v32 = vpop.eup %2391  ;;  %v873_v33 = vrot.slane %v865_v22, %v2661_v24  ;;  %v880_v34 = vrot.slane %v866_v23, %v2661_v24  ;;  %v890_v35 = vrot.slane %v882_v25, %v2661_v24  ;;  %v907_v36 = vrot.slane %v899_v26, %v2661_v24 }
  0x4c   : > { %v2394_v37 = vpop.eup %2393  ;;  %v361_v38 = vmul.f32 %v2392_v32, %v2392_v32  ;;  %v897_v39 = vrot.slane %v883_v27, %v2661_v24  ;;  %v914_v40 = vrot.slane %v900_v28, %v2661_v24  ;;  %v924_v41 = vrot.slane %v916_v29, %v2661_v24 }
  0x4d   : > { %v2396_v42 = vpop.eup %2395  ;;  %v362_v43 = vmul.f32 %v2394_v37, %v2394_v37  ;;  %v881_v44 = vcombine.low %v873_v33, %v880_v34  ;;  %v931_v45 = vrot.slane %v917_v30, %v2661_v24  ;;  %v314_v47 = vmul.f32 15.0, %v286_v31 }
  0x4e   : > { %v2398_v48 = vpop.eup %2397  ;;  %v363_v49 = vmul.f32 %v2396_v42, %v2396_v42  ;;  %v898_v50 = vcombine.low %v890_v35, %v897_v39  ;;  %v915_v51 = vcombine.low %v907_v36, %v914_v40  ;;  %2399 = vtanh.f32 %v312_v59 }
  0x4f   : > { %v364_v52 = vmul.f32 %v2398_v48, %v2398_v48  ;;  %v932_v53 = vcombine.low %v924_v41, %v931_v45  ;;  %v1369_v55 = vmul.f32 %v881_v44, %v361_v38  ;;  %2401 = vtanh.f32 %v2617_v60 }
  0x50   : > { %v1370_v56 = vmul.f32 %v898_v50, %v362_v43  ;;  %v1371_v57 = vmul.f32 %v915_v51, %v363_v49  ;;  %2403 = vtanh.f32 %v314_v47  ;;  %v315_v27 = vmul.f32 15.0, %v287_v15  ;;  %v394_v47 = vld [vmem:[%s2600_s8 + $0x28] sm:$0xff] }
  0x51   : > { %v1372_v58 = vmul.f32 %v932_v53, %v364_v52  ;;  %v1425_v0 = vcombine.high %v1369_v55, %v1369_v55  ;;  %v1432_v4 = vrot.slane %v1369_v55, %v2661_v24  ;;  %v548_v31 = vrot.slane %v393_v20, %v2620_v61 }
  0x52   : > { %v1442_v5 = vcombine.high %v1370_v56, %v1370_v56  ;;  %v1449_v6 = vrot.slane %v1370_v56, %v2661_v24  ;;  %v1459_v7 = vcombine.high %v1371_v57, %v1371_v57  ;;  %v1466_v8 = vrot.slane %v1371_v57, %v2661_v24 }
  0x53   : > { %v1439_v59 = vrot.slane %v1425_v0, %v2661_v24  ;;  %v1440_v9 = vcombine.high %v1432_v4, %v1432_v4  ;;  %v1476_v12 = vcombine.high %v1372_v58, %v1372_v58  ;;  %v2682_v14 = vrot.slane %v1372_v58, %v2661_v24 }
  0x54   : > { %v1456_v13 = vrot.slane %v1442_v5, %v2661_v24  ;;  %v2679_v60 = vrot.slane %v1459_v7, %v2661_v24  ;;  %v1457_v17 = vcombine.high %v1449_v6, %v1449_v6  ;;  %v2014_v19 = vsel %vm2013_vm1, %v1432_v4, 0.0 }
  0x55   : > { %v1441_v16 = vcombine.high %v1439_v59, %v1439_v59  ;;  %v2686_v18 = vrot.slane %v1476_v12, %v2661_v24  ;;  %v1474_v22 = vcombine.high %v1466_v8, %v1466_v8  ;;  %v2015_v23 = vsel %vm2013_vm1, %v1440_v9, 0.0 }
  0x56   : > { %v1458_v21 = vcombine.high %v1456_v13, %v1456_v13  ;;  %v2017_v25 = vsel %vm2013_vm1, %v1439_v59, 0.0  ;;  %v2016_v26 = vadd.f32 %v2015_v23, %v2014_v19  ;;  %v1475_v28 = vcombine.high %v2679_v60, %v2679_v60 }
  0x57   : > { %v1491_v29 = vcombine.high %v2682_v14, %v2682_v14  ;;  %v2019_v30 = vsel %vm2013_vm1, %v1441_v16, 0.0  ;;  %v1492_v33 = vcombine.high %v2686_v18, %v2686_v18  ;;  %v2021_v35 = vsel %vm2013_vm1, %v1449_v6, 0.0 }
  0x58   : > { %v2400_v32 = vpop.eup %2399  ;;  %v2018_v34 = vadd.f32 %v2017_v25, %v2016_v26  ;;  %v2023_v36 = vsel %vm2013_vm1, %v1457_v17, 0.0  ;;  %v2025_v38 = vsel %vm2013_vm1, %v1456_v13, 0.0  ;;  %v2027_v39 = vsel %vm2013_vm1, %v1458_v21, 0.0  ;;  %v280_v25 = vld [vmem:[%s2598_s7 + $0x20] sm:$0xff] }
  0x59   : > { %v2402_v37 = vpop.eup %2401  ;;  %v2029_v40 = vsel %vm2013_vm1, %v1466_v8, 0.0  ;;  %v2031_v41 = vsel %vm2013_vm1, %v1474_v22, 0.0  ;;  %2405 = vtanh.f32 %v315_v27  ;;  %v369_v44 = vmul.f32 %v2400_v32, %v2400_v32 }
  0x5a   : > { %v2404_v42 = vpop.eup %2403  ;;  %v2020_v43 = vadd.f32 %v2019_v30, %v2018_v34  ;;  %v370_v45 = vmul.f32 %v2402_v37, %v2402_v37  ;;  %v552_v49 = vrot.slane %v393_v20, %v2623_v62  ;;  %v556_v50 = vrot.slane %v393_v20, %v2626_v63 }
  0x5b   : > { %v371_v48 = vmul.f32 %v2404_v42, %v2404_v42  ;;  %v560_v51 = vrot.slane %v393_v20, %v2630_v1  ;;  %v564_v53 = vrot.slane %v393_v20, %v2633_v2  ;;  %v568_v55 = vrot.slane %v393_v20, %v2636_v3 }
  0x5c   : > { %v2022_v52 = vadd.f32 %v2021_v35, %v2020_v43  ;;  %v572_v56 = vrot.slane %v393_v20, %v2645_v10  ;;  %v576_v57 = vrot.slane %v393_v20, %v2648_v11  ;;  %v580_v58 = vrot.slane %v394_v47, %v2620_v61 }
  0x5d   : > { %v584_v0 = vrot.slane %v394_v47, %v2623_v62  ;;  %v588_v4 = vrot.slane %v394_v47, %v2626_v63  ;;  %v592_v6 = vrot.slane %v394_v47, %v2630_v1  ;;  %v596_v7 = vrot.slane %v394_v47, %v2633_v2 }
  0x5e   : > { %v2024_v5 = vadd.f32 %v2023_v36, %v2022_v52  ;;  %v600_v8 = vrot.slane %v394_v47, %v2636_v3  ;;  %v604_v59 = vrot.slane %v394_v47, %v2645_v10  ;;  %v608_v9 = vrot.slane %v394_v47, %v2648_v11 }
  0x5f   : > { %v1001_v12 = vcombine.low %v548_v31, %v552_v49  ;;  %v1002_v13 = vcombine.low %v556_v50, %v560_v51  ;;  %v1018_v16 = vcombine.low %v564_v53, %v568_v55  ;;  %v1019_v17 = vcombine.low %v572_v56, %v576_v57 }
  0x60   : > { %v2026_v15 = vadd.f32 %v2025_v38, %v2024_v5  ;;  %v1035_v19 = vcombine.low %v580_v58, %v584_v0  ;;  %v1036_v22 = vcombine.low %v588_v4, %v592_v6  ;;  %v1052_v23 = vcombine.low %v596_v7, %v600_v8 }
  0x61   : > { %v1009_v20 = vrot.slane %v1001_v12, %v2661_v24  ;;  %v1016_v21 = vrot.slane %v1002_v13, %v2661_v24  ;;  %v1026_v27 = vrot.slane %v1018_v16, %v2661_v24  ;;  %v1033_v30 = vrot.slane %v1019_v17, %v2661_v24 }
  0x62   : > { %v2028_v26 = vadd.f32 %v2027_v39, %v2026_v15  ;;  %v1043_v32 = vrot.slane %v1035_v19, %v2661_v24  ;;  %v1050_v34 = vrot.slane %v1036_v22, %v2661_v24  ;;  %v1053_v35 = vcombine.low %v604_v59, %v608_v9  ;;  %v281_v59 = vld [vmem:[%s2598_s7 + $0x28] sm:$0xff]  ;;  %v282_v19 = vld [vmem:[%s2598_s7 + $0x30] sm:$0xff] }
  0x63   : > { %v1017_v31 = vcombine.low %v1009_v20, %v1016_v21  ;;  %v1060_v36 = vrot.slane %v1052_v23, %v2661_v24  ;;  %v2406_v37 = vpop.eup %2405  ;;  %v2033_v42 = vsel %vm2013_vm1, %v2679_v60, 0.0  ;;  %v1034_v43 = vcombine.low %v1026_v27, %v1033_v30  ;;  %v283_v20 = vld [vmem:[%s2598_s7 + $0x38] sm:$0xff] }
  0x64   : > { %v2030_v38 = vadd.f32 %v2029_v40, %v2028_v26  ;;  %v308_v47 = vmul.f32 15.0, %v280_v25  ;;  %v372_v39 = vmul.f32 %v2406_v37, %v2406_v37  ;;  %v1051_v49 = vcombine.low %v1043_v32, %v1050_v34 }
  0x65   : > { %v1067_v50 = vrot.slane %v1053_v35, %v2661_v24  ;;  %v1377_v51 = vmul.f32 %v1017_v31, %v369_v44  ;;  %v2035_v53 = vsel %vm2013_vm1, %v1475_v28, 0.0  ;;  %v2037_v55 = vsel %vm2013_vm1, %v2682_v14, 0.0 }
  0x66   : > { %v2032_v52 = vadd.f32 %v2031_v41, %v2030_v38  ;;  %v1378_v40 = vmul.f32 %v1034_v43, %v370_v45  ;;  %v1379_v57 = vmul.f32 %v1051_v49, %v371_v48  ;;  %2407 = vtanh.f32 %v308_v47 }
  0x67   : > { %v1068_v56 = vcombine.low %v1060_v36, %v1067_v50  ;;  %v1561_v58 = vcombine.high %v1377_v51, %v1377_v51  ;;  %v1568_v0 = vrot.slane %v1377_v51, %v2661_v24  ;;  %v2039_v45 = vsel %vm2013_vm1, %v1491_v29, 0.0 }
  0x68   : > { %v2034_v4 = vadd.f32 %v2033_v42, %v2032_v52  ;;  %v1578_v5 = vcombine.high %v1378_v40, %v1378_v40  ;;  %v1585_v44 = vrot.slane %v1378_v40, %v2661_v24  ;;  %v1595_v6 = vcombine.high %v1379_v57, %v1379_v57  ;;  %v391_v42 = vld [vmem:[%s2600_s8 + $0x10] sm:$0xff] }
  0x69   : > { %v1380_v41 = vmul.f32 %v1068_v56, %v372_v39  ;;  %v1575_v60 = vrot.slane %v1561_v58, %v2661_v24  ;;  %v1576_v28 = vcombine.high %v1568_v0, %v1568_v0  ;;  %v2041_v48 = vsel %vm2013_vm1, %v2686_v18, 0.0 }
  0x6a   : > { %v2036_v7 = vadd.f32 %v2035_v53, %v2034_v4  ;;  %v1592_v8 = vrot.slane %v1578_v5, %v2661_v24  ;;  %v2043_v9 = vsel %vm2013_vm1, %v1492_v33, 0.0  ;;  %v1602_v13 = vrot.slane %v1379_v57, %v2661_v24  ;;  %v392_v57 = vld [vmem:[%s2600_s8 + $0x18] sm:$0xff] }
  0x6b   : > { %v1577_v12 = vcombine.high %v1575_v60, %v1575_v60  ;;  %v1612_v15 = vcombine.high %v1380_v41, %v1380_v41  ;;  %v2756_v14 = vrot.slane %v1595_v6, %v2661_v24  ;;  %v2759_v29 = vrot.slane %v1380_v41, %v2661_v24 }
  0x6c   : > { %v2038_v16 = vadd.f32 %v2037_v55, %v2036_v7  ;;  %v2080_v17 = vsel %vm2013_vm1, %v1568_v0, 0.0  ;;  %v1593_v21 = vcombine.high %v1585_v44, %v1585_v44  ;;  %v2081_v33 = vsel %vm2013_vm1, %v1576_v28, 0.0 }
  0x6d   : > { %v2765_v18 = vrot.slane %v1612_v15, %v2661_v24  ;;  %v309_v22 = vmul.f32 15.0, %v281_v59  ;;  %v1594_v25 = vcombine.high %v1592_v8, %v1592_v8  ;;  %v2082_v26 = vadd.f32 %v2081_v33, %v2080_v17 }
  0x6e   : > { %v2040_v23 = vadd.f32 %v2039_v45, %v2038_v16  ;;  %v2083_v27 = vsel %vm2013_vm1, %v1575_v60, 0.0  ;;  %v1610_v30 = vcombine.high %v1602_v13, %v1602_v13  ;;  %v2085_v32 = vsel %vm2013_vm1, %v1577_v12, 0.0 }
  0x6f   : > { %v310_v31 = vmul.f32 15.0, %v282_v19  ;;  %v311_v34 = vmul.f32 15.0, %v283_v20  ;;  %v1611_v36 = vcombine.high %v2756_v14, %v2756_v14  ;;  %v1627_v37 = vcombine.high %v2759_v29, %v2759_v29 }
  0x70   : > { %v2042_v35 = vadd.f32 %v2041_v48, %v2040_v23  ;;  %v2084_v38 = vadd.f32 %v2083_v27, %v2082_v26  ;;  %v1628_v43 = vcombine.high %v2765_v18, %v2765_v18  ;;  %v2087_v47 = vsel %vm2013_vm1, %v1585_v44, 0.0  ;;  %v2408_v50 = vpop.eup %2407 }
  0x71   : > { %v2089_v39 = vsel %vm2013_vm1, %v1593_v21, 0.0  ;;  %v2091_v49 = vsel %vm2013_vm1, %v1592_v8, 0.0  ;;  %v2093_v53 = vsel %vm2013_vm1, %v1594_v25, 0.0  ;;  %v2095_v55 = vsel %vm2013_vm1, %v1602_v13, 0.0 }
  0x72   : > { %v2044_v51 = vadd.f32 %v2043_v9, %v2042_v35  ;;  %v2086_v52 = vadd.f32 %v2085_v32, %v2084_v38  ;;  %v2097_v40 = vsel %vm2013_vm1, %v1610_v30, 0.0  ;;  %2409 = vtanh.f32 %v309_v22 }
  0x73   : > { %v365_v56 = vmul.f32 %v2408_v50, %v2408_v50  ;;  %v484_v58 = vrot.slane %v391_v42, %v2620_v61  ;;  %2411 = vtanh.f32 %v310_v31  ;;  %v488_v4 = vrot.slane %v391_v42, %v2623_v62 }
  0x74   : > { %2045 = vadd.xlane.f32.xlu0 %v2044_v51  ;;  %v2088_v0 = vadd.f32 %v2087_v47, %v2086_v52  ;;  %v492_v5 = vrot.slane %v391_v42, %v2626_v63  ;;  %2413 = vtanh.f32 %v311_v34  ;;  %v496_v44 = vrot.slane %v391_v42, %v2630_v1 }
  0x75   : > { %v500_v41 = vrot.slane %v391_v42, %v2633_v2  ;;  %v504_v60 = vrot.slane %v391_v42, %v2636_v3  ;;  %v508_v6 = vrot.slane %v391_v42, %v2645_v10  ;;  %v512_v7 = vrot.slane %v391_v42, %v2648_v11 }
  0x76   : > { %v2090_v28 = vadd.f32 %v2089_v39, %v2088_v0  ;;  %v516_v45 = vrot.slane %v392_v57, %v2620_v61  ;;  %v520_v48 = vrot.slane %v392_v57, %v2623_v62  ;;  %v524_v8 = vrot.slane %v392_v57, %v2626_v63 }
  0x77   : > { %v528_v59 = vrot.slane %v392_v57, %v2630_v1  ;;  %v532_v9 = vrot.slane %v392_v57, %v2633_v2  ;;  %v536_v13 = vrot.slane %v392_v57, %v2636_v3  ;;  %v540_v15 = vrot.slane %v392_v57, %v2645_v10 }
  0x78   : > { %v2092_v12 = vadd.f32 %v2091_v49, %v2090_v28  ;;  %v544_v16 = vrot.slane %v392_v57, %v2648_v11  ;;  %v933_v17 = vcombine.low %v484_v58, %v488_v4  ;;  %v934_v19 = vcombine.low %v492_v5, %v496_v44 }
  0x79   : > { %v950_v20 = vcombine.low %v500_v41, %v504_v60  ;;  %v951_v21 = vcombine.low %v508_v6, %v512_v7  ;;  %v967_v22 = vcombine.low %v516_v45, %v520_v48  ;;  %v968_v23 = vcombine.low %v524_v8, %v528_v59  ;;  %v288_v59 = vld [vmem:[%s2598_s7 + $0x60] sm:$0xff] }
  0x7a   : > { %v2094_v33 = vadd.f32 %v2093_v53, %v2092_v12  ;;  %v984_v25 = vcombine.low %v532_v9, %v536_v13  ;;  %v941_v26 = vrot.slane %v933_v17, %v2661_v24  ;;  %v948_v27 = vrot.slane %v934_v19, %v2661_v24 }
  0x7b   : > { %v958_v30 = vrot.slane %v950_v20, %v2661_v24  ;;  %v965_v32 = vrot.slane %v951_v21, %v2661_v24  ;;  %v975_v34 = vrot.slane %v967_v22, %v2661_v24  ;;  %v982_v35 = vrot.slane %v968_v23, %v2661_v24  ;;  %v290_v22 = vld [vmem:[%s2598_s7 + $0x70] sm:$0xff] }
  0x7c   : > { %v2096_v31 = vadd.f32 %v2095_v55, %v2094_v33  ;;  %v985_v38 = vcombine.low %v540_v15, %v544_v16  ;;  %v2410_v42 = vpop.eup %2409  ;;  %v2099_v47 = vsel %vm2013_vm1, %v2756_v14, 0.0  ;;  %v949_v39 = vcombine.low %v941_v26, %v948_v27 }
  0x7d   : > { %v966_v49 = vcombine.low %v958_v30, %v965_v32  ;;  %v992_v50 = vrot.slane %v984_v25, %v2661_v24  ;;  %v2412_v51 = vpop.eup %2411  ;;  %v366_v53 = vmul.f32 %v2410_v42, %v2410_v42  ;;  %v983_v57 = vcombine.low %v975_v34, %v982_v35 }
  0x7e   : > { %v2098_v52 = vadd.f32 %v2097_v40, %v2096_v31  ;;  %v999_v58 = vrot.slane %v985_v38, %v2661_v24  ;;  %v2414_v55 = vpop.eup %2413  ;;  %v2101_v0 = vsel %vm2013_vm1, %v1611_v36, 0.0  ;;  %v2103_v4 = vsel %vm2013_vm1, %v2759_v29, 0.0 }
  0x7f   : > { %v367_v5 = vmul.f32 %v2412_v51, %v2412_v51  ;;  %v1373_v44 = vmul.f32 %v949_v39, %v365_v56  ;;  %v368_v60 = vmul.f32 %v2414_v55, %v2414_v55  ;;  %v1374_v28 = vmul.f32 %v966_v49, %v366_v53  ;;  %v395_v55 = vld [vmem:[%s2600_s8 + $0x30] sm:$0xff] }
  0x80   : > { %v2100_v41 = vadd.f32 %v2099_v47, %v2098_v52  ;;  %v1000_v40 = vcombine.low %v992_v50, %v999_v58  ;;  %v2105_v6 = vsel %vm2013_vm1, %v1627_v37, 0.0  ;;  %v2107_v48 = vsel %vm2013_vm1, %v2765_v18, 0.0  ;;  %v289_v37 = vld [vmem:[%s2598_s7 + $0x68] sm:$0xff]  ;;  %v291_v18 = vld [vmem:[%s2598_s7 + $0x78] sm:$0xff] }
  0x81   : > { %v1375_v7 = vmul.f32 %v983_v57, %v367_v5  ;;  %v1493_v14 = vcombine.high %v1373_v44, %v1373_v44  ;;  %v1500_v36 = vrot.slane %v1373_v44, %v2661_v24  ;;  %v1510_v8 = vcombine.high %v1374_v28, %v1374_v28 }
  0x82   : > { %v2102_v45 = vadd.f32 %v2101_v0, %v2100_v41  ;;  %v1376_v56 = vmul.f32 %v1000_v40, %v368_v60  ;;  %v1517_v29 = vrot.slane %v1374_v28, %v2661_v24  ;;  %v2109_v16 = vsel %vm2013_vm1, %v1628_v43, 0.0  ;;  %v396_v28 = vld [vmem:[%s2600_s8 + $0x38] sm:$0xff] }
  0x83   : > { %v1507_v9 = vrot.slane %v1493_v14, %v2661_v24  ;;  %v1508_v12 = vcombine.high %v1500_v36, %v1500_v36  ;;  %v1527_v13 = vcombine.high %v1375_v7, %v1375_v7  ;;  %v1524_v17 = vrot.slane %v1510_v8, %v2661_v24 }
  0x84   : > { %v2104_v15 = vadd.f32 %v2103_v4, %v2102_v45  ;;  %v1534_v19 = vrot.slane %v1375_v7, %v2661_v24  ;;  %v1544_v33 = vcombine.high %v1376_v56, %v1376_v56  ;;  %v316_v23 = vmul.f32 15.0, %v288_v59 }
  0x85   : > { %v1509_v20 = vcombine.high %v1507_v9, %v1507_v9  ;;  %v2834_v21 = vrot.slane %v1527_v13, %v2661_v24  ;;  %v2838_v26 = vrot.slane %v1376_v56, %v2661_v24  ;;  %v2047_v27 = vsel %vm2013_vm1, %v1500_v36, 0.0 }
  0x86   : > { %v2106_v25 = vadd.f32 %v2105_v6, %v2104_v15  ;;  %v317_v30 = vmul.f32 15.0, %v289_v37  ;;  %v1525_v43 = vcombine.high %v1517_v29, %v1517_v29  ;;  %v1526_v32 = vcombine.high %v1524_v17, %v1524_v17 }
  0x87   : > { %v2048_v31 = vsel %vm2013_vm1, %v1508_v12, 0.0  ;;  %v2050_v34 = vsel %vm2013_vm1, %v1507_v9, 0.0  ;;  %v1542_v38 = vcombine.high %v1534_v19, %v1534_v19  ;;  %v318_v47 = vmul.f32 15.0, %v290_v22 }
  0x88   : > { %v2108_v35 = vadd.f32 %v2107_v48, %v2106_v25  ;;  %v2049_v42 = vadd.f32 %v2048_v31, %v2047_v27  ;;  %v1543_v39 = vcombine.high %v2834_v21, %v2834_v21  ;;  %v2847_v49 = vrot.slane %v1544_v33, %v2661_v24 }
  0x89   : > { %v2052_v50 = vsel %vm2013_vm1, %v1509_v20, 0.0  ;;  %v319_v51 = vmul.f32 15.0, %v291_v18  ;;  %v1559_v53 = vcombine.high %v2838_v26, %v2838_v26  ;;  %v2054_v58 = vsel %vm2013_vm1, %v1517_v29, 0.0 }
  0x8a   : > { %v2110_v52 = vadd.f32 %v2109_v16, %v2108_v35  ;;  %v2051_v57 = vadd.f32 %v2050_v34, %v2049_v42  ;;  %v2056_v0 = vsel %vm2013_vm1, %v1525_v43, 0.0  ;;  %v2058_v4 = vsel %vm2013_vm1, %v1524_v17, 0.0  ;;  %v292_v34 = vld [vmem:[%s2598_s7 + $0x80] sm:$0xff] }
  0x8b   : > { %v2060_v5 = vsel %vm2013_vm1, %v1526_v32, 0.0  ;;  %v2062_v44 = vsel %vm2013_vm1, %v1534_v19, 0.0  ;;  %v2064_v60 = vsel %vm2013_vm1, %v1542_v38, 0.0  ;;  %v2066_v40 = vsel %vm2013_vm1, %v2834_v21, 0.0 }
  0x8c   : > { %2111 = vadd.xlane.f32.xlu1 %v2110_v52  ;;  %v2053_v41 = vadd.f32 %v2052_v50, %v2051_v57  ;;  %2415 = vtanh.f32 %v316_v23  ;;  %v612_v6 = vrot.slane %v395_v55, %v2620_v61  ;;  %v616_v7 = vrot.slane %v395_v55, %v2623_v62 }
  0x8d   : > { %2417 = vtanh.f32 %v317_v30  ;;  %v620_v14 = vrot.slane %v395_v55, %v2626_v63  ;;  %v624_v45 = vrot.slane %v395_v55, %v2630_v1  ;;  %v628_v48 = vrot.slane %v395_v55, %v2633_v2 }
  0x8e   : > { %v2055_v36 = vadd.f32 %v2054_v58, %v2053_v41  ;;  %2419 = vtanh.f32 %v318_v47  ;;  %v632_v56 = vrot.slane %v395_v55, %v2636_v3  ;;  %v636_v8 = vrot.slane %v395_v55, %v2645_v10 }
  0x8f   : > { %2421 = vtanh.f32 %v319_v51  ;;  %v640_v59 = vrot.slane %v395_v55, %v2648_v11  ;;  %v644_v12 = vrot.slane %v396_v28, %v2620_v61  ;;  %v648_v29 = vrot.slane %v396_v28, %v2623_v62 }
  0x90   : > { %v2057_v9 = vadd.f32 %v2056_v0, %v2055_v36  ;;  %v652_v13 = vrot.slane %v396_v28, %v2626_v63  ;;  %v656_v37 = vrot.slane %v396_v28, %v2630_v1  ;;  %v660_v15 = vrot.slane %v396_v28, %v2633_v2 }
  0x91   : > { %v664_v16 = vrot.slane %v396_v28, %v2636_v3  ;;  %v668_v17 = vrot.slane %v396_v28, %v2645_v10  ;;  %v672_v20 = vrot.slane %v396_v28, %v2648_v11  ;;  %v1069_v33 = vcombine.low %v612_v6, %v616_v7 }
  0x92   : > { %v2059_v19 = vadd.f32 %v2058_v4, %v2057_v9  ;;  %v1070_v22 = vcombine.low %v620_v14, %v624_v45  ;;  %v1086_v23 = vcombine.low %v628_v48, %v632_v56  ;;  %v1087_v25 = vcombine.low %v636_v8, %v640_v59 }
  0x93   : > { %v1103_v27 = vcombine.low %v644_v12, %v648_v29  ;;  %v1104_v18 = vcombine.low %v652_v13, %v656_v37  ;;  %v1077_v43 = vrot.slane %v1069_v33, %v2661_v24  ;;  %v1120_v31 = vcombine.low %v660_v15, %v664_v16 }
  0x94   : > { %v2061_v30 = vadd.f32 %v2060_v5, %v2059_v19  ;;  %v1084_v32 = vrot.slane %v1070_v22, %v2661_v24  ;;  %v1094_v35 = vrot.slane %v1086_v23, %v2661_v24  ;;  %v1101_v38 = vrot.slane %v1087_v25, %v2661_v24 }
  0x95   : > { %v1111_v42 = vrot.slane %v1103_v27, %v2661_v24  ;;  %v1118_v47 = vrot.slane %v1104_v18, %v2661_v24  ;;  %v1121_v57 = vcombine.low %v668_v17, %v672_v20  ;;  %v1128_v58 = vrot.slane %v1120_v31, %v2661_v24  ;;  %v293_v27 = vld [vmem:[%s2598_s7 + $0x88] sm:$0xff]  ;;  %v294_v31 = vld [vmem:[%s2598_s7 + $0x90] sm:$0xff] }
  0x96   : > { %v2416_v50 = vpop.eup %2415  ;;  %v2063_v51 = vadd.f32 %v2062_v44, %v2061_v30  ;;  %v1085_v52 = vcombine.low %v1077_v43, %v1084_v32  ;;  %v1102_v4 = vcombine.low %v1094_v35, %v1101_v38  ;;  %v320_v41 = vmul.f32 15.0, %v292_v34  ;;  %v295_v34 = vld [vmem:[%s2598_s7 + $0x98] sm:$0xff] }
  0x97   : > { %v2418_v55 = vpop.eup %2417  ;;  %v373_v0 = vmul.f32 %v2416_v50, %v2416_v50  ;;  %v1119_v5 = vcombine.low %v1111_v42, %v1118_v47  ;;  %v1560_v6 = vcombine.high %v2847_v49, %v2847_v49  ;;  %v1135_v36 = vrot.slane %v1121_v57, %v2661_v24 }
  0x98   : > { %v2420_v28 = vpop.eup %2419  ;;  %v2065_v7 = vadd.f32 %v2064_v60, %v2063_v51  ;;  %v374_v14 = vmul.f32 %v2418_v55, %v2418_v55  ;;  %v2068_v44 = vsel %vm2013_vm1, %v1543_v39, 0.0  ;;  %v2070_v48 = vsel %vm2013_vm1, %v2838_v26, 0.0 }
  0x99   : > { %v2422_v45 = vpop.eup %2421  ;;  %v375_v56 = vmul.f32 %v2420_v28, %v2420_v28  ;;  %v1381_v8 = vmul.f32 %v1085_v52, %v373_v0  ;;  %v1136_v12 = vcombine.low %v1128_v58, %v1135_v36  ;;  %2423 = vtanh.f32 %v320_v41 }
  0x9a   : > { %v2067_v59 = vadd.f32 %v2066_v40, %v2065_v7  ;;  %v376_v9 = vmul.f32 %v2422_v45, %v2422_v45  ;;  %v1382_v29 = vmul.f32 %v1102_v4, %v374_v14  ;;  %v2072_v21 = vsel %vm2013_vm1, %v1559_v53, 0.0 }
  0x9b   : > { %v1383_v13 = vmul.f32 %v1119_v5, %v375_v56  ;;  %v1629_v60 = vcombine.high %v1381_v8, %v1381_v8  ;;  %v1636_v37 = vrot.slane %v1381_v8, %v2661_v24  ;;  %v2074_v26 = vsel %vm2013_vm1, %v2847_v49, 0.0 }
  0x9c   : > { %v2069_v15 = vadd.f32 %v2068_v44, %v2067_v59  ;;  %v1646_v39 = vcombine.high %v1382_v29, %v1382_v29  ;;  %v1653_v17 = vrot.slane %v1382_v29, %v2661_v24  ;;  %v1384_v33 = vmul.f32 %v1136_v12, %v376_v9  ;;  %v398_v9 = vld [vmem:[%s2600_s8 + $0x48] sm:$0xff] }
  0x9d   : > { %v1643_v16 = vrot.slane %v1629_v60, %v2661_v24  ;;  %v1644_v40 = vcombine.high %v1636_v37, %v1636_v37  ;;  %v1663_v19 = vcombine.high %v1383_v13, %v1383_v13  ;;  %v1670_v23 = vrot.slane %v1383_v13, %v2661_v24 }
  0x9e   : > { %v2071_v20 = vadd.f32 %v2070_v48, %v2069_v15  ;;  %v1660_v22 = vrot.slane %v1646_v39, %v2661_v24  ;;  %v2076_v53 = vsel %vm2013_vm1, %v1560_v6, 0.0  ;;  %v1680_v43 = vcombine.high %v1384_v33, %v1384_v33  ;;  %v397_v6 = vld [vmem:[%s2600_s8 + $0x40] sm:$0xff] }
  0x9f   : > { %v1645_v25 = vcombine.high %v1643_v16, %v1643_v16  ;;  %v2909_v30 = vrot.slane %v1663_v19, %v2661_v24  ;;  %v2113_v32 = vsel %vm2013_vm1, %v1636_v37, 0.0  ;;  %v1661_v35 = vcombine.high %v1653_v17, %v1653_v17 }
  0xa0   : > { %v2073_v18 = vadd.f32 %v2072_v21, %v2071_v20  ;;  %v1662_v38 = vcombine.high %v1660_v22, %v1660_v22  ;;  %v2114_v42 = vsel %vm2013_vm1, %v1644_v40, 0.0  ;;  %v2116_v49 = vsel %vm2013_vm1, %v1643_v16, 0.0 }
  0xa1   : > { %v1678_v50 = vcombine.high %v1670_v23, %v1670_v23  ;;  %v2115_v51 = vadd.f32 %v2114_v42, %v2113_v32  ;;  %v321_v52 = vmul.f32 15.0, %v293_v27  ;;  %v2917_v57 = vrot.slane %v1384_v33, %v2661_v24 }
  0xa2   : > { %v2075_v47 = vadd.f32 %v2074_v26, %v2073_v18  ;;  %v2118_v58 = vsel %vm2013_vm1, %v1645_v25, 0.0  ;;  %v322_v55 = vmul.f32 15.0, %v294_v31  ;;  %v323_v0 = vmul.f32 15.0, %v295_v34 }
  0xa3   : > { %v1679_v5 = vcombine.high %v2909_v30, %v2909_v30  ;;  %v2923_v41 = vrot.slane %v1680_v43, %v2661_v24  ;;  %v2117_v28 = vadd.f32 %v2116_v49, %v2115_v51  ;;  %v2424_v7 = vpop.eup %2423  ;;  %v2120_v14 = vsel %vm2013_vm1, %v1653_v17, 0.0 }
  0xa4   : > { %v2077_v4 = vadd.f32 %v2076_v53, %v2075_v47  ;;  %v2122_v36 = vsel %vm2013_vm1, %v1661_v35, 0.0  ;;  %v2124_v45 = vsel %vm2013_vm1, %v1660_v22, 0.0  ;;  %v2126_v44 = vsel %vm2013_vm1, %v1662_v38, 0.0 }
  0xa5   : > { %v2119_v48 = vadd.f32 %v2118_v58, %v2117_v28  ;;  %v2128_v56 = vsel %vm2013_vm1, %v1670_v23, 0.0  ;;  %v2130_v8 = vsel %vm2013_vm1, %v1678_v50, 0.0  ;;  %2425 = vtanh.f32 %v321_v52 }
  0xa6   : > { %2078 = vadd.xlane.f32.xlu0 %v2077_v4  ;;  %2427 = vtanh.f32 %v322_v55  ;;  %v377_v59 = vmul.f32 %v2424_v7, %v2424_v7  ;;  %v676_v12 = vrot.slane %v397_v6, %v2620_v61  ;;  %v680_v29 = vrot.slane %v397_v6, %v2623_v62 }
  0xa7   : > { %v2121_v13 = vadd.f32 %v2120_v14, %v2119_v48  ;;  %2429 = vtanh.f32 %v323_v0  ;;  %v684_v60 = vrot.slane %v397_v6, %v2626_v63  ;;  %v688_v37 = vrot.slane %v397_v6, %v2630_v1 }
  0xa8   : > { %v692_v15 = vrot.slane %v397_v6, %v2633_v2  ;;  %v696_v21 = vrot.slane %v397_v6, %v2636_v3  ;;  %v700_v39 = vrot.slane %v397_v6, %v2645_v10  ;;  %v704_v16 = vrot.slane %v397_v6, %v2648_v11 }
  0xa9   : > { %v2123_v40 = vadd.f32 %v2122_v36, %v2121_v13  ;;  %v708_v17 = vrot.slane %v398_v9, %v2620_v61  ;;  %v712_v19 = vrot.slane %v398_v9, %v2623_v62  ;;  %v716_v20 = vrot.slane %v398_v9, %v2626_v63 }
  0xaa   : > { %v720_v33 = vrot.slane %v398_v9, %v2630_v1  ;;  %v724_v22 = vrot.slane %v398_v9, %v2633_v2  ;;  %v728_v23 = vrot.slane %v398_v9, %v2636_v3  ;;  %v732_v26 = vrot.slane %v398_v9, %v2645_v10 }
  0xab   : > { %v2125_v53 = vadd.f32 %v2124_v45, %v2123_v40  ;;  %v736_v25 = vrot.slane %v398_v9, %v2648_v11  ;;  %v1137_v27 = vcombine.low %v676_v12, %v680_v29  ;;  %v1138_v18 = vcombine.low %v684_v60, %v688_v37 }
  0xac   : > { %v1154_v43 = vcombine.low %v692_v15, %v696_v21  ;;  %v1155_v32 = vcombine.low %v700_v39, %v704_v16  ;;  %v1171_v31 = vcombine.low %v708_v17, %v712_v19  ;;  %v1172_v34 = vcombine.low %v716_v20, %v720_v33  ;;  %v296_v33 = vld [vmem:[%s2598_s7 + $0xa0] sm:$0xff] }
  0xad   : > { %v2127_v35 = vadd.f32 %v2126_v44, %v2125_v53  ;;  %v1145_v38 = vrot.slane %v1137_v27, %v2661_v24  ;;  %v1152_v42 = vrot.slane %v1138_v18, %v2661_v24  ;;  %v1188_v49 = vcombine.low %v724_v22, %v728_v23  ;;  %v297_v18 = vld [vmem:[%s2598_s7 + $0xa8] sm:$0xff] }
  0xae   : > { %v1162_v47 = vrot.slane %v1154_v43, %v2661_v24  ;;  %v1169_v50 = vrot.slane %v1155_v32, %v2661_v24  ;;  %v1179_v51 = vrot.slane %v1171_v31, %v2661_v24  ;;  %v1186_v52 = vrot.slane %v1172_v34, %v2661_v24  ;;  %v298_v34 = vld [vmem:[%s2598_s7 + $0xb0] sm:$0xff] }
  0xaf   : > { %v2426_v58 = vpop.eup %2425  ;;  %v2129_v55 = vadd.f32 %v2128_v56, %v2127_v35  ;;  %v2132_v0 = vsel %vm2013_vm1, %v2909_v30, 0.0  ;;  %v1153_v4 = vcombine.low %v1145_v38, %v1152_v42  ;;  %v1189_v28 = vcombine.low %v732_v26, %v736_v25 }
  0xb0   : > { %v2428_v6 = vpop.eup %2427  ;;  %v378_v7 = vmul.f32 %v2426_v58, %v2426_v58  ;;  %v1170_v14 = vcombine.low %v1162_v47, %v1169_v50  ;;  %v1187_v36 = vcombine.low %v1179_v51, %v1186_v52  ;;  %v1196_v45 = vrot.slane %v1188_v49, %v2661_v24  ;;  %v299_v47 = vld [vmem:[%s2598_s7 + $0xb8] sm:$0xff] }
  0xb1   : > { %v2430_v44 = vpop.eup %2429  ;;  %v2131_v48 = vadd.f32 %v2130_v8, %v2129_v55  ;;  %v379_v9 = vmul.f32 %v2428_v6, %v2428_v6  ;;  %v1203_v12 = vrot.slane %v1189_v28, %v2661_v24  ;;  %v1385_v29 = vmul.f32 %v1153_v4, %v377_v59 }
  0xb2   : > { %v1695_v56 = vcombine.high %v2917_v57, %v2917_v57  ;;  %v1696_v13 = vcombine.high %v2923_v41, %v2923_v41  ;;  %v2134_v60 = vsel %vm2013_vm1, %v1679_v5, 0.0  ;;  %v1386_v37 = vmul.f32 %v1170_v14, %v378_v7 }
  0xb3   : > { %v2133_v15 = vadd.f32 %v2132_v0, %v2131_v48  ;;  %v2136_v8 = vsel %vm2013_vm1, %v2917_v57, 0.0  ;;  %v1387_v21 = vmul.f32 %v1187_v36, %v379_v9  ;;  %v1697_v39 = vcombine.high %v1385_v29, %v1385_v29 }
  0xb4   : > { %v380_v59 = vmul.f32 %v2430_v44, %v2430_v44  ;;  %v1204_v16 = vcombine.low %v1196_v45, %v1203_v12  ;;  %v1704_v40 = vrot.slane %v1385_v29, %v2661_v24  ;;  %v1714_v17 = vcombine.high %v1386_v37, %v1386_v37  ;;  %v399_v45 = vld [vmem:[%s2600_s8 + $0x50] sm:$0xff] }
  0xb5   : > { %v2135_v19 = vadd.f32 %v2134_v60, %v2133_v15  ;;  %v1711_v20 = vrot.slane %v1697_v39, %v2661_v24  ;;  %v1721_v30 = vrot.slane %v1386_v37, %v2661_v24  ;;  %v1731_v5 = vcombine.high %v1387_v21, %v1387_v21  ;;  %v400_v15 = vld [vmem:[%s2600_s8 + $0x58] sm:$0xff] }
  0xb6   : > { %v2138_v22 = vsel %vm2013_vm1, %v1695_v56, 0.0  ;;  %v1712_v23 = vcombine.high %v1704_v40, %v1704_v40  ;;  %v1728_v57 = vrot.slane %v1714_v17, %v2661_v24  ;;  %v2140_v53 = vsel %vm2013_vm1, %v2923_v41, 0.0 }
  0xb7   : > { %v2137_v26 = vadd.f32 %v2136_v8, %v2135_v19  ;;  %v1713_v25 = vcombine.high %v1711_v20, %v1711_v20  ;;  %v1738_v27 = vrot.slane %v1387_v21, %v2661_v24  ;;  %v2142_v43 = vsel %vm2013_vm1, %v1696_v13, 0.0 }
  0xb8   : > { %v2980_v32 = vmul.f32 %v1204_v16, %v380_v59  ;;  %v2146_v31 = vsel %vm2013_vm1, %v1704_v40, 0.0  ;;  %v324_v35 = vmul.f32 15.0, %v296_v33  ;;  %v1729_v42 = vcombine.high %v1721_v30, %v1721_v30 }
  0xb9   : > { %v2139_v38 = vadd.f32 %v2138_v22, %v2137_v26  ;;  %v2985_v49 = vrot.slane %v1731_v5, %v2661_v24  ;;  %v2147_v41 = vsel %vm2013_vm1, %v1712_v23, 0.0  ;;  %v1730_v50 = vcombine.high %v1728_v57, %v1728_v57 }
  0xba   : > { %v2148_v51 = vadd.f32 %v2147_v41, %v2146_v31  ;;  %v2149_v52 = vsel %vm2013_vm1, %v1711_v20, 0.0  ;;  %v325_v58 = vmul.f32 15.0, %v297_v18  ;;  %v1746_v0 = vcombine.high %v1738_v27, %v1738_v27 }
  0xbb   : > { %v2141_v55 = vadd.f32 %v2140_v53, %v2139_v38  ;;  %v2151_v4 = vsel %vm2013_vm1, %v1713_v25, 0.0  ;;  %v326_v28 = vmul.f32 15.0, %v298_v34  ;;  %v1748_v6 = vcombine.high %v2980_v32, %v2980_v32 }
  0xbc   : > { %v2995_v7 = vrot.slane %v2980_v32, %v2661_v24  ;;  %v2150_v14 = vadd.f32 %v2149_v52, %v2148_v51  ;;  %v327_v36 = vmul.f32 15.0, %v299_v47  ;;  %v1747_v48 = vcombine.high %v2985_v49, %v2985_v49 }
  0xbd   : > { %v2143_v44 = vadd.f32 %v2142_v43, %v2141_v55  ;;  %v2153_v9 = vsel %vm2013_vm1, %v1721_v30, 0.0  ;;  %v2155_v12 = vsel %vm2013_vm1, %v1729_v42, 0.0  ;;  %v2157_v56 = vsel %vm2013_vm1, %v1728_v57, 0.0 }
  0xbe   : > { %v2152_v29 = vadd.f32 %v2151_v4, %v2150_v14  ;;  %v2159_v13 = vsel %vm2013_vm1, %v1730_v50, 0.0  ;;  %v2161_v60 = vsel %vm2013_vm1, %v1738_v27, 0.0  ;;  %v2163_v37 = vsel %vm2013_vm1, %v1746_v0, 0.0 }
  0xbf   : > { %2144 = vadd.xlane.f32.xlu1 %v2143_v44  ;;  %2431 = vtanh.f32 %v324_v35  ;;  %v740_v8 = vrot.slane %v399_v45, %v2620_v61  ;;  %v744_v21 = vrot.slane %v399_v45, %v2623_v62  ;;  %v748_v59 = vrot.slane %v399_v45, %v2626_v63 }
  0xc0   : > { %v2154_v39 = vadd.f32 %v2153_v9, %v2152_v29  ;;  %2433 = vtanh.f32 %v325_v58  ;;  %v752_v16 = vrot.slane %v399_v45, %v2630_v1  ;;  %v756_v40 = vrot.slane %v399_v45, %v2633_v2 }
  0xc1   : > { %2435 = vtanh.f32 %v326_v28  ;;  %v760_v17 = vrot.slane %v399_v45, %v2636_v3  ;;  %v764_v19 = vrot.slane %v399_v45, %v2645_v10  ;;  %v768_v30 = vrot.slane %v399_v45, %v2648_v11 }
  0xc2   : > { %v2156_v20 = vadd.f32 %v2155_v12, %v2154_v39  ;;  %2437 = vtanh.f32 %v327_v36  ;;  %v772_v5 = vrot.slane %v400_v15, %v2620_v61  ;;  %v776_v33 = vrot.slane %v400_v15, %v2623_v62  ;;  %v300_v39 = vld [vmem:[%s2598_s7 + $0xc0] sm:$0xff] }
  0xc3   : > { %v780_v22 = vrot.slane %v400_v15, %v2626_v63  ;;  %v784_v23 = vrot.slane %v400_v15, %v2630_v1  ;;  %v788_v57 = vrot.slane %v400_v15, %v2633_v2  ;;  %v792_v53 = vrot.slane %v400_v15, %v2636_v3 }
  0xc4   : > { %v2158_v26 = vadd.f32 %v2157_v56, %v2156_v20  ;;  %v796_v25 = vrot.slane %v400_v15, %v2645_v10  ;;  %v800_v27 = vrot.slane %v400_v15, %v2648_v11  ;;  %v1205_v18 = vcombine.low %v740_v8, %v744_v21 }
  0xc5   : > { %v1206_v43 = vcombine.low %v748_v59, %v752_v16  ;;  %v1222_v32 = vcombine.low %v756_v40, %v760_v17  ;;  %v1223_v31 = vcombine.low %v764_v19, %v768_v30  ;;  %v1239_v35 = vcombine.low %v772_v5, %v776_v33  ;;  %v301_v59 = vld [vmem:[%s2598_s7 + $0xc8] sm:$0xff] }
  0xc6   : > { %v2160_v34 = vadd.f32 %v2159_v13, %v2158_v26  ;;  %v1240_v38 = vcombine.low %v780_v22, %v784_v23  ;;  %v1256_v42 = vcombine.low %v788_v57, %v792_v53  ;;  %v1213_v41 = vrot.slane %v1205_v18, %v2661_v24 }
  0xc7   : > { %v1220_v47 = vrot.slane %v1206_v43, %v2661_v24  ;;  %v1230_v50 = vrot.slane %v1222_v32, %v2661_v24  ;;  %v1237_v51 = vrot.slane %v1223_v31, %v2661_v24  ;;  %v1762_v52 = vrot.slane %v1748_v6, %v2661_v24 }
  0xc8   : > { %v2162_v58 = vadd.f32 %v2161_v60, %v2160_v34  ;;  %v1257_v55 = vcombine.low %v796_v25, %v800_v27  ;;  %v2165_v4 = vsel %vm2013_vm1, %v2985_v49, 0.0  ;;  %v1247_v14 = vrot.slane %v1239_v35, %v2661_v24 }
  0xc9   : > { %v2432_v0 = vpop.eup %2431  ;;  %v1221_v28 = vcombine.low %v1213_v41, %v1220_v47  ;;  %v1254_v36 = vrot.slane %v1240_v38, %v2661_v24  ;;  %v1763_v44 = vcombine.high %v2995_v7, %v2995_v7  ;;  %v1238_v6 = vcombine.low %v1230_v50, %v1237_v51 }
  0xca   : > { %v2434_v45 = vpop.eup %2433  ;;  %v2164_v9 = vadd.f32 %v2163_v37, %v2162_v58  ;;  %v381_v12 = vmul.f32 %v2432_v0, %v2432_v0  ;;  %v2167_v56 = vsel %vm2013_vm1, %v1747_v48, 0.0  ;;  %v1264_v49 = vrot.slane %v1256_v42, %v2661_v24  ;;  %v302_v58 = vld [vmem:[%s2598_s7 + $0xd0] sm:$0xff] }
  0xcb   : > { %v2436_v29 = vpop.eup %2435  ;;  %v382_v13 = vmul.f32 %v2434_v45, %v2434_v45  ;;  %v1271_v60 = vrot.slane %v1257_v55, %v2661_v24  ;;  %v1764_v16 = vcombine.high %v1762_v52, %v1762_v52  ;;  %v2169_v40 = vsel %vm2013_vm1, %v2995_v7, 0.0  ;;  %v303_v55 = vld [vmem:[%s2598_s7 + $0xd8] sm:$0xff]  ;;  %v401_v0 = vld [vmem:[%s2600_s8 + $0x60] sm:$0xff] }
  0xcc   : > { %v2438_v15 = vpop.eup %2437  ;;  %v2166_v8 = vadd.f32 %v2165_v4, %v2164_v9  ;;  %v1389_v21 = vmul.f32 %v1221_v28, %v381_v12  ;;  %v383_v37 = vmul.f32 %v2436_v29, %v2436_v29  ;;  %v1255_v17 = vcombine.low %v1247_v14, %v1254_v36 }
  0xcd   : > { %v1390_v20 = vmul.f32 %v1238_v6, %v382_v13  ;;  %v2171_v5 = vsel %vm2013_vm1, %v1763_v44, 0.0  ;;  %v1272_v33 = vcombine.low %v1264_v49, %v1271_v60  ;;  %v328_v22 = vmul.f32 15.0, %v300_v39 }
  0xce   : > { %v2168_v19 = vadd.f32 %v2167_v56, %v2166_v8  ;;  %v1765_v30 = vcombine.high %v1389_v21, %v1389_v21  ;;  %v1772_v48 = vrot.slane %v1389_v21, %v2661_v24  ;;  %v329_v23 = vmul.f32 15.0, %v301_v59  ;;  %v3065_v59 = vld [vmem:[%s2600_s8 + $0x68] sm:$0xff] }
  0xcf   : > { %v384_v26 = vmul.f32 %v2438_v15, %v2438_v15  ;;  %v2173_v27 = vsel %vm2013_vm1, %v1762_v52, 0.0  ;;  %v1782_v7 = vcombine.high %v1390_v20, %v1390_v20  ;;  %v1391_v43 = vmul.f32 %v1255_v17, %v383_v37 }
  0xd0   : > { %v2170_v57 = vadd.f32 %v2169_v40, %v2168_v19  ;;  %v1779_v53 = vrot.slane %v1765_v30, %v2661_v24  ;;  %v1780_v25 = vcombine.high %v1772_v48, %v1772_v48  ;;  %v1789_v31 = vrot.slane %v1390_v20, %v2661_v24 }
  0xd1   : > { %v2175_v34 = vsel %vm2013_vm1, %v1764_v16, 0.0  ;;  %v2179_v35 = vsel %vm2013_vm1, %v1772_v48, 0.0  ;;  %2439 = vtanh.f32 %v328_v22  ;;  %v1392_v42 = vmul.f32 %v1272_v33, %v384_v26 }
  0xd2   : > { %v2172_v18 = vadd.f32 %v2171_v5, %v2170_v57  ;;  %v1781_v32 = vcombine.high %v1779_v53, %v1779_v53  ;;  %v2180_v41 = vsel %vm2013_vm1, %v1780_v25, 0.0  ;;  %2441 = vtanh.f32 %v329_v23 }
  0xd3   : > { %v1796_v47 = vrot.slane %v1782_v7, %v2661_v24  ;;  %v1799_v50 = vcombine.high %v1391_v43, %v1391_v43  ;;  %v2181_v51 = vadd.f32 %v2180_v41, %v2179_v35  ;;  %v2182_v52 = vsel %vm2013_vm1, %v1779_v53, 0.0 }
  0xd4   : > { %v2174_v38 = vadd.f32 %v2173_v27, %v2172_v18  ;;  %v1797_v28 = vcombine.high %v1789_v31, %v1789_v31  ;;  %v1806_v14 = vrot.slane %v1391_v43, %v2661_v24  ;;  %v2184_v36 = vsel %vm2013_vm1, %v1781_v32, 0.0 }
  0xd5   : > { %v2183_v45 = vadd.f32 %v2182_v52, %v2181_v51  ;;  %v2186_v44 = vsel %vm2013_vm1, %v1789_v31, 0.0  ;;  %v330_v9 = vmul.f32 15.0, %v302_v58  ;;  %v331_v12 = vmul.f32 15.0, %v303_v55 }
  0xd6   : > { %v2176_v4 = vadd.f32 %v2175_v34, %v2174_v38  ;;  %v804_v6 = vrot.slane %v401_v0, %v2620_v61  ;;  %v1798_v29 = vcombine.high %v1796_v47, %v1796_v47  ;;  %v1813_v56 = vrot.slane %v1799_v50, %v2661_v24 }
  0xd7   : > { %v1816_v13 = vcombine.high %v1392_v42, %v1392_v42  ;;  %v2185_v49 = vadd.f32 %v2184_v36, %v2183_v45  ;;  %v1814_v60 = vcombine.high %v1806_v14, %v1806_v14  ;;  %v3060_v15 = vrot.slane %v1392_v42, %v2661_v24 }
  0xd8   : > { %2177 = vadd.xlane.f32.xlu0 %v2176_v4  ;;  %v2188_v8 = vsel %vm2013_vm1, %v1797_v28, 0.0  ;;  %v808_v21 = vrot.slane %v401_v0, %v2623_v62  ;;  %v812_v16 = vrot.slane %v401_v0, %v2626_v63  ;;  %v816_v40 = vrot.slane %v401_v0, %v2630_v1 }
  0xd9   : > { %v2187_v39 = vadd.f32 %v2186_v44, %v2185_v49  ;;  %v820_v37 = vrot.slane %v401_v0, %v2633_v2  ;;  %v2190_v17 = vsel %vm2013_vm1, %v1796_v47, 0.0  ;;  %v824_v19 = vrot.slane %v401_v0, %v2636_v3 }
  0xda   : > { %v828_v20 = vrot.slane %v401_v0, %v2645_v10  ;;  %v832_v30 = vrot.slane %v401_v0, %v2648_v11  ;;  %v3075_v5 = vrot.slane %v1816_v13, %v2661_v24  ;;  %v2192_v22 = vsel %vm2013_vm1, %v1798_v29, 0.0 }
  0xdb   : > { %v2440_v48 = vpop.eup %2439  ;;  %v2189_v33 = vadd.f32 %v2188_v8, %v2187_v39  ;;  %2443 = vtanh.f32 %v330_v9  ;;  %v836_v57 = vrot.slane %v3065_v59, %v2620_v61  ;;  %v840_v26 = vrot.slane %v3065_v59, %v2623_v62 }
  0xdc   : > { %v2442_v23 = vpop.eup %2441  ;;  %v844_v53 = vrot.slane %v3065_v59, %v2626_v63  ;;  %v848_v25 = vrot.slane %v3065_v59, %v2630_v1  ;;  %v1273_v7 = vcombine.low %v804_v6, %v808_v21  ;;  %v1274_v18 = vcombine.low %v812_v16, %v816_v40 }
  0xdd   : > { %v2191_v27 = vadd.f32 %v2190_v17, %v2189_v33  ;;  %v1290_v43 = vcombine.low %v820_v37, %v824_v19  ;;  %v1815_v32 = vcombine.high %v1813_v56, %v1813_v56  ;;  %v2194_v31 = vsel %vm2013_vm1, %v1806_v14, 0.0 }
  0xde   : > { %v385_v34 = vmul.f32 %v2440_v48, %v2440_v48  ;;  %v1291_v35 = vcombine.low %v828_v20, %v832_v30  ;;  %v1281_v61 = vrot.slane %v1273_v7, %v2661_v24  ;;  %v1288_v62 = vrot.slane %v1274_v18, %v2661_v24 }
  0xdf   : > { %v2193_v38 = vadd.f32 %v2192_v22, %v2191_v27  ;;  %v1298_v42 = vrot.slane %v1290_v43, %v2661_v24  ;;  %v2196_v63 = vsel %vm2013_vm1, %v1814_v60, 0.0  ;;  %v1307_v41 = vcombine.low %v836_v57, %v840_v26 }
  0xe0   : > { %v1305_v1 = vrot.slane %v1291_v35, %v2661_v24  ;;  %v1308_v47 = vcombine.low %v844_v53, %v848_v25  ;;  %v1831_v50 = vcombine.high %v3060_v15, %v3060_v15  ;;  %v386_v52 = vmul.f32 %v2442_v23, %v2442_v23 }
  0xe1   : > { %v2195_v51 = vadd.f32 %v2194_v31, %v2193_v38  ;;  %v1289_v58 = vcombine.low %v1281_v61, %v1288_v62  ;;  %v2198_v55 = vsel %vm2013_vm1, %v1813_v56, 0.0  ;;  %v2200_v0 = vsel %vm2013_vm1, %v1815_v32, 0.0 }
  0xe2   : > { %2445 = vtanh.f32 %v331_v12  ;;  %v1306_v4 = vcombine.low %v1298_v42, %v1305_v1  ;;  %v852_v14 = vrot.slane %v3065_v59, %v2633_v2  ;;  %v856_v36 = vrot.slane %v3065_v59, %v2636_v3 }
  0xe3   : > { %v2197_v28 = vadd.f32 %v2196_v63, %v2195_v51  ;;  %v1393_v45 = vmul.f32 %v1289_v58, %v385_v34  ;;  %v860_v44 = vrot.slane %v3065_v59, %v2645_v10  ;;  %v864_v9 = vrot.slane %v3065_v59, %v2648_v11 }
  0xe4   : > { %v1315_v6 = vrot.slane %v1307_v41, %v2661_v24  ;;  %v1322_v29 = vrot.slane %v1308_v47, %v2661_v24  ;;  %v1394_v13 = vmul.f32 %v1306_v4, %v386_v52  ;;  %v1832_v3 = vcombine.high %v3075_v5, %v3075_v5 }
  0xe5   : > { %v2444_v12 = vpop.eup %2443  ;;  %v2199_v56 = vadd.f32 %v2198_v55, %v2197_v28  ;;  %v1833_v49 = vcombine.high %v1393_v45, %v1393_v45  ;;  %v1840_v2 = vrot.slane %v1393_v45, %v2661_v24  ;;  %v2202_v60 = vsel %vm2013_vm1, %v3060_v15, 0.0 }
  0xe6   : > { %v2204_v8 = vsel %vm2013_vm1, %v1831_v50, 0.0  ;;  %v387_v39 = vmul.f32 %v2444_v12, %v2444_v12  ;;  %v1323_v59 = vcombine.low %v1315_v6, %v1322_v29  ;;  %v1324_v16 = vcombine.low %v852_v14, %v856_v36 }
  0xe7   : > { %v2201_v10 = vadd.f32 %v2200_v0, %v2199_v56  ;;  %v1847_v11 = vrot.slane %v1833_v49, %v2661_v24  ;;  %v1848_v21 = vcombine.high %v1840_v2, %v1840_v2  ;;  %v1325_v40 = vcombine.low %v860_v44, %v864_v9 }
  0xe8   : > { %v1850_v19 = vcombine.high %v1394_v13, %v1394_v13  ;;  %v1857_v20 = vrot.slane %v1394_v13, %v2661_v24  ;;  %v2206_v30 = vsel %vm2013_vm1, %v3075_v5, 0.0  ;;  %v2212_v15 = vsel %vm2013_vm1, %v1840_v2, 0.0 }
  0xe9   : > { %v2203_v37 = vadd.f32 %v2202_v60, %v2201_v10  ;;  %v1849_v17 = vcombine.high %v1847_v11, %v1847_v11  ;;  %v2208_v33 = vsel %vm2013_vm1, %v1832_v3, 0.0  ;;  %v2213_v22 = vsel %vm2013_vm1, %v1848_v21, 0.0 }
  0xea   : > { %v2215_v23 = vsel %vm2013_vm1, %v1847_v11, 0.0  ;;  %v1332_v26 = vrot.slane %v1324_v16, %v2661_v24  ;;  %v1339_v53 = vrot.slane %v1325_v40, %v2661_v24  ;;  %v1395_v25 = vmul.f32 %v1323_v59, %v387_v39 }
  0xeb   : > { %v2205_v48 = vadd.f32 %v2204_v8, %v2203_v37  ;;  %v2214_v27 = vadd.f32 %v2213_v22, %v2212_v15  ;;  %v1864_v18 = vrot.slane %v1850_v19, %v2661_v24  ;;  %v1865_v5 = vcombine.high %v1857_v20, %v1857_v20 }
  0xec   : > { %v2446_v57 = vpop.eup %2445  ;;  %v2217_v43 = vsel %vm2013_vm1, %v1849_v17, 0.0  ;;  %v2219_v34 = vsel %vm2013_vm1, %v1857_v20, 0.0  ;;  %v1340_v38 = vcombine.low %v1332_v26, %v1339_v53  ;;  %v1867_v42 = vcombine.high %v1395_v25, %v1395_v25 }
  0xed   : > { %v2207_v7 = vadd.f32 %v2206_v30, %v2205_v48  ;;  %v2216_v32 = vadd.f32 %v2215_v23, %v2214_v27  ;;  %v388_v35 = vmul.f32 %v2446_v57, %v2446_v57  ;;  %v1866_v62 = vcombine.high %v1864_v18, %v1864_v18 }
  0xee   : > { %v1874_v63 = vrot.slane %v1395_v25, %v2661_v24  ;;  %v2221_v1 = vsel %vm2013_vm1, %v1865_v5, 0.0  ;;  %v2223_v47 = vsel %vm2013_vm1, %v1864_v18, 0.0  ;;  %v1881_v52 = vrot.slane %v1867_v42, %v2661_v24 }
  0xef   : > { %v2209_v31 = vadd.f32 %v2208_v33, %v2207_v7  ;;  %v2218_v61 = vadd.f32 %v2217_v43, %v2216_v32  ;;  %v1396_v51 = vmul.f32 %v1340_v38, %v388_v35  ;;  %v2225_v55 = vsel %vm2013_vm1, %v1866_v62, 0.0  ;;  %v360_v7 = vld [vmem:[%s3160_s2] sm:$0x7f] }
  0xf0   : > { %v1882_v58 = vcombine.high %v1874_v63, %v1874_v63  ;;  %v2227_v4 = vsel %vm2013_vm1, %v1874_v63, 0.0  ;;  %v1883_v14 = vcombine.high %v1881_v52, %v1881_v52  ;;  %v2231_v6 = vsel %vm2013_vm1, %v1881_v52, 0.0 }
  0xf1   : > { %2210 = vadd.xlane.f32.xlu1 %v2209_v31  ;;  %v2220_v41 = vadd.f32 %v2219_v34, %v2218_v61  ;;  %v1884_v36 = vcombine.high %v1396_v51, %v1396_v51  ;;  %v1891_v45 = vrot.slane %v1396_v51, %v2661_v24  ;;  %v2253_v40 = vand.u32 127, %v417_v46 }
  0xf2   : > { %v2229_v44 = vsel %vm2013_vm1, %v1882_v58, 0.0  ;;  %v2233_v13 = vsel %vm2013_vm1, %v1883_v14, 0.0  ;;  %vm2286_vm4 = vcmask 1043459   ;;  %vm2288_vm5 = vcmask 1044484  }
  0xf3   : > { %v2222_v50 = vadd.f32 %v2221_v1, %v2220_v41  ;;  %v1898_v12 = vrot.slane %v1884_v36, %v2661_v24  ;;  %v1899_v56 = vcombine.high %v1891_v45, %v1891_v45  ;;  %v2235_v2 = vsel %vm2013_vm1, %v1891_v45, 0.0 }
  0xf4   : > { %v2256_v19 = vsub.s32 %v2253_v40, %v2612_v54  ;;  %vm2290_vm6 = vcmask 1045509   ;;  %vm2292_vm7 = vcmask 1046534   ;;  %vm2296_vm8 = vcmask 14336  }
  0xf5   : > { %v2224_v0 = vadd.f32 %v2223_v47, %v2222_v50  ;;  %v1900_v60 = vcombine.high %v1898_v12, %v1898_v12  ;;  %v2237_v10 = vsel %vm2013_vm1, %v1899_v56, 0.0  ;;  %v2239_v11 = vsel %vm2013_vm1, %v1898_v12, 0.0 }
  0xf7   : > { %v2226_v28 = vadd.f32 %v2225_v55, %v2224_v0  ;;  %v2241_v39 = vsel %vm2013_vm1, %v1900_v60, 0.0 }
  0xf9   : > { %v2228_v9 = vadd.f32 %v2227_v4, %v2226_v28 }
  0xfb   : > { %v2230_v29 = vadd.f32 %v2229_v44, %v2228_v9 }
  0xfd   : > { %v2232_v49 = vadd.f32 %v2231_v6, %v2230_v29 }
  0xff   : > { %v2234_v3 = vadd.f32 %v2233_v13, %v2232_v49 }
 0x101   : > { %v2236_v8 = vadd.f32 %v2235_v2, %v2234_v3  ;;  %v2046_v24 = vpop.xlane.xlu0 %2045 }
 0x102   : > { %v2257_v30 = vrot.slane %v2046_v24, %v2256_v19 }
 0x103   : > { %v2238_v21 = vadd.f32 %v2237_v10, %v2236_v8 }
 0x105   : > { %v2240_v59 = vadd.f32 %v2239_v11, %v2238_v21 }
 0x107   : > { %v2242_v16 = vadd.f32 %v2241_v39, %v2240_v59 }
 0x109   : > { %2243 = vadd.xlane.f32.xlu0 %v2242_v16 }
 0x119   : > { %v2112_v37 = vpop.xlane.xlu1 %2111 }
 0x11a   : > { %v2265_v33 = vrot.slane %v2112_v37, %v2256_v19 }
 0x133   : > { %v2079_v17 = vpop.xlane.xlu0 %2078 }
 0x134   : > { %v2261_v20 = vrot.slane %v2079_v17, %v2256_v19 }
 0x136   : > { %v2283_v48 = vsel %vm2282_vm2, %v2261_v20, %v2257_v30 }
 0x137   : > { %v2285_v57 = vsel %vm2284_vm3, %v2265_v33, %v2283_v48 }
 0x14c   : > { %v2145_v15 = vpop.xlane.xlu1 %2144 }
 0x14d   : > { %v2269_v22 = vrot.slane %v2145_v15, %v2256_v19 }
 0x14f   : > { %v2287_v25 = vsel %vm2286_vm4, %v2269_v22, %v2285_v57 }
 0x165   : > { %v2178_v23 = vpop.xlane.xlu0 %2177 }
 0x166   : > { %v2273_v26 = vrot.slane %v2178_v23, %v2256_v19 }
 0x168   : > { %v2289_v27 = vsel %vm2288_vm5, %v2273_v26, %v2287_v25 }
 0x17e   : > { %v2211_v53 = vpop.xlane.xlu1 %2210 }
 0x17f   : > { %v2277_v46 = vrot.slane %v2211_v53, %v2256_v19 }
 0x181   : > { %v2291_v5 = vsel %vm2290_vm6, %v2277_v46, %v2289_v27 }
 0x196   : > { %v2244_v54 = vpop.xlane.xlu0 %2243 }
 0x197   : > { %v2281_v18 = vrot.slane %v2244_v54, %v2256_v19 }
 0x199   : > { %v2293_v43 = vsel %vm2292_vm7, %v2281_v18, %v2291_v5 }
 0x19a   : > { %v2295_v32 = vadd.f32 %v2293_v43, %v360_v7 }
 0x19c   : > { %2297 = vst.msk [vmem:[%s3160_s2] sm:$0x7f] %vm2296_vm8, %v2295_v32 }
 0x19d PF: > { %p9_p9 = scmp.ge.s32.totalorder %s2505_s13, 4   ;;  %s3162_s9 = smov %s2465_s10 }
 0x19e   : > { %s3163_s10 = smov %s2514_s16  ;;  %s3164_s11 = smov %s2505_s13 }
 0x19f   :  { %11 = sbr.rel (!%p9_p9) target bundleno = 2 (0x2), region = 117 }

// kernel: inception_forward.10
= control target key start
LH: loop header
LB: loop body
LE: loop exit
PB: predicated region body
PF: predicated region fallthrough
CT: control target
= control target key end

     0   :  { %s7272_s15 = smov 0   ;;  %s9829_s0 = inlined_call_operand.vmem [shape: bf16[2,320,8], index: 0, kind: input, shape index: {}]   ;;  %s9830_s1 = inlined_call_operand.vmem [shape: bf16[9,8,128], index: 1, kind: input, shape index: {}]   ;;  %s9831_s2 = inlined_call_operand.vmem [shape: bf16[2,256,1], index: 2, kind: input, shape index: {}]   ;;  %s9832_s3 = inlined_call_operand.vmem [shape: f32[1,128], index: 3, kind: input, shape index: {}]   ;;  %s9833_s4 = inlined_call_operand.vmem [shape: f32[2,256,128], index: 4, kind: output, shape index: {}]  }
   0x1 LB: > { %s6007_s16 = sadd.s32 4294967295, %s7243_s15   ;;  %p6011_p0 = scmp.ge.s32.totalorder %s7243_s15, 1  ;;  %s7243_s15 = sphi %s7272_s15, %s14_s15  }
   0x2   : > { %p162_p1 = scmp.lt.s32.totalorder %s7243_s15, 3 }
   0x4   : > { %p163_p2 = pnand %p6011_p0, %p162_p1 }
   0x6   : > { %166 = sbr.rel (%p163_p2) target bundleno = 780 (0x30c), region = 36 }
   0xd   : > { %v6083_v0 = vld [vmem:[%s9831_s2 + $0x88] sm:$0xf]  ;;  %v6081_v1 = vld [vmem:[%s9831_s2 + $0x80] sm:$0xf]  ;;  %v7245_v2 = vmov 0   ;;  %vm1168_vm0 = vcmask 1043456  }
   0xe   : > { %7092 = vset.pattern.permute.xlu1 %v7245_v2  ;;  %7091 = vset.pattern.permute.xlu0 %v7245_v2  ;;  %v6084_v3 = vld [vmem:[%s9831_s2 + $0x8c] sm:$0xf]  ;;  %v6082_v4 = vld [vmem:[%s9831_s2 + $0x84] sm:$0xf]  ;;  %v6086_v5 = vld [vmem:[%s9831_s2 + $0x94] sm:$0xf] }
   0xf   : > { %1873 = vperm.xlu1 %7092, %v6083_v0   ;;  %1849 = vperm.xlu0 %7091, %v6081_v1   ;;  %v6085_v6 = vld [vmem:[%s9831_s2 + $0x90] sm:$0xf]  ;;  %v6088_v7 = vld [vmem:[%s9831_s2 + $0x9c] sm:$0xf]  ;;  %v6087_v8 = vld [vmem:[%s9831_s2 + $0x98] sm:$0xf] }
  0x10   : > { %v6090_v9 = vld [vmem:[%s9831_s2 + $0xa4] sm:$0xf]  ;;  %v6089_v10 = vld [vmem:[%s9831_s2 + $0xa0] sm:$0xf]  ;;  %v6092_v11 = vld [vmem:[%s9831_s2 + $0xac] sm:$0xf] }
  0x11   : > { %v6091_v12 = vld [vmem:[%s9831_s2 + $0xa8] sm:$0xf]  ;;  %v6181_v13 = vld [vmem:[%s9830_s1 + $0x10] sm:$0xf]  ;;  %p188_p3 = scmp.lt.s32.totalorder %s6007_s16, 1  ;;  %vm1119_vm1 = vcmask 64512  }
  0x12   : > { %7074 = vmatprep.subr.msk.bf16.mxu0 %vm1168_vm0, %v6181_v13  ;;  %v7321_v14 = vsel %vm1168_vm0, %v6181_v13, 0  ;;  %v6015_v15 = vld [vmem:[%s9830_s1 + $0x4] sm:$0xf]  ;;  %v6094_v16 = vld [vmem:[%s9831_s2 + $0xb4] sm:$0xf] }
  0x13   : > { %1885 = vperm.xlu1 %7092, %v6084_v3   ;;  %1861 = vperm.xlu0 %7091, %v6082_v4   ;;  %9962 = vst [vmem:[#allocation2_spill] sm:$0xff] %v7321_v14  ;;  %v6093_v17 = vld [vmem:[%s9831_s2 + $0xb0] sm:$0xf]  ;;  %s10300_s16 = smov (!%p188_p3, %s6007_s16), 1  ;;  %v1170_v18 = vsel %vm1168_vm0, %v6015_v15, 0 }
  0x14   : > { %6643 = vmatpush3.bf16.msra.mxu0 %v7321_v14  ;;  %7070 = vmatprep.subr.msk.bf16.mxu1 %vm1168_vm0, %v6015_v15  ;;  %s7080_s25 = smul.u32 160, %s10300_s16  ;;  %v6096_v19 = vld [vmem:[%s9831_s2 + $0xbc] sm:$0xf]  ;;  %v6095_v20 = vld [vmem:[%s9831_s2 + $0xb8] sm:$0xf]  ;;  %s6352_s9 = sshll.u32 %s10300_s16, 8 }
  0x15   : > { %6507 = vmatpush3.bf16.msra.mxu1 %v1170_v18  ;;  %v6098_v24 = vld [vmem:[%s9831_s2 + $0xc4] sm:$0xf]  ;;  %v6097_v27 = vld [vmem:[%s9831_s2 + $0xc0] sm:$0xf]  ;;  %v235_v43 = vld [vmem:[%s9831_s2 + $0xc] sm:$0xf]  ;;  %s9757_s12 = scalar_lea.vmem %s9833_s4, %s6352_s9 }
  0x16   : > { %s7351_s6 = scalar_lea.vmem %s9829_s0, %s7080_s25  ;;  %v233_v40 = vld [vmem:[%s9831_s2 + $0x4] sm:$0xf]  ;;  %v232_v41 = vld [vmem:[%s9831_s2] sm:$0xf]  ;;  %v234_v44 = vld [vmem:[%s9831_s2 + $0x8] sm:$0xf] }
  0x17   : > { %1909 = vperm.xlu1 %7092, %v6086_v5   ;;  %1897 = vperm.xlu0 %7091, %v6085_v6   ;;  %v3050_v21 = vld [vmem:[%s7351_s6 + $0x10] sm:$0xf]  ;;  %v3051_v22 = vld [vmem:[%s7351_s6 + $0x14] sm:$0xf]  ;;  %v3052_v23 = vld [vmem:[%s7351_s6 + $0x18] sm:$0xf] }
  0x18   : > { %v6182_v25 = vcombine.low %v3050_v21, %v3051_v22  ;;  %v3053_v26 = vld [vmem:[%s7351_s6 + $0x1c] sm:$0xf]  ;;  %v200_v29 = vld [vmem:[%s7351_s6 + $0x8] sm:$0xf]  ;;  %v201_v30 = vld [vmem:[%s7351_s6 + $0xc] sm:$0xf] }
  0x19   : > { %v6183_v28 = vcombine.low %v3052_v23, %v3053_v26  ;;  %v6016_v31 = vcombine.low %v200_v29, %v201_v30  ;;  %v3054_v32 = vld [vmem:[%s7351_s6 + $0x20] sm:$0xf]  ;;  %v3055_v33 = vld [vmem:[%s7351_s6 + $0x24] sm:$0xf]  ;;  %v202_v34 = vld [vmem:[%s7351_s6 + $0x10] sm:$0xf] }
  0x1a   : > { %6644 = vmatprep.mubr.msk.bf16.mxu0 %vm1119_vm1, %v6182_v25  ;;  %v6184_v35 = vcombine.low %v3054_v32, %v3055_v33  ;;  %v203_v36 = vld [vmem:[%s7351_s6 + $0x14] sm:$0xf]  ;;  %v3056_v38 = vld [vmem:[%s7351_s6 + $0x28] sm:$0xf]  ;;  %v3057_v39 = vld [vmem:[%s7351_s6 + $0x2c] sm:$0xf] }
  0x1b   : > { %1933 = vperm.xlu1 %7092, %v6088_v7   ;;  %1921 = vperm.xlu0 %7091, %v6087_v8   ;;  %v6017_v37 = vcombine.low %v202_v34, %v203_v36  ;;  %v6185_v42 = vcombine.low %v3056_v38, %v3057_v39  ;;  %v204_v45 = vld [vmem:[%s7351_s6 + $0x18] sm:$0xf]  ;;  %v205_v46 = vld [vmem:[%s7351_s6 + $0x1c] sm:$0xf]  ;;  %v3058_v47 = vld [vmem:[%s7351_s6 + $0x30] sm:$0xf] }
  0x1c   : > { %6645 = vmatmul.mubr.msk.bf16.vlgmr.msra.gmra.mrb[0].mxu0 %vm1119_vm1, %v6183_v28  ;;  %6508 = vmatprep.mubr.msk.bf16.mxu1 %vm1119_vm1, %v6016_v31  ;;  %v6018_v48 = vcombine.low %v204_v45, %v205_v46  ;;  %v3059_v49 = vld [vmem:[%s7351_s6 + $0x34] sm:$0xf]  ;;  %v206_v50 = vld [vmem:[%s7351_s6 + $0x20] sm:$0xf]  ;;  %v207_v51 = vld [vmem:[%s7351_s6 + $0x24] sm:$0xf] }
  0x1d   : > { %6648 = vmatprep.mubr.msk.bf16.mxu0 %vm1119_vm1, %v6184_v35  ;;  %6509 = vmatmul.mubr.msk.bf16.vlgmr.msra.gmra.mrb[0].mxu1 %vm1119_vm1, %v6017_v37  ;;  %v6186_v52 = vcombine.low %v3058_v47, %v3059_v49  ;;  %v6019_v53 = vcombine.low %v206_v50, %v207_v51  ;;  %v3060_v54 = vld [vmem:[%s7351_s6 + $0x38] sm:$0xf]  ;;  %v3061_v55 = vld [vmem:[%s7351_s6 + $0x3c] sm:$0xf]  ;;  %v6099_v56 = vld [vmem:[%s9831_s2 + $0xc8] sm:$0xf] }
  0x1e   : > { %6512 = vmatprep.mubr.msk.bf16.mxu1 %vm1119_vm1, %v6018_v48  ;;  %v236_v57 = vld [vmem:[%s9831_s2 + $0x10] sm:$0xf]  ;;  %v6187_v58 = vcombine.low %v3060_v54, %v3061_v55  ;;  %v208_v59 = vld [vmem:[%s7351_s6 + $0x28] sm:$0xf]  ;;  %v209_v60 = vld [vmem:[%s7351_s6 + $0x2c] sm:$0xf] }
  0x1f   : > { %1957 = vperm.xlu1 %7092, %v6090_v9   ;;  %1945 = vperm.xlu0 %7091, %v6089_v10   ;;  %v3062_v61 = vld [vmem:[%s7351_s6 + $0x40] sm:$0xf]  ;;  %v3063_v62 = vld [vmem:[%s7351_s6 + $0x44] sm:$0xf]  ;;  %v6020_v63 = vcombine.low %v208_v59, %v209_v60  ;;  %v210_v1 = vld [vmem:[%s7351_s6 + $0x30] sm:$0xf] }
  0x20   : > { %v6188_v0 = vcombine.low %v3062_v61, %v3063_v62  ;;  %v211_v2 = vld [vmem:[%s7351_s6 + $0x34] sm:$0xf]  ;;  %v6100_v4 = vld [vmem:[%s9831_s2 + $0xcc] sm:$0xf]  ;;  %v3064_v6 = vld [vmem:[%s7351_s6 + $0x48] sm:$0xf] }
  0x21   : > { %v237_v3 = vld [vmem:[%s9831_s2 + $0x14] sm:$0xf]  ;;  %v6021_v5 = vcombine.low %v210_v1, %v211_v2  ;;  %v3065_v7 = vld [vmem:[%s7351_s6 + $0x4c] sm:$0xf]  ;;  %v6101_v10 = vld [vmem:[%s9831_s2 + $0xd0] sm:$0xf] }
  0x22   : > { %v6214_v8 = vld [vmem:[%s9830_s1 + $0x14] sm:$0xf]  ;;  %v212_v13 = vld [vmem:[%s7351_s6 + $0x38] sm:$0xf]  ;;  %v213_v15 = vld [vmem:[%s7351_s6 + $0x3c] sm:$0xf] }
  0x23   : > { %1981 = vperm.xlu1 %7092, %v6092_v11   ;;  %1969 = vperm.xlu0 %7091, %v6091_v12   ;;  %v6102_v9 = vld [vmem:[%s9831_s2 + $0xd4] sm:$0xf]  ;;  %v4254_v11 = vsel %vm1168_vm0, %v6214_v8, 0  ;;  %v6189_v12 = vcombine.low %v3064_v6, %v3065_v7  ;;  %v215_v18 = vld [vmem:[%s7351_s6 + $0x44] sm:$0xf] }
  0x24   : > { %6649 = vmatmul.mubr.msk.bf16.gmra.mrb[4].mxu0 %vm1119_vm1, %v6185_v42  ;;  %7076 = vmatprep.subr.msk.bf16.mxu0 %vm1168_vm0, %v6214_v8  ;;  %v1036_v22 = vld [vmem:[%s9830_s1] sm:$0xf]  ;;  %v217_v25 = vld [vmem:[%s7351_s6 + $0x4c] sm:$0xf]  ;;  %v218_v29 = vld [vmem:[%s7351_s6 + $0x50] sm:$0xf] }
  0x25   : > { %6652 = vmatprep.mubr.msk.bf16.mxu0 %vm1119_vm1, %v6186_v52  ;;  %6513 = vmatmul.mubr.msk.bf16.gmra.mrb[4].mxu1 %vm1119_vm1, %v6019_v53  ;;  %v1618_v23 = vsel %vm1168_vm0, %v1036_v22, 0  ;;  %v240_v28 = vld [vmem:[%s9831_s2 + $0x20] sm:$0xf]  ;;  %v219_v30 = vld [vmem:[%s7351_s6 + $0x54] sm:$0xf] }
  0x26   : > { %6516 = vmatprep.mubr.msk.bf16.mxu1 %vm1119_vm1, %v6020_v63  ;;  %6677 = vmatpush3.bf16.msra.mxu0 %v4254_v11  ;;  %v241_v31 = vld [vmem:[%s9831_s2 + $0x24] sm:$0xf]  ;;  %v6104_v32 = vld [vmem:[%s9831_s2 + $0xdc] sm:$0xf]  ;;  %v6025_v33 = vcombine.low %v218_v29, %v219_v30  ;;  %v220_v34 = vld [vmem:[%s7351_s6 + $0x58] sm:$0xf] }
  0x27   : > { %2005 = vperm.xlu1 %7092, %v6094_v16   ;;  %1993 = vperm.xlu0 %7091, %v6093_v17   ;;  %v6022_v16 = vcombine.low %v212_v13, %v213_v15  ;;  %v214_v17 = vld [vmem:[%s7351_s6 + $0x40] sm:$0xf]  ;;  %v221_v35 = vld [vmem:[%s7351_s6 + $0x5c] sm:$0xf]  ;;  %v6106_v36 = vld [vmem:[%s9831_s2 + $0xe4] sm:$0xf] }
  0x28   : > { %v6023_v21 = vcombine.low %v214_v17, %v215_v18  ;;  %7071 = vmatprep.subr.msk.bf16.mxu1 %vm1168_vm0, %v1036_v22  ;;  %v6105_v37 = vld [vmem:[%s9831_s2 + $0xe0] sm:$0xf]  ;;  %v6026_v38 = vcombine.low %v220_v34, %v221_v35  ;;  %v242_v42 = vld [vmem:[%s9831_s2 + $0x28] sm:$0xf]  ;;  %v244_v45 = vld [vmem:[%s9831_s2 + $0x30] sm:$0xf]  ;;  %v272_v18 = vlaneseq }
  0x29   : > { %6541 = vmatpush3.bf16.msra.mxu1 %v1618_v23  ;;  %v222_v39 = vld [vmem:[%s7351_s6 + $0x60] sm:$0xf]  ;;  %v245_v46 = vld [vmem:[%s9831_s2 + $0x34] sm:$0xf]  ;;  %v6108_v47 = vld [vmem:[%s9831_s2 + $0xec] sm:$0xf] }
  0x2a   : > { %v224_v48 = vld [vmem:[%s7351_s6 + $0x68] sm:$0xf]  ;;  %v225_v49 = vld [vmem:[%s7351_s6 + $0x6c] sm:$0xf]  ;;  %v226_v51 = vld [vmem:[%s7351_s6 + $0x70] sm:$0xf] }
  0x2b   : > { %2029 = vperm.xlu1 %7092, %v6096_v19   ;;  %2017 = vperm.xlu0 %7091, %v6095_v20   ;;  %v239_v19 = vld [vmem:[%s9831_s2 + $0x1c] sm:$0xf]  ;;  %v238_v20 = vld [vmem:[%s9831_s2 + $0x18] sm:$0xf]  ;;  %v6028_v50 = vcombine.low %v224_v48, %v225_v49  ;;  %v227_v52 = vld [vmem:[%s7351_s6 + $0x74] sm:$0xf] }
  0x2c   : > { %6653 = vmatmul.mubr.msk.bf16.gmra.mrb[8].mxu0 %vm1119_vm1, %v6187_v58  ;;  %v6110_v53 = vld [vmem:[%s9831_s2 + $0xf4] sm:$0xf]  ;;  %v6109_v54 = vld [vmem:[%s9831_s2 + $0xf0] sm:$0xf]  ;;  %v6029_v55 = vcombine.low %v226_v51, %v227_v52  ;;  %v6111_v58 = vld [vmem:[%s9831_s2 + $0xf8] sm:$0xf] }
  0x2d   : > { %6656 = vmatprep.mubr.msk.bf16.mxu0 %vm1119_vm1, %v6188_v0  ;;  %6517 = vmatmul.mubr.msk.bf16.gmra.mrb[8].mxu1 %vm1119_vm1, %v6021_v5  ;;  %v248_v59 = vld [vmem:[%s9831_s2 + $0x40] sm:$0xf]  ;;  %v249_v60 = vld [vmem:[%s9831_s2 + $0x44] sm:$0xf]  ;;  %v6112_v61 = vld [vmem:[%s9831_s2 + $0xfc] sm:$0xf] }
  0x2e   : > { %6520 = vmatprep.mubr.msk.bf16.mxu1 %vm1119_vm1, %v6022_v16  ;;  %v228_v62 = vld [vmem:[%s7351_s6 + $0x78] sm:$0xf]  ;;  %v229_v63 = vld [vmem:[%s7351_s6 + $0x7c] sm:$0xf]  ;;  %v230_v1 = vld [vmem:[%s7351_s6 + $0x80] sm:$0xf] }
  0x2f   : > { %2053 = vperm.xlu1 %7092, %v6098_v24   ;;  %2041 = vperm.xlu0 %7091, %v6097_v27   ;;  %v216_v24 = vld [vmem:[%s7351_s6 + $0x48] sm:$0xf]  ;;  %v6103_v27 = vld [vmem:[%s9831_s2 + $0xd8] sm:$0xf]  ;;  %v6030_v0 = vcombine.low %v228_v62, %v229_v63  ;;  %v231_v2 = vld [vmem:[%s7351_s6 + $0x84] sm:$0xf] }
  0x30   : > { %v6024_v26 = vcombine.low %v216_v24, %v217_v25  ;;  %v250_v5 = vld [vmem:[%s9831_s2 + $0x48] sm:$0xf]  ;;  %v253_v6 = vld [vmem:[%s9831_s2 + $0x54] sm:$0xf]  ;;  %v252_v7 = vld [vmem:[%s9831_s2 + $0x50] sm:$0xf] }
  0x31   : > { %v255_v8 = vld [vmem:[%s9831_s2 + $0x5c] sm:$0xf]  ;;  %v257_v11 = vld [vmem:[%s9831_s2 + $0x64] sm:$0xf]  ;;  %v259_v13 = vld [vmem:[%s9831_s2 + $0x6c] sm:$0xf] }
  0x32   : > { %v258_v15 = vld [vmem:[%s9831_s2 + $0x68] sm:$0xf]  ;;  %v7246_v16 = vmov 839922192   ;;  %v273_v22 = vshrl.u32 %v272_v18, 7 }
  0x33   : > { %278 = vperm.xlu1 %7092, %v233_v40   ;;  %266 = vperm.xlu0 %7091, %v232_v41   ;;  %v223_v40 = vld [vmem:[%s7351_s6 + $0x64] sm:$0xf]  ;;  %v243_v41 = vld [vmem:[%s9831_s2 + $0x2c] sm:$0xf]  ;;  %v270_v17 = vunpack.c.l.s4 %v7246_v16  ;;  %v263_v23 = vld [vmem:[%s9831_s2 + $0x7c] sm:$0xf] }
  0x34   : > { %6657 = vmatmul.mubr.msk.bf16.gmra.mrb[12].mxu0 %vm1119_vm1, %v6189_v12  ;;  %v256_v12 = vld [vmem:[%s9831_s2 + $0x60] sm:$0xf]  ;;  %v262_v24 = vld [vmem:[%s9831_s2 + $0x78] sm:$0xf]  ;;  %vm2231_vm2 = vsmask.f32 256 }
  0x35   : > { %6521 = vmatmul.mubr.msk.bf16.gmra.mrb[12].mxu1 %vm1119_vm1, %v6023_v21  ;;  %v271_v21 = vunpack.c.0.s8 %v270_v17  ;;  %vm2232_vm3 = vsmask.f32 4368  ;;  %vm2672_vm5 = vsmask.f32 7424  ;;  %vm648_vm6 = vsmask.f32 3328 }
  0x36   : > { %6524 = vmatprep.mubr.msk.bf16.mxu1 %vm1119_vm1, %v6024_v26  ;;  %vm7599_vm4 = vmor %vm2231_vm2, %vm2232_vm3  ;;  %vm649_vm7 = vsmask.f32 7440  ;;  %vm1416_vm9 = vsmask.f32 4352 }
  0x37   : > { %302 = vperm.xlu1 %7092, %v235_v43   ;;  %290 = vperm.xlu0 %7091, %v234_v44   ;;  %v6027_v43 = vcombine.low %v222_v39, %v223_v40  ;;  %v6107_v44 = vld [vmem:[%s9831_s2 + $0xe8] sm:$0xf]  ;;  %v7586_v25 = vsub.s32 %v271_v21, %v273_v22  ;;  %v7661_v21 = vld [vmem:[%s7351_s6 + $0x14] sm:$0xf]  ;;  %vm8031_vm8 = vmor %vm648_vm6, %vm649_vm7 }
  0x3b   : > { %2065 = vperm.xlu1 %7092, %v6099_v56   ;;  %314 = vperm.xlu0 %7091, %v236_v57   ;;  %v247_v56 = vld [vmem:[%s9831_s2 + $0x3c] sm:$0xf]  ;;  %v246_v57 = vld [vmem:[%s9831_s2 + $0x38] sm:$0xf] }
  0x3d   : > { %6525 = vmatmul.mubr.msk.bf16.gmra.mrb[16].mxu1 %vm1119_vm1, %v6025_v33 }
  0x3e   : > { %6528 = vmatprep.mubr.msk.bf16.mxu1 %vm1119_vm1, %v6026_v38 }
  0x3f   : > { %326 = vperm.xlu1 %7092, %v237_v3   ;;  %2077 = vperm.xlu0 %7091, %v6100_v4   ;;  %v6031_v3 = vcombine.low %v230_v1, %v231_v2  ;;  %v251_v4 = vld [vmem:[%s9831_s2 + $0x4c] sm:$0xf]  ;;  %v7619_v1 = vld [vmem:[%s7351_s6 + $0x18] sm:$0xf] }
  0x40   : > { %9967 = vst [vmem:[#allocation5_spill] sm:$0xff] %v7619_v1 }
  0x43   : > { %2101 = vperm.xlu1 %7092, %v6102_v9   ;;  %2089 = vperm.xlu0 %7091, %v6101_v10   ;;  %v254_v9 = vld [vmem:[%s9831_s2 + $0x58] sm:$0xf] }
  0x44   : > { %v7558_v10 = vld [vmem:[%s9830_s1 + $0x18] sm:$0xf] }
  0x45   : > { %6529 = vmatmul.mubr.msk.bf16.gmra.mrb[20].mxu1 %vm1119_vm1, %v6027_v43  ;;  %7077 = vmatprep.subr.msk.bf16.mxu0 %vm1168_vm0, %v7558_v10 }
  0x46   : > { %6532 = vmatprep.mubr.msk.bf16.mxu1 %vm1119_vm1, %v6028_v50 }
  0x47   : > { %350 = vperm.xlu1 %7092, %v239_v19   ;;  %338 = vperm.xlu0 %7091, %v238_v20   ;;  %v261_v19 = vld [vmem:[%s9831_s2 + $0x74] sm:$0xf]  ;;  %v260_v20 = vld [vmem:[%s9831_s2 + $0x70] sm:$0xf] }
  0x4b   : > { %2113 = vperm.xlu1 %7092, %v6103_v27   ;;  %362 = vperm.xlu0 %7091, %v240_v28  }
  0x4d   : > { %6533 = vmatmul.mubr.msk.bf16.gmra.mrb[24].mxu1 %vm1119_vm1, %v6029_v55  ;;  %v7607_v55 = vld [vmem:[%s7351_s6 + $0x24] sm:$0xf] }
  0x4e   : > { %6536 = vmatprep.mubr.msk.bf16.mxu1 %vm1119_vm1, %v6030_v0  ;;  %9966 = vst [vmem:[#allocation4_spill] sm:$0xff] %v7607_v55 }
  0x4f   : > { %374 = vperm.xlu1 %7092, %v241_v31   ;;  %2125 = vperm.xlu0 %7091, %v6104_v32  }
  0x53   : > { %2149 = vperm.xlu1 %7092, %v6106_v36   ;;  %2137 = vperm.xlu0 %7091, %v6105_v37  }
  0x55   : > { %6537 = vmatmul.mubr.msk.bf16.gmra.mrb[28].mxu1 %vm1119_vm1, %v6031_v3 }
  0x57   : > { %398 = vperm.xlu1 %7092, %v243_v41   ;;  %386 = vperm.xlu0 %7091, %v242_v42  }
  0x5b   : > { %2161 = vperm.xlu1 %7092, %v6107_v44   ;;  %410 = vperm.xlu0 %7091, %v244_v45  }
  0x5f   : > { %422 = vperm.xlu1 %7092, %v245_v46   ;;  %2173 = vperm.xlu0 %7091, %v6108_v47  }
  0x63   : > { %2197 = vperm.xlu1 %7092, %v6110_v53   ;;  %2185 = vperm.xlu0 %7091, %v6109_v54   ;;  %v7604_v54 = vld [vmem:[%s7351_s6 + $0x20] sm:$0xf] }
  0x64   : > { %9965 = vst [vmem:[#allocation3_spill] sm:$0xff] %v7604_v54 }
  0x67   : > { %446 = vperm.xlu1 %7092, %v247_v56   ;;  %434 = vperm.xlu0 %7091, %v246_v57   ;;  %v7610_v56 = vld [vmem:[%s7351_s6 + $0x8] sm:$0xf]  ;;  %v7613_v57 = vld [vmem:[%s7351_s6 + $0x10] sm:$0xf] }
  0x6b   : > { %2209 = vperm.xlu1 %7092, %v6111_v58   ;;  %458 = vperm.xlu0 %7091, %v248_v59  }
  0x6f   : > { %470 = vperm.xlu1 %7092, %v249_v60   ;;  %2221 = vperm.xlu0 %7091, %v6112_v61  }
  0x73   : > { %494 = vperm.xlu1 %7092, %v251_v4   ;;  %482 = vperm.xlu0 %7091, %v250_v5   ;;  %v7625_v4 = vsel %vm1168_vm0, %v7558_v10, 0 }
  0x77   : > { %518 = vperm.xlu1 %7092, %v253_v6   ;;  %506 = vperm.xlu0 %7091, %v252_v7   ;;  %v7628_v6 = vld [vmem:[%s7351_s6 + $0x14] sm:$0xf] }
  0x7b   : > { %542 = vperm.xlu1 %7092, %v255_v8   ;;  %530 = vperm.xlu0 %7091, %v254_v9   ;;  %v7635_v8 = vld [vmem:[%s7351_s6 + $0x1c] sm:$0xf] }
  0x7f   : > { %566 = vperm.xlu1 %7092, %v257_v11   ;;  %554 = vperm.xlu0 %7091, %v256_v12  }
  0x83   : > { %590 = vperm.xlu1 %7092, %v259_v13   ;;  %578 = vperm.xlu0 %7091, %v258_v15   ;;  %v7644_v13 = vld [vmem:[%s7351_s6 + $0x24] sm:$0xf]  ;;  %v7647_v15 = vld [vmem:[%s7351_s6 + $0xc] sm:$0xf] }
  0x84   : > { %9968 = vst [vmem:[#allocation6_spill] sm:$0xff] %v7644_v13 }
  0x87   : > { %614 = vperm.xlu1 %7092, %v261_v19   ;;  %602 = vperm.xlu0 %7091, %v260_v20  }
  0x8b   : > { %638 = vperm.xlu1 %7092, %v263_v23   ;;  %626 = vperm.xlu0 %7091, %v262_v24  }
  0x8e   : > { %v1874_v26 = vpop.permute.xlu1 %1873  ;;  %v1850_v27 = vpop.permute.xlu0 %1849 }
  0x8f   : > { %v1882_v28 = vrot.slane %v1874_v26, %v7586_v25  ;;  %v1858_v29 = vrot.slane %v1850_v27, %v7586_v25  ;;  %v7838_v26 = vld [vmem:[%s7351_s6 + $0x3c] sm:$0xf] }
  0x91   : > { %v2252_v30 = vshrl.u32 %v1882_v28, 16  ;;  %v2235_v31 = vshrl.u32 %v1858_v29, 16  ;;  %v2255_v38 = vshll.u32 %v1882_v28, 16  ;;  %v2238_v44 = vshll.u32 %v1858_v29, 16  ;;  %v3924_v28 = vld [vmem:[%s7351_s6 + $0x18] sm:$0xf] }
  0x92   : > { %v1886_v32 = vpop.permute.xlu1 %1885  ;;  %v1862_v33 = vpop.permute.xlu0 %1861 }
  0x93   : > { %v1894_v34 = vrot.slane %v1886_v32, %v7586_v25  ;;  %v1870_v35 = vrot.slane %v1862_v33, %v7586_v25  ;;  %v2254_v36 = vrot.slane %v2252_v30, 7  ;;  %v2237_v37 = vrot.slane %v2235_v31, 7  ;;  %v1785_v33 = vld [vmem:[%s7351_s6 + $0x18] sm:$0xf]  ;;  %v7788_v31 = vld [vmem:[%s7351_s6 + $0x34] sm:$0xf] }
  0x95   : > { %v2261_v39 = vshrl.u32 %v1894_v34, 16  ;;  %v2243_v40 = vshrl.u32 %v1870_v35, 16  ;;  %v2259_v43 = vrot.slane %v2254_v36, 4  ;;  %v2264_v45 = vshll.u32 %v1894_v34, 16  ;;  %v1786_v34 = vld [vmem:[%s7351_s6 + $0x1c] sm:$0xf] }
  0x96   : > { %v1910_v41 = vpop.permute.xlu1 %1909  ;;  %v1898_v42 = vpop.permute.xlu0 %1897  ;;  %v2246_v49 = vshll.u32 %v1870_v35, 16  ;;  %v7596_v51 = vor.u32 %v2238_v44, %v2237_v37  ;;  %v2241_v0 = vrot.slane %v2237_v37, 4  ;;  %v2257_v5 = vor.u32 %v2255_v38, %v2254_v36 }
  0x97   : > { %v1918_v46 = vrot.slane %v1910_v41, %v7586_v25  ;;  %v7593_v47 = vrot.slane %v2261_v39, 7  ;;  %v2245_v48 = vrot.slane %v2243_v40, 7  ;;  %v1906_v50 = vrot.slane %v1898_v42, %v7586_v25  ;;  %v3926_v40 = vld [vmem:[%s7351_s6 + $0x20] sm:$0xf]  ;;  %v5326_v41 = vld [vmem:[%s7351_s6 + $0x28] sm:$0xf] }
  0x98   : > { %v3955_v10 = vmul.bf16 %v7613_v57, %v7596_v51 }
  0x99   : > { %v2279_v53 = vshrl.u32 %v1918_v46, 16  ;;  %v2266_v58 = vor.u32 %v2264_v45, %v7593_v47  ;;  %v2248_v59 = vor.u32 %v2246_v49, %v2245_v48  ;;  %v2250_v60 = vrot.slane %v2245_v48, 4  ;;  %v5327_v45 = vld [vmem:[%s7351_s6 + $0x2c] sm:$0xf] }
  0x9a   : > { %v1934_v61 = vpop.permute.xlu1 %1933  ;;  %v1922_v62 = vpop.permute.xlu0 %1921  ;;  %v2270_v3 = vshrl.u32 %v1906_v50, 16  ;;  %v2282_v17 = vshll.u32 %v1918_v46, 16  ;;  %v2268_v19 = vrot.slane %v7593_v47, 4  ;;  %v2273_v22 = vshll.u32 %v1906_v50, 16  ;;  %v3927_v50 = vld [vmem:[%s7351_s6 + $0x24] sm:$0xf] }
  0x9b   : > { %v7621_v2 = vrot.slane %v2279_v53, 7  ;;  %v7632_v7 = vsel %vm7599_vm4, %v2259_v43, %v2266_v58  ;;  %v1942_v9 = vrot.slane %v1934_v61, %v7586_v25  ;;  %v1930_v11 = vrot.slane %v1922_v62, %v7586_v25  ;;  %v7692_v61 = vld [vmem:[%s7351_s6 + $0x10] sm:$0xf]  ;;  %v7695_v62 = vld [vmem:[%s7351_s6 + $0x1c] sm:$0xf] }
  0x9c   : > { %v7651_v16 = vsel %vm7599_vm4, %v2241_v0, %v2248_v59  ;;  %v7658_v20 = vsel %vm7599_vm4, %v2250_v60, %v2257_v5  ;;  %v3958_v27 = vmul.bf16 %v7635_v8, %v7632_v7  ;;  %v2272_v30 = vrot.slane %v2270_v3, 7  ;;  %9969 = vst [vmem:[#allocation7_spill] sm:$0xff] %v7692_v61  ;;  %9970 = vst [vmem:[#allocation8_spill] sm:$0xff] %v7695_v62 }
  0x9d   : > { %v2284_v29 = vor.u32 %v2282_v17, %v7621_v2  ;;  %v2297_v35 = vshrl.u32 %v1942_v9, 16  ;;  %v2288_v36 = vshrl.u32 %v1930_v11, 16  ;;  %v3956_v37 = vmul.bf16 %v7661_v21, %v7651_v16 }
  0x9e   : > { %v1958_v23 = vpop.permute.xlu1 %1957  ;;  %v1946_v24 = vpop.permute.xlu0 %1945  ;;  %v2275_v38 = vor.u32 %v2273_v22, %v2272_v30  ;;  %v2277_v39 = vrot.slane %v2272_v30, 4  ;;  %v3957_v43 = vmul.bf16 %v3924_v28, %v7658_v20  ;;  %v2286_v44 = vrot.slane %v7621_v2, 4 }
  0x9f   : > { %v1966_v42 = vrot.slane %v1958_v23, %v7586_v25  ;;  %v7683_v46 = vrot.slane %v2297_v35, 7  ;;  %v2290_v47 = vrot.slane %v2288_v36, 7  ;;  %v2300_v53 = vshll.u32 %v1942_v9, 16  ;;  %v7699_v9 = vld [vmem:[%s7351_s6 + $0x20] sm:$0xf] }
  0xa0   : > { %v2276_v48 = vsel %vm7599_vm4, %v2268_v19, %v2275_v38  ;;  %v2285_v49 = vsel %vm7599_vm4, %v2277_v39, %v2284_v29  ;;  %v1954_v58 = vrot.slane %v1946_v24, %v7586_v25  ;;  %v2291_v3 = vshll.u32 %v1930_v11, 16  ;;  %9971 = vst [vmem:[#allocation9_spill] sm:$0xff] %v7699_v9  ;;  %v7795_v11 = vld [vmem:[%s7351_s6 + $0x3c] sm:$0xf]  ;;  %v7823_v29 = vld [vmem:[%s7351_s6 + $0x34] sm:$0xf] }
  0xa1   : > { %v2558_v0 = vmul.bf16 %v2276_v48, %v1785_v33  ;;  %v2559_v2 = vmul.bf16 %v2285_v49, %v1786_v34  ;;  %v2315_v5 = vshrl.u32 %v1966_v42, 16  ;;  %v3959_v8 = vmul.bf16 %v3926_v40, %v2276_v48  ;;  %v7710_v34 = vld [vmem:[%s7351_s6 + $0x20] sm:$0xf]  ;;  %9985 = vst [vmem:[#allocation23_spill] sm:$0xff] %v7795_v11  ;;  %9987 = vst [vmem:[#allocation25_spill] sm:$0xff] %v7823_v29 }
  0xa2   : > { %v1982_v59 = vpop.permute.xlu1 %1981  ;;  %v1970_v60 = vpop.permute.xlu0 %1969  ;;  %v5359_v17 = vmul.bf16 %v5326_v41, %v2276_v48  ;;  %v5360_v19 = vmul.bf16 %v5327_v45, %v2285_v49  ;;  %v2302_v21 = vor.u32 %v2300_v53, %v7683_v46  ;;  %v3960_v23 = vmul.bf16 %v3927_v50, %v2285_v49  ;;  %9974 = vst [vmem:[#allocation12_spill] sm:$0xff] %v7710_v34  ;;  %v7723_v41 = vld [vmem:[%s7351_s6 + $0x24] sm:$0xf]  ;;  %v7150_v29 = vld [vmem:[%s7351_s6 + $0x20] sm:$0xf] }
  0xa3   : > { %v7701_v22 = vcombine.low %v2558_v0, %v2559_v2  ;;  %v2293_v24 = vor.u32 %v2291_v3, %v2290_v47  ;;  %v2295_v28 = vrot.slane %v2290_v47, 4  ;;  %v2306_v33 = vshrl.u32 %v1954_v58, 16  ;;  %9976 = vst [vmem:[#allocation14_spill] sm:$0xff] %v7723_v41  ;;  %v7745_v3 = vld [vmem:[%s7351_s6 + $0x2c] sm:$0xf] }
  0xa4   : > { %v7707_v30 = vcombine.low %v5359_v17, %v5360_v19  ;;  %v7716_v36 = vrot.slane %v2315_v5, 7  ;;  %v1990_v38 = vrot.slane %v1982_v59, %v7586_v25  ;;  %v1978_v39 = vrot.slane %v1970_v60, %v7586_v25  ;;  %v7740_v59 = vld [vmem:[%s7351_s6 + $0x28] sm:$0xf] }
  0xa5   : > { %9972 = vst [vmem:[#allocation10_spill] sm:$0xff] %v7701_v22  ;;  %v7714_v35 = vsel %vm7599_vm4, %v2286_v44, %v2293_v24  ;;  %v7727_v45 = vsel %vm7599_vm4, %v2295_v28, %v2302_v21  ;;  %v7732_v48 = vcombine.low %v3955_v10, %v3956_v37  ;;  %v7734_v49 = vcombine.low %v3957_v43, %v3958_v27  ;;  %v7750_v27 = vld [vmem:[%s7351_s6 + $0x30] sm:$0xf]  ;;  %v7753_v37 = vld [vmem:[%s7351_s6 + $0x34] sm:$0xf] }
  0xa6   : > { %9973 = vst [vmem:[#allocation11_spill] sm:$0xff] %v7707_v30  ;;  %9975 = vst [vmem:[#allocation13_spill] sm:$0xff] %v7714_v35  ;;  %v2006_v47 = vpop.permute.xlu1 %2005  ;;  %v1994_v44 = vpop.permute.xlu0 %1993  ;;  %v7736_v50 = vcombine.low %v3959_v8, %v3960_v23  ;;  %v2304_v53 = vrot.slane %v7683_v46, 4  ;;  %v2318_v60 = vshll.u32 %v1966_v42, 16  ;;  %v2309_v0 = vshll.u32 %v1954_v58, 16 }
  0xa7   : > { %9977 = vst [vmem:[#allocation15_spill] sm:$0xff] %v7727_v45  ;;  %v2308_v5 = vrot.slane %v2306_v33, 7  ;;  %v2333_v17 = vshrl.u32 %v1990_v38, 16  ;;  %v2324_v57 = vshrl.u32 %v1978_v39, 16  ;;  %9978 = vst [vmem:[#allocation16_spill] sm:$0xff] %v7750_v27  ;;  %v2014_v43 = vrot.slane %v2006_v47, %v7586_v25 }
  0xa8   : > { %9979 = vst [vmem:[#allocation17_spill] sm:$0xff] %v7753_v37  ;;  %v2320_v42 = vor.u32 %v2318_v60, %v7716_v36  ;;  %v2002_v46 = vrot.slane %v1994_v44, %v7586_v25  ;;  %v3961_v23 = vmul.bf16 %v7740_v59, %v7714_v35  ;;  %v3962_v24 = vmul.bf16 %v7745_v3, %v7727_v45  ;;  %v7769_v60 = vld [vmem:[%s7351_s6 + $0x28] sm:$0xf]  ;;  %v4463_v45 = vld [vmem:[%s7351_s6 + $0x4c] sm:$0xf] }
  0xa9   : > { %v2311_v58 = vor.u32 %v2309_v0, %v2308_v5  ;;  %v2313_v8 = vrot.slane %v2308_v5, 4  ;;  %v7758_v19 = vrot.slane %v2333_v17, 7  ;;  %v2326_v21 = vrot.slane %v2324_v57, 7  ;;  %9980 = vst [vmem:[#allocation18_spill] sm:$0xff] %v7769_v60  ;;  %v7772_v0 = vld [vmem:[%s7351_s6 + $0x2c] sm:$0xf] }
  0xaa   : > { %v2351_v28 = vshrl.u32 %v2014_v43, 16  ;;  %v2342_v33 = vshrl.u32 %v2002_v46, 16  ;;  %9981 = vst [vmem:[#allocation19_spill] sm:$0xff] %v7772_v0  ;;  %v2336_v5 = vshll.u32 %v1990_v38, 16  ;;  %v2327_v59 = vshll.u32 %v1978_v39, 16 }
  0xab   : > { %v2322_v3 = vrot.slane %v7716_v36, 4  ;;  %v7777_v17 = vsel %vm7599_vm4, %v2304_v53, %v2311_v58  ;;  %v7780_v57 = vld [vmem:[%s7351_s6 + $0x30] sm:$0xf]  ;;  %v2354_v47 = vshll.u32 %v2014_v43, 16  ;;  %v4074_v40 = vshrl.u32 %v7732_v48, 16 }
  0xac   : > { %9982 = vst [vmem:[#allocation20_spill] sm:$0xff] %v7777_v17  ;;  %v7785_v44 = vsel %vm7599_vm4, %v2313_v8, %v2320_v42  ;;  %v7791_v38 = vld [vmem:[%s7351_s6 + $0x38] sm:$0xf]  ;;  %v2338_v39 = vor.u32 %v2336_v5, %v7758_v19  ;;  %v2329_v36 = vor.u32 %v2327_v59, %v2326_v21  ;;  %v2331_v18 = vrot.slane %v2326_v21, 4  ;;  %v2030_v8 = vpop.permute.xlu1 %2029  ;;  %v7153_v0 = vld [vmem:[%s7351_s6 + $0x28] sm:$0xf] }
  0xad   : > { %9983 = vst [vmem:[#allocation21_spill] sm:$0xff] %v7785_v44  ;;  %9984 = vst [vmem:[#allocation22_spill] sm:$0xff] %v7791_v38  ;;  %v7797_v53 = vrot.slane %v2351_v28, 7  ;;  %v2344_v43 = vrot.slane %v2342_v33, 7  ;;  %v4076_v58 = vshll.u32 %v7732_v48, 16  ;;  %v4081_v42 = vshll.u32 %v7734_v49, 16  ;;  %v2018_v28 = vpop.permute.xlu0 %2017 }
  0xae   : > { %v2340_v5 = vrot.slane %v7758_v19, 4  ;;  %v2345_v59 = vshll.u32 %v2002_v46, 16  ;;  %v4089_v21 = vshll.u32 %v7736_v50, 16  ;;  %v6113_v48 = vld [vmem:[%s9830_s1 + $0x8] sm:$0xf]  ;;  %v3963_v2 = vmul.bf16 %v7780_v57, %v7777_v17 }
  0xaf   : > { %v3964_v63 = vmul.bf16 %v7788_v31, %v7785_v44  ;;  %v7817_v19 = vld [vmem:[%s7351_s6 + $0x30] sm:$0xf]  ;;  %7072 = vmatprep.subr.msk.bf16.mxu1 %vm1168_vm0, %v6113_v48  ;;  %v7827_v33 = vsel %vm7599_vm4, %v2322_v3, %v2329_v36  ;;  %v7831_v31 = vsel %vm7599_vm4, %v2331_v18, %v2338_v39  ;;  %v7834_v57 = vld [vmem:[%s7351_s6 + $0x38] sm:$0xf]  ;;  %v4085_v46 = vshrl.u32 %v7734_v49, 16 }
  0xb0   : > { %9986 = vst [vmem:[#allocation24_spill] sm:$0xff] %v7817_v19  ;;  %9988 = vst [vmem:[#allocation26_spill] sm:$0xff] %v7827_v33  ;;  %v7841_v48 = vld [vmem:[%s7351_s6 + $0x40] sm:$0xf]  ;;  %v2356_v10 = vor.u32 %v2354_v47, %v7797_v53  ;;  %v2347_v12 = vor.u32 %v2345_v59, %v2344_v43  ;;  %v4078_v32 = vrot.slane %v4076_v58, 1  ;;  %v4083_v14 = vrot.slane %v4081_v42, 1  ;;  %v2054_v30 = vpop.permute.xlu1 %2053 }
  0xb1   : > { %9989 = vst [vmem:[#allocation27_spill] sm:$0xff] %v7831_v31  ;;  %9990 = vst [vmem:[#allocation28_spill] sm:$0xff] %v7841_v48  ;;  %v7845_v38 = vld [vmem:[%s7351_s6 + $0x44] sm:$0xf]  ;;  %v2349_v3 = vrot.slane %v2344_v43, 4  ;;  %v4091_v36 = vrot.slane %v4089_v21, 1  ;;  %v2038_v18 = vrot.slane %v2030_v8, %v7586_v25  ;;  %v2026_v39 = vrot.slane %v2018_v28, %v7586_v25  ;;  %v2042_v8 = vpop.permute.xlu0 %2041 }
  0xb2   : > { %9991 = vst [vmem:[#allocation29_spill] sm:$0xff] %v7845_v38  ;;  %v4079_v11 = vor.u32 %v4078_v32, %v4074_v40  ;;  %v4087_v27 = vor.u32 %v4085_v46, %v4083_v14  ;;  %v6218_v37 = vcombine.low %v3961_v23, %v3962_v24  ;;  %v7863_v40 = vsel %vm7599_vm4, %v2340_v5, %v2347_v12  ;;  %v7873_v42 = vld [vmem:[%s7351_s6 + $0x38] sm:$0xf]  ;;  %v7876_v32 = vld [vmem:[%s7351_s6 + $0x3c] sm:$0xf] }
  0xb3   : > { %9992 = vst [vmem:[#allocation30_spill] sm:$0xff] %v7863_v40  ;;  %v7869_v59 = vsel %vm7599_vm4, %v2349_v3, %v2356_v10  ;;  %v2369_v21 = vshrl.u32 %v2038_v18, 16  ;;  %v2372_v28 = vshll.u32 %v2038_v18, 16  ;;  %v2360_v46 = vshrl.u32 %v2026_v39, 16  ;;  %9994 = vst [vmem:[#allocation32_spill] sm:$0xff] %v7873_v42 }
  0xb4   : > { %v4084_v23 = vsel %vm2672_vm5, %v4079_v11, %v4083_v14  ;;  %v4092_v24 = vsel %vm2672_vm5, %v4087_v27, %v4091_v36  ;;  %9993 = vst [vmem:[#allocation31_spill] sm:$0xff] %v7869_v59  ;;  %9995 = vst [vmem:[#allocation33_spill] sm:$0xff] %v7876_v32  ;;  %v4093_v14 = vshrl.u32 %v7736_v50, 16  ;;  %v4097_v12 = vshll.u32 %v6218_v37, 16  ;;  %v7883_v27 = vld [vmem:[%s7351_s6 + $0x40] sm:$0xf]  ;;  %v279_v43 = vpop.permute.xlu1 %278 }
  0xb5   : > { %6678 = vmatprep.mubr.msk.bf16.mxu0 %vm1119_vm1, %v4084_v23  ;;  %v2062_v11 = vrot.slane %v2054_v30, %v7586_v25  ;;  %v2050_v10 = vrot.slane %v2042_v8, %v7586_v25  ;;  %v7885_v5 = vrot.slane %v2369_v21, 7  ;;  %v2362_v3 = vrot.slane %v2360_v46, 7  ;;  %v7892_v50 = vld [vmem:[%s7351_s6 + $0x44] sm:$0xf]  ;;  %v7897_v58 = vld [vmem:[%s7351_s6 + $0x48] sm:$0xf] }
  0xb6   : > { %6679 = vmatmul.mubr.msk.bf16.vlgmr.msra.gmra.mrb[0].mxu0 %vm1119_vm1, %v4092_v24  ;;  %v2363_v18 = vshll.u32 %v2026_v39, 16  ;;  %v7887_v23 = vcombine.low %v3963_v2, %v3964_v63  ;;  %v2358_v24 = vrot.slane %v7797_v53, 4  ;;  %v4095_v49 = vor.u32 %v4093_v14, %v4091_v36  ;;  %9996 = vst [vmem:[#allocation34_spill] sm:$0xff] %v7897_v58  ;;  %v7900_v21 = vld [vmem:[%s7351_s6 + $0x4c] sm:$0xf] }
  0xb7   : > { %6711 = vmatpush3.bf16.msra.mxu0 %v7625_v4  ;;  %v4099_v47 = vrot.slane %v4097_v12, 1  ;;  %v2387_v30 = vshrl.u32 %v2062_v11, 16  ;;  %9997 = vst [vmem:[#allocation35_spill] sm:$0xff] %v7900_v21  ;;  %v2374_v63 = vor.u32 %v2372_v28, %v7885_v5  ;;  %v2367_v2 = vrot.slane %v2362_v3, 4  ;;  %v7922_v36 = vld [vmem:[%s7351_s6 + $0x44] sm:$0xf] }
  0xb8   : > { %v2365_v4 = vor.u32 %v2363_v18, %v2362_v3  ;;  %v2378_v46 = vshrl.u32 %v2050_v10, 16  ;;  %v4101_v28 = vshrl.u32 %v6218_v37, 16  ;;  %v4105_v18 = vshll.u32 %v7887_v23, 16  ;;  %v267_v3 = vpop.permute.xlu0 %266  ;;  %9999 = vst [vmem:[#allocation37_spill] sm:$0xff] %v7922_v36  ;;  %v303_v9 = vpop.permute.xlu1 %302  ;;  %v4464_v22 = vld [vmem:[%s7351_s6 + $0x50] sm:$0xf] }
  0xb9   : > { %v4100_v39 = vsel %vm2672_vm5, %v4095_v49, %v4099_v47  ;;  %v7911_v12 = vrot.slane %v2387_v30, 7  ;;  %v7919_v49 = vld [vmem:[%s7351_s6 + $0x40] sm:$0xf]  ;;  %v7930_v37 = vsel %vm7599_vm4, %v2367_v2, %v2374_v63  ;;  %v2390_v8 = vshll.u32 %v2062_v11, 16  ;;  %v7955_v2 = vld [vmem:[%s7351_s6 + $0x50] sm:$0xf] }
  0xba   : > { %6682 = vmatprep.mubr.msk.bf16.mxu0 %vm1119_vm1, %v4100_v39  ;;  %9998 = vst [vmem:[#allocation36_spill] sm:$0xff] %v7919_v49  ;;  %v7926_v30 = vsel %vm7599_vm4, %v2358_v24, %v2365_v4  ;;  %10001 = vst [vmem:[#allocation39_spill] sm:$0xff] %v7930_v37  ;;  %v2376_v39 = vrot.slane %v7885_v5, 4  ;;  %v2381_v14 = vshll.u32 %v2050_v10, 16  ;;  %v4103_v53 = vor.u32 %v4101_v28, %v4099_v47  ;;  %v7940_v4 = vld [vmem:[%s7351_s6 + $0x48] sm:$0xf] }
  0xbb   : > { %10000 = vst [vmem:[#allocation38_spill] sm:$0xff] %v7926_v30  ;;  %v2380_v58 = vrot.slane %v2378_v46, 7  ;;  %v4107_v21 = vrot.slane %v4105_v18, 1  ;;  %v287_v48 = vrot.slane %v279_v43, %v7586_v25  ;;  %v275_v38 = vrot.slane %v267_v3, %v7586_v25  ;;  %v7943_v5 = vld [vmem:[%s7351_s6 + $0x4c] sm:$0xf]  ;;  %10004 = vst [vmem:[#allocation40_spill] sm:$0xff] %v7955_v2 }
  0xbc   : > { %v2392_v11 = vor.u32 %v2390_v8, %v7911_v12  ;;  %v10002_v47 = vmul.bf16 %v7838_v26, %v7831_v31  ;;  %v10003_v43 = vmul.bf16 %v7834_v57, %v7827_v33  ;;  %v311_v26 = vrot.slane %v303_v9, %v7586_v25  ;;  %v291_v13 = vpop.permute.xlu0 %290 }
  0xbd   : > { %v2383_v46 = vor.u32 %v2381_v14, %v2380_v58  ;;  %v2385_v28 = vrot.slane %v2380_v58, 4  ;;  %v4108_v18 = vsel %vm2672_vm5, %v4103_v53, %v4107_v21  ;;  %v661_v8 = vshll.u32 %v287_v48, 16 }
  0xbe   : > { %v7952_v10 = vcombine.low %v10003_v43, %v10002_v47  ;;  %6683 = vmatmul.mubr.msk.bf16.gmra.mrb[4].mxu0 %vm1119_vm1, %v4108_v18  ;;  %v665_v3 = vshrl.u32 %v287_v48, 16  ;;  %v652_v24 = vshll.u32 %v275_v38, 16  ;;  %v655_v63 = vshrl.u32 %v275_v38, 16  ;;  %v7965_v47 = vld [vmem:[%s7351_s6 + $0x54] sm:$0xf] }
  0xbf   : > { %10005 = vst [vmem:[#allocation41_spill] sm:$0xff] %v7965_v47  ;;  %v4109_v58 = vshrl.u32 %v7887_v23, 16  ;;  %v7972_v43 = vld [vmem:[%s7351_s6 + $0x48] sm:$0xf]  ;;  %v7975_v38 = vld [vmem:[%s7351_s6 + $0x4c] sm:$0xf]  ;;  %v7979_v9 = vsel %vm7599_vm4, %v2376_v39, %v2383_v46  ;;  %v7983_v18 = vsel %vm7599_vm4, %v2385_v28, %v2392_v11  ;;  %v299_v2 = vrot.slane %v291_v13, %v7586_v25  ;;  %v2066_v13 = vpop.permute.xlu1 %2065 }
  0xc0   : > { %v4113_v53 = vshll.u32 %v7952_v10, 16  ;;  %10006 = vst [vmem:[#allocation42_spill] sm:$0xff] %v7972_v43  ;;  %10007 = vst [vmem:[#allocation43_spill] sm:$0xff] %v7975_v38  ;;  %v663_v23 = vrot.slane %v661_v8, 5  ;;  %v667_v57 = vrot.slane %v665_v3, 4  ;;  %v7985_v14 = vrot.slane %v652_v24, 5 }
  0xc1   : > { %10008 = vst [vmem:[#allocation44_spill] sm:$0xff] %v7979_v9  ;;  %10009 = vst [vmem:[#allocation45_spill] sm:$0xff] %v7983_v18  ;;  %v4111_v48 = vor.u32 %v4109_v58, %v4107_v21  ;;  %v657_v1 = vrot.slane %v655_v63, 4  ;;  %v681_v49 = vshll.u32 %v311_v26, 16  ;;  %v685_v36 = vshrl.u32 %v311_v26, 16 }
  0xc2   : > { %10010 = vst [vmem:[#allocation46_spill] sm:$0xff] %v7985_v14  ;;  %v4115_v62 = vrot.slane %v4113_v53, 1  ;;  %v7996_v28 = vld [vmem:[%s7351_s6 + $0x50] sm:$0xf]  ;;  %v7999_v21 = vld [vmem:[%s7351_s6 + $0x54] sm:$0xf]  ;;  %v668_v8 = vor.u32 %v667_v57, %v663_v23  ;;  %v315_v53 = vpop.permute.xlu0 %314  ;;  %v10013_v47 = vmul.bf16 %v7892_v50, %v7869_v59  ;;  %v10014_v57 = vmul.bf16 %v7883_v27, %v7863_v40 }
  0xc3   : > { %v8002_v63 = vld [vmem:[%s7351_s6 + $0x58] sm:$0xf]  ;;  %v658_v3 = vor.u32 %v657_v1, %v7985_v14  ;;  %v683_v58 = vrot.slane %v681_v49, 5  ;;  %v8007_v39 = vld [vmem:[%s7351_s6 + $0x5c] sm:$0xf]  ;;  %v687_v11 = vrot.slane %v685_v36, 4  ;;  %v323_v49 = vrot.slane %v315_v53, %v7586_v25  ;;  %v327_v59 = vpop.permute.xlu1 %326 }
  0xc4   : > { %10011 = vst [vmem:[#allocation47_spill] sm:$0xff] %v8002_v63  ;;  %v4116_v26 = vsel %vm2672_vm5, %v4111_v48, %v4115_v62  ;;  %10012 = vst [vmem:[#allocation48_spill] sm:$0xff] %v8007_v39  ;;  %v671_v24 = vshll.u32 %v299_v2, 16  ;;  %v675_v46 = vshrl.u32 %v299_v2, 16  ;;  %v8016_v43 = vcombine.low %v10014_v57, %v10013_v47  ;;  %v8023_v48 = vld [vmem:[%s7351_s6 + $0x4] sm:$0x8] }
  0xc5   : > { %6686 = vmatprep.mubr.msk.bf16.mxu0 %vm1119_vm1, %v4116_v26  ;;  %v659_v26 = vrot.slane %v658_v3, 4  ;;  %v8026_v36 = vld [vmem:[%s7351_s6 + $0xc] sm:$0x8]  ;;  %v2074_v2 = vrot.slane %v2066_v13, %v7586_v25  ;;  %v8036_v27 = vld [vmem:[%s7351_s6 + $0x14] sm:$0x8]  ;;  %v669_v38 = vrot.slane %v668_v8, 4 }
  0xc6   : > { %10015 = vst [vmem:[#allocation49_spill] sm:$0xff] %v8026_v36  ;;  %v673_v47 = vrot.slane %v671_v24, 5  ;;  %v677_v57 = vrot.slane %v675_v46, 4  ;;  %v4121_v1 = vshll.u32 %v8016_v43, 16  ;;  %v4117_v13 = vshrl.u32 %v7952_v10, 16 }
  0xc7   : > { %v2396_v42 = vshrl.u32 %v2074_v2, 16  ;;  %v688_v24 = vor.u32 %v687_v11, %v683_v58  ;;  %v8051_v53 = vsel %vm8031_vm8, %v659_v26, %v663_v23  ;;  %v2399_v39 = vshll.u32 %v2074_v2, 16  ;;  %v4451_v23 = vld [vmem:[%s7351_s6 + $0x1c] sm:$0xf]  ;;  %v8071_v2 = vld [vmem:[%s7351_s6 + $0x18] sm:$0xf] }
  0xc8   : > { %v678_v8 = vor.u32 %v677_v57, %v673_v47  ;;  %v4119_v3 = vor.u32 %v4117_v13, %v4115_v62  ;;  %v4123_v63 = vrot.slane %v4121_v1, 1  ;;  %v691_v32 = vshll.u32 %v323_v49, 16  ;;  %v2078_v1 = vpop.permute.xlu0 %2077 }
  0xc9   : > { %v8055_v40 = vrot.slane %v2396_v42, 7  ;;  %v8059_v11 = vsel %vm8031_vm8, %v669_v38, %v673_v47  ;;  %v695_v26 = vshrl.u32 %v323_v49, 16  ;;  %v10018_v10 = vmul.bf16 %v7943_v5, %v7930_v37  ;;  %v8076_v49 = vld [vmem:[%s7351_s6 + $0x8] sm:$0xf]  ;;  %v7146_v37 = vld [vmem:[%s7351_s6 + $0x10] sm:$0xf] }
  0xca   : > { %v679_v46 = vrot.slane %v678_v8, 4  ;;  %v10019_v62 = vmul.bf16 %v7940_v4, %v7926_v30  ;;  %v689_v57 = vrot.slane %v688_v24, 4  ;;  %v4124_v38 = vsel %vm2672_vm5, %v4119_v3, %v4123_v63  ;;  %v7142_v3 = vld [vmem:[%s7351_s6 + $0x14] sm:$0xf] }
  0xcb   : > { %v2401_v47 = vor.u32 %v2399_v39, %v8055_v40  ;;  %v693_v13 = vrot.slane %v691_v32, 5  ;;  %6687 = vmatmul.mubr.msk.bf16.gmra.mrb[8].mxu0 %vm1119_vm1, %v4124_v38  ;;  %v3084_v39 = vmul.bf16 %v7142_v3, %v8059_v11  ;;  %v7143_v32 = vld [vmem:[%s7351_s6 + $0x18] sm:$0xf]  ;;  %v8101_v38 = vld [vmem:[%s7351_s6 + $0xc] sm:$0xf]  ;;  %v10023_v30 = vrot.slane %v7911_v12, 4 }
  0xcc   : > { %v8068_v42 = vcombine.low %v10019_v62, %v10018_v10  ;;  %v8082_v4 = vsel %vm8031_vm8, %v679_v46, %v683_v58  ;;  %v697_v10 = vrot.slane %v695_v26, 4  ;;  %v4484_v62 = vmul.bf16 %v4451_v23, %v8059_v11  ;;  %v8094_v58 = vld [vmem:[%s7351_s6 + $0x10] sm:$0xf] }
  0xcd   : > { %v3085_v8 = vmul.bf16 %v7143_v32, %v8082_v4  ;;  %v4485_v5 = vmul.bf16 %v7604_v54, %v8082_v4  ;;  %10020 = vst [vmem:[#allocation50_spill] sm:$0xff] %v8094_v58  ;;  %v4125_v32 = vshrl.u32 %v8016_v43, 16  ;;  %v8111_v54 = vld [vmem:[%s7351_s6 + $0x50] sm:$0xf]  ;;  %v8117_v46 = vsel %vm7599_vm4, %v10023_v30, %v2401_v47  ;;  %v2102_v58 = vpop.permute.xlu1 %2101 }
  0xce   : > { %v4129_v24 = vshll.u32 %v8068_v42, 16  ;;  %10022 = vst [vmem:[#allocation52_spill] sm:$0xff] %v8111_v54  ;;  %10024 = vst [vmem:[#allocation53_spill] sm:$0xff] %v8117_v46  ;;  %v698_v26 = vor.u32 %v697_v10, %v693_v13  ;;  %v1006_v19 = vmul.bf16 %v7146_v37, %v8082_v4  ;;  %v2403_v3 = vrot.slane %v8055_v40, 4  ;;  %v7147_v4 = vld [vmem:[%s7351_s6 + $0x14] sm:$0xf] }
  0xcf   : > { %v8106_v36 = vcombine.low %v3084_v39, %v3085_v8  ;;  %v8108_v23 = vcombine.low %v4484_v62, %v4485_v5  ;;  %v4127_v43 = vor.u32 %v4125_v32, %v4123_v63  ;;  %v2090_v5 = vpop.permute.xlu0 %2089  ;;  %v694_v8 = vsel %vm8031_vm8, %v689_v57, %v693_v13 }
  0xd0   : > { %v4131_v39 = vrot.slane %v4129_v24, 1  ;;  %v335_v12 = vrot.slane %v327_v59, %v7586_v25  ;;  %v2086_v62 = vrot.slane %v2078_v1, %v7586_v25  ;;  %v10025_v30 = vmul.bf16 %v7999_v21, %v7983_v18 }
  0xd1   : > { %10021 = vst [vmem:[#allocation51_spill] sm:$0xff] %v8106_v36  ;;  %v10026_v47 = vmul.bf16 %v7996_v28, %v7979_v9  ;;  %v699_v63 = vrot.slane %v698_v26, 4  ;;  %v2110_v59 = vrot.slane %v2102_v58, %v7586_v25  ;;  %v2098_v28 = vrot.slane %v2090_v5, %v7586_v25  ;;  %v8146_v36 = vld [vmem:[%s7351_s6 + $0x58] sm:$0xf]  ;;  %v351_v9 = vpop.permute.xlu1 %350 }
  0xd2   : > { %v4132_v57 = vsel %vm2672_vm5, %v4127_v43, %v4131_v39  ;;  %v701_v1 = vshll.u32 %v335_v12, 16  ;;  %v705_v21 = vshrl.u32 %v335_v12, 16  ;;  %v2405_v13 = vshrl.u32 %v2086_v62, 16  ;;  %v8149_v12 = vld [vmem:[%s7351_s6 + $0x60] sm:$0xf] }
  0xd3   : > { %v8132_v37 = vcombine.low %v10026_v47, %v10025_v30  ;;  %6690 = vmatprep.mubr.msk.bf16.mxu0 %vm1119_vm1, %v4132_v57  ;;  %v1007_v10 = vmul.bf16 %v7147_v4, %v694_v8  ;;  %v4133_v24 = vshrl.u32 %v8068_v42, 16  ;;  %v2423_v32 = vshrl.u32 %v2110_v59, 16  ;;  %v7148_v30 = vld [vmem:[%s7351_s6 + $0x1c] sm:$0xf]  ;;  %v4454_v47 = vld [vmem:[%s7351_s6 + $0x28] sm:$0xf] }
  0xd4   : > { %v3086_v43 = vmul.bf16 %v7148_v30, %v694_v8  ;;  %v703_v58 = vrot.slane %v701_v1, 5  ;;  %v2407_v57 = vrot.slane %v2405_v13, 7  ;;  %v2408_v40 = vshll.u32 %v2086_v62, 16  ;;  %10027 = vst [vmem:[#allocation54_spill] sm:$0xff] %v8149_v12  ;;  %v7149_v13 = vld [vmem:[%s7351_s6 + $0x18] sm:$0xf] }
  0xd5   : > { %v4137_v26 = vshll.u32 %v8132_v37, 16  ;;  %v4486_v5 = vmul.bf16 %v7607_v55, %v694_v8  ;;  %v707_v4 = vrot.slane %v705_v21, 4  ;;  %v4135_v54 = vor.u32 %v4133_v24, %v4131_v39  ;;  %v339_v24 = vpop.permute.xlu0 %338 }
  0xd6   : > { %v704_v30 = vsel %vm8031_vm8, %v699_v63, %v703_v58  ;;  %v2410_v18 = vor.u32 %v2408_v40, %v2407_v57  ;;  %v8156_v1 = vrot.slane %v2423_v32, 7  ;;  %v2414_v33 = vshrl.u32 %v2098_v28, 16 }
  0xd7   : > { %v8152_v42 = vrot.slane %v4137_v26, 1  ;;  %v1008_v62 = vmul.bf16 %v7149_v13, %v704_v30  ;;  %v3087_v31 = vmul.bf16 %v7150_v29, %v704_v30  ;;  %v4487_v60 = vmul.bf16 %v4454_v47, %v704_v30  ;;  %v8174_v13 = vld [vmem:[%s7351_s6 + $0x54] sm:$0xf] }
  0xd8   : > { %v2426_v40 = vshll.u32 %v2110_v59, 16  ;;  %v359_v21 = vrot.slane %v351_v9, %v7586_v25  ;;  %v708_v26 = vor.u32 %v707_v4, %v703_v58  ;;  %10029 = vst [vmem:[#allocation55_spill] sm:$0xff] %v8174_v13  ;;  %v8178_v63 = vsel %vm7599_vm4, %v2403_v3, %v2410_v18  ;;  %v8181_v59 = vld [vmem:[%s7351_s6 + $0x5c] sm:$0xf] }
  0xd9   : > { %v4140_v39 = vsel %vm2672_vm5, %v4135_v54, %v8152_v42  ;;  %v6050_v29 = vcombine.low %v1007_v10, %v1008_v62  ;;  %v6150_v32 = vcombine.low %v3086_v43, %v3087_v31  ;;  %v6251_v47 = vcombine.low %v4486_v5, %v4487_v60  ;;  %10030 = vst [vmem:[#allocation56_spill] sm:$0xff] %v8178_v63  ;;  %v8184_v31 = vld [vmem:[%s7351_s6 + $0x64] sm:$0xf] }
  0xda   : > { %6691 = vmatmul.mubr.msk.bf16.gmra.mrb[12].mxu0 %vm1119_vm1, %v4140_v39  ;;  %v10028_v54 = vmul.bf16 %v8101_v38, %v8059_v11  ;;  %v2416_v39 = vrot.slane %v2414_v33, 7  ;;  %v2417_v9 = vshll.u32 %v2098_v28, 16  ;;  %10031 = vst [vmem:[#allocation57_spill] sm:$0xff] %v8184_v31  ;;  %v2428_v60 = vor.u32 %v2426_v40, %v8156_v1  ;;  %v8210_v28 = vld [vmem:[%s7351_s6 + $0x5c] sm:$0xf] }
  0xdb   : > { %v1435_v8 = vshrl.u32 %v6050_v29, 16  ;;  %v1438_v58 = vshll.u32 %v6050_v29, 16  ;;  %v3218_v10 = vshrl.u32 %v6150_v32, 16  ;;  %v3221_v11 = vshll.u32 %v6150_v32, 16  ;;  %v2114_v29 = vpop.permute.xlu1 %2113  ;;  %v363_v32 = vpop.permute.xlu0 %362  ;;  %10036 = vst [vmem:[#allocation62_spill] sm:$0xff] %v8210_v28 }
  0xdc   : > { %v8171_v30 = vcombine.low %v10028_v54, %v1006_v19  ;;  %v2419_v19 = vor.u32 %v2417_v9, %v2416_v39  ;;  %v2421_v38 = vrot.slane %v2416_v39, 4  ;;  %v721_v43 = vshll.u32 %v359_v21, 16 }
  0xdd   : > { %v709_v5 = vrot.slane %v708_v26, 4  ;;  %v4618_v18 = vshrl.u32 %v6251_v47, 16  ;;  %v2412_v3 = vrot.slane %v2407_v57, 4  ;;  %v4621_v33 = vshll.u32 %v6251_v47, 16  ;;  %v8201_v47 = vld [vmem:[%s7351_s6 + $0x58] sm:$0xf] }
  0xde   : > { %v8194_v54 = vrot.slane %v1435_v8, 3  ;;  %v8196_v26 = vrot.slane %v1438_v58, 4  ;;  %v8198_v57 = vrot.slane %v3218_v10, 3  ;;  %10033 = vst [vmem:[#allocation59_spill] sm:$0xff] %v8201_v47  ;;  %v8207_v9 = vrot.slane %v3221_v11, 4 }
  0xdf   : > { %v8205_v39 = vsel %vm7599_vm4, %v2412_v3, %v2419_v19  ;;  %v8214_v40 = vsel %vm7599_vm4, %v2421_v38, %v2428_v60  ;;  %v723_v8 = vrot.slane %v721_v43, 5  ;;  %v725_v58 = vshrl.u32 %v359_v21, 16  ;;  %v8219_v10 = vld [vmem:[%s7351_s6 + $0x60] sm:$0xf]  ;;  %v8229_v38 = vld [vmem:[%s7351_s6 + $0x64] sm:$0xf] }
  0xe0   : > { %10032 = vst [vmem:[#allocation58_spill] sm:$0xff] %v8198_v57  ;;  %10034 = vst [vmem:[#allocation60_spill] sm:$0xff] %v8205_v39  ;;  %v8216_v62 = vrot.slane %v4618_v18, 3  ;;  %v347_v4 = vrot.slane %v339_v24, %v7586_v25  ;;  %v2122_v19 = vrot.slane %v2114_v29, %v7586_v25  ;;  %v371_v11 = vrot.slane %v363_v32, %v7586_v25  ;;  %v8242_v60 = vld [vmem:[%s7351_s6 + $0x68] sm:$0xf]  ;;  %v375_v57 = vpop.permute.xlu1 %374 }
  0xe1   : > { %10035 = vst [vmem:[#allocation61_spill] sm:$0xff] %v8207_v9  ;;  %10037 = vst [vmem:[#allocation63_spill] sm:$0xff] %v8214_v40  ;;  %v8224_v3 = vrot.slane %v4621_v33, 4  ;;  %v727_v21 = vrot.slane %v725_v58, 4  ;;  %v10038_v43 = vmul.bf16 %v8076_v49, %v8051_v53  ;;  %v10039_v18 = vmul.bf16 %v7985_v14, %v8023_v48  ;;  %v8247_v48 = vld [vmem:[%s7351_s6 + $0x6c] sm:$0xf] }
  0xe2   : > { %v711_v32 = vshll.u32 %v347_v4, 16  ;;  %v715_v33 = vshrl.u32 %v347_v4, 16  ;;  %v2432_v12 = vshrl.u32 %v2122_v19, 16  ;;  %10040 = vst [vmem:[#allocation64_spill] sm:$0xff] %v8242_v60  ;;  %v731_v58 = vshll.u32 %v371_v11, 16  ;;  %10041 = vst [vmem:[#allocation65_spill] sm:$0xff] %v8247_v48 }
  0xe3   : > { %v6048_v24 = vcombine.low %v10039_v18, %v10038_v43  ;;  %v728_v55 = vor.u32 %v727_v21, %v723_v8  ;;  %v735_v9 = vshrl.u32 %v371_v11, 16  ;;  %v2435_v4 = vshll.u32 %v2122_v19, 16  ;;  %v4455_v19 = vld [vmem:[%s7351_s6 + $0x2c] sm:$0xf] }
  0xe4   : > { %v713_v43 = vrot.slane %v711_v32, 5  ;;  %v717_v18 = vrot.slane %v715_v33, 4  ;;  %v8249_v29 = vrot.slane %v2432_v12, 7  ;;  %v733_v47 = vrot.slane %v731_v58, 5  ;;  %v7152_v12 = vld [vmem:[%s7351_s6 + $0x24] sm:$0xf]  ;;  %v2150_v48 = vpop.permute.xlu1 %2149 }
  0xe5   : > { %v737_v31 = vrot.slane %v735_v9, 4  ;;  %v1418_v28 = vshrl.u32 %v6048_v24, 16  ;;  %v729_v21 = vrot.slane %v728_v55, 4  ;;  %v1421_v13 = vshll.u32 %v6048_v24, 16  ;;  %v4456_v55 = vld [vmem:[%s7351_s6 + $0x30] sm:$0xf]  ;;  %v2126_v24 = vpop.permute.xlu0 %2125 }
  0xe6   : > { %v8253_v11 = vsel %vm8031_vm8, %v709_v5, %v713_v43  ;;  %v718_v49 = vor.u32 %v717_v18, %v713_v43  ;;  %v2437_v9 = vor.u32 %v2435_v4, %v8249_v29  ;;  %v1426_v33 = vshrl.u32 %v8171_v30, 16  ;;  %v8266_v18 = vld [vmem:[%s7351_s6 + $0x1c] sm:$0xf] }
  0xe7   : > { %v738_v17 = vor.u32 %v737_v31, %v733_v47  ;;  %v1429_v5 = vshll.u32 %v8171_v30, 16  ;;  %v383_v43 = vrot.slane %v375_v57, %v7586_v25  ;;  %v3088_v4 = vmul.bf16 %v7152_v12, %v8253_v11 }
  0xe8   : > { %v719_v58 = vrot.slane %v718_v49, 4  ;;  %v1420_v49 = vrot.slane %v1418_v28, 3  ;;  %v4488_v30 = vmul.bf16 %v4455_v19, %v8253_v11  ;;  %v8280_v57 = vsel %vm8031_vm8, %v729_v21, %v733_v47  ;;  %v4457_v19 = vld [vmem:[%s7351_s6 + $0x34] sm:$0xf] }
  0xe9   : > { %v1423_v32 = vrot.slane %v1421_v13, 4  ;;  %v10042_v28 = vrot.slane %v8156_v1, 4  ;;  %v1431_v34 = vrot.slane %v1429_v5, 4  ;;  %v741_v47 = vshll.u32 %v383_v43, 16 }
  0xea   : > { %v8275_v31 = vsel %vm8031_vm8, %v719_v58, %v723_v8  ;;  %v1428_v8 = vrot.slane %v1426_v33, 3  ;;  %v739_v58 = vrot.slane %v738_v17, 4  ;;  %v745_v13 = vshrl.u32 %v383_v43, 16  ;;  %v6282_v17 = vld [vmem:[%s9830_s1 + $0x1c] sm:$0xf] }
  0xeb   : > { %v3089_v44 = vmul.bf16 %v7153_v0, %v8275_v31  ;;  %v4489_v12 = vmul.bf16 %v4456_v55, %v8275_v31  ;;  %v8289_v60 = vsel %vm7599_vm4, %v10042_v28, %v2437_v9  ;;  %v8297_v55 = vld [vmem:[%s7351_s6 + $0x24] sm:$0xf]  ;;  %v2134_v9 = vrot.slane %v2126_v24, %v7586_v25  ;;  %7078 = vmatprep.subr.msk.bf16.mxu0 %vm1168_vm0, %v6282_v17  ;;  %v8314_v24 = vld [vmem:[%s7351_s6 + $0x60] sm:$0xf] }
  0xec   : > { %10043 = vst [vmem:[#allocation66_spill] sm:$0xff] %v8289_v60  ;;  %v1424_v33 = vor.u32 %v1423_v32, %v1420_v49  ;;  %v1432_v5 = vor.u32 %v1431_v34, %v1428_v8  ;;  %v8305_v28 = vrot.slane %v741_v47, 5  ;;  %v8310_v43 = vor.u32 %v8196_v26, %v8194_v54  ;;  %10045 = vst [vmem:[#allocation68_spill] sm:$0xff] %v8314_v24  ;;  %v399_v26 = vpop.permute.xlu1 %398  ;;  %v8326_v47 = vld [vmem:[%s7351_s6 + $0x68] sm:$0xf] }
  0xed   : > { %v8292_v21 = vcombine.low %v3088_v4, %v3089_v44  ;;  %v8294_v0 = vcombine.low %v4488_v30, %v4489_v12  ;;  %v4458_v44 = vld [vmem:[%s7351_s6 + $0x38] sm:$0xf]  ;;  %v2138_v4 = vpop.permute.xlu0 %2137  ;;  %v7155_v30 = vld [vmem:[%s7351_s6 + $0x2c] sm:$0xf]  ;;  %v4490_v32 = vmul.bf16 %v4457_v19, %v8280_v57  ;;  %v2441_v34 = vshrl.u32 %v2134_v9, 16 }
  0xee   : > { %v3090_v12 = vmul.bf16 %v7155_v30, %v8280_v57  ;;  %v10046_v49 = vmul.bf16 %v8181_v59, %v8178_v63  ;;  %v10047_v8 = vmul.bf16 %v8146_v36, %v8117_v46  ;;  %v1433_v17 = vsel %vm1416_vm9, %v1424_v33, %v1432_v5  ;;  %v7156_v36 = vld [vmem:[%s7351_s6 + $0x30] sm:$0xf]  ;;  %v7157_v63 = vld [vmem:[%s7351_s6 + $0x20] sm:$0xf] }
  0xef   : > { %10044 = vst [vmem:[#allocation67_spill] sm:$0xff] %v8292_v21  ;;  %v8332_v1 = vsel %vm8031_vm8, %v739_v58, %v8305_v28  ;;  %v747_v30 = vrot.slane %v745_v13, 4  ;;  %v1442_v19 = vsel %vm1416_vm9, %v1432_v5, %v8310_v43  ;;  %v8337_v21 = vld [vmem:[%s7351_s6 + $0x70] sm:$0xf]  ;;  %6542 = vmatprep.mubr.msk.bf16.mxu1 %vm1119_vm1, %v1433_v17  ;;  %v2444_v33 = vshll.u32 %v2134_v9, 16 }
  0xf0   : > { %v6224_v54 = vcombine.low %v10047_v8, %v10046_v49  ;;  %10048 = vst [vmem:[#allocation69_spill] sm:$0xff] %v8337_v21  ;;  %v3091_v59 = vmul.bf16 %v7156_v36, %v8332_v1  ;;  %v4491_v49 = vmul.bf16 %v4458_v44, %v8332_v1  ;;  %v2443_v8 = vrot.slane %v2441_v34, 7  ;;  %6543 = vmatmul.mubr.msk.bf16.vlgmr.msra.gmra.mrb[0].mxu1 %vm1119_vm1, %v1442_v19 }
  0xf1   : > { %v4141_v13 = vshrl.u32 %v8132_v37, 16  ;;  %v2158_v46 = vrot.slane %v2150_v48, %v7586_v25  ;;  %v387_v37 = vpop.permute.xlu0 %386  ;;  %v1010_v48 = vmul.bf16 %v7157_v63, %v8275_v31  ;;  %v748_v35 = vor.u32 %v747_v30, %v8305_v28 }
  0xf2   : > { %v4145_v5 = vshll.u32 %v6224_v54, 16  ;;  %v8350_v36 = vcombine.low %v3090_v12, %v3091_v59  ;;  %v8352_v44 = vcombine.low %v4490_v32, %v4491_v49  ;;  %v2446_v34 = vor.u32 %v2444_v33, %v2443_v8  ;;  %v2162_v49 = vpop.permute.xlu1 %2161 }
  0xf3   : > { %v4143_v58 = vor.u32 %v4141_v13, %v8152_v42  ;;  %v2459_v24 = vshrl.u32 %v2158_v46, 16  ;;  %v2146_v17 = vrot.slane %v2138_v4, %v7586_v25  ;;  %v10050_v12 = vmul.bf16 %v8229_v38, %v8214_v40  ;;  %v7158_v42 = vld [vmem:[%s7351_s6 + $0x28] sm:$0xf] }
  0xf4   : > { %10049 = vst [vmem:[#allocation70_spill] sm:$0xff] %v8350_v36  ;;  %v4147_v19 = vrot.slane %v4145_v5, 1  ;;  %v10051_v32 = vmul.bf16 %v8219_v10, %v8205_v39  ;;  %v1012_v33 = vmul.bf16 %v7158_v42, %v8332_v1  ;;  %v2448_v13 = vrot.slane %v2443_v8, 4 }
  0xf5   : > { %v2462_v63 = vshll.u32 %v2158_v46, 16  ;;  %v10052_v31 = vrot.slane %v8249_v29, 4  ;;  %v8379_v38 = vrot.slane %v2459_v24, 7  ;;  %v2450_v10 = vshrl.u32 %v2146_v17, 16 }
  0xf6   : > { %v8367_v59 = vcombine.low %v10051_v32, %v10050_v12  ;;  %v4148_v5 = vsel %vm2672_vm5, %v4143_v58, %v4147_v19  ;;  %v4149_v4 = vshrl.u32 %v6224_v54, 16  ;;  %v407_v1 = vrot.slane %v399_v26, %v7586_v25 }
  0xf7   : > { %v8376_v28 = vsel %vm7599_vm4, %v10052_v31, %v2446_v34  ;;  %6694 = vmatprep.mubr.msk.bf16.mxu0 %vm1119_vm1, %v4148_v5  ;;  %v395_v8 = vrot.slane %v387_v37, %v7586_v25  ;;  %v2170_v46 = vrot.slane %v2162_v49, %v7586_v25  ;;  %v2464_v29 = vor.u32 %v2462_v63, %v8379_v38  ;;  %v411_v5 = vpop.permute.xlu0 %410  ;;  %v8389_v31 = vld [vmem:[%s7351_s6 + $0x64] sm:$0xf]  ;;  %v8392_v49 = vld [vmem:[%s7351_s6 + $0x6c] sm:$0xf] }
  0xf8   : > { %10053 = vst [vmem:[#allocation71_spill] sm:$0xff] %v8376_v28  ;;  %v4153_v30 = vshll.u32 %v8367_v59, 16  ;;  %v2452_v58 = vrot.slane %v2450_v10, 7  ;;  %v2453_v34 = vshll.u32 %v2146_v17, 16  ;;  %v4151_v12 = vor.u32 %v4149_v4, %v4147_v19  ;;  %10054 = vst [vmem:[#allocation72_spill] sm:$0xff] %v8389_v31 }
  0xf9   : > { %v761_v24 = vshll.u32 %v407_v1, 16  ;;  %v765_v54 = vshrl.u32 %v407_v1, 16  ;;  %v751_v42 = vshll.u32 %v395_v8, 16  ;;  %v755_v9 = vshrl.u32 %v395_v8, 16  ;;  %v8400_v1 = vld [vmem:[%s7351_s6 + $0x68] sm:$0xf] }
  0xfa   : > { %v8386_v32 = vrot.slane %v4153_v30, 1  ;;  %v2455_v26 = vor.u32 %v2453_v34, %v2452_v58  ;;  %v2457_v37 = vrot.slane %v2452_v58, 4  ;;  %v2468_v21 = vshrl.u32 %v2170_v46, 16  ;;  %v8397_v30 = vld [vmem:[%s7351_s6 + $0x74] sm:$0xf]  ;;  %10056 = vst [vmem:[#allocation74_spill] sm:$0xff] %v8400_v1 }
  0xfb   : > { %v763_v19 = vrot.slane %v761_v24, 5  ;;  %v767_v63 = vrot.slane %v765_v54, 4  ;;  %v753_v10 = vrot.slane %v751_v42, 5  ;;  %v749_v4 = vrot.slane %v748_v35, 4  ;;  %10055 = vst [vmem:[#allocation73_spill] sm:$0xff] %v8397_v30 }
  0xfc   : > { %v4156_v17 = vsel %vm2672_vm5, %v4151_v12, %v8386_v32  ;;  %v8404_v34 = vsel %vm7599_vm4, %v2448_v13, %v2455_v26  ;;  %v757_v8 = vrot.slane %v755_v9, 4  ;;  %v419_v58 = vrot.slane %v411_v5, %v7586_v25  ;;  %v8419_v42 = vld [vmem:[%s7351_s6 + $0x6c] sm:$0xf]  ;;  %v4459_v26 = vld [vmem:[%s7351_s6 + $0x3c] sm:$0xf]  ;;  %v423_v13 = vpop.permute.xlu1 %422 }
  0xfd   : > { %10057 = vst [vmem:[#allocation75_spill] sm:$0xff] %v8404_v34  ;;  %6695 = vmatmul.mubr.msk.bf16.gmra.mrb[16].mxu0 %vm1119_vm1, %v4156_v17  ;;  %v10058_v12 = vmul.bf16 %v8266_v18, %v8253_v11  ;;  %v10059_v35 = vmul.bf16 %v8297_v55, %v8280_v57  ;;  %10060 = vst [vmem:[#allocation76_spill] sm:$0xff] %v8419_v42  ;;  %v8423_v9 = vsel %vm7599_vm4, %v2457_v37, %v2464_v29  ;;  %v8442_v17 = vld [vmem:[%s7351_s6 + $0x70] sm:$0xf]  ;;  %v2174_v11 = vpop.permute.xlu0 %2173  ;;  %v8451_v30 = vld [vmem:[%s7351_s6 + $0x78] sm:$0xf] }
  0xfe   : > { %10061 = vst [vmem:[#allocation77_spill] sm:$0xff] %v8423_v9  ;;  %v768_v18 = vor.u32 %v767_v63, %v763_v19  ;;  %v8429_v57 = vsel %vm8031_vm8, %v749_v4, %v753_v10  ;;  %v8431_v55 = vrot.slane %v2468_v21, 7  ;;  %v758_v5 = vor.u32 %v757_v8, %v753_v10  ;;  %v8445_v63 = vld [vmem:[%s7351_s6 + $0x74] sm:$0xf]  ;;  %10062 = vst [vmem:[#allocation78_spill] sm:$0xff] %v8451_v30 }
  0xff   : > { %v6051_v24 = vcombine.low %v10058_v12, %v1010_v48  ;;  %v8414_v54 = vcombine.low %v10059_v35, %v1012_v33  ;;  %v2466_v33 = vrot.slane %v8379_v38, 4  ;;  %v7159_v21 = vld [vmem:[%s7351_s6 + $0x34] sm:$0xf]  ;;  %v2471_v12 = vshll.u32 %v2170_v46, 16  ;;  %v4460_v48 = vld [vmem:[%s7351_s6 + $0x40] sm:$0xf] }
 0x100   : > { %v3092_v4 = vmul.bf16 %v7159_v21, %v8429_v57  ;;  %v771_v35 = vshll.u32 %v419_v58, 16  ;;  %v759_v38 = vrot.slane %v758_v5, 4  ;;  %v775_v29 = vshrl.u32 %v419_v58, 16  ;;  %v8454_v37 = vld [vmem:[%s7351_s6 + $0x7c] sm:$0xf] }
 0x101   : > { %v1444_v10 = vshrl.u32 %v6051_v24, 16  ;;  %v1447_v8 = vshll.u32 %v6051_v24, 16  ;;  %10063 = vst [vmem:[#allocation79_spill] sm:$0xff] %v8454_v37  ;;  %v769_v36 = vrot.slane %v768_v18, 4  ;;  %v4492_v1 = vmul.bf16 %v4459_v26, %v8429_v57  ;;  %v7160_v31 = vld [vmem:[%s7351_s6 + $0x38] sm:$0xf] }
 0x102   : > { %v2473_v21 = vor.u32 %v2471_v12, %v8431_v55  ;;  %v773_v46 = vrot.slane %v771_v35, 5  ;;  %v8460_v5 = vsel %vm8031_vm8, %v759_v38, %v763_v19  ;;  %v777_v58 = vrot.slane %v775_v29, 4  ;;  %v8476_v35 = vld [vmem:[%s7351_s6 + $0x2c] sm:$0xf]  ;;  %v8494_v12 = vld [vmem:[%s7351_s6 + $0x70] sm:$0xf] }
 0x103   : > { %v1446_v42 = vrot.slane %v1444_v10, 3  ;;  %v1449_v24 = vrot.slane %v1447_v8, 4  ;;  %v3093_v39 = vmul.bf16 %v7160_v31, %v8460_v5  ;;  %v4493_v40 = vmul.bf16 %v4460_v48, %v8460_v5  ;;  %10066 = vst [vmem:[#allocation82_spill] sm:$0xff] %v8494_v12  ;;  %v8519_v37 = vld [vmem:[%s7351_s6 + $0x78] sm:$0xf] }
 0x104   : > { %v431_v18 = vrot.slane %v423_v13, %v7586_v25  ;;  %v2182_v26 = vrot.slane %v2174_v11, %v7586_v25  ;;  %v778_v38 = vor.u32 %v777_v58, %v773_v46  ;;  %v8486_v10 = vsel %vm7599_vm4, %v2466_v33, %v2473_v21  ;;  %v2186_v58 = vpop.permute.xlu0 %2185 }
 0x105   : > { %v8480_v11 = vcombine.low %v3092_v4, %v3093_v39  ;;  %v8482_v48 = vcombine.low %v4492_v1, %v4493_v40  ;;  %10065 = vst [vmem:[#allocation81_spill] sm:$0xff] %v8486_v10  ;;  %v2475_v8 = vrot.slane %v8431_v55, 4  ;;  %v8491_v29 = vsel %vm8031_vm8, %v769_v36, %v773_v46  ;;  %v8497_v1 = vld [vmem:[%s7351_s6 + $0x30] sm:$0xf]  ;;  %v4461_v55 = vld [vmem:[%s7351_s6 + $0x44] sm:$0xf]  ;;  %v2198_v46 = vpop.permute.xlu1 %2197 }
 0x106   : > { %v1450_v31 = vor.u32 %v1449_v24, %v1446_v42  ;;  %v779_v13 = vrot.slane %v778_v38, 4  ;;  %v781_v39 = vshll.u32 %v431_v18, 16  ;;  %v785_v4 = vshrl.u32 %v431_v18, 16  ;;  %v4462_v38 = vld [vmem:[%s7351_s6 + $0x48] sm:$0xf] }
 0x107   : > { %10064 = vst [vmem:[#allocation80_spill] sm:$0xff] %v8480_v11  ;;  %v2477_v40 = vshrl.u32 %v2182_v26, 16  ;;  %v1453_v42 = vshrl.u32 %v8414_v54, 16  ;;  %v1456_v21 = vshll.u32 %v8414_v54, 16  ;;  %v10067_v33 = vmul.bf16 %v8392_v49, %v8376_v28  ;;  %v7163_v11 = vld [vmem:[%s7351_s6 + $0x3c] sm:$0xf] }
 0x108   : > { %v1451_v36 = vsel %vm1416_vm9, %v8310_v43, %v1450_v31  ;;  %v783_v24 = vrot.slane %v781_v39, 5  ;;  %v787_v18 = vrot.slane %v785_v4, 4  ;;  %v10068_v43 = vmul.bf16 %v8326_v47, %v8289_v60 }
 0x109   : > { %6546 = vmatprep.mubr.msk.bf16.mxu1 %vm1119_vm1, %v1451_v36  ;;  %v8508_v19 = vrot.slane %v2477_v40, 7  ;;  %v3094_v39 = vmul.bf16 %v7163_v11, %v8491_v29  ;;  %v1455_v4 = vrot.slane %v1453_v42, 3  ;;  %v1458_v36 = vrot.slane %v1456_v21, 4 }
 0x10a   : > { %v6226_v30 = vcombine.low %v10068_v43, %v10067_v33  ;;  %v4494_v40 = vmul.bf16 %v4461_v55, %v8491_v29  ;;  %v8526_v49 = vsel %vm8031_vm8, %v779_v13, %v783_v24  ;;  %v2480_v28 = vshll.u32 %v2182_v26, 16  ;;  %v7164_v43 = vld [vmem:[%s7351_s6 + $0x40] sm:$0xf]  ;;  %v7165_v26 = vld [vmem:[%s7351_s6 + $0x34] sm:$0xf] }
 0x10b   : > { %v2206_v47 = vrot.slane %v2198_v46, %v7586_v25  ;;  %v788_v33 = vor.u32 %v787_v18, %v783_v24  ;;  %v3095_v54 = vmul.bf16 %v7164_v43, %v8526_v49  ;;  %v4495_v12 = vmul.bf16 %v4462_v38, %v8526_v49  ;;  %v447_v38 = vpop.permute.xlu1 %446 }
 0x10c   : > { %v8532_v11 = vor.u32 %v1458_v36, %v1455_v4  ;;  %v2482_v55 = vor.u32 %v2480_v28, %v8508_v19  ;;  %v4157_v13 = vshrl.u32 %v8367_v59, 16  ;;  %v4161_v21 = vshll.u32 %v6226_v30, 16  ;;  %v435_v4 = vpop.permute.xlu0 %434  ;;  %v7166_v36 = vld [vmem:[%s7351_s6 + $0x38] sm:$0xf] }
 0x10d   : > { %v1015_v46 = vmul.bf16 %v7165_v26, %v8491_v29  ;;  %v8540_v24 = vcombine.low %v3094_v39, %v3095_v54  ;;  %v8542_v18 = vcombine.low %v4494_v40, %v4495_v12  ;;  %v2484_v43 = vrot.slane %v8508_v19, 4  ;;  %v8572_v26 = vld [vmem:[%s7351_s6 + $0x80] sm:$0xf] }
 0x10e   : > { %v1016_v60 = vmul.bf16 %v7166_v36, %v8526_v49  ;;  %v1460_v28 = vsel %vm1416_vm9, %v1450_v31, %v8532_v11  ;;  %v4159_v59 = vor.u32 %v4157_v13, %v8386_v32  ;;  %v4163_v42 = vrot.slane %v4161_v21, 1  ;;  %10073 = vst [vmem:[#allocation85_spill] sm:$0xff] %v8572_v26 }
 0x10f   : > { %10069 = vst [vmem:[#allocation83_spill] sm:$0xff] %v8540_v24  ;;  %v789_v41 = vrot.slane %v788_v33, 4  ;;  %6547 = vmatmul.mubr.msk.bf16.gmra.mrb[4].mxu1 %vm1119_vm1, %v1460_v28  ;;  %v2495_v29 = vshrl.u32 %v2206_v47, 16  ;;  %v2194_v12 = vrot.slane %v2186_v58, %v7586_v25  ;;  %v10070_v19 = vmul.bf16 %v8445_v63, %v8423_v9  ;;  %v8581_v24 = vld [vmem:[%s7351_s6 + $0x7c] sm:$0xf] }
 0x110   : > { %v10071_v54 = vmul.bf16 %v8442_v17, %v8404_v34  ;;  %v8562_v31 = vsel %vm7599_vm4, %v2475_v8, %v2482_v55  ;;  %v4164_v32 = vsel %vm2672_vm5, %v4159_v59, %v4163_v42  ;;  %v455_v40 = vrot.slane %v447_v38, %v7586_v25  ;;  %v2210_v59 = vpop.permute.xlu1 %2209 }
 0x111   : > { %10072 = vst [vmem:[#allocation84_spill] sm:$0xff] %v8562_v31  ;;  %v443_v49 = vrot.slane %v435_v4, %v7586_v25  ;;  %6698 = vmatprep.mubr.msk.bf16.mxu0 %vm1119_vm1, %v4164_v32  ;;  %v8568_v58 = vrot.slane %v2495_v29, 7  ;;  %v2486_v63 = vshrl.u32 %v2194_v12, 16  ;;  %v4165_v33 = vshrl.u32 %v6226_v30, 16  ;;  %v459_v29 = vpop.permute.xlu0 %458 }
 0x112   : > { %v8558_v39 = vcombine.low %v10071_v54, %v10070_v19  ;;  %v2498_v13 = vshll.u32 %v2206_v47, 16  ;;  %v801_v21 = vshll.u32 %v455_v40, 16  ;;  %v805_v8 = vshrl.u32 %v455_v40, 16  ;;  %v8577_v19 = vld [vmem:[%s7351_s6 + $0x74] sm:$0xf] }
 0x113   : > { %v791_v55 = vshll.u32 %v443_v49, 16  ;;  %v2488_v38 = vrot.slane %v2486_v63, 7  ;;  %v2489_v36 = vshll.u32 %v2194_v12, 16  ;;  %v4167_v4 = vor.u32 %v4165_v33, %v4163_v42  ;;  %10074 = vst [vmem:[#allocation86_spill] sm:$0xff] %v8577_v19  ;;  %v8584_v40 = vld [vmem:[%s7351_s6 + $0x84] sm:$0xf] }
 0x114   : > { %v4169_v17 = vshll.u32 %v8558_v39, 16  ;;  %v2500_v30 = vor.u32 %v2498_v13, %v8568_v58  ;;  %v803_v54 = vrot.slane %v801_v21, 5  ;;  %v795_v32 = vshrl.u32 %v443_v49, 16  ;;  %10075 = vst [vmem:[#allocation87_spill] sm:$0xff] %v8584_v40 }
 0x115   : > { %v793_v47 = vrot.slane %v791_v55, 5  ;;  %v2491_v34 = vor.u32 %v2489_v36, %v2488_v38  ;;  %v2493_v63 = vrot.slane %v2488_v38, 4  ;;  %v807_v12 = vrot.slane %v805_v8, 4  ;;  %v8606_v36 = vld [vmem:[%s7351_s6 + $0x78] sm:$0xf] }
 0x116   : > { %v8574_v28 = vrot.slane %v4169_v17, 1  ;;  %v797_v17 = vrot.slane %v795_v32, 4  ;;  %v2218_v49 = vrot.slane %v2210_v59, %v7586_v25  ;;  %v467_v13 = vrot.slane %v459_v29, %v7586_v25  ;;  %10078 = vst [vmem:[#allocation88_spill] sm:$0xff] %v8606_v36  ;;  %v8626_v29 = vld [vmem:[%s7351_s6 + $0x7c] sm:$0xf] }
 0x117   : > { %v8591_v33 = vsel %vm8031_vm8, %v789_v41, %v793_v47  ;;  %v10076_v21 = vmul.bf16 %v8497_v1, %v8460_v5  ;;  %v10077_v55 = vmul.bf16 %v8476_v35, %v8429_v57  ;;  %v8603_v41 = vcombine.low %v1015_v46, %v1016_v60  ;;  %10081 = vst [vmem:[#allocation91_spill] sm:$0xff] %v8626_v29  ;;  %v8641_v35 = vld [vmem:[%s9830_s1 + $0xc] sm:$0xf]  ;;  %v8644_v32 = vld [vmem:[%s7351_s6 + $0x88] sm:$0xf] }
 0x118   : > { %v4172_v42 = vsel %vm2672_vm5, %v4167_v4, %v8574_v28  ;;  %v8610_v4 = vsel %vm7599_vm4, %v2484_v43, %v2491_v34  ;;  %v2502_v1 = vrot.slane %v8568_v58, 4  ;;  %v8621_v60 = vsel %vm7599_vm4, %v2493_v63, %v2500_v30  ;;  %v7167_v34 = vld [vmem:[%s7351_s6 + $0x3c] sm:$0xf]  ;;  %v8636_v63 = vld [vmem:[%s7351_s6 + $0x84] sm:$0xf]  ;;  %10082 = vst [vmem:[#allocation92_spill] sm:$0xff] %v8641_v35 }
 0x119   : > { %6699 = vmatmul.mubr.msk.bf16.gmra.mrb[20].mxu0 %vm1119_vm1, %v4172_v42  ;;  %v6053_v8 = vcombine.low %v10077_v55, %v10076_v21  ;;  %10079 = vst [vmem:[#allocation89_spill] sm:$0xff] %v8610_v4  ;;  %10080 = vst [vmem:[#allocation90_spill] sm:$0xff] %v8621_v60  ;;  %v808_v46 = vor.u32 %v807_v12, %v803_v54  ;;  %v798_v59 = vor.u32 %v797_v17, %v793_v47  ;;  %v8631_v42 = vld [vmem:[%s7351_s6 + $0x80] sm:$0xf]  ;;  %v7168_v21 = vld [vmem:[%s7351_s6 + $0x44] sm:$0xf] }
 0x11a   : > { %v1017_v43 = vmul.bf16 %v7167_v34, %v8591_v33  ;;  %v3096_v58 = vmul.bf16 %v7168_v21, %v8591_v33  ;;  %v2504_v55 = vshrl.u32 %v2218_v49, 16  ;;  %v811_v30 = vshll.u32 %v467_v13, 16  ;;  %v471_v34 = vpop.permute.xlu1 %470  ;;  %10083 = vst [vmem:[#allocation93_spill] sm:$0xff] %v8644_v32  ;;  %v3066_v29 = vld [vmem:[%s7351_s6 + $0x50] sm:$0xf] }
 0x11b   : > { %v799_v47 = vrot.slane %v798_v59, 4  ;;  %v815_v12 = vshrl.u32 %v467_v13, 16  ;;  %v1462_v17 = vshrl.u32 %v6053_v8, 16  ;;  %v1465_v38 = vshll.u32 %v6053_v8, 16  ;;  %v7169_v13 = vld [vmem:[%s9830_s1 + $0x8] sm:$0xf] }
 0x11c   : > { %v8646_v21 = vrot.slane %v2504_v55, 7  ;;  %v2507_v5 = vshll.u32 %v2218_v49, 16  ;;  %v813_v57 = vrot.slane %v811_v30, 5  ;;  %v2854_v8 = vsel %vm1168_vm0, %v7169_v13, 0  ;;  %v8653_v59 = vld [vmem:[%s7351_s6 + $0x8c] sm:$0xf] }
 0x11d   : > { %10084 = vst [vmem:[#allocation94_spill] sm:$0xff] %v8653_v59  ;;  %v804_v26 = vsel %vm8031_vm8, %v799_v47, %v803_v54  ;;  %v817_v40 = vrot.slane %v815_v12, 4  ;;  %v1464_v36 = vrot.slane %v1462_v17, 3  ;;  %v1467_v19 = vrot.slane %v1465_v38, 4  ;;  %6575 = vmatpush3.bf16.msra.mxu1 %v2854_v8  ;;  %v7170_v30 = vld [vmem:[%s7351_s6 + $0x48] sm:$0xf]  ;;  %v2222_v17 = vpop.permute.xlu0 %2221 }
 0x11e   : > { %v809_v55 = vrot.slane %v808_v46, 4  ;;  %v3097_v9 = vmul.bf16 %v7170_v30, %v804_v26  ;;  %v2509_v13 = vor.u32 %v2507_v5, %v8646_v21  ;;  %7073 = vmatprep.subr.msk.bf16.mxu1 %vm1168_vm0, %v8641_v35  ;;  %v479_v12 = vrot.slane %v471_v34, %v7586_v25  ;;  %v7171_v30 = vld [vmem:[%s7351_s6 + $0x40] sm:$0xf]  ;;  %v495_v34 = vpop.permute.xlu1 %494  ;;  %v4466_v32 = vld [vmem:[%s7351_s6 + $0x58] sm:$0xf] }
 0x11f   : > { %v818_v47 = vor.u32 %v817_v40, %v813_v57  ;;  %v1468_v38 = vor.u32 %v1467_v19, %v1464_v36  ;;  %v1018_v5 = vmul.bf16 %v7171_v30, %v804_v26  ;;  %v4496_v40 = vmul.bf16 %v4463_v45, %v8591_v33  ;;  %v8690_v30 = vld [vmem:[%s7351_s6 + $0x88] sm:$0xf] }
 0x120   : > { %v8673_v49 = vcombine.low %v3096_v58, %v3097_v9  ;;  %v4497_v19 = vmul.bf16 %v4464_v22, %v804_v26  ;;  %v8681_v54 = vsel %vm7599_vm4, %v2502_v1, %v2509_v13  ;;  %v8685_v8 = vsel %vm8031_vm8, %v809_v55, %v813_v57 }
 0x121   : > { %10086 = vst [vmem:[#allocation96_spill] sm:$0xff] %v8681_v54  ;;  %v819_v9 = vrot.slane %v818_v47, 4  ;;  %v1469_v58 = vsel %vm1416_vm9, %v8532_v11, %v1468_v38  ;;  %v821_v22 = vshll.u32 %v479_v12, 16  ;;  %v825_v45 = vshrl.u32 %v479_v12, 16 }
 0x122   : > { %10085 = vst [vmem:[#allocation95_spill] sm:$0xff] %v8673_v49  ;;  %6550 = vmatprep.mubr.msk.bf16.mxu1 %vm1119_vm1, %v1469_v58  ;;  %v2230_v26 = vrot.slane %v2222_v17, %v7586_v25  ;;  %v1471_v33 = vshrl.u32 %v8603_v41, 16  ;;  %v8695_v1 = vcombine.low %v1017_v43, %v1018_v5  ;;  %v1474_v57 = vshll.u32 %v8603_v41, 16  ;;  %v483_v43 = vpop.permute.xlu0 %482  ;;  %v8711_v5 = vld [vmem:[%s7351_s6 + $0x54] sm:$0xf] }
 0x123   : > { %v10087_v55 = vmul.bf16 %v8581_v24, %v8562_v31  ;;  %v10088_v11 = vmul.bf16 %v8519_v37, %v8486_v10  ;;  %v503_v47 = vrot.slane %v495_v34, %v7586_v25  ;;  %v8705_v58 = vcombine.low %v4496_v40, %v4497_v19  ;;  %v7173_v49 = vld [vmem:[%s7351_s6 + $0x44] sm:$0xf]  ;;  %v7174_v31 = vld [vmem:[%s7351_s6 + $0x48] sm:$0xf] }
 0x124   : > { %v823_v12 = vrot.slane %v821_v22, 5  ;;  %v827_v17 = vrot.slane %v825_v45, 4  ;;  %v2513_v36 = vshrl.u32 %v2230_v26, 16  ;;  %v1473_v24 = vrot.slane %v1471_v33, 3 }
 0x125   : > { %v6228_v13 = vcombine.low %v10088_v11, %v10087_v55  ;;  %v1476_v46 = vrot.slane %v1474_v57, 4  ;;  %v7172_v55 = vld [vmem:[%s7351_s6 + $0x4c] sm:$0xf]  ;;  %v4173_v34 = vshrl.u32 %v8558_v39, 16  ;;  %v841_v22 = vshll.u32 %v503_v47, 16 }
 0x126   : > { %v3098_v40 = vmul.bf16 %v7172_v55, %v8685_v8  ;;  %v824_v19 = vsel %vm8031_vm8, %v819_v9, %v823_v12  ;;  %v828_v45 = vor.u32 %v827_v17, %v823_v12  ;;  %v2515_v59 = vrot.slane %v2513_v36, 7  ;;  %v519_v36 = vpop.permute.xlu1 %518 }
 0x127   : > { %v4177_v37 = vshll.u32 %v6228_v13, 16  ;;  %v3099_v11 = vmul.bf16 %v3066_v29, %v824_v19  ;;  %v8719_v41 = vor.u32 %v1476_v46, %v1473_v24  ;;  %v1019_v33 = vmul.bf16 %v7173_v49, %v8685_v8 }
 0x128   : > { %v4498_v57 = vmul.bf16 %v8711_v5, %v8685_v8  ;;  %v4175_v55 = vor.u32 %v4173_v34, %v8574_v28  ;;  %v1020_v9 = vmul.bf16 %v7174_v31, %v824_v19  ;;  %v2516_v39 = vshll.u32 %v2230_v26, 16  ;;  %v507_v8 = vpop.permute.xlu0 %506 }
 0x129   : > { %v4179_v10 = vrot.slane %v4177_v37, 1  ;;  %v8727_v35 = vcombine.low %v3098_v40, %v3099_v11  ;;  %v1478_v29 = vsel %vm1416_vm9, %v1468_v38, %v8719_v41  ;;  %v4499_v46 = vmul.bf16 %v4466_v32, %v824_v19 }
 0x12a   : > { %6551 = vmatmul.mubr.msk.bf16.gmra.mrb[8].mxu1 %vm1119_vm1, %v1478_v29  ;;  %v843_v12 = vrot.slane %v841_v22, 5  ;;  %v845_v17 = vshrl.u32 %v503_v47, 16  ;;  %v829_v5 = vrot.slane %v828_v45, 4  ;;  %v2518_v28 = vor.u32 %v2516_v39, %v2515_v59 }
 0x12b   : > { %10089 = vst [vmem:[#allocation97_spill] sm:$0xff] %v8727_v35  ;;  %v4180_v49 = vsel %vm2672_vm5, %v4175_v55, %v4179_v10  ;;  %v8733_v24 = vrot.slane %v2515_v59, 4  ;;  %v491_v31 = vrot.slane %v483_v43, %v7586_v25  ;;  %v10091_v38 = vmul.bf16 %v8636_v63, %v8621_v60  ;;  %v7177_v60 = vld [vmem:[%s7351_s6 + $0x50] sm:$0xf] }
 0x12c   : > { %6702 = vmatprep.mubr.msk.bf16.mxu0 %vm1119_vm1, %v4180_v49  ;;  %v847_v26 = vrot.slane %v845_v17, 4  ;;  %v10092_v32 = vmul.bf16 %v8631_v42, %v8610_v4  ;;  %v4181_v40 = vshrl.u32 %v6228_v13, 16  ;;  %v527_v47 = vrot.slane %v519_v36, %v7586_v25  ;;  %v3067_v17 = vld [vmem:[%s7351_s6 + $0x54] sm:$0xf] }
 0x12d   : > { %10090 = vst [vmem:[#allocation98_spill] sm:$0xff] %v8733_v24  ;;  %v8746_v19 = vcombine.low %v1019_v33, %v1020_v9  ;;  %v831_v59 = vshll.u32 %v491_v31, 16  ;;  %v835_v34 = vshrl.u32 %v491_v31, 16  ;;  %v515_v22 = vrot.slane %v507_v8, %v7586_v25  ;;  %v4467_v8 = vld [vmem:[%s7351_s6 + $0x5c] sm:$0xf] }
 0x12e   : > { %v8743_v37 = vcombine.low %v10092_v32, %v10091_v38  ;;  %v848_v43 = vor.u32 %v847_v26, %v843_v12  ;;  %v4183_v45 = vor.u32 %v4181_v40, %v4179_v10  ;;  %v861_v11 = vshll.u32 %v527_v47, 16  ;;  %v543_v38 = vpop.permute.xlu1 %542 }
 0x12f   : > { %v833_v55 = vrot.slane %v831_v59, 5  ;;  %v837_v42 = vrot.slane %v835_v34, 4  ;;  %v865_v39 = vshrl.u32 %v527_v47, 16  ;;  %v851_v13 = vshll.u32 %v515_v22, 16  ;;  %v7175_v59 = vld [vmem:[%s7351_s6 + $0x4c] sm:$0xf] }
 0x130   : > { %v4185_v63 = vshll.u32 %v8743_v37, 16  ;;  %v849_v29 = vrot.slane %v848_v43, 4  ;;  %v863_v9 = vrot.slane %v861_v11, 5  ;;  %v855_v36 = vshrl.u32 %v515_v22, 16  ;;  %v3069_v22 = vld [vmem:[%s7351_s6 + $0x5c] sm:$0xf]  ;;  %v531_v43 = vpop.permute.xlu0 %530 }
 0x131   : > { %v8754_v49 = vsel %vm8031_vm8, %v829_v5, %v833_v55  ;;  %v838_v10 = vor.u32 %v837_v42, %v833_v55  ;;  %v867_v31 = vrot.slane %v865_v39, 4  ;;  %v853_v26 = vrot.slane %v851_v13, 5  ;;  %v3068_v11 = vld [vmem:[%s7351_s6 + $0x58] sm:$0xf] }
 0x132   : > { %v8750_v33 = vrot.slane %v4185_v63, 1  ;;  %v8758_v32 = vcombine.low %v4498_v57, %v4499_v46  ;;  %v10093_v40 = vrot.slane %v8646_v21, 4  ;;  %v1021_v5 = vmul.bf16 %v7175_v59, %v8754_v49  ;;  %v4469_v46 = vld [vmem:[%s7351_s6 + $0x64] sm:$0xf] }
 0x133   : > { %v839_v63 = vrot.slane %v838_v10, 4  ;;  %v868_v57 = vor.u32 %v867_v31, %v863_v9  ;;  %v854_v52 = vsel %vm8031_vm8, %v849_v29, %v853_v26  ;;  %v857_v21 = vrot.slane %v855_v36, 4  ;;  %v4468_v10 = vld [vmem:[%s7351_s6 + $0x60] sm:$0xf] }
 0x134   : > { %v8764_v47 = vsel %vm7599_vm4, %v10093_v40, %v2518_v28  ;;  %v4188_v34 = vsel %vm2672_vm5, %v4183_v45, %v8750_v33  ;;  %v3100_v28 = vmul.bf16 %v3067_v17, %v8754_v49  ;;  %v4500_v55 = vmul.bf16 %v4467_v8, %v8754_v49  ;;  %v7176_v45 = vld [vmem:[%s7351_s6 + $0x54] sm:$0xf]  ;;  %v3070_v17 = vld [vmem:[%s7351_s6 + $0x60] sm:$0xf]  ;;  %v4470_v8 = vld [vmem:[%s7351_s6 + $0x68] sm:$0xf] }
 0x135   : > { %10094 = vst [vmem:[#allocation99_spill] sm:$0xff] %v8764_v47  ;;  %6703 = vmatmul.mubr.msk.bf16.gmra.mrb[24].mxu0 %vm1119_vm1, %v4188_v34  ;;  %v1023_v42 = vmul.bf16 %v7176_v45, %v854_v52  ;;  %v551_v39 = vrot.slane %v543_v38, %v7586_v25  ;;  %v844_v13 = vsel %vm8031_vm8, %v839_v63, %v843_v12  ;;  %v869_v59 = vrot.slane %v868_v57, 4  ;;  %v3953_v63 = vld [vmem:[%s7351_s6 + $0x8c] sm:$0xf] }
 0x136   : > { %v858_v31 = vor.u32 %v857_v21, %v853_v26  ;;  %v3102_v40 = vmul.bf16 %v3069_v22, %v854_v52  ;;  %v539_v29 = vrot.slane %v531_v43, %v7586_v25  ;;  %v3101_v36 = vmul.bf16 %v3068_v11, %v844_v13  ;;  %v7178_v21 = vld [vmem:[%s7351_s6 + $0x58] sm:$0xf] }
 0x137   : > { %v4502_v34 = vmul.bf16 %v4469_v46, %v854_v52  ;;  %v881_v35 = vshll.u32 %v551_v39, 16  ;;  %v885_v45 = vshrl.u32 %v551_v39, 16  ;;  %v1022_v61 = vmul.bf16 %v7177_v60, %v844_v13 }
 0x138   : > { %v859_v49 = vrot.slane %v858_v31, 4  ;;  %v871_v38 = vshll.u32 %v539_v29, 16  ;;  %v875_v4 = vshrl.u32 %v539_v29, 16  ;;  %v8787_v12 = vcombine.low %v3100_v28, %v3101_v36 }
 0x139   : > { %v4501_v26 = vmul.bf16 %v4468_v10, %v844_v13  ;;  %v883_v22 = vrot.slane %v881_v35, 5  ;;  %v887_v11 = vrot.slane %v885_v45, 4  ;;  %v1480_v29 = vshrl.u32 %v8695_v1, 16  ;;  %v555_v10 = vpop.permute.xlu0 %554 }
 0x13a   : > { %10095 = vst [vmem:[#allocation100_spill] sm:$0xff] %v8787_v12  ;;  %v864_v43 = vsel %vm8031_vm8, %v859_v49, %v863_v9  ;;  %v873_v57 = vrot.slane %v871_v38, 5  ;;  %v877_v52 = vrot.slane %v875_v4, 4  ;;  %v1483_v13 = vshll.u32 %v8695_v1, 16  ;;  %v567_v9 = vpop.permute.xlu1 %566 }
 0x13b   : > { %v1024_v46 = vmul.bf16 %v7178_v21, %v864_v43  ;;  %v3103_v31 = vmul.bf16 %v3070_v17, %v864_v43  ;;  %v4503_v39 = vmul.bf16 %v4470_v8, %v864_v43  ;;  %v888_v60 = vor.u32 %v887_v11, %v883_v22  ;;  %v3071_v8 = vld [vmem:[%s7351_s6 + $0x64] sm:$0xf]  ;;  %v7179_v43 = vld [vmem:[%s7351_s6 + $0x5c] sm:$0xf]  ;;  %v3072_v11 = vld [vmem:[%s7351_s6 + $0x68] sm:$0xf] }
 0x13c   : > { %v874_v35 = vsel %vm8031_vm8, %v869_v59, %v873_v57  ;;  %v878_v28 = vor.u32 %v877_v52, %v873_v57  ;;  %v3986_v4 = vmul.bf16 %v3953_v63, %v8764_v47  ;;  %v8798_v36 = vcombine.low %v1021_v5, %v1022_v61 }
 0x13d   : > { %v8800_v49 = vcombine.low %v4500_v55, %v4501_v26  ;;  %v8802_v17 = vcombine.low %v3102_v40, %v3103_v31  ;;  %v8805_v45 = vcombine.low %v1023_v42, %v1024_v46  ;;  %v8807_v38 = vcombine.low %v4502_v34, %v4503_v39  ;;  %v4472_v26 = vld [vmem:[%s7351_s6 + $0x70] sm:$0xf] }
 0x13e   : > { %v879_v59 = vrot.slane %v878_v28, 4  ;;  %v1025_v1 = vmul.bf16 %v7179_v43, %v874_v35  ;;  %v1482_v57 = vrot.slane %v1480_v29, 3  ;;  %v1485_v52 = vrot.slane %v1483_v13, 4  ;;  %v8824_v29 = vld [vmem:[%s7351_s6 + $0x6c] sm:$0xf] }
 0x13f   : > { %10096 = vst [vmem:[#allocation101_spill] sm:$0xff] %v8802_v17  ;;  %v575_v61 = vrot.slane %v567_v9, %v7586_v25  ;;  %v563_v5 = vrot.slane %v555_v10, %v7586_v25  ;;  %v889_v55 = vrot.slane %v888_v60, 4  ;;  %v3104_v42 = vmul.bf16 %v3071_v8, %v874_v35  ;;  %10098 = vst [vmem:[#allocation102_spill] sm:$0xff] %v8824_v29  ;;  %v7184_v17 = vld [vmem:[%s7351_s6 + $0x70] sm:$0xf] }
 0x140   : > { %v884_v40 = vsel %vm8031_vm8, %v879_v59, %v883_v22  ;;  %v1489_v34 = vshrl.u32 %v8746_v19, 16  ;;  %v1486_v21 = vor.u32 %v1485_v52, %v1482_v57  ;;  %v1492_v46 = vshll.u32 %v8746_v19, 16  ;;  %v7180_v22 = vld [vmem:[%s7351_s6 + $0x60] sm:$0xf]  ;;  %v591_v19 = vpop.permute.xlu1 %590 }
 0x141   : > { %v3105_v63 = vmul.bf16 %v3072_v11, %v884_v40  ;;  %v10097_v31 = vmul.bf16 %v8690_v30, %v8681_v54  ;;  %v901_v28 = vshll.u32 %v575_v61, 16  ;;  %v905_v60 = vshrl.u32 %v575_v61, 16 }
 0x142   : > { %v891_v13 = vshll.u32 %v563_v5, 16  ;;  %v895_v9 = vshrl.u32 %v563_v5, 16  ;;  %v1026_v10 = vmul.bf16 %v7180_v22, %v884_v40  ;;  %v4505_v59 = vmul.bf16 %v4472_v26, %v884_v40  ;;  %v7181_v22 = vld [vmem:[%s7351_s6 + $0x64] sm:$0xf] }
 0x143   : > { %v8821_v39 = vcombine.low %v10097_v31, %v3986_v4  ;;  %v8827_v8 = vcombine.low %v3104_v42, %v3105_v63  ;;  %v1487_v43 = vsel %vm1416_vm9, %v8719_v41, %v1486_v21  ;;  %v903_v30 = vrot.slane %v901_v28, 5  ;;  %v579_v31 = vpop.permute.xlu0 %578 }
 0x144   : > { %6554 = vmatprep.mubr.msk.bf16.mxu1 %vm1119_vm1, %v1487_v43  ;;  %v907_v4 = vrot.slane %v905_v60, 4  ;;  %v893_v11 = vrot.slane %v891_v13, 5  ;;  %v897_v57 = vrot.slane %v895_v9, 4  ;;  %v4504_v52 = vmul.bf16 %v8824_v29, %v874_v35  ;;  %v3954_v13 = vld [vmem:[%s7351_s6 + $0x90] sm:$0x1] }
 0x145   : > { %10099 = vst [vmem:[#allocation103_spill] sm:$0xff] %v8827_v8  ;;  %v1491_v61 = vrot.slane %v1489_v34, 3  ;;  %v1494_v5 = vrot.slane %v1492_v46, 4  ;;  %v4193_v40 = vshll.u32 %v8821_v39, 16  ;;  %v4189_v26 = vshrl.u32 %v8743_v37, 16 }
 0x146   : > { %v8836_v41 = vsel %vm8031_vm8, %v889_v55, %v893_v11  ;;  %v898_v42 = vor.u32 %v897_v57, %v893_v11  ;;  %v599_v63 = vrot.slane %v591_v19, %v7586_v25  ;;  %v8840_v28 = vcombine.low %v1025_v1, %v1026_v10  ;;  %v3073_v34 = vld [vmem:[%s7351_s6 + $0x6c] sm:$0xf]  ;;  %v3074_v43 = vld [vmem:[%s7351_s6 + $0x70] sm:$0xf]  ;;  %v4478_v29 = vld [vmem:[%s7351_s6 + $0x88] sm:$0xf] }
 0x147   : > { %v8842_v60 = vcombine.low %v4504_v52, %v4505_v59  ;;  %v908_v35 = vor.u32 %v907_v4, %v903_v30  ;;  %v8845_v46 = vor.u32 %v1494_v5, %v1491_v61  ;;  %v1027_v55 = vmul.bf16 %v7181_v22, %v8836_v41  ;;  %v8861_v52 = vld [vmem:[%s7351_s6 + $0x74] sm:$0xf] }
 0x148   : > { %v899_v9 = vrot.slane %v898_v42, 4  ;;  %v4191_v37 = vor.u32 %v4189_v26, %v8750_v33  ;;  %v4195_v11 = vrot.slane %v4193_v40, 1  ;;  %v921_v10 = vshll.u32 %v599_v63, 16 }
 0x149   : > { %v1496_v1 = vsel %vm1416_vm9, %v1486_v21, %v8845_v46  ;;  %v925_v59 = vshrl.u32 %v599_v63, 16  ;;  %v587_v19 = vrot.slane %v579_v31, %v7586_v25  ;;  %v3106_v57 = vmul.bf16 %v3073_v34, %v8836_v41  ;;  %v615_v34 = vpop.permute.xlu1 %614 }
 0x14a   : > { %v8857_v4 = vsel %vm8031_vm8, %v899_v9, %v903_v30  ;;  %6555 = vmatmul.mubr.msk.bf16.gmra.mrb[12].mxu1 %vm1119_vm1, %v1496_v1  ;;  %v4196_v33 = vsel %vm2672_vm5, %v4191_v37, %v4195_v11  ;;  %v3987_v21 = vmul.bf16 %v3954_v13, %v8733_v24  ;;  %v909_v61 = vrot.slane %v908_v35, 4  ;;  %v7182_v9 = vld [vmem:[%s7351_s6 + $0x68] sm:$0xf]  ;;  %v8874_v37 = vld [vmem:[%s7351_s6 + $0x78] sm:$0xf] }
 0x14b   : > { %v3107_v5 = vmul.bf16 %v3074_v43, %v8857_v4  ;;  %6706 = vmatprep.mubr.msk.bf16.mxu0 %vm1119_vm1, %v4196_v33  ;;  %v923_v40 = vrot.slane %v921_v10, 5  ;;  %v4197_v30 = vshrl.u32 %v8821_v39, 16  ;;  %v927_v42 = vrot.slane %v925_v59, 4 }
 0x14c   : > { %v911_v26 = vshll.u32 %v587_v19, 16  ;;  %v915_v63 = vshrl.u32 %v587_v19, 16  ;;  %v6231_v31 = vcombine.low %v3987_v21, %v3987_v21  ;;  %v1028_v22 = vmul.bf16 %v7182_v9, %v8857_v4  ;;  %v8896_v9 = vld [vmem:[%s7351_s6 + $0x6c] sm:$0xf] }
 0x14d   : > { %v8871_v1 = vcombine.low %v3106_v57, %v3107_v5  ;;  %v4199_v13 = vor.u32 %v4197_v30, %v4195_v11  ;;  %v928_v43 = vor.u32 %v927_v42, %v923_v40  ;;  %v10101_v19 = vmul.bf16 %v8071_v2, %v8051_v53  ;;  %v8903_v30 = vld [vmem:[%s7351_s6 + $0x7c] sm:$0xf] }
 0x14e   : > { %v913_v10 = vrot.slane %v911_v26, 5  ;;  %v917_v39 = vrot.slane %v915_v63, 4  ;;  %v4201_v59 = vshll.u32 %v6231_v31, 16  ;;  %v10102_v57 = vmul.bf16 %v8036_v27, %v7985_v14  ;;  %v603_v63 = vpop.permute.xlu0 %602 }
 0x14f   : > { %10100 = vst [vmem:[#allocation104_spill] sm:$0xff] %v8871_v1  ;;  %v4609_v21 = vshrl.u32 %v8108_v23, 16  ;;  %v4612_v5 = vshll.u32 %v8108_v23, 16  ;;  %v623_v11 = vrot.slane %v615_v34, %v7586_v25  ;;  %v8893_v31 = vcombine.low %v1027_v55, %v1028_v22  ;;  %v3075_v34 = vld [vmem:[%s7351_s6 + $0x74] sm:$0xf] }
 0x150   : > { %v6249_v33 = vcombine.low %v10102_v57, %v10101_v19  ;;  %v8891_v42 = vsel %vm8031_vm8, %v909_v61, %v913_v10  ;;  %v918_v26 = vor.u32 %v917_v39, %v913_v10  ;;  %v4203_v2 = vrot.slane %v4201_v59, 1  ;;  %v3076_v19 = vld [vmem:[%s7351_s6 + $0x78] sm:$0xf]  ;;  %v8912_v1 = vld [vmem:[%s7351_s6 + $0x80] sm:$0xf] }
 0x151   : > { %v929_v27 = vrot.slane %v928_v43, 4  ;;  %v4611_v39 = vrot.slane %v4609_v21, 3  ;;  %v4614_v22 = vrot.slane %v4612_v5, 4  ;;  %v941_v43 = vshll.u32 %v623_v11, 16 }
 0x152   : > { %v4601_v57 = vshrl.u32 %v6249_v33, 16  ;;  %v919_v35 = vrot.slane %v918_v26, 4  ;;  %v4204_v61 = vsel %vm2672_vm5, %v4199_v13, %v4203_v2  ;;  %v4604_v10 = vshll.u32 %v6249_v33, 16 }
 0x153   : > { %6707 = vmatmul.mubr.msk.bf16.gmra.mrb[28].mxu0 %vm1119_vm1, %v4204_v61  ;;  %v945_v59 = vshrl.u32 %v623_v11, 16  ;;  %v611_v8 = vrot.slane %v603_v63, %v7586_v25  ;;  %v1498_v13 = vshrl.u32 %v8798_v36, 16  ;;  %v3108_v33 = vmul.bf16 %v3075_v34, %v8891_v42  ;;  %v639_v61 = vpop.permute.xlu1 %638 }
 0x154   : > { %v4603_v55 = vrot.slane %v4601_v57, 3  ;;  %v8909_v23 = vsel %vm8031_vm8, %v919_v35, %v923_v40  ;;  %v4606_v26 = vrot.slane %v4604_v10, 4  ;;  %v4615_v11 = vor.u32 %v4614_v22, %v4611_v39  ;;  %v627_v10 = vpop.permute.xlu0 %626 }
 0x155   : > { %v3109_v21 = vmul.bf16 %v3076_v19, %v8909_v23  ;;  %v943_v40 = vrot.slane %v941_v43, 5  ;;  %v947_v35 = vrot.slane %v945_v59, 4  ;;  %v931_v57 = vshll.u32 %v611_v8, 16  ;;  %v4477_v43 = vld [vmem:[%s7351_s6 + $0x84] sm:$0xf] }
 0x156   : > { %v4607_v2 = vor.u32 %v4606_v26, %v4603_v55  ;;  %v1030_v63 = vmul.bf16 %v7184_v17, %v8909_v23  ;;  %v4509_v34 = vmul.bf16 %v8912_v1, %v8909_v23  ;;  %v935_v19 = vshrl.u32 %v611_v8, 16  ;;  %v3077_v55 = vld [vmem:[%s7351_s6 + $0x7c] sm:$0xf] }
 0x157   : > { %v8922_v12 = vcombine.low %v3108_v33, %v3109_v21  ;;  %v948_v39 = vor.u32 %v947_v35, %v943_v40  ;;  %v933_v22 = vrot.slane %v931_v57, 5  ;;  %v1500_v59 = vrot.slane %v1498_v13, 3 }
 0x158   : > { %v4616_v5 = vsel %vm1416_vm9, %v4607_v2, %v4615_v11  ;;  %v937_v26 = vrot.slane %v935_v19, 4  ;;  %v1501_v17 = vshll.u32 %v8798_v36, 16  ;;  %v647_v33 = vrot.slane %v639_v61, %v7586_v25  ;;  %v3078_v19 = vld [vmem:[%s7351_s6 + $0x80] sm:$0xf] }
 0x159   : > { %10103 = vst [vmem:[#allocation105_spill] sm:$0xff] %v8922_v12  ;;  %6712 = vmatprep.mubr.msk.bf16.mxu0 %vm1119_vm1, %v4616_v5  ;;  %v635_v21 = vrot.slane %v627_v10, %v7586_v25  ;;  %v949_v8 = vrot.slane %v948_v39, 4  ;;  %v934_v1 = vsel %vm8031_vm8, %v929_v27, %v933_v22  ;;  %v8937_v23 = vor.u32 %v8224_v3, %v8216_v62  ;;  %v7185_v5 = vld [vmem:[%s7351_s6 + $0x74] sm:$0xf] }
 0x15a   : > { %v4627_v13 = vshrl.u32 %v8294_v0, 16  ;;  %v938_v2 = vor.u32 %v937_v26, %v933_v22  ;;  %v1031_v35 = vmul.bf16 %v7185_v5, %v934_v1  ;;  %v3110_v57 = vmul.bf16 %v3077_v55, %v934_v1 }
 0x15b   : > { %v4510_v36 = vmul.bf16 %v4477_v43, %v934_v1  ;;  %v1503_v61 = vrot.slane %v1501_v17, 4  ;;  %v961_v12 = vshll.u32 %v647_v33, 16  ;;  %v965_v25 = vshrl.u32 %v647_v33, 16 }
 0x15c   : > { %v951_v10 = vshll.u32 %v635_v21, 16  ;;  %v939_v39 = vrot.slane %v938_v2, 4  ;;  %v955_v27 = vshrl.u32 %v635_v21, 16  ;;  %v4625_v62 = vsel %vm1416_vm9, %v4615_v11, %v8937_v23  ;;  %v7186_v21 = vld [vmem:[%s7351_s6 + $0x78] sm:$0xf] }
 0x15d   : > { %v4629_v3 = vrot.slane %v4627_v13, 3  ;;  %v8945_v14 = vor.u32 %v1503_v61, %v1500_v59  ;;  %v963_v22 = vrot.slane %v961_v12, 5  ;;  %v967_v26 = vrot.slane %v965_v25, 4  ;;  %6713 = vmatmul.mubr.msk.bf16.vlgmr.msra.gmra.mrb[0].mxu0 %vm1119_vm1, %v4625_v62 }
 0x15e   : > { %v953_v5 = vrot.slane %v951_v10, 5  ;;  %v944_v55 = vsel %vm8031_vm8, %v939_v39, %v943_v40  ;;  %v957_v43 = vrot.slane %v955_v27, 4  ;;  %v4630_v17 = vshll.u32 %v8294_v0, 16  ;;  %v3081_v27 = vld [vmem:[%s7351_s6 + $0x8c] sm:$0xf] }
 0x15f   : > { %v1507_v33 = vshrl.u32 %v8805_v45, 16  ;;  %v1032_v11 = vmul.bf16 %v7186_v21, %v944_v55  ;;  %v3111_v59 = vmul.bf16 %v3078_v19, %v944_v55  ;;  %v4511_v1 = vmul.bf16 %v4478_v29, %v944_v55 }
 0x160   : > { %v1505_v12 = vsel %vm1416_vm9, %v8845_v46, %v8945_v14  ;;  %v968_v40 = vor.u32 %v967_v26, %v963_v22  ;;  %v8959_v0 = vsel %vm8031_vm8, %v949_v8, %v953_v5  ;;  %v958_v13 = vor.u32 %v957_v43, %v953_v5  ;;  %v8989_v26 = vld [vmem:[%s7351_s6 + $0x8c] sm:$0xf]  ;;  %v7188_v5 = vld [vmem:[%s9830_s1 + $0x1c] sm:$0xf]  ;;  %v7189_v43 = vld [vmem:[%s7351_s6 + $0x84] sm:$0xf] }
 0x161   : > { %6558 = vmatprep.mubr.msk.bf16.mxu1 %vm1119_vm1, %v1505_v12  ;;  %v4632_v2 = vrot.slane %v4630_v17, 4  ;;  %v10104_v19 = vmul.bf16 %v8874_v37, %v8857_v4  ;;  %v10105_v29 = vmul.bf16 %v8861_v52, %v8836_v41  ;;  %v10106_v46 = vmul.bf16 %v8896_v9, %v8891_v42  ;;  %v3079_v4 = vld [vmem:[%s7351_s6 + $0x84] sm:$0xf]  ;;  %v3080_v37 = vld [vmem:[%s7351_s6 + $0x88] sm:$0xf] }
 0x162   : > { %v10107_v8 = vmul.bf16 %v8903_v30, %v8891_v42  ;;  %v8979_v39 = vcombine.low %v3110_v57, %v3111_v59  ;;  %v8984_v41 = vcombine.low %v1031_v35, %v1032_v11  ;;  %v8986_v52 = vcombine.low %v4510_v36, %v4511_v1  ;;  %v8994_v30 = vld [vmem:[%s9830_s1 + $0x20] sm:$0xf]  ;;  %v4481_v42 = vld [vmem:[%s7351_s6 + $0x94] sm:$0xf]  ;;  %v9000_v57 = vld [vmem:[%s7351_s6 + $0x90] sm:$0xf] }
 0x163   : > { %v8967_v61 = vcombine.low %v10105_v29, %v10104_v19  ;;  %v8972_v25 = vcombine.low %v10106_v46, %v1030_v63  ;;  %v969_v62 = vrot.slane %v968_v40, 4  ;;  %v959_v9 = vrot.slane %v958_v13, 4  ;;  %v7187_v63 = vld [vmem:[%s7351_s6 + $0x7c] sm:$0xf]  ;;  %v7190_v1 = vld [vmem:[%s7351_s6 + $0x80] sm:$0xf] }
 0x164   : > { %v8977_v10 = vcombine.low %v10107_v8, %v4509_v34  ;;  %v1033_v34 = vmul.bf16 %v7187_v63, %v8959_v0  ;;  %v4633_v35 = vor.u32 %v4632_v2, %v4629_v3  ;;  %v1510_v36 = vshll.u32 %v8805_v45, 16 }
 0x165   : > { %v5127_v55 = vsel %vm1168_vm0, %v7188_v5, 0  ;;  %v1035_v17 = vmul.bf16 %v7189_v43, %v969_v62  ;;  %v9010_v21 = vsel %vm8031_vm8, %v959_v9, %v963_v22  ;;  %v3112_v11 = vmul.bf16 %v3079_v4, %v8959_v0 }
 0x166   : > { %v1509_v59 = vrot.slane %v1507_v33, 3  ;;  %6745 = vmatpush3.bf16.msra.mxu0 %v5127_v55  ;;  %v1034_v3 = vmul.bf16 %v7190_v1, %v9010_v21  ;;  %v3113_v45 = vmul.bf16 %v3080_v37, %v9010_v21  ;;  %v4512_v12 = vmul.bf16 %v8989_v26, %v8959_v0 }
 0x167   : > { %v4634_v40 = vsel %vm1416_vm9, %v8937_v23, %v4633_v35  ;;  %7079 = vmatprep.subr.msk.bf16.mxu0 %vm1168_vm0, %v8994_v30  ;;  %v9022_v50 = vmul.bf16 %v3081_v27, %v969_v62  ;;  %v9024_v22 = vmul.bf16 %v4481_v42, %v969_v62  ;;  %v4513_v33 = vmul.bf16 %v9000_v57, %v9010_v21 }
 0x168   : > { %6716 = vmatprep.mubr.msk.bf16.mxu0 %vm1119_vm1, %v4634_v40  ;;  %v1512_v13 = vrot.slane %v1510_v36, 4  ;;  %v9029_v2 = vcombine.low %v1035_v17, %v1035_v17  ;;  %v9031_v19 = vcombine.low %v1033_v34, %v1034_v3  ;;  %v9033_v29 = vcombine.low %v3112_v11, %v3113_v45 }
 0x169   : > { %v1516_v23 = vshrl.u32 %v8840_v28, 16  ;;  %v1519_v8 = vshll.u32 %v8840_v28, 16  ;;  %v4636_v27 = vshrl.u32 %v8352_v44, 16  ;;  %v4639_v4 = vshll.u32 %v8352_v44, 16 }
 0x16a   : > { %v1513_v46 = vor.u32 %v1512_v13, %v1509_v59  ;;  %v4645_v62 = vshrl.u32 %v8482_v48, 16  ;;  %v4648_v9 = vshll.u32 %v8482_v48, 16  ;;  %v1525_v42 = vshrl.u32 %v8893_v31, 16 }
 0x16b   : > { %v1518_v37 = vrot.slane %v1516_v23, 3  ;;  %v1521_v34 = vrot.slane %v1519_v8, 4  ;;  %v4638_v36 = vrot.slane %v4636_v27, 3  ;;  %v4641_v5 = vrot.slane %v4639_v4, 4 }
 0x16c   : > { %v1514_v63 = vsel %vm1416_vm9, %v8945_v14, %v1513_v46  ;;  %v4647_v28 = vrot.slane %v4645_v62, 3  ;;  %v4650_v55 = vrot.slane %v4648_v9, 4  ;;  %v1527_v43 = vrot.slane %v1525_v42, 3 }
 0x16d   : > { %6559 = vmatmul.mubr.msk.bf16.gmra.mrb[16].mxu1 %vm1119_vm1, %v1514_v63  ;;  %v1528_v44 = vshll.u32 %v8893_v31, 16  ;;  %v1522_v17 = vor.u32 %v1521_v34, %v1518_v37  ;;  %v4642_v11 = vor.u32 %v4641_v5, %v4638_v36  ;;  %v1534_v59 = vshrl.u32 %v8972_v25, 16 }
 0x16e   : > { %v1537_v48 = vshll.u32 %v8972_v25, 16  ;;  %v4651_v1 = vor.u32 %v4650_v55, %v4647_v28  ;;  %v4654_v14 = vshrl.u32 %v8542_v18, 16  ;;  %v4657_v45 = vshll.u32 %v8542_v18, 16 }
 0x16f   : > { %v1530_v3 = vrot.slane %v1528_v44, 4  ;;  %v1523_v40 = vsel %vm1416_vm9, %v1513_v46, %v1522_v17  ;;  %v4643_v13 = vsel %vm1416_vm9, %v4633_v35, %v4642_v11  ;;  %v1536_v23 = vrot.slane %v1534_v59, 3 }
 0x170   : > { %v1539_v8 = vrot.slane %v1537_v48, 4  ;;  %6562 = vmatprep.mubr.msk.bf16.mxu1 %vm1119_vm1, %v1523_v40  ;;  %6717 = vmatmul.mubr.msk.bf16.gmra.mrb[4].mxu0 %vm1119_vm1, %v4643_v13  ;;  %v4652_v31 = vsel %vm1416_vm9, %v4642_v11, %v4651_v1  ;;  %v4656_v25 = vrot.slane %v4654_v14, 3  ;;  %v4659_v4 = vrot.slane %v4657_v45, 4 }
 0x171   : > { %v1531_v27 = vor.u32 %v1530_v3, %v1527_v43  ;;  %6720 = vmatprep.mubr.msk.bf16.mxu0 %vm1119_vm1, %v4652_v31  ;;  %v4663_v18 = vshrl.u32 %v8705_v58, 16  ;;  %v4666_v46 = vshll.u32 %v8705_v58, 16  ;;  %v1543_v35 = vshrl.u32 %v8984_v41, 16 }
 0x172   : > { %v1540_v37 = vor.u32 %v1539_v8, %v1536_v23  ;;  %v4660_v9 = vor.u32 %v4659_v4, %v4656_v25  ;;  %v1546_v42 = vshll.u32 %v8984_v41, 16  ;;  %v1552_v63 = vshrl.u32 %v9031_v19, 16 }
 0x173   : > { %v1532_v62 = vsel %vm1416_vm9, %v1522_v17, %v1531_v27  ;;  %v4665_v36 = vrot.slane %v4663_v18, 3  ;;  %v4668_v5 = vrot.slane %v4666_v46, 4  ;;  %v1545_v28 = vrot.slane %v1543_v35, 3  ;;  %v10111_v46 = vld [vmem:[#allocation7_spill] sm:$0xff] }
 0x174   : > { %v1541_v34 = vsel %vm1416_vm9, %v1531_v27, %v1540_v37  ;;  %v4661_v55 = vsel %vm1416_vm9, %v4651_v1, %v4660_v9  ;;  %v1548_v43 = vrot.slane %v1546_v42, 4  ;;  %v1554_v58 = vrot.slane %v1552_v63, 3 }
 0x175   : > { %6563 = vmatmul.mubr.msk.bf16.gmra.mrb[20].mxu1 %vm1119_vm1, %v1532_v62  ;;  %v1555_v44 = vshll.u32 %v9031_v19, 16  ;;  %v4669_v17 = vor.u32 %v4668_v5, %v4665_v36  ;;  %v4672_v41 = vshrl.u32 %v8758_v32, 16  ;;  %v4675_v11 = vshll.u32 %v8758_v32, 16 }
 0x176   : > { %6566 = vmatprep.mubr.msk.bf16.mxu1 %vm1119_vm1, %v1541_v34  ;;  %v4681_v59 = vshrl.u32 %v8800_v49, 16  ;;  %v9072_v48 = vcombine.low %v9024_v22, %v9024_v22  ;;  %v1549_v3 = vor.u32 %v1548_v43, %v1545_v28  ;;  %v4684_v1 = vshll.u32 %v8800_v49, 16 }
 0x177   : > { %v1557_v14 = vrot.slane %v1555_v44, 4  ;;  %v4674_v45 = vrot.slane %v4672_v41, 3  ;;  %v4677_v40 = vrot.slane %v4675_v11, 4  ;;  %v1561_v13 = vshrl.u32 %v9029_v2, 16  ;;  %v10114_v41 = vld [vmem:[#allocation92_spill] sm:$0xff] }
 0x178   : > { %v4683_v19 = vrot.slane %v4681_v59, 3  ;;  %6721 = vmatmul.mubr.msk.bf16.gmra.mrb[8].mxu0 %vm1119_vm1, %v4661_v55  ;;  %v4670_v23 = vsel %vm1416_vm9, %v4660_v9, %v4669_v17  ;;  %v1550_v32 = vsel %vm1416_vm9, %v1540_v37, %v1549_v3  ;;  %v4686_v31 = vrot.slane %v4684_v1, 4  ;;  %v10113_v55 = vld [vmem:[#allocation10_spill] sm:$0xff]  ;;  %v10115_v1 = vld [vmem:[#allocation15_spill] sm:$0xff] }
 0x179   : > { %v1558_v8 = vor.u32 %v1557_v14, %v1554_v58  ;;  %6724 = vmatprep.mubr.msk.bf16.mxu0 %vm1119_vm1, %v4670_v23  ;;  %v4678_v22 = vor.u32 %v4677_v40, %v4674_v45  ;;  %v1564_v27 = vshll.u32 %v9029_v2, 16  ;;  %v10108_v49 = vmul.bf16 %v7651_v16, %v7647_v15  ;;  %v10116_v45 = vld [vmem:[#allocation14_spill] sm:$0xff] }
 0x17a   : > { %v10109_v25 = vmul.bf16 %v7596_v51, %v7610_v56  ;;  %v10110_v18 = vmul.bf16 %v7632_v7, %v7628_v6  ;;  %v10112_v37 = vmul.bf16 %v7658_v20, %v10111_v46  ;;  %v4687_v9 = vor.u32 %v4686_v31, %v4683_v19  ;;  %v10118_v19 = vld [vmem:[#allocation13_spill] sm:$0xff] }
 0x17b   : > { %v1559_v62 = vsel %vm1416_vm9, %v1549_v3, %v1558_v8  ;;  %v4690_v42 = vshrl.u32 %v8807_v38, 16  ;;  %v4693_v2 = vshll.u32 %v8807_v38, 16  ;;  %v9102_v56 = vcombine.low %v4512_v12, %v4513_v33 }
 0x17c   : > { %v6114_v4 = vcombine.low %v10109_v25, %v10108_v49  ;;  %v6115_v35 = vcombine.low %v10112_v37, %v10110_v18  ;;  %v1563_v6 = vrot.slane %v1561_v13, 3  ;;  %v1566_v15 = vrot.slane %v1564_v27, 4  ;;  %v10119_v13 = vld [vmem:[#allocation12_spill] sm:$0xff] }
 0x17d   : > { %6567 = vmatmul.mubr.msk.bf16.gmra.mrb[24].mxu1 %vm1119_vm1, %v1550_v32  ;;  %v4679_v34 = vsel %vm1416_vm9, %v4669_v17, %v4678_v22  ;;  %v4688_v36 = vsel %vm1416_vm9, %v4678_v22, %v4687_v9  ;;  %v4692_v57 = vrot.slane %v4690_v42, 3  ;;  %v4695_v21 = vrot.slane %v4693_v2, 4 }
 0x17e   : > { %v2676_v63 = vshll.u32 %v6114_v4, 16  ;;  %v2674_v5 = vshrl.u32 %v6114_v4, 16  ;;  %v2681_v28 = vshll.u32 %v6115_v35, 16  ;;  %6570 = vmatprep.mubr.msk.bf16.mxu1 %vm1119_vm1, %v1559_v62  ;;  %v4699_v0 = vshrl.u32 %v8842_v60, 16 }
 0x17f   : > { %v2685_v12 = vshrl.u32 %v6115_v35, 16  ;;  %v4702_v33 = vshll.u32 %v8842_v60, 16  ;;  %v2689_v43 = vshll.u32 %v10113_v55, 16  ;;  %v1567_v58 = vor.u32 %v1566_v15, %v1563_v6  ;;  %v10121_v15 = vld [vmem:[#allocation21_spill] sm:$0xff] }
 0x180   : > { %v2678_v38 = vrot.slane %v2676_v63, 1  ;;  %v2683_v26 = vrot.slane %v2681_v28, 1  ;;  %v4701_v17 = vrot.slane %v4699_v0, 3  ;;  %v9113_v11 = vsel %vm1168_vm0, %v10114_v41, 0  ;;  %6725 = vmatmul.mubr.msk.bf16.gmra.mrb[12].mxu0 %vm1119_vm1, %v4679_v34  ;;  %v10122_v63 = vld [vmem:[#allocation19_spill] sm:$0xff] }
 0x181   : > { %v4704_v3 = vrot.slane %v4702_v33, 4  ;;  %v2691_v14 = vrot.slane %v2689_v43, 1  ;;  %v10117_v40 = vmul.bf16 %v10115_v1, %v10116_v45  ;;  %v10120_v60 = vmul.bf16 %v10118_v19, %v10119_v13  ;;  %6728 = vmatprep.mubr.msk.bf16.mxu0 %vm1119_vm1, %v4688_v36  ;;  %v10124_v36 = vld [vmem:[#allocation20_spill] sm:$0xff] }
 0x182   : > { %v2679_v44 = vor.u32 %v2678_v38, %v2674_v5  ;;  %v2687_v59 = vor.u32 %v2685_v12, %v2683_v26  ;;  %v4696_v31 = vor.u32 %v4695_v21, %v4692_v57  ;;  %v2693_v22 = vshrl.u32 %v10113_v55, 16  ;;  %v10125_v5 = vld [vmem:[#allocation18_spill] sm:$0xff]  ;;  %v10128_v21 = vld [vmem:[#allocation25_spill] sm:$0xff]  ;;  %v10131_v12 = vld [vmem:[#allocation24_spill] sm:$0xff] }
 0x183   : > { %v6117_v23 = vcombine.low %v10120_v60, %v10117_v40  ;;  %v4708_v27 = vshrl.u32 %v8967_v61, 16  ;;  %v4705_v49 = vor.u32 %v4704_v3, %v4701_v17  ;;  %v4711_v18 = vshll.u32 %v8967_v61, 16 }
 0x184   : > { %v2684_v32 = vsel %vm2672_vm5, %v2679_v44, %v2683_v26  ;;  %v2692_v25 = vsel %vm2672_vm5, %v2687_v59, %v2691_v14  ;;  %v1568_v46 = vsel %vm1416_vm9, %v1558_v8, %v1567_v58  ;;  %v4717_v35 = vshrl.u32 %v8977_v10, 16  ;;  %v10130_v26 = vld [vmem:[#allocation26_spill] sm:$0xff] }
 0x185   : > { %v2697_v4 = vshll.u32 %v6117_v23, 16  ;;  %v4710_v37 = vrot.slane %v4708_v27, 3  ;;  %v4720_v62 = vshll.u32 %v8977_v10, 16  ;;  %6571 = vmatmul.mubr.msk.bf16.gmra.mrb[28].mxu1 %vm1119_vm1, %v1568_v46  ;;  %v2695_v42 = vor.u32 %v2693_v22, %v2691_v14  ;;  %v10127_v10 = vld [vmem:[#allocation27_spill] sm:$0xff]  ;;  %v9150_v14 = vld [vmem:[%s7351_s6 + $0x80] sm:$0xf] }
 0x186   : > { %v4713_v6 = vrot.slane %v4711_v18, 4  ;;  %v10123_v34 = vmul.bf16 %v10121_v15, %v10122_v63  ;;  %v10126_v28 = vmul.bf16 %v10124_v36, %v10125_v5  ;;  %6576 = vmatprep.mubr.msk.bf16.mxu1 %vm1119_vm1, %v2684_v32  ;;  %v4697_v8 = vsel %vm1416_vm9, %v4687_v9, %v4696_v31  ;;  %v9156_v32 = vld [vmem:[%s7351_s6 + $0x84] sm:$0xf]  ;;  %v10137_v63 = vld [vmem:[#allocation32_spill] sm:$0xff] }
 0x187   : > { %v2699_v2 = vrot.slane %v2697_v4, 1  ;;  %v4719_v38 = vrot.slane %v4717_v35, 3  ;;  %v4722_v57 = vrot.slane %v4720_v62, 4  ;;  %v10129_v0 = vmul.bf16 %v10127_v10, %v10128_v21  ;;  %v10133_v62 = vld [vmem:[#allocation31_spill] sm:$0xff] }
 0x188   : > { %v6118_v61 = vcombine.low %v10126_v28, %v10123_v34  ;;  %v10132_v33 = vmul.bf16 %v10130_v26, %v10131_v12  ;;  %v4706_v43 = vsel %vm1416_vm9, %v4696_v31, %v4705_v49  ;;  %v2701_v44 = vshrl.u32 %v6117_v23, 16  ;;  %6729 = vmatmul.mubr.msk.bf16.gmra.mrb[16].mxu0 %vm1119_vm1, %v4697_v8  ;;  %v10139_v28 = vld [vmem:[#allocation39_spill] sm:$0xff] }
 0x189   : > { %v2700_v58 = vsel %vm2672_vm5, %v2695_v42, %v2699_v2  ;;  %v4714_v41 = vor.u32 %v4713_v6, %v4710_v37  ;;  %v4726_v9 = vshrl.u32 %v8986_v52, 16  ;;  %v4729_v13 = vshll.u32 %v8986_v52, 16  ;;  %6732 = vmatprep.mubr.msk.bf16.mxu0 %vm1119_vm1, %v4706_v43  ;;  %v10134_v42 = vld [vmem:[#allocation33_spill] sm:$0xff]  ;;  %v10136_v6 = vld [vmem:[#allocation30_spill] sm:$0xff]  ;;  %v10173_v35 = vld [vmem:[#allocation75_spill] sm:$0xff] }
 0x18a   : > { %v6119_v55 = vcombine.low %v10132_v33, %v10129_v0  ;;  %v2705_v17 = vshll.u32 %v6118_v61, 16  ;;  %v2709_v59 = vshrl.u32 %v6118_v61, 16  ;;  %v2703_v45 = vor.u32 %v2701_v44, %v2699_v2  ;;  %v10140_v61 = vld [vmem:[#allocation37_spill] sm:$0xff] }
 0x18b   : > { %v4735_v60 = vshrl.u32 %v9102_v56, 16  ;;  %v4723_v23 = vor.u32 %v4722_v57, %v4719_v38  ;;  %v4728_v22 = vrot.slane %v4726_v9, 3  ;;  %v4738_v27 = vshll.u32 %v9102_v56, 16  ;;  %v10142_v56 = vld [vmem:[#allocation38_spill] sm:$0xff]  ;;  %v10143_v38 = vld [vmem:[#allocation36_spill] sm:$0xff] }
 0x18c   : > { %v2713_v3 = vshll.u32 %v6119_v55, 16  ;;  %v2707_v40 = vrot.slane %v2705_v17, 1  ;;  %v4731_v46 = vrot.slane %v4729_v13, 4  ;;  %v10135_v2 = vmul.bf16 %v10133_v62, %v10134_v42 }
 0x18d   : > { %v4737_v37 = vrot.slane %v4735_v60, 3  ;;  %v4740_v52 = vrot.slane %v4738_v27, 4  ;;  %v10138_v34 = vmul.bf16 %v10136_v6, %v10137_v63  ;;  %v10141_v8 = vmul.bf16 %v10139_v28, %v10140_v61  ;;  %6577 = vmatmul.mubr.msk.bf16.vlgmr.msra.gmra.mrb[0].mxu1 %vm1119_vm1, %v2692_v25  ;;  %v10146_v60 = vld [vmem:[#allocation45_spill] sm:$0xff] }
 0x18e   : > { %v2715_v31 = vrot.slane %v2713_v3, 1  ;;  %v2708_v4 = vsel %vm2672_vm5, %v2703_v45, %v2707_v40  ;;  %v2711_v18 = vor.u32 %v2709_v59, %v2707_v40  ;;  %v10144_v57 = vmul.bf16 %v10142_v56, %v10143_v38  ;;  %6609 = vmatpush3.bf16.msra.mxu1 %v9113_v11  ;;  %6580 = vmatprep.mubr.msk.bf16.mxu1 %vm1119_vm1, %v2700_v58  ;;  %v10147_v58 = vld [vmem:[#allocation43_spill] sm:$0xff]  ;;  %v10155_v63 = vld [vmem:[#allocation53_spill] sm:$0xff] }
 0x18f   : > { %v6120_v5 = vcombine.low %v10138_v34, %v10135_v2  ;;  %v4744_v33 = vshrl.u32 %v9072_v48, 16  ;;  %v4747_v43 = vshll.u32 %v9072_v48, 16  ;;  %v9183_v44 = vcombine.low %v9022_v50, %v9022_v50  ;;  %v7191_v48 = vld [vmem:[%s9830_s1 + $0x10] sm:$0xf] }
 0x190   : > { %v6121_v21 = vcombine.low %v10144_v57, %v10141_v8  ;;  %v2716_v12 = vsel %vm2672_vm5, %v2711_v18, %v2715_v31  ;;  %v4715_v17 = vsel %vm1416_vm9, %v4705_v49, %v4714_v41  ;;  %v2717_v59 = vshrl.u32 %v6119_v55, 16  ;;  %7075 = vmatprep.subr.msk.bf16.mxu1 %vm1168_vm0, %v7191_v48  ;;  %v10149_v49 = vld [vmem:[#allocation44_spill] sm:$0xff]  ;;  %v10150_v55 = vld [vmem:[#allocation42_spill] sm:$0xff] }
 0x191   : > { %10145 = vst [vmem:[#allocation7_spill] sm:$0xff] %v9183_v44  ;;  %v2721_v3 = vshll.u32 %v6120_v5, 16  ;;  %v4724_v25 = vsel %vm1416_vm9, %v4714_v41, %v4723_v23  ;;  %v4732_v9 = vor.u32 %v4731_v46, %v4728_v22  ;;  %v4741_v45 = vor.u32 %v4740_v52, %v4737_v37  ;;  %6733 = vmatmul.mubr.msk.bf16.gmra.mrb[20].mxu0 %vm1119_vm1, %v4715_v17  ;;  %v10152_v37 = vld [vmem:[#allocation56_spill] sm:$0xff]  ;;  %v10153_v52 = vld [vmem:[#allocation55_spill] sm:$0xff] }
 0x192   : > { %v2729_v40 = vshll.u32 %v6121_v21, 16  ;;  %v2719_v50 = vor.u32 %v2717_v59, %v2715_v31  ;;  %v2725_v11 = vshrl.u32 %v6120_v5, 16  ;;  %v10148_v27 = vmul.bf16 %v10146_v60, %v10147_v58  ;;  %v10156_v34 = vld [vmem:[#allocation52_spill] sm:$0xff]  ;;  %6736 = vmatprep.mubr.msk.bf16.mxu0 %vm1119_vm1, %v4724_v25  ;;  %v10162_v58 = vld [vmem:[#allocation59_spill] sm:$0xff] }
 0x193   : > { %v2723_v13 = vrot.slane %v2721_v3, 1  ;;  %v10151_v18 = vmul.bf16 %v10149_v49, %v10150_v55  ;;  %v4746_v22 = vrot.slane %v4744_v33, 3  ;;  %v4749_v46 = vrot.slane %v4747_v43, 4  ;;  %v10158_v43 = vld [vmem:[#allocation63_spill] sm:$0xff]  ;;  %v10159_v3 = vld [vmem:[#allocation62_spill] sm:$0xff]  ;;  %v10161_v48 = vld [vmem:[#allocation60_spill] sm:$0xff] }
 0x194   : > { %v2731_v41 = vrot.slane %v2729_v40, 1  ;;  %v10154_v2 = vmul.bf16 %v10152_v37, %v10153_v52  ;;  %v10157_v31 = vmul.bf16 %v10155_v63, %v10156_v34  ;;  %v2733_v38 = vshrl.u32 %v6121_v21, 16  ;;  %v10167_v34 = vld [vmem:[#allocation66_spill] sm:$0xff]  ;;  %v10206_v44 = vld [vmem:[#allocation83_spill] sm:$0xff] }
 0x195   : > { %v6122_v42 = vcombine.low %v10151_v18, %v10148_v27  ;;  %v2724_v5 = vsel %vm2672_vm5, %v2719_v50, %v2723_v13  ;;  %v2727_v8 = vor.u32 %v2725_v11, %v2723_v13  ;;  %v4733_v59 = vsel %vm1416_vm9, %v4723_v23, %v4732_v9  ;;  %6581 = vmatmul.mubr.msk.bf16.gmra.mrb[4].mxu1 %vm1119_vm1, %v2708_v4  ;;  %v10164_v13 = vld [vmem:[#allocation71_spill] sm:$0xff]  ;;  %v10165_v11 = vld [vmem:[#allocation72_spill] sm:$0xff] }
 0x196   : > { %v6123_v61 = vcombine.low %v10157_v31, %v10154_v2  ;;  %v4742_v17 = vsel %vm1416_vm9, %v4732_v9, %v4741_v45  ;;  %v10160_v40 = vmul.bf16 %v10158_v43, %v10159_v3  ;;  %v10163_v27 = vmul.bf16 %v10161_v48, %v10162_v58  ;;  %v10168_v31 = vld [vmem:[#allocation68_spill] sm:$0xff]  ;;  %6584 = vmatprep.mubr.msk.bf16.mxu1 %vm1119_vm1, %v2716_v12  ;;  %v7192_v12 = vld [vmem:[%s7351_s6 + $0x1c] sm:$0xf] }
 0x197   : > { %v2737_v57 = vshll.u32 %v6122_v42, 16  ;;  %v2732_v18 = vsel %vm2672_vm5, %v2727_v8, %v2731_v41  ;;  %v2735_v25 = vor.u32 %v2733_v38, %v2731_v41  ;;  %v2741_v50 = vshrl.u32 %v6122_v42, 16  ;;  %v10204_v48 = vld [vmem:[#allocation4_spill] sm:$0xff] }
 0x198   : > { %v2745_v33 = vshll.u32 %v6123_v61, 16  ;;  %v6124_v55 = vcombine.low %v10163_v27, %v10160_v40  ;;  %v2749_v21 = vshrl.u32 %v6123_v61, 16  ;;  %v10166_v2 = vmul.bf16 %v10164_v13, %v10165_v11  ;;  %v10170_v61 = vld [vmem:[#allocation77_spill] sm:$0xff]  ;;  %v10171_v40 = vld [vmem:[#allocation76_spill] sm:$0xff]  ;;  %v10174_v11 = vld [vmem:[#allocation74_spill] sm:$0xff] }
 0x199   : > { %v2739_v52 = vrot.slane %v2737_v57, 1  ;;  %v10169_v3 = vmul.bf16 %v10167_v34, %v10168_v31  ;;  %v4750_v8 = vor.u32 %v4749_v46, %v4746_v22  ;;  %v10172_v27 = vmul.bf16 %v10170_v61, %v10171_v40  ;;  %v7193_v22 = vld [vmem:[%s7351_s6 + $0x18] sm:$0xf]  ;;  %v10176_v31 = vld [vmem:[#allocation84_spill] sm:$0xff]  ;;  %6737 = vmatmul.mubr.msk.bf16.gmra.mrb[24].mxu0 %vm1119_vm1, %v4733_v59  ;;  %v10198_v61 = vld [vmem:[#allocation67_spill] sm:$0xff] }
 0x19a   : > { %v2747_v23 = vrot.slane %v2745_v33, 1  ;;  %v2753_v9 = vshll.u32 %v6124_v55, 16  ;;  %v2757_v38 = vshrl.u32 %v6124_v55, 16  ;;  %v10175_v0 = vmul.bf16 %v10173_v35, %v10174_v11  ;;  %6740 = vmatprep.mubr.msk.bf16.mxu0 %vm1119_vm1, %v4742_v17 }
 0x19b   : > { %v6125_v58 = vcombine.low %v10169_v3, %v10166_v2  ;;  %v9226_v41 = vsel %vm2672_vm5, %v2735_v25, %v2739_v52  ;;  %v2743_v42 = vor.u32 %v2741_v50, %v2739_v52  ;;  %v6283_v46 = vcombine.low %v7193_v22, %v7192_v12  ;;  %v10177_v52 = vld [vmem:[#allocation86_spill] sm:$0xff]  ;;  %v10179_v50 = vld [vmem:[#allocation81_spill] sm:$0xff]  ;;  %v10183_v22 = vld [vmem:[#allocation91_spill] sm:$0xff] }
 0x19c   : > { %v2751_v4 = vor.u32 %v2749_v21, %v2747_v23  ;;  %v2755_v57 = vrot.slane %v2753_v9, 1  ;;  %v6126_v13 = vcombine.low %v10175_v0, %v10172_v27  ;;  %v10178_v55 = vmul.bf16 %v10176_v31, %v10177_v52  ;;  %v10180_v21 = vld [vmem:[#allocation82_spill] sm:$0xff]  ;;  %v10185_v52 = vld [vmem:[#allocation89_spill] sm:$0xff] }
 0x19d   : > { %v2761_v33 = vshll.u32 %v6125_v58, 16  ;;  %v9235_v2 = vsel %vm2672_vm5, %v2743_v42, %v2747_v23  ;;  %v2765_v25 = vshrl.u32 %v6125_v58, 16  ;;  %v10181_v9 = vmul.bf16 %v10179_v50, %v10180_v21  ;;  %v10182_v12 = vld [vmem:[#allocation90_spill] sm:$0xff]  ;;  %6585 = vmatmul.mubr.msk.bf16.gmra.mrb[8].mxu1 %vm1119_vm1, %v2724_v5  ;;  %v9286_v5 = vld [vmem:[%s7351_s6 + $0x30] sm:$0xf]  ;;  %v10197_v31 = vld [vmem:[#allocation61_spill] sm:$0xff] }
 0x19e   : > { %v9247_v40 = vsel %vm2672_vm5, %v2751_v4, %v2755_v57  ;;  %v2759_v0 = vor.u32 %v2757_v38, %v2755_v57  ;;  %v2769_v42 = vshll.u32 %v6126_v13, 16  ;;  %v4751_v58 = vsel %vm1416_vm9, %v4741_v45, %v4750_v8  ;;  %v10186_v4 = vld [vmem:[#allocation88_spill] sm:$0xff]  ;;  %6588 = vmatprep.mubr.msk.bf16.mxu1 %vm1119_vm1, %v2732_v18 }
 0x19f   : > { %v6127_v3 = vcombine.low %v10181_v9, %v10178_v55  ;;  %v2763_v23 = vrot.slane %v2761_v33, 1  ;;  %v9253_v27 = vsel %vm1168_vm0, %v8994_v30, 0  ;;  %v10184_v59 = vmul.bf16 %v10182_v12, %v10183_v22  ;;  %v1813_v9 = vld [vmem:[%s7351_s6 + $0x88] sm:$0x1]  ;;  %v9340_v12 = vld [vmem:[%s7351_s6 + $0x54] sm:$0xf] }
 0x1a0   : > { %v10187_v55 = vmul.bf16 %v10185_v52, %v10186_v4  ;;  %v2771_v17 = vrot.slane %v2769_v42, 1  ;;  %v2773_v21 = vshrl.u32 %v6126_v13, 16  ;;  %v10188_v50 = vmul.bf16 %v8764_v47, %v9156_v32  ;;  %v9337_v52 = vld [vmem:[%s7351_s6 + $0x50] sm:$0xf]  ;;  %v9356_v47 = vld [vmem:[%s7351_s6 + $0x5c] sm:$0xf] }
 0x1a1   : > { %v2777_v11 = vshll.u32 %v6127_v3, 16  ;;  %v9262_v57 = vsel %vm2672_vm5, %v2759_v0, %v2763_v23  ;;  %v2767_v33 = vor.u32 %v2765_v25, %v2763_v23  ;;  %v2781_v8 = vshrl.u32 %v6127_v3, 16  ;;  %v9273_v0 = vld [vmem:[%s7351_s6 + $0x28] sm:$0xf]  ;;  %v9276_v25 = vld [vmem:[%s7351_s6 + $0x2c] sm:$0xf]  ;;  %6741 = vmatmul.mubr.msk.bf16.gmra.mrb[28].mxu0 %vm1119_vm1, %v4751_v58 }
 0x1a2   : > { %v6128_v38 = vcombine.low %v10187_v55, %v10184_v59  ;;  %v10189_v22 = vmul.bf16 %v8681_v54, %v9150_v14  ;;  %v2775_v23 = vor.u32 %v2773_v21, %v2771_v17  ;;  %v9289_v59 = vld [vmem:[%s7351_s6 + $0x34] sm:$0xf]  ;;  %v10193_v21 = vld [vmem:[#allocation46_spill] sm:$0xff]  ;;  %6746 = vmatprep.mubr.msk.bf16.mxu0 %vm1119_vm1, %v6283_v46  ;;  %v9332_v46 = vld [vmem:[%s7351_s6 + $0x4c] sm:$0xf]  ;;  %v3227_v34 = vshrl.u32 %v10198_v61, 16 }
 0x1a3   : > { %v2779_v45 = vrot.slane %v2777_v11, 1  ;;  %v9281_v3 = vsel %vm2672_vm5, %v2767_v33, %v2771_v17  ;;  %v10192_v17 = vld [vmem:[#allocation49_spill] sm:$0xff]  ;;  %v10196_v58 = vld [vmem:[#allocation58_spill] sm:$0xff]  ;;  %v10207_v63 = vcombine.low %v9273_v0, %v9276_v25 }
 0x1a4   : > { %v2785_v30 = vshll.u32 %v6128_v38, 16  ;;  %v6129_v4 = vcombine.low %v10189_v22, %v10188_v50  ;;  %v2789_v42 = vshrl.u32 %v6128_v38, 16  ;;  %v2586_v50 = vmul.bf16 %v8733_v24, %v1813_v9  ;;  %v10190_v38 = vld [vmem:[#allocation50_spill] sm:$0xff] }
 0x1a5   : > { %v2783_v32 = vor.u32 %v2781_v8, %v2779_v45  ;;  %v9294_v33 = vsel %vm2672_vm5, %v2775_v23, %v2779_v45  ;;  %v10191_v18 = vmul.bf16 %v10190_v38, %v8051_v53  ;;  %v10194_v8 = vmul.bf16 %v10192_v17, %v10193_v21  ;;  %v9329_v21 = vld [vmem:[%s7351_s6 + $0x48] sm:$0xf]  ;;  %6589 = vmatmul.mubr.msk.bf16.gmra.mrb[12].mxu1 %vm1119_vm1, %v9226_v41  ;;  %v10199_v54 = vld [vmem:[#allocation70_spill] sm:$0xff] }
 0x1a6   : > { %v2787_v11 = vrot.slane %v2785_v30, 1  ;;  %v2793_v14 = vshll.u32 %v6129_v4, 16  ;;  %v10195_v30 = vld [vmem:[#allocation51_spill] sm:$0xff]  ;;  %v6130_v45 = vcombine.low %v2586_v50, %v2586_v50  ;;  %v3224_v35 = vor.u32 %v10197_v31, %v10196_v58  ;;  %6592 = vmatprep.mubr.msk.bf16.mxu1 %vm1119_vm1, %v9235_v2  ;;  %v10202_v2 = vld [vmem:[#allocation80_spill] sm:$0xff] }
 0x1a7   : > { %v6148_v9 = vcombine.low %v10194_v8, %v10191_v18  ;;  %v3209_v22 = vshrl.u32 %v10195_v30, 16  ;;  %v3212_v17 = vshll.u32 %v10195_v30, 16  ;;  %v9310_v18 = vld [vmem:[%s7351_s6 + $0x38] sm:$0xf]  ;;  %v3230_v8 = vshll.u32 %v10198_v61, 16  ;;  %v10203_v31 = vld [vmem:[#allocation3_spill] sm:$0xff] }
 0x1a8   : > { %v9304_v13 = vsel %vm2672_vm5, %v2783_v32, %v2787_v11  ;;  %v2791_v24 = vor.u32 %v2789_v42, %v2787_v11  ;;  %v2795_v55 = vrot.slane %v2793_v14, 1  ;;  %v9313_v32 = vld [vmem:[%s7351_s6 + $0x3c] sm:$0xf]  ;;  %v9318_v11 = vld [vmem:[%s7351_s6 + $0x40] sm:$0xf]  ;;  %v3229_v61 = vrot.slane %v3227_v34, 3 }
 0x1a9   : > { %v3201_v23 = vshrl.u32 %v6148_v9, 16  ;;  %v3204_v53 = vshll.u32 %v6148_v9, 16  ;;  %v3211_v38 = vrot.slane %v3209_v22, 3  ;;  %v9321_v14 = vld [vmem:[%s7351_s6 + $0x44] sm:$0xf]  ;;  %v2797_v9 = vshrl.u32 %v6129_v4, 16 }
 0x1aa   : > { %v9326_v50 = vsel %vm2672_vm5, %v2791_v24, %v2795_v55  ;;  %v3214_v42 = vrot.slane %v3212_v17, 4  ;;  %v9353_v24 = vld [vmem:[%s7351_s6 + $0x58] sm:$0xf]  ;;  %v3232_v58 = vrot.slane %v3230_v8, 4  ;;  %v3236_v41 = vshrl.u32 %v10199_v54, 16  ;;  %v10210_v34 = vld [vmem:[#allocation8_spill] sm:$0xff] }
 0x1ab   : > { %v3203_v30 = vrot.slane %v3201_v23, 3  ;;  %v3206_v22 = vrot.slane %v3204_v53, 4  ;;  %v2799_v4 = vor.u32 %v2797_v9, %v2795_v55  ;;  %v2801_v23 = vshll.u32 %v6130_v45, 16  ;;  %v9370_v9 = vld [vmem:[%s7351_s6 + $0x64] sm:$0xf] }
 0x1ac   : > { %v3215_v17 = vor.u32 %v3214_v42, %v3211_v38  ;;  %v3239_v38 = vshll.u32 %v10199_v54, 16  ;;  %v3245_v42 = vshrl.u32 %v10202_v2, 16  ;;  %v3233_v8 = vor.u32 %v3232_v58, %v3229_v61 }
 0x1ad   : > { %v3207_v53 = vor.u32 %v3206_v22, %v3203_v30  ;;  %v9373_v30 = vld [vmem:[%s7351_s6 + $0x60] sm:$0xf]  ;;  %v3238_v22 = vrot.slane %v3236_v41, 3  ;;  %v2803_v54 = vrot.slane %v2801_v23, 1  ;;  %v9394_v23 = vld [vmem:[%s7351_s6 + $0x68] sm:$0xf]  ;;  %6593 = vmatmul.mubr.msk.bf16.gmra.mrb[16].mxu1 %vm1119_vm1, %v9247_v40 }
 0x1ae   : > { %v9365_v45 = vsel %vm1416_vm9, %v3215_v17, %v3224_v35  ;;  %v3247_v43 = vrot.slane %v3245_v42, 3  ;;  %v9389_v61 = vsel %vm1416_vm9, %v3224_v35, %v3233_v8  ;;  %6596 = vmatprep.mubr.msk.bf16.mxu1 %vm1119_vm1, %v9262_v57  ;;  %v10219_v57 = vcombine.low %v9286_v5, %v9289_v59  ;;  %v10223_v5 = vld [vmem:[#allocation17_spill] sm:$0xff] }
 0x1af   : > { %v9362_v55 = vsel %vm1416_vm9, %v3207_v53, %v3215_v17  ;;  %10201 = vst [vmem:[#allocation92_spill] sm:$0xff] %v9365_v45  ;;  %v3248_v53 = vshll.u32 %v10202_v2, 16  ;;  %v10205_v17 = vcombine.low %v10203_v31, %v10204_v48  ;;  %v3241_v45 = vrot.slane %v3239_v38, 4  ;;  %v10208_v31 = vld [vmem:[#allocation95_spill] sm:$0xff]  ;;  %v10209_v38 = vld [vmem:[#allocation102_spill] sm:$0xff] }
 0x1b0   : > { %10200 = vst [vmem:[#allocation10_spill] sm:$0xff] %v9362_v55  ;;  %v3254_v55 = vshrl.u32 %v10206_v44, 16  ;;  %v3257_v48 = vshll.u32 %v10206_v44, 16  ;;  %v3263_v41 = vshrl.u32 %v10208_v31, 16  ;;  %v9400_v0 = vsel %vm2672_vm5, %v2799_v4, %v2803_v54 }
 0x1b1   : > { %6747 = vmatmul.mubr.msk.bf16.vlgmr.msra.gmra.mrb[0].mxu0 %vm1119_vm1, %v10205_v17  ;;  %v3250_v58 = vrot.slane %v3248_v53, 4  ;;  %v3242_v42 = vor.u32 %v3241_v45, %v3238_v22  ;;  %v3266_v17 = vshll.u32 %v10208_v31, 16  ;;  %v10211_v2 = vmul.bf16 %v10210_v34, %v7651_v16  ;;  %v10212_v45 = vld [vmem:[#allocation5_spill] sm:$0xff]  ;;  %v10214_v31 = vld [vmem:[#allocation6_spill] sm:$0xff] }
 0x1b2   : > { %6779 = vmatpush3.bf16.msra.mxu0 %v9253_v27  ;;  %6750 = vmatprep.mubr.msk.bf16.mxu0 %vm1119_vm1, %v10207_v63  ;;  %v3256_v27 = vrot.slane %v3254_v55, 3  ;;  %v3259_v35 = vrot.slane %v3257_v48, 4  ;;  %v3265_v25 = vrot.slane %v3263_v41, 3  ;;  %v10213_v55 = vmul.bf16 %v10212_v45, %v7596_v51  ;;  %v10218_v48 = vld [vmem:[#allocation97_spill] sm:$0xff] }
 0x1b3   : > { %v3251_v63 = vor.u32 %v3250_v58, %v3247_v43  ;;  %v9405_v44 = vsel %vm1416_vm9, %v3233_v8, %v3242_v42  ;;  %v3268_v53 = vrot.slane %v3266_v17, 4  ;;  %v10215_v4 = vmul.bf16 %v10214_v31, %v7632_v7  ;;  %v10216_v43 = vld [vmem:[#allocation9_spill] sm:$0xff] }
 0x1b4   : > { %v6316_v22 = vcombine.low %v10213_v55, %v10211_v2  ;;  %v10217_v54 = vmul.bf16 %v10216_v43, %v7658_v20  ;;  %v3260_v8 = vor.u32 %v3259_v35, %v3256_v27  ;;  %v3272_v16 = vshrl.u32 %v10218_v48, 16 }
 0x1b5   : > { %v9422_v40 = vsel %vm1416_vm9, %v3242_v42, %v3251_v63  ;;  %v3275_v34 = vshll.u32 %v10218_v48, 16  ;;  %v3269_v51 = vor.u32 %v3268_v53, %v3265_v25  ;;  %v10220_v25 = vld [vmem:[#allocation100_spill] sm:$0xff]  ;;  %v10224_v59 = vmul.bf16 %v10223_v5, %v10115_v1  ;;  %6597 = vmatmul.mubr.msk.bf16.gmra.mrb[20].mxu1 %vm1119_vm1, %v9281_v3  ;;  %v10229_v5 = vld [vmem:[#allocation23_spill] sm:$0xff] }
 0x1b6   : > { %v6317_v58 = vcombine.low %v10217_v54, %v10215_v4  ;;  %v5474_v41 = vshrl.u32 %v6316_v22, 16  ;;  %v5476_v2 = vshll.u32 %v6316_v22, 16  ;;  %v9427_v7 = vsel %vm1416_vm9, %v3251_v63, %v3260_v8  ;;  %v10222_v4 = vld [vmem:[#allocation11_spill] sm:$0xff]  ;;  %v10225_v54 = vld [vmem:[#allocation16_spill] sm:$0xff]  ;;  %6600 = vmatprep.mubr.msk.bf16.mxu1 %vm1119_vm1, %v9294_v33 }
 0x1b7   : > { %v3274_v45 = vrot.slane %v3272_v16, 3  ;;  %v3277_v55 = vrot.slane %v3275_v34, 4  ;;  %v9434_v42 = vsel %vm1416_vm9, %v3260_v8, %v3269_v51  ;;  %v3281_v53 = vshrl.u32 %v10220_v25, 16 }
 0x1b8   : > { %v5481_v17 = vshll.u32 %v6317_v58, 16  ;;  %v5485_v20 = vshrl.u32 %v6317_v58, 16  ;;  %v5478_v27 = vrot.slane %v5476_v2, 1  ;;  %v10221_v22 = vcombine.low %v9310_v18, %v9313_v32 }
 0x1b9   : > { %6751 = vmatmul.mubr.msk.bf16.gmra.mrb[4].mxu0 %vm1119_vm1, %v10219_v57  ;;  %v3278_v63 = vor.u32 %v3277_v55, %v3274_v45  ;;  %v3284_v31 = vshll.u32 %v10220_v25, 16  ;;  %v5489_v43 = vshll.u32 %v10222_v4, 16  ;;  %v10226_v58 = vmul.bf16 %v10225_v54, %v10118_v19  ;;  %v10227_v55 = vld [vmem:[#allocation101_spill] sm:$0xff] }
 0x1ba   : > { %v5483_v35 = vrot.slane %v5481_v17, 1  ;;  %6754 = vmatprep.mubr.msk.bf16.mxu0 %vm1119_vm1, %v10221_v22  ;;  %v5479_v48 = vor.u32 %v5478_v27, %v5474_v41  ;;  %v3283_v34 = vrot.slane %v3281_v53, 3  ;;  %v5493_v2 = vshrl.u32 %v10222_v4, 16 }
 0x1bb   : > { %v6319_v8 = vcombine.low %v10226_v58, %v10224_v59  ;;  %v9451_v18 = vsel %vm1416_vm9, %v3269_v51, %v3278_v63  ;;  %v3286_v32 = vrot.slane %v3284_v31, 4  ;;  %v5491_v17 = vrot.slane %v5489_v43, 1  ;;  %v10231_v59 = vld [vmem:[#allocation22_spill] sm:$0xff] }
 0x1bc   : > { %v5487_v16 = vor.u32 %v5485_v20, %v5483_v35  ;;  %v9456_v1 = vsel %vm2672_vm5, %v5479_v48, %v5483_v35  ;;  %v3290_v19 = vshrl.u32 %v10227_v55, 16  ;;  %v3293_v41 = vshll.u32 %v10227_v55, 16  ;;  %v10228_v20 = vld [vmem:[#allocation103_spill] sm:$0xff] }
 0x1bd   : > { %v5497_v45 = vshll.u32 %v6319_v8, 16  ;;  %v3299_v57 = vshrl.u32 %v10228_v20, 16  ;;  %v3287_v51 = vor.u32 %v3286_v32, %v3283_v34  ;;  %v5495_v25 = vor.u32 %v5493_v2, %v5491_v17  ;;  %6601 = vmatmul.mubr.msk.bf16.gmra.mrb[24].mxu1 %vm1119_vm1, %v9304_v13 }
 0x1be   : > { %v9464_v27 = vsel %vm2672_vm5, %v5487_v16, %v5491_v17  ;;  %v3292_v22 = vrot.slane %v3290_v19, 3  ;;  %v3295_v3 = vrot.slane %v3293_v41, 4  ;;  %v3302_v35 = vshll.u32 %v10228_v20, 16  ;;  %v10236_v17 = vld [vmem:[#allocation28_spill] sm:$0xff]  ;;  %6604 = vmatprep.mubr.msk.bf16.mxu1 %vm1119_vm1, %v9326_v50 }
 0x1bf   : > { %v5499_v53 = vrot.slane %v5497_v45, 1  ;;  %v3301_v31 = vrot.slane %v3299_v57, 3  ;;  %v9468_v4 = vsel %vm1416_vm9, %v3278_v63, %v3287_v51  ;;  %v10230_v33 = vmul.bf16 %v10229_v5, %v10121_v15  ;;  %v10234_v63 = vld [vmem:[#allocation29_spill] sm:$0xff]  ;;  %v10238_v15 = vld [vmem:[#allocation104_spill] sm:$0xff] }
 0x1c0   : > { %v10232_v54 = vmul.bf16 %v10231_v59, %v10124_v36  ;;  %v5501_v48 = vshrl.u32 %v6319_v8, 16  ;;  %v10233_v16 = vcombine.low %v9318_v11, %v9321_v14  ;;  %v3296_v34 = vor.u32 %v3295_v3, %v3292_v22  ;;  %v10240_v3 = vld [vmem:[#allocation105_spill] sm:$0xff] }
 0x1c1   : > { %v9471_v43 = vsel %vm2672_vm5, %v5495_v25, %v5499_v53  ;;  %v3304_v2 = vrot.slane %v3302_v35, 4  ;;  %v10235_v32 = vmul.bf16 %v10234_v63, %v10127_v10  ;;  %v10237_v45 = vmul.bf16 %v10236_v17, %v10130_v26  ;;  %v10247_v17 = vld [vmem:[#allocation40_spill] sm:$0xff] }
 0x1c2   : > { %v6320_v58 = vcombine.low %v10232_v54, %v10230_v33  ;;  %6755 = vmatmul.mubr.msk.bf16.gmra.mrb[8].mxu0 %vm1119_vm1, %v10233_v16  ;;  %v3308_v19 = vshrl.u32 %v10238_v15, 16  ;;  %v10239_v36 = vcombine.low %v9329_v21, %v9332_v46  ;;  %v5503_v8 = vor.u32 %v5501_v48, %v5499_v53  ;;  %v10241_v53 = vld [vmem:[#allocation35_spill] sm:$0xff]  ;;  %v10243_v33 = vld [vmem:[#allocation34_spill] sm:$0xff] }
 0x1c3   : > { %v6321_v55 = vcombine.low %v10237_v45, %v10235_v32  ;;  %v3311_v41 = vshll.u32 %v10238_v15, 16  ;;  %v9496_v20 = vsel %vm1416_vm9, %v3287_v51, %v3296_v34  ;;  %v3305_v10 = vor.u32 %v3304_v2, %v3301_v31  ;;  %v10245_v32 = vld [vmem:[#allocation41_spill] sm:$0xff] }
 0x1c4   : > { %6758 = vmatprep.mubr.msk.bf16.mxu0 %vm1119_vm1, %v10239_v36  ;;  %v5505_v11 = vshll.u32 %v6320_v58, 16  ;;  %v5509_v14 = vshrl.u32 %v6320_v58, 16  ;;  %v3310_v25 = vrot.slane %v3308_v19, 3  ;;  %v3317_v35 = vshrl.u32 %v10240_v3, 16 }
 0x1c5   : > { %v5513_v57 = vshll.u32 %v6321_v55, 16  ;;  %v3313_v22 = vrot.slane %v3311_v41, 4  ;;  %v3320_v5 = vshll.u32 %v10240_v3, 16  ;;  %v9503_v21 = vsel %vm1416_vm9, %v3296_v34, %v3305_v10  ;;  %6605 = vmatmul.mubr.msk.bf16.gmra.mrb[28].mxu1 %vm1119_vm1, %v9400_v0 }
 0x1c6   : > { %v5507_v26 = vrot.slane %v5505_v11, 1  ;;  %v10242_v51 = vmul.bf16 %v10241_v53, %v10133_v62  ;;  %v10244_v31 = vmul.bf16 %v10243_v33, %v10136_v6  ;;  %v5517_v54 = vshrl.u32 %v6321_v55, 16  ;;  %v5352_v53 = vld [vmem:[%s7351_s6 + $0x90] sm:$0xf] }
 0x1c7   : > { %v5515_v46 = vrot.slane %v5513_v57, 1  ;;  %v3314_v13 = vor.u32 %v3313_v22, %v3310_v25  ;;  %v3319_v16 = vrot.slane %v3317_v35, 3  ;;  %v3322_v34 = vrot.slane %v3320_v5, 4  ;;  %v10251_v25 = vld [vmem:[#allocation48_spill] sm:$0xff] }
 0x1c8   : > { %v6322_v59 = vcombine.low %v10244_v31, %v10242_v51  ;;  %v9514_v58 = vsel %vm2672_vm5, %v5503_v8, %v5507_v26  ;;  %v5511_v48 = vor.u32 %v5509_v14, %v5507_v26  ;;  %v10246_v62 = vmul.bf16 %v10245_v32, %v10139_v28  ;;  %v10255_v51 = vld [vmem:[#allocation57_spill] sm:$0xff]  ;;  %v10257_v31 = vld [vmem:[#allocation54_spill] sm:$0xff]  ;;  %v10261_v32 = vld [vmem:[#allocation7_spill] sm:$0xff] }
 0x1c9   : > { %v5519_v2 = vor.u32 %v5517_v54, %v5515_v46  ;;  %v10248_v6 = vmul.bf16 %v10247_v17, %v10142_v56  ;;  %v9526_v50 = vsel %vm1416_vm9, %v3305_v10, %v3314_v13  ;;  %v3326_v19 = vshrl.u32 %v8979_v39, 16 }
 0x1ca   : > { %v5521_v63 = vshll.u32 %v6322_v59, 16  ;;  %v9523_v55 = vsel %vm2672_vm5, %v5511_v48, %v5515_v46  ;;  %v5525_v15 = vshrl.u32 %v6322_v59, 16  ;;  %v10249_v36 = vcombine.low %v9337_v52, %v9340_v12  ;;  %v10253_v52 = vld [vmem:[#allocation47_spill] sm:$0xff]  ;;  %v10258_v59 = vld [vmem:[#allocation53_spill] sm:$0xff] }
 0x1cb   : > { %v6323_v45 = vcombine.low %v10248_v6, %v10246_v62  ;;  %v3323_v8 = vor.u32 %v3322_v34, %v3319_v16  ;;  %v3329_v56 = vshll.u32 %v8979_v39, 16  ;;  %v10250_v14 = vcombine.low %v9353_v24, %v9356_v47  ;;  %v10260_v16 = vld [vmem:[#allocation10_spill] sm:$0xff]  ;;  %v5353_v62 = vld [vmem:[%s7351_s6 + $0x94] sm:$0xf] }
 0x1cc   : > { %6759 = vmatmul.mubr.msk.bf16.gmra.mrb[12].mxu0 %vm1119_vm1, %v10249_v36  ;;  %v5523_v28 = vrot.slane %v5521_v63, 1  ;;  %v3328_v41 = vrot.slane %v3326_v19, 3  ;;  %v3335_v10 = vshrl.u32 %v9033_v29, 16  ;;  %v3338_v57 = vshll.u32 %v9033_v29, 16  ;;  %6610 = vmatprep.mubr.msk.bf16.mxu1 %vm1119_vm1, %v10260_v16  ;;  %v10265_v36 = vld [vmem:[#allocation64_spill] sm:$0xff]  ;;  %v10279_v16 = vld [vmem:[#allocation77_spill] sm:$0xff] }
 0x1cd   : > { %v5529_v11 = vshll.u32 %v6323_v45, 16  ;;  %6762 = vmatprep.mubr.msk.bf16.mxu0 %vm1119_vm1, %v10250_v14  ;;  %v10252_v12 = vmul.bf16 %v10251_v25, %v10146_v60  ;;  %v10254_v26 = vmul.bf16 %v10253_v52, %v10149_v49  ;;  %v9547_v3 = vsel %vm1416_vm9, %v3314_v13, %v3323_v8  ;;  %v10268_v14 = vld [vmem:[#allocation96_spill] sm:$0xff] }
 0x1ce   : > { %v9550_v39 = vsel %vm2672_vm5, %v5519_v2, %v5523_v28  ;;  %v5527_v47 = vor.u32 %v5525_v15, %v5523_v28  ;;  %v3331_v35 = vrot.slane %v3329_v56, 4  ;;  %v3337_v5 = vrot.slane %v3335_v10, 3  ;;  %v10262_v15 = vld [vmem:[#allocation65_spill] sm:$0xff]  ;;  %v10266_v28 = vld [vmem:[#allocation60_spill] sm:$0xff] }
 0x1cf   : > { %v6324_v22 = vcombine.low %v10254_v26, %v10252_v12  ;;  %v5531_v24 = vrot.slane %v5529_v11, 1  ;;  %v3340_v46 = vrot.slane %v3338_v57, 4  ;;  %v5533_v29 = vshrl.u32 %v6323_v45, 16 }
 0x1d0   : > { %v10256_v33 = vmul.bf16 %v10255_v51, %v10152_v37  ;;  %v10259_v54 = vmul.bf16 %v10257_v31, %v10258_v59  ;;  %v3332_v34 = vor.u32 %v3331_v35, %v3328_v41  ;;  %v3344_v0 = vshrl.u32 %v10261_v32, 16  ;;  %v10263_v37 = vld [vmem:[#allocation63_spill] sm:$0xff]  ;;  %v7211_v31 = vld [vmem:[%s7351_s6 + $0x70] sm:$0xf]  ;;  %v7212_v59 = vld [vmem:[%s7351_s6 + $0x74] sm:$0xf] }
 0x1d1   : > { %v9556_v60 = vsel %vm2672_vm5, %v5527_v47, %v5531_v24  ;;  %v5537_v49 = vshll.u32 %v6324_v22, 16  ;;  %v5541_v13 = vshrl.u32 %v6324_v22, 16  ;;  %v3341_v2 = vor.u32 %v3340_v46, %v3337_v5 }
 0x1d2   : > { %v6325_v48 = vcombine.low %v10259_v54, %v10256_v33  ;;  %v5535_v63 = vor.u32 %v5533_v29, %v5531_v24  ;;  %v3347_v45 = vshll.u32 %v10261_v32, 16  ;;  %v10264_v19 = vmul.bf16 %v10262_v15, %v10263_v37  ;;  %v10270_v24 = vld [vmem:[#allocation99_spill] sm:$0xff]  ;;  %v10284_v15 = vld [vmem:[#allocation92_spill] sm:$0xff]  ;;  %v7213_v37 = vld [vmem:[%s7351_s6 + $0x78] sm:$0xf] }
 0x1d3   : > { %v5539_v17 = vrot.slane %v5537_v49, 1  ;;  %v10267_v11 = vmul.bf16 %v10265_v36, %v10266_v28  ;;  %v5385_v41 = vmul.bf16 %v5352_v53, %v10268_v14  ;;  %v9577_v10 = vsel %vm1416_vm9, %v3323_v8, %v3332_v34  ;;  %v10275_v53 = vld [vmem:[#allocation69_spill] sm:$0xff]  ;;  %v10276_v49 = vld [vmem:[#allocation66_spill] sm:$0xff]  ;;  %6611 = vmatmul.mubr.msk.bf16.vlgmr.msra.gmra.mrb[0].mxu1 %vm1119_vm1, %v10284_v15  ;;  %v10285_v14 = vld [vmem:[#allocation87_spill] sm:$0xff] }
 0x1d4   : > { %v5545_v6 = vshll.u32 %v6325_v48, 16  ;;  %v9580_v57 = vsel %vm1416_vm9, %v3332_v34, %v3341_v2  ;;  %v3346_v25 = vrot.slane %v3344_v0, 3  ;;  %v10269_v12 = vcombine.low %v9373_v30, %v9370_v9  ;;  %v10272_v9 = vld [vmem:[#allocation73_spill] sm:$0xff]  ;;  %v10273_v30 = vld [vmem:[#allocation71_spill] sm:$0xff]  ;;  %6614 = vmatprep.mubr.msk.bf16.mxu1 %vm1119_vm1, %v9389_v61  ;;  %v7216_v15 = vld [vmem:[%s7351_s6 + $0x84] sm:$0xf] }
 0x1d5   : > { %v6326_v56 = vcombine.low %v10267_v11, %v10264_v19  ;;  %v9587_v52 = vsel %vm2672_vm5, %v5535_v63, %v5539_v17  ;;  %v5543_v26 = vor.u32 %v5541_v13, %v5539_v17  ;;  %v3349_v47 = vrot.slane %v3347_v45, 4  ;;  %v10281_v63 = vld [vmem:[#allocation78_spill] sm:$0xff]  ;;  %v7214_v19 = vld [vmem:[%s7351_s6 + $0x7c] sm:$0xf] }
 0x1d6   : > { %6763 = vmatmul.mubr.msk.bf16.gmra.mrb[16].mxu0 %vm1119_vm1, %v10269_v12  ;;  %v5547_v22 = vrot.slane %v5545_v6, 1  ;;  %v5386_v35 = vmul.bf16 %v5353_v62, %v10270_v24  ;;  %v10271_v8 = vcombine.low %v9394_v23, %v10209_v38  ;;  %v5549_v5 = vshrl.u32 %v6325_v48, 16  ;;  %v10278_v38 = vld [vmem:[#allocation79_spill] sm:$0xff] }
 0x1d7   : > { %v5553_v46 = vshll.u32 %v6326_v56, 16  ;;  %v10274_v29 = vmul.bf16 %v10272_v9, %v10273_v30  ;;  %v10277_v51 = vmul.bf16 %v10275_v53, %v10276_v49  ;;  %v6294_v54 = vcombine.low %v7211_v31, %v7212_v59  ;;  %v10282_v48 = vld [vmem:[#allocation75_spill] sm:$0xff]  ;;  %v10292_v53 = vld [vmem:[#allocation94_spill] sm:$0xff]  ;;  %v10295_v31 = vld [vmem:[#allocation93_spill] sm:$0xff] }
 0x1d8   : > { %6766 = vmatprep.mubr.msk.bf16.mxu0 %vm1119_vm1, %v10271_v8  ;;  %v9603_v13 = vsel %vm2672_vm5, %v5543_v26, %v5547_v22  ;;  %v3350_v23 = vor.u32 %v3349_v47, %v3346_v25  ;;  %v10280_v34 = vmul.bf16 %v10278_v38, %v10279_v16  ;;  %v10283_v32 = vmul.bf16 %v10281_v63, %v10282_v48  ;;  %v10286_v25 = vld [vmem:[#allocation84_spill] sm:$0xff]  ;;  %v10288_v26 = vld [vmem:[#allocation85_spill] sm:$0xff]  ;;  %v10291_v8 = vld [vmem:[#allocation2_spill] sm:$0xff] }
 0x1d9   : > { %v6327_v33 = vcombine.low %v10277_v51, %v10274_v29  ;;  %v5551_v62 = vor.u32 %v5549_v5, %v5547_v22  ;;  %v5555_v17 = vrot.slane %v5553_v46, 1  ;;  %v5557_v6 = vshrl.u32 %v6326_v56, 16  ;;  %v10289_v47 = vld [vmem:[#allocation81_spill] sm:$0xff]  ;;  %6813 = vmatpush3.bf16.msra.mxu1 %v10291_v8  ;;  %v10293_v49 = vld [vmem:[#allocation90_spill] sm:$0xff] }
 0x1da   : > { %v6328_v0 = vcombine.low %v10283_v32, %v10280_v34  ;;  %v6295_v36 = vcombine.low %v7213_v37, %v7214_v19  ;;  %v9616_v28 = vsel %vm1416_vm9, %v3341_v2, %v3350_v23  ;;  %v10287_v12 = vmul.bf16 %v10285_v14, %v10286_v25  ;;  %v10296_v59 = vld [vmem:[#allocation89_spill] sm:$0xff]  ;;  %v7218_v14 = vld [vmem:[%s7351_s6 + $0x8c] sm:$0xf] }
 0x1db   : > { %v5561_v45 = vshll.u32 %v6327_v33, 16  ;;  %v10290_v24 = vmul.bf16 %v10288_v26, %v10289_v47  ;;  %v9628_v56 = vsel %vm2672_vm5, %v5551_v62, %v5555_v17  ;;  %v5559_v5 = vor.u32 %v5557_v6, %v5555_v17  ;;  %6615 = vmatmul.mubr.msk.bf16.gmra.mrb[4].mxu1 %vm1119_vm1, %v9405_v44  ;;  %v7219_v44 = vld [vmem:[%s7351_s6 + $0x94] sm:$0xf]  ;;  %v7220_v26 = vld [vmem:[%s7351_s6 + $0x90] sm:$0xf] }
 0x1dc   : > { %v5569_v11 = vshll.u32 %v6328_v0, 16  ;;  %v5565_v2 = vshrl.u32 %v6327_v33, 16  ;;  %v5573_v30 = vshrl.u32 %v6328_v0, 16  ;;  %v10294_v51 = vmul.bf16 %v10292_v53, %v10293_v49  ;;  %6618 = vmatprep.mubr.msk.bf16.mxu1 %vm1119_vm1, %v9422_v40  ;;  %v7221_v40 = vld [vmem:[%s7351_s6 + $0x50] sm:$0xf] }
 0x1dd   : > { %v6329_v22 = vcombine.low %v10290_v24, %v10287_v12  ;;  %v5563_v46 = vrot.slane %v5561_v45, 1  ;;  %v10297_v23 = vmul.bf16 %v10295_v31, %v10296_v59  ;;  %v9637_v61 = vcombine.low %v5385_v41, %v5386_v35  ;;  %v7236_v53 = vld [vmem:[%s7351_s6 + $0x88] sm:$0xf] }
 0x1de   : > { %v5571_v9 = vrot.slane %v5569_v11, 1  ;;  %6767 = vmatmul.mubr.msk.bf16.gmra.mrb[20].mxu0 %vm1119_vm1, %v6294_v54  ;;  %v7215_v54 = vld [vmem:[%s7351_s6 + $0x80] sm:$0xf]  ;;  %v7217_v11 = vld [vmem:[%s7351_s6 + $0x88] sm:$0xf]  ;;  %v6298_v47 = vcombine.low %v7220_v26, %v7219_v44 }
 0x1df   : > { %v5577_v29 = vshll.u32 %v6329_v22, 16  ;;  %v6330_v38 = vcombine.low %v10297_v23, %v10294_v51  ;;  %v5564_v16 = vsel %vm2672_vm5, %v5559_v5, %v5563_v46  ;;  %v5567_v34 = vor.u32 %v5565_v2, %v5563_v46  ;;  %6770 = vmatprep.mubr.msk.bf16.mxu0 %vm1119_vm1, %v6295_v36  ;;  %v7234_v5 = vld [vmem:[%s7351_s6 + $0x84] sm:$0xf] }
 0x1e0   : > { %v5575_v33 = vor.u32 %v5573_v30, %v5571_v9  ;;  %v5581_v48 = vshrl.u32 %v6329_v22, 16  ;;  %v5593_v62 = vshll.u32 %v9637_v61, 16  ;;  %v6296_v37 = vcombine.low %v7215_v54, %v7216_v15 }
 0x1e1   : > { %v5579_v63 = vrot.slane %v5577_v29, 1  ;;  %v5585_v32 = vshll.u32 %v6330_v38, 16  ;;  %v5572_v0 = vsel %vm2672_vm5, %v5567_v34, %v5571_v9  ;;  %v5589_v35 = vshrl.u32 %v6330_v38, 16  ;;  %v7235_v29 = vld [vmem:[%s7351_s6 + $0x8c] sm:$0xf] }
 0x1e2   : > { %v9644_v45 = vrot.slane %v5593_v62, 1  ;;  %v6297_v25 = vcombine.low %v7217_v11, %v7218_v14  ;;  %v5597_v22 = vshrl.u32 %v9637_v61, 16  ;;  %v6197_v49 = vcombine.low %v7236_v53, %v7235_v29 }
 0x1e3   : > { %v5580_v17 = vsel %vm2672_vm5, %v5575_v33, %v5579_v63  ;;  %v5583_v6 = vor.u32 %v5581_v48, %v5579_v63  ;;  %v5587_v41 = vrot.slane %v5585_v32, 1  ;;  %6619 = vmatmul.mubr.msk.bf16.gmra.mrb[8].mxu1 %vm1119_vm1, %v9427_v7  ;;  %v7222_v7 = vld [vmem:[%s7351_s6 + $0x54] sm:$0xf] }
 0x1e4   : > { %6622 = vmatprep.mubr.msk.bf16.mxu1 %vm1119_vm1, %v9434_v42  ;;  %v6190_v42 = vcombine.low %v7221_v40, %v7222_v7  ;;  %v5599_v2 = vor.u32 %v5597_v22, %v9644_v45 }
 0x1e5   : > { %v5588_v19 = vsel %vm2672_vm5, %v5583_v6, %v5587_v41  ;;  %v5591_v36 = vor.u32 %v5589_v35, %v5587_v41  ;;  %v9750_v35 = vld [vmem:[%s9832_s3] ss:$0 sm:$0xff] }
 0x1e6   : > { %6771 = vmatmul.mubr.msk.bf16.gmra.mrb[24].mxu0 %vm1119_vm1, %v6296_v37 }
 0x1e7   : > { %v5596_v12 = vsel %vm2672_vm5, %v5591_v36, %v9644_v45  ;;  %6774 = vmatprep.mubr.msk.bf16.mxu0 %vm1119_vm1, %v6297_v25 }
 0x1eb   : > { %6623 = vmatmul.mubr.msk.bf16.gmra.mrb[12].mxu1 %vm1119_vm1, %v9451_v18  ;;  %v7223_v18 = vld [vmem:[%s7351_s6 + $0x5c] sm:$0xf] }
 0x1ec   : > { %6626 = vmatprep.mubr.msk.bf16.mxu1 %vm1119_vm1, %v9468_v4  ;;  %v7225_v4 = vld [vmem:[%s7351_s6 + $0x60] sm:$0xf] }
 0x1ee   : > { %6775 = vmatmul.mubr.msk.bf16.gmra.mrb[28].mxu0 %vm1119_vm1, %v6298_v47 }
 0x1ef   : > { %6780 = vmatprep.mubr.msk.bf16.mxu0 %vm1119_vm1, %v9456_v1  ;;  %v7224_v1 = vld [vmem:[%s7351_s6 + $0x58] sm:$0xf] }
 0x1f3   : > { %6627 = vmatmul.mubr.msk.bf16.gmra.mrb[16].mxu1 %vm1119_vm1, %v9496_v20 }
 0x1f4   : > { %6630 = vmatprep.mubr.msk.bf16.mxu1 %vm1119_vm1, %v9503_v21  ;;  %v5354_v21 = vld [vmem:[%s7351_s6 + $0x98] sm:$0x1] }
 0x1f6   : > { %6781 = vmatmul.mubr.msk.bf16.vlgmr.msra.gmra.mrb[0].mxu0 %vm1119_vm1, %v9464_v27  ;;  %v6191_v27 = vcombine.low %v7224_v1, %v7223_v18 }
 0x1f7   : > { %6784 = vmatprep.mubr.msk.bf16.mxu0 %vm1119_vm1, %v9471_v43  ;;  %v7226_v43 = vld [vmem:[%s7351_s6 + $0x64] sm:$0xf] }
 0x1f8   : > { %v6192_v20 = vcombine.low %v7225_v4, %v7226_v43 }
 0x1fb   : > { %6631 = vmatmul.mubr.msk.bf16.gmra.mrb[20].mxu1 %vm1119_vm1, %v9526_v50 }
 0x1fc   : > { %6634 = vmatprep.mubr.msk.bf16.mxu1 %vm1119_vm1, %v9547_v3  ;;  %v7229_v3 = vld [vmem:[%s7351_s6 + $0x70] sm:$0xf] }
 0x1fe   : > { %6785 = vmatmul.mubr.msk.bf16.gmra.mrb[4].mxu0 %vm1119_vm1, %v9514_v58  ;;  %v7227_v58 = vld [vmem:[%s7351_s6 + $0x68] sm:$0xf] }
 0x1ff   : > { %6788 = vmatprep.mubr.msk.bf16.mxu0 %vm1119_vm1, %v9523_v55  ;;  %v7228_v55 = vld [vmem:[%s7351_s6 + $0x6c] sm:$0xf] }
 0x200   : > { %v6193_v50 = vcombine.low %v7227_v58, %v7228_v55 }
 0x203   : > { %6635 = vmatmul.mubr.msk.bf16.gmra.mrb[24].mxu1 %vm1119_vm1, %v9577_v10  ;;  %v10298_v10 = vld [vmem:[#allocation98_spill] sm:$0xff] }
 0x204   : > { %6638 = vmatprep.mubr.msk.bf16.mxu1 %vm1119_vm1, %v9580_v57  ;;  %v5387_v57 = vmul.bf16 %v5354_v21, %v10298_v10 }
 0x206   : > { %6789 = vmatmul.mubr.msk.bf16.gmra.mrb[8].mxu0 %vm1119_vm1, %v9550_v39  ;;  %v7230_v39 = vld [vmem:[%s7351_s6 + $0x74] sm:$0xf] }
 0x207   : > { %6792 = vmatprep.mubr.msk.bf16.mxu0 %vm1119_vm1, %v9556_v60  ;;  %v6194_v60 = vcombine.low %v7229_v3, %v7230_v39 }
 0x20b   : > { %6639 = vmatmul.mubr.msk.bf16.gmra.mrb[28].mxu1 %vm1119_vm1, %v9616_v28  ;;  %v7232_v28 = vld [vmem:[%s7351_s6 + $0x7c] sm:$0xf] }
 0x20c   : > { %6660 = vmatprep.mubr.msk.bf16.mxu1 %vm1119_vm1, %v6190_v42 }
 0x20e   : > { %6793 = vmatmul.mubr.msk.bf16.gmra.mrb[12].mxu0 %vm1119_vm1, %v9587_v52  ;;  %v6332_v52 = vcombine.low %v5387_v57, %v5387_v57 }
 0x20f   : > { %6796 = vmatprep.mubr.msk.bf16.mxu0 %vm1119_vm1, %v9603_v13  ;;  %v7231_v13 = vld [vmem:[%s7351_s6 + $0x78] sm:$0xf] }
 0x210   : > { %v6195_v24 = vcombine.low %v7231_v13, %v7232_v28  ;;  %v5601_v8 = vshll.u32 %v6332_v52, 16 }
 0x212   : > { %v5603_v9 = vrot.slane %v5601_v8, 1 }
 0x213   : > { %6661 = vmatmul.mubr.msk.bf16.vlgmr.msra.gmra.mrb[16].mxu1 %vm1119_vm1, %v6191_v27 }
 0x214   : > { %6664 = vmatprep.mubr.msk.bf16.mxu1 %vm1119_vm1, %v6192_v20  ;;  %v5604_v30 = vsel %vm2672_vm5, %v5599_v2, %v5603_v9 }
 0x216   : > { %6797 = vmatmul.mubr.msk.bf16.gmra.mrb[16].mxu0 %vm1119_vm1, %v9628_v56  ;;  %v7233_v56 = vld [vmem:[%s7351_s6 + $0x80] sm:$0xf] }
 0x217   : > { %6800 = vmatprep.mubr.msk.bf16.mxu0 %vm1119_vm1, %v5564_v16  ;;  %v6196_v46 = vcombine.low %v7233_v56, %v7234_v5 }
 0x21b   : > { %6665 = vmatmul.mubr.msk.bf16.gmra.mrb[20].mxu1 %vm1119_vm1, %v6193_v50 }
 0x21c   : > { %6668 = vmatprep.mubr.msk.bf16.mxu1 %vm1119_vm1, %v6194_v60 }
 0x21e   : > { %6801 = vmatmul.mubr.msk.bf16.gmra.mrb[20].mxu0 %vm1119_vm1, %v5572_v0 }
 0x21f   : > { %6804 = vmatprep.mubr.msk.bf16.mxu0 %vm1119_vm1, %v5580_v17 }
 0x223   : > { %6669 = vmatmul.mubr.msk.bf16.gmra.mrb[24].mxu1 %vm1119_vm1, %v6195_v24 }
 0x224   : > { %6672 = vmatprep.mubr.msk.bf16.mxu1 %vm1119_vm1, %v6196_v46 }
 0x226   : > { %6805 = vmatmul.mubr.msk.bf16.gmra.mrb[24].mxu0 %vm1119_vm1, %v5588_v19 }
 0x227   : > { %6808 = vmatprep.mubr.msk.bf16.mxu0 %vm1119_vm1, %v5596_v12 }
 0x22b   : > { %6673 = vmatmul.mubr.msk.bf16.gmra.mrb[28].mxu1 %vm1119_vm1, %v6197_v49 }
 0x22e   : > { %6809 = vmatmul.mubr.msk.bf16.gmra.mrb[28].mxu0 %vm1119_vm1, %v5604_v30 }
 0x2a6   : > { %v6612_v51 = vpop.f32.mrb[0].mxu1 }
 0x2a7   : > { %v3437_v31 = vpop.f32.mrb[1].mxu1 }
 0x2a8   : > { %v6613_v59 = vpop.f32.mrb[2].mxu1 }
 0x2a9   : > { %v3440_v23 = vpop.f32.mrb[3].mxu1 }
 0x2ae   : > { %v6616_v38 = vpop.f32.mrb[4].mxu1 }
 0x2af   : > { %v3453_v16 = vpop.f32.mrb[5].mxu1 }
 0x2b0   : > { %v6617_v34 = vpop.f32.mrb[6].mxu1 }
 0x2b1   : > { %v3456_v61 = vpop.f32.mrb[7].mxu1 }
 0x2b6   : > { %v6620_v33 = vpop.f32.mrb[8].mxu1 }
 0x2b7   : > { %v3469_v63 = vpop.f32.mrb[9].mxu1 }
 0x2b8   : > { %v6621_v48 = vpop.f32.mrb[10].mxu1 }
 0x2b9   : > { %v3472_v32 = vpop.f32.mrb[11].mxu1 }
 0x2be   : > { %v9739_v0 = vpop.f32.mrb[12].mxu1 }
 0x2bf   : > { %v9741_v62 = vpop.f32.mrb[13].mxu1 }
 0x2c0   : > { %v9743_v17 = vpop.f32.mrb[14].mxu1 }
 0x2c1   : > { %v9745_v6 = vpop.f32.mrb[15].mxu1 }
 0x2c9   : > { %v6782_v41 = vpop.f32.mrb[0].mxu0 }
 0x2ca   : > { %v6814_v45 = vadd.f32 %v6782_v41, %v6612_v51  ;;  %v5690_v54 = vpop.f32.mrb[1].mxu0 }
 0x2cb   : > { %v6815_v15 = vadd.f32 %v5690_v54, %v3437_v31  ;;  %v6783_v37 = vpop.f32.mrb[2].mxu0 }
 0x2cc   : > { %v5858_v19 = vadd.f32 %v6814_v45, %v9750_v35  ;;  %v6816_v36 = vadd.f32 %v6783_v37, %v6613_v59  ;;  %v5693_v11 = vpop.f32.mrb[3].mxu0 }
 0x2cd   : > { %v5856_v14 = vadd.f32 %v6815_v15, %v9750_v35  ;;  %v6817_v25 = vadd.f32 %v5693_v11, %v3440_v23 }
 0x2ce   : > { %v5890_v12 = vmax.f32 %v5858_v19, 0.0  ;;  %v5859_v44 = vadd.f32 %v6816_v36, %v9750_v35 }
 0x2cf   : > { %v5888_v26 = vmax.f32 %v5856_v14, 0.0  ;;  %v5857_v47 = vadd.f32 %v6817_v25, %v9750_v35 }
 0x2d0   : > { %5922 = vst [vmem:[%s9757_s12 + $0x10] sm:$0xff] %v5890_v12  ;;  %v5891_v40 = vmax.f32 %v5859_v44, 0.0 }
 0x2d1   : > { %5920 = vst [vmem:[%s9757_s12] sm:$0xff] %v5888_v26  ;;  %v5889_v7 = vmax.f32 %v5857_v47, 0.0  ;;  %v6786_v42 = vpop.f32.mrb[4].mxu0 }
 0x2d2   : > { %5923 = vst [vmem:[%s9757_s12 + $0x18] sm:$0xff] %v5891_v40  ;;  %v6818_v18 = vadd.f32 %v6786_v42, %v6616_v38  ;;  %v5706_v1 = vpop.f32.mrb[5].mxu0 }
 0x2d3   : > { %5921 = vst [vmem:[%s9757_s12 + $0x8] sm:$0xff] %v5889_v7  ;;  %v6819_v27 = vadd.f32 %v5706_v1, %v3453_v16  ;;  %v6787_v4 = vpop.f32.mrb[6].mxu0 }
 0x2d4   : > { %v5862_v43 = vadd.f32 %v6818_v18, %v9750_v35  ;;  %v6820_v20 = vadd.f32 %v6787_v4, %v6617_v34  ;;  %v5709_v21 = vpop.f32.mrb[7].mxu0 }
 0x2d5   : > { %v5860_v58 = vadd.f32 %v6819_v27, %v9750_v35  ;;  %v6821_v55 = vadd.f32 %v5709_v21, %v3456_v61 }
 0x2d6   : > { %v5894_v50 = vmax.f32 %v5862_v43, 0.0  ;;  %v5863_v3 = vadd.f32 %v6820_v20, %v9750_v35 }
 0x2d7   : > { %v5892_v39 = vmax.f32 %v5860_v58, 0.0  ;;  %v5861_v60 = vadd.f32 %v6821_v55, %v9750_v35 }
 0x2d8   : > { %5926 = vst [vmem:[%s9757_s12 + $0x30] sm:$0xff] %v5894_v50  ;;  %v5895_v10 = vmax.f32 %v5863_v3, 0.0 }
 0x2d9   : > { %5924 = vst [vmem:[%s9757_s12 + $0x20] sm:$0xff] %v5892_v39  ;;  %v5893_v57 = vmax.f32 %v5861_v60, 0.0  ;;  %v6790_v52 = vpop.f32.mrb[8].mxu0 }
 0x2da   : > { %5927 = vst [vmem:[%s9757_s12 + $0x38] sm:$0xff] %v5895_v10  ;;  %v6822_v13 = vadd.f32 %v6790_v52, %v6620_v33  ;;  %v5722_v28 = vpop.f32.mrb[9].mxu0 }
 0x2db   : > { %5925 = vst [vmem:[%s9757_s12 + $0x28] sm:$0xff] %v5893_v57  ;;  %v6823_v24 = vadd.f32 %v5722_v28, %v3469_v63  ;;  %v6791_v22 = vpop.f32.mrb[10].mxu0 }
 0x2dc   : > { %v5866_v8 = vadd.f32 %v6822_v13, %v9750_v35  ;;  %v6824_v56 = vadd.f32 %v6791_v22, %v6621_v48  ;;  %v5725_v5 = vpop.f32.mrb[11].mxu0 }
 0x2dd   : > { %v5864_v46 = vadd.f32 %v6823_v24, %v9750_v35  ;;  %v6825_v2 = vadd.f32 %v5725_v5, %v3472_v32 }
 0x2de   : > { %v5898_v9 = vmax.f32 %v5866_v8, 0.0  ;;  %v5867_v30 = vadd.f32 %v6824_v56, %v9750_v35 }
 0x2df   : > { %v5896_v29 = vmax.f32 %v5864_v46, 0.0  ;;  %v5865_v53 = vadd.f32 %v6825_v2, %v9750_v35 }
 0x2e0   : > { %5930 = vst [vmem:[%s9757_s12 + $0x50] sm:$0xff] %v5898_v9  ;;  %v5899_v49 = vmax.f32 %v5867_v30, 0.0 }
 0x2e1   : > { %5928 = vst [vmem:[%s9757_s12 + $0x40] sm:$0xff] %v5896_v29  ;;  %v5897_v51 = vmax.f32 %v5865_v53, 0.0  ;;  %v6794_v31 = vpop.f32.mrb[12].mxu0 }
 0x2e2   : > { %5931 = vst [vmem:[%s9757_s12 + $0x58] sm:$0xff] %v5899_v49  ;;  %v6826_v59 = vadd.f32 %v6794_v31, %v9739_v0  ;;  %v5738_v23 = vpop.f32.mrb[13].mxu0 }
 0x2e3   : > { %5929 = vst [vmem:[%s9757_s12 + $0x48] sm:$0xff] %v5897_v51  ;;  %v6827_v38 = vadd.f32 %v5738_v23, %v9741_v62  ;;  %v6795_v16 = vpop.f32.mrb[14].mxu0 }
 0x2e4   : > { %v5870_v34 = vadd.f32 %v6826_v59, %v9750_v35  ;;  %v6828_v61 = vadd.f32 %v6795_v16, %v9743_v17  ;;  %v5741_v33 = vpop.f32.mrb[15].mxu0 }
 0x2e5   : > { %v5868_v63 = vadd.f32 %v6827_v38, %v9750_v35  ;;  %v6829_v48 = vadd.f32 %v5741_v33, %v9745_v6 }
 0x2e6   : > { %v5902_v32 = vmax.f32 %v5870_v34, 0.0  ;;  %v5871_v0 = vadd.f32 %v6828_v61, %v9750_v35  ;;  %v6662_v36 = vpop.f32.mrb[16].mxu1 }
 0x2e7   : > { %v5900_v41 = vmax.f32 %v5868_v63, 0.0  ;;  %v5869_v45 = vadd.f32 %v6829_v48, %v9750_v35  ;;  %v3827_v6 = vpop.f32.mrb[17].mxu1 }
 0x2e8   : > { %5934 = vst [vmem:[%s9757_s12 + $0x70] sm:$0xff] %v5902_v32  ;;  %v5903_v62 = vmax.f32 %v5871_v0, 0.0  ;;  %v6663_v25 = vpop.f32.mrb[18].mxu1 }
 0x2e9   : > { %5932 = vst [vmem:[%s9757_s12 + $0x60] sm:$0xff] %v5900_v41  ;;  %v5901_v54 = vmax.f32 %v5869_v45, 0.0  ;;  %v6798_v15 = vpop.f32.mrb[16].mxu0  ;;  %v3830_v26 = vpop.f32.mrb[19].mxu1 }
 0x2ea   : > { %5935 = vst [vmem:[%s9757_s12 + $0x78] sm:$0xff] %v5903_v62  ;;  %v5754_v37 = vpop.f32.mrb[17].mxu0  ;;  %v6830_v11 = vadd.f32 %v6798_v15, %v6662_v36 }
 0x2eb   : > { %5933 = vst [vmem:[%s9757_s12 + $0x68] sm:$0xff] %v5901_v54  ;;  %v6799_v17 = vpop.f32.mrb[18].mxu0  ;;  %v6831_v14 = vadd.f32 %v5754_v37, %v3827_v6 }
 0x2ec   : > { %v5757_v19 = vpop.f32.mrb[19].mxu0  ;;  %v5874_v12 = vadd.f32 %v6830_v11, %v9750_v35  ;;  %v6832_v44 = vadd.f32 %v6799_v17, %v6663_v25 }
 0x2ed   : > { %v5872_v47 = vadd.f32 %v6831_v14, %v9750_v35  ;;  %v6833_v40 = vadd.f32 %v5757_v19, %v3830_v26 }
 0x2ee   : > { %v5906_v42 = vmax.f32 %v5874_v12, 0.0  ;;  %v5875_v18 = vadd.f32 %v6832_v44, %v9750_v35  ;;  %v6666_v55 = vpop.f32.mrb[20].mxu1 }
 0x2ef   : > { %v5904_v27 = vmax.f32 %v5872_v47, 0.0  ;;  %v5873_v4 = vadd.f32 %v6833_v40, %v9750_v35  ;;  %v3843_v3 = vpop.f32.mrb[21].mxu1 }
 0x2f0   : > { %5938 = vst [vmem:[%s9757_s12 + $0x90] sm:$0xff] %v5906_v42  ;;  %v5907_v20 = vmax.f32 %v5875_v18, 0.0  ;;  %v6667_v60 = vpop.f32.mrb[22].mxu1 }
 0x2f1   : > { %v6802_v7 = vpop.f32.mrb[20].mxu0  ;;  %5936 = vst [vmem:[%s9757_s12 + $0x80] sm:$0xff] %v5904_v27  ;;  %v5905_v58 = vmax.f32 %v5873_v4, 0.0  ;;  %v3846_v52 = vpop.f32.mrb[23].mxu1 }
 0x2f2   : > { %v5770_v1 = vpop.f32.mrb[21].mxu0  ;;  %5939 = vst [vmem:[%s9757_s12 + $0x98] sm:$0xff] %v5907_v20  ;;  %v6834_v50 = vadd.f32 %v6802_v7, %v6666_v55 }
 0x2f3   : > { %v6803_v43 = vpop.f32.mrb[22].mxu0  ;;  %5937 = vst [vmem:[%s9757_s12 + $0x88] sm:$0xff] %v5905_v58  ;;  %v6835_v39 = vadd.f32 %v5770_v1, %v3843_v3 }
 0x2f4   : > { %v5773_v21 = vpop.f32.mrb[23].mxu0  ;;  %v5878_v10 = vadd.f32 %v6834_v50, %v9750_v35  ;;  %v6836_v57 = vadd.f32 %v6803_v43, %v6667_v60 }
 0x2f5   : > { %v5876_v13 = vadd.f32 %v6835_v39, %v9750_v35  ;;  %v6837_v28 = vadd.f32 %v5773_v21, %v3846_v52 }
 0x2f6   : > { %v5910_v22 = vmax.f32 %v5878_v10, 0.0  ;;  %v5879_v8 = vadd.f32 %v6836_v57, %v9750_v35  ;;  %v6670_v53 = vpop.f32.mrb[24].mxu1 }
 0x2f7   : > { %v5908_v5 = vmax.f32 %v5876_v13, 0.0  ;;  %v5877_v46 = vadd.f32 %v6837_v28, %v9750_v35  ;;  %v3859_v51 = vpop.f32.mrb[25].mxu1 }
 0x2f8   : > { %5942 = vst [vmem:[%s9757_s12 + $0xb0] sm:$0xff] %v5910_v22  ;;  %v5911_v9 = vmax.f32 %v5879_v8, 0.0  ;;  %v6671_v59 = vpop.f32.mrb[26].mxu1 }
 0x2f9   : > { %v6806_v24 = vpop.f32.mrb[24].mxu0  ;;  %5940 = vst [vmem:[%s9757_s12 + $0xa0] sm:$0xff] %v5908_v5  ;;  %v5909_v29 = vmax.f32 %v5877_v46, 0.0  ;;  %v3862_v16 = vpop.f32.mrb[27].mxu1 }
 0x2fa   : > { %v5786_v56 = vpop.f32.mrb[25].mxu0  ;;  %5943 = vst [vmem:[%s9757_s12 + $0xb8] sm:$0xff] %v5911_v9  ;;  %v6838_v49 = vadd.f32 %v6806_v24, %v6670_v53 }
 0x2fb   : > { %v6807_v2 = vpop.f32.mrb[26].mxu0  ;;  %5941 = vst [vmem:[%s9757_s12 + $0xa8] sm:$0xff] %v5909_v29  ;;  %v6839_v31 = vadd.f32 %v5786_v56, %v3859_v51 }
 0x2fc   : > { %v5789_v30 = vpop.f32.mrb[27].mxu0  ;;  %v5882_v23 = vadd.f32 %v6838_v49, %v9750_v35  ;;  %v6840_v38 = vadd.f32 %v6807_v2, %v6671_v59 }
 0x2fd   : > { %v5880_v34 = vadd.f32 %v6839_v31, %v9750_v35  ;;  %v6841_v61 = vadd.f32 %v5789_v30, %v3862_v16 }
 0x2fe   : > { %v5914_v63 = vmax.f32 %v5882_v23, 0.0  ;;  %v5883_v48 = vadd.f32 %v6840_v38, %v9750_v35  ;;  %v6674_v37 = vpop.f32.mrb[28].mxu1 }
 0x2ff   : > { %v5912_v0 = vmax.f32 %v5880_v34, 0.0  ;;  %v5881_v41 = vadd.f32 %v6841_v61, %v9750_v35  ;;  %v3875_v19 = vpop.f32.mrb[29].mxu1 }
 0x300   : > { %5946 = vst [vmem:[%s9757_s12 + $0xd0] sm:$0xff] %v5914_v63  ;;  %v5915_v62 = vmax.f32 %v5883_v48, 0.0  ;;  %v6675_v11 = vpop.f32.mrb[30].mxu1 }
 0x301   : > { %v6810_v33 = vpop.f32.mrb[28].mxu0  ;;  %5944 = vst [vmem:[%s9757_s12 + $0xc0] sm:$0xff] %v5912_v0  ;;  %v5913_v15 = vmax.f32 %v5881_v41, 0.0  ;;  %v3878_v25 = vpop.f32.mrb[31].mxu1 }
 0x302   : > { %v5802_v32 = vpop.f32.mrb[29].mxu0  ;;  %5947 = vst [vmem:[%s9757_s12 + $0xd8] sm:$0xff] %v5915_v62  ;;  %v6842_v17 = vadd.f32 %v6810_v33, %v6674_v37 }
 0x303   : > { %v6811_v45 = vpop.f32.mrb[30].mxu0  ;;  %5945 = vst [vmem:[%s9757_s12 + $0xc8] sm:$0xff] %v5913_v15  ;;  %v6843_v36 = vadd.f32 %v5802_v32, %v3875_v19 }
 0x304   : > { %v5805_v54 = vpop.f32.mrb[31].mxu0  ;;  %v5886_v6 = vadd.f32 %v6842_v17, %v9750_v35  ;;  %v6844_v14 = vadd.f32 %v6811_v45, %v6675_v11 }
 0x305   : > { %v5884_v12 = vadd.f32 %v6843_v36, %v9750_v35  ;;  %v6845_v44 = vadd.f32 %v5805_v54, %v3878_v25 }
 0x306   : > { %v5918_v26 = vmax.f32 %v5886_v6, 0.0  ;;  %v5887_v47 = vadd.f32 %v6844_v14, %v9750_v35 }
 0x307   : > { %v5916_v40 = vmax.f32 %v5884_v12, 0.0  ;;  %v5885_v7 = vadd.f32 %v6845_v44, %v9750_v35 }
 0x308   : > { %5950 = vst [vmem:[%s9757_s12 + $0xf0] sm:$0xff] %v5918_v26  ;;  %v5919_v42 = vmax.f32 %v5887_v47, 0.0 }
 0x309   : > { %5948 = vst [vmem:[%s9757_s12 + $0xe0] sm:$0xff] %v5916_v40  ;;  %v5917_v18 = vmax.f32 %v5885_v7, 0.0 }
 0x30a   : > { %5951 = vst [vmem:[%s9757_s12 + $0xf8] sm:$0xff] %v5919_v42 }
 0x30b   : > { %5949 = vst [vmem:[%s9757_s12 + $0xe8] sm:$0xff] %v5917_v18 }
 0x30c PF: > { %s14_s15 = sadd.s32 1, %s7243_s15  }
 0x30d   : > { %p11_p4 = scmp.ge.s32.totalorder %s14_s15, 4  }
 0x30f   :  { %13 = sbr.rel (!%p11_p4) target bundleno = 1 (0x1), region = 75 }

// kernel: inception_forward.12
= control target key start
LH: loop header
LB: loop body
LE: loop exit
PB: predicated region body
PF: predicated region fallthrough
CT: control target
= control target key end

     0   :  { %s7319_s15 = smov 0   ;;  %s9839_s0 = inlined_call_operand.vmem [shape: bf16[2,320,16], index: 0, kind: input, shape index: {}]   ;;  %s9840_s1 = inlined_call_operand.vmem [shape: bf16[9,16,128], index: 1, kind: input, shape index: {}]   ;;  %s9841_s2 = inlined_call_operand.vmem [shape: bf16[2,256,1], index: 2, kind: input, shape index: {}]   ;;  %s9842_s3 = inlined_call_operand.vmem [shape: f32[1,128], index: 3, kind: input, shape index: {}]   ;;  %s9843_s4 = inlined_call_operand.vmem [shape: f32[2,256,128], index: 4, kind: output, shape index: {}]  }
   0x1 LB: > { %s6042_s16 = sadd.s32 4294967295, %s7290_s15   ;;  %p6046_p0 = scmp.ge.s32.totalorder %s7290_s15, 1  ;;  %s7290_s15 = sphi %s7319_s15, %s14_s15  }
   0x2   : > { %p162_p1 = scmp.lt.s32.totalorder %s7290_s15, 3 }
   0x4   : > { %p163_p2 = pnand %p6046_p0, %p162_p1 }
   0x6   : > { %166 = sbr.rel (%p163_p2) target bundleno = 783 (0x30f), region = 36 }
   0xd   : > { %v6121_v0 = vld [vmem:[%s9841_s2 + $0x88] sm:$0xf]  ;;  %v6119_v1 = vld [vmem:[%s9841_s2 + $0x80] sm:$0xf]  ;;  %v7292_v3 = vmov 0   ;;  %p188_p3 = scmp.lt.s32.totalorder %s6042_s16, 1 }
   0xe   : > { %v7135_v2 = vld [vmem:[%s9840_s1 + $0x20] sm:$0xff]   ;;  %7134 = vset.pattern.permute.xlu1 %v7292_v3  ;;  %7133 = vset.pattern.permute.xlu0 %v7292_v3  ;;  %v6122_v4 = vld [vmem:[%s9841_s2 + $0x8c] sm:$0xf]  ;;  %v6124_v6 = vld [vmem:[%s9841_s2 + $0x94] sm:$0xf]  ;;  %vm1127_vm0 = vcmask 130048  }
   0xf   : > { %1880 = vperm.xlu1 %7134, %v6121_v0   ;;  %1856 = vperm.xlu0 %7133, %v6119_v1   ;;  %v6120_v5 = vld [vmem:[%s9841_s2 + $0x84] sm:$0xf]  ;;  %v6123_v7 = vld [vmem:[%s9841_s2 + $0x90] sm:$0xf]  ;;  %v6126_v8 = vld [vmem:[%s9841_s2 + $0x9c] sm:$0xf] }
  0x10   : > { %6694 = vmatprep.subr.bf16.mxu0 %v7135_v2  ;;  %v6125_v9 = vld [vmem:[%s9841_s2 + $0x98] sm:$0xf]  ;;  %v6128_v10 = vld [vmem:[%s9841_s2 + $0xa4] sm:$0xf]  ;;  %v6127_v11 = vld [vmem:[%s9841_s2 + $0xa0] sm:$0xf] }
  0x11   : > { %6695 = vmatpush3.bf16.msra.mxu0 %v7135_v2  ;;  %v6130_v12 = vld [vmem:[%s9841_s2 + $0xac] sm:$0xf]  ;;  %v6129_v13 = vld [vmem:[%s9841_s2 + $0xa8] sm:$0xf]  ;;  %v6132_v14 = vld [vmem:[%s9841_s2 + $0xb4] sm:$0xf] }
  0x12   : > { %v6131_v15 = vld [vmem:[%s9841_s2 + $0xb0] sm:$0xf]  ;;  %s10317_s16 = smov (!%p188_p3, %s6042_s16), 1  ;;  %v7138_v16 = vld [vmem:[%s9840_s1 + $0x8] sm:$0xff]   ;;  %v6134_v17 = vld [vmem:[%s9841_s2 + $0xbc] sm:$0xf] }
  0x13   : > { %1892 = vperm.xlu1 %7134, %v6122_v4   ;;  %1868 = vperm.xlu0 %7133, %v6120_v5   ;;  %v6133_v18 = vld [vmem:[%s9841_s2 + $0xb8] sm:$0xf]  ;;  %s7122_s29 = smul.u32 160, %s10317_s16  ;;  %v6136_v22 = vld [vmem:[%s9841_s2 + $0xc4] sm:$0xf]  ;;  %s6404_s9 = sshll.u32 %s10317_s16, 8 }
  0x14   : > { %6558 = vmatprep.subr.bf16.mxu1 %v7138_v16  ;;  %v6135_v25 = vld [vmem:[%s9841_s2 + $0xc0] sm:$0xf]  ;;  %v233_v38 = vld [vmem:[%s9841_s2 + $0x4] sm:$0xf]  ;;  %v235_v41 = vld [vmem:[%s9841_s2 + $0xc] sm:$0xf]  ;;  %s9767_s12 = scalar_lea.vmem %s9843_s4, %s6404_s9 }
  0x15   : > { %s7391_s6 = scalar_lea.vmem %s9839_s0, %s7122_s29  ;;  %6559 = vmatpush3.bf16.msra.mxu1 %v7138_v16  ;;  %v232_v39 = vld [vmem:[%s9841_s2] sm:$0xf]  ;;  %v234_v42 = vld [vmem:[%s9841_s2 + $0x8] sm:$0xf]  ;;  %v236_v55 = vld [vmem:[%s9841_s2 + $0x10] sm:$0xf] }
  0x16   : > { %v3061_v19 = vld [vmem:[%s7391_s6 + $0x10] sm:$0xf]  ;;  %v3062_v20 = vld [vmem:[%s7391_s6 + $0x14] sm:$0xf]  ;;  %v3063_v21 = vld [vmem:[%s7391_s6 + $0x18] sm:$0xf] }
  0x17   : > { %1916 = vperm.xlu1 %7134, %v6124_v6   ;;  %1904 = vperm.xlu0 %7133, %v6123_v7   ;;  %v6225_v23 = vcombine.low %v3061_v19, %v3062_v20  ;;  %v3064_v24 = vld [vmem:[%s7391_s6 + $0x1c] sm:$0xf]  ;;  %v200_v27 = vld [vmem:[%s7391_s6 + $0x8] sm:$0xf]  ;;  %v201_v28 = vld [vmem:[%s7391_s6 + $0xc] sm:$0xf] }
  0x18   : > { %v6226_v26 = vcombine.low %v3063_v21, %v3064_v24  ;;  %v6052_v29 = vcombine.low %v200_v27, %v201_v28  ;;  %v3065_v30 = vld [vmem:[%s7391_s6 + $0x20] sm:$0xf]  ;;  %v3066_v31 = vld [vmem:[%s7391_s6 + $0x24] sm:$0xf]  ;;  %v202_v32 = vld [vmem:[%s7391_s6 + $0x10] sm:$0xf] }
  0x19   : > { %6696 = vmatprep.mubr.msk.bf16.mxu0 %vm1127_vm0, %v6225_v23  ;;  %v6227_v33 = vcombine.low %v3065_v30, %v3066_v31  ;;  %v203_v34 = vld [vmem:[%s7391_s6 + $0x14] sm:$0xf]  ;;  %v3067_v36 = vld [vmem:[%s7391_s6 + $0x28] sm:$0xf]  ;;  %v3068_v37 = vld [vmem:[%s7391_s6 + $0x2c] sm:$0xf] }
  0x1a   : > { %6697 = vmatmul.mubr.msk.bf16.vlgmr.msra.gmra.mrb[0].mxu0 %vm1127_vm0, %v6226_v26  ;;  %6560 = vmatprep.mubr.msk.bf16.mxu1 %vm1127_vm0, %v6052_v29  ;;  %v6053_v35 = vcombine.low %v202_v32, %v203_v34  ;;  %v6228_v40 = vcombine.low %v3067_v36, %v3068_v37  ;;  %v204_v43 = vld [vmem:[%s7391_s6 + $0x18] sm:$0xf]  ;;  %v205_v44 = vld [vmem:[%s7391_s6 + $0x1c] sm:$0xf]  ;;  %v3069_v45 = vld [vmem:[%s7391_s6 + $0x30] sm:$0xf] }
  0x1b   : > { %1940 = vperm.xlu1 %7134, %v6126_v8   ;;  %1928 = vperm.xlu0 %7133, %v6125_v9   ;;  %v6054_v46 = vcombine.low %v204_v43, %v205_v44  ;;  %v3070_v47 = vld [vmem:[%s7391_s6 + $0x34] sm:$0xf]  ;;  %v206_v48 = vld [vmem:[%s7391_s6 + $0x20] sm:$0xf]  ;;  %v207_v49 = vld [vmem:[%s7391_s6 + $0x24] sm:$0xf] }
  0x1c   : > { %6700 = vmatprep.mubr.msk.bf16.mxu0 %vm1127_vm0, %v6227_v33  ;;  %6561 = vmatmul.mubr.msk.bf16.vlgmr.msra.gmra.mrb[0].mxu1 %vm1127_vm0, %v6053_v35  ;;  %v6229_v50 = vcombine.low %v3069_v45, %v3070_v47  ;;  %v6055_v51 = vcombine.low %v206_v48, %v207_v49  ;;  %v3071_v52 = vld [vmem:[%s7391_s6 + $0x38] sm:$0xf]  ;;  %v3072_v53 = vld [vmem:[%s7391_s6 + $0x3c] sm:$0xf]  ;;  %v6137_v54 = vld [vmem:[%s9841_s2 + $0xc8] sm:$0xf] }
  0x1d   : > { %6564 = vmatprep.mubr.msk.bf16.mxu1 %vm1127_vm0, %v6054_v46  ;;  %v6230_v56 = vcombine.low %v3071_v52, %v3072_v53  ;;  %v208_v57 = vld [vmem:[%s7391_s6 + $0x28] sm:$0xf]  ;;  %v209_v58 = vld [vmem:[%s7391_s6 + $0x2c] sm:$0xf]  ;;  %v3073_v59 = vld [vmem:[%s7391_s6 + $0x40] sm:$0xf] }
  0x1e   : > { %v3074_v60 = vld [vmem:[%s7391_s6 + $0x44] sm:$0xf]  ;;  %v6056_v61 = vcombine.low %v208_v57, %v209_v58  ;;  %v210_v63 = vld [vmem:[%s7391_s6 + $0x30] sm:$0xf]  ;;  %v211_v0 = vld [vmem:[%s7391_s6 + $0x34] sm:$0xf] }
  0x1f   : > { %1964 = vperm.xlu1 %7134, %v6128_v10   ;;  %1952 = vperm.xlu0 %7133, %v6127_v11   ;;  %v6231_v62 = vcombine.low %v3073_v59, %v3074_v60  ;;  %v237_v1 = vld [vmem:[%s9841_s2 + $0x14] sm:$0xf]  ;;  %v6138_v2 = vld [vmem:[%s9841_s2 + $0xcc] sm:$0xf]  ;;  %v6057_v3 = vcombine.low %v210_v63, %v211_v0  ;;  %v3075_v4 = vld [vmem:[%s7391_s6 + $0x48] sm:$0xf] }
  0x20   : > { %v3076_v5 = vld [vmem:[%s7391_s6 + $0x4c] sm:$0xf]  ;;  %v6140_v7 = vld [vmem:[%s9841_s2 + $0xd4] sm:$0xf]  ;;  %v6139_v8 = vld [vmem:[%s9841_s2 + $0xd0] sm:$0xf] }
  0x21   : > { %v7151_v6 = vld [vmem:[%s9840_s1 + $0x28] sm:$0xff]   ;;  %v6232_v9 = vcombine.low %v3075_v4, %v3076_v5  ;;  %v212_v10 = vld [vmem:[%s7391_s6 + $0x38] sm:$0xf]  ;;  %v213_v11 = vld [vmem:[%s7391_s6 + $0x3c] sm:$0xf] }
  0x22   : > { %6701 = vmatmul.mubr.msk.bf16.gmra.mrb[4].mxu0 %vm1127_vm0, %v6228_v40  ;;  %6728 = vmatprep.subr.bf16.mxu0 %v7151_v6  ;;  %v238_v16 = vld [vmem:[%s9841_s2 + $0x18] sm:$0xf]  ;;  %v216_v19 = vld [vmem:[%s7391_s6 + $0x48] sm:$0xf]  ;;  %v217_v20 = vld [vmem:[%s7391_s6 + $0x4c] sm:$0xf] }
  0x23   : > { %1988 = vperm.xlu1 %7134, %v6130_v12   ;;  %1976 = vperm.xlu0 %7133, %v6129_v13   ;;  %v214_v12 = vld [vmem:[%s7391_s6 + $0x40] sm:$0xf]  ;;  %v6058_v13 = vcombine.low %v212_v10, %v213_v11  ;;  %v6141_v21 = vld [vmem:[%s9841_s2 + $0xd8] sm:$0xf]  ;;  %v218_v24 = vld [vmem:[%s7391_s6 + $0x50] sm:$0xf] }
  0x24   : > { %6704 = vmatprep.mubr.msk.bf16.mxu0 %vm1127_vm0, %v6229_v50  ;;  %6565 = vmatmul.mubr.msk.bf16.gmra.mrb[4].mxu1 %vm1127_vm0, %v6055_v51  ;;  %v240_v23 = vld [vmem:[%s9841_s2 + $0x20] sm:$0xf]  ;;  %v241_v26 = vld [vmem:[%s9841_s2 + $0x24] sm:$0xf]  ;;  %v6142_v27 = vld [vmem:[%s9841_s2 + $0xdc] sm:$0xf] }
  0x25   : > { %6568 = vmatprep.mubr.msk.bf16.mxu1 %vm1127_vm0, %v6056_v61  ;;  %6729 = vmatpush3.bf16.msra.mxu0 %v7151_v6  ;;  %v220_v29 = vld [vmem:[%s7391_s6 + $0x58] sm:$0xf]  ;;  %v221_v30 = vld [vmem:[%s7391_s6 + $0x5c] sm:$0xf]  ;;  %v6144_v31 = vld [vmem:[%s9841_s2 + $0xe4] sm:$0xf] }
  0x26   : > { %v6143_v32 = vld [vmem:[%s9841_s2 + $0xe0] sm:$0xf]  ;;  %v6062_v33 = vcombine.low %v220_v29, %v221_v30  ;;  %v223_v35 = vld [vmem:[%s7391_s6 + $0x64] sm:$0xf]  ;;  %v243_v36 = vld [vmem:[%s9841_s2 + $0x2c] sm:$0xf] }
  0x27   : > { %2012 = vperm.xlu1 %7134, %v6132_v14   ;;  %2000 = vperm.xlu0 %7133, %v6131_v15   ;;  %v215_v14 = vld [vmem:[%s7391_s6 + $0x44] sm:$0xf]  ;;  %v239_v15 = vld [vmem:[%s9841_s2 + $0x1c] sm:$0xf]  ;;  %v222_v34 = vld [vmem:[%s7391_s6 + $0x60] sm:$0xf] }
  0x28   : > { %v242_v37 = vld [vmem:[%s9841_s2 + $0x28] sm:$0xf]  ;;  %v244_v40 = vld [vmem:[%s9841_s2 + $0x30] sm:$0xf]  ;;  %v225_v44 = vld [vmem:[%s7391_s6 + $0x6c] sm:$0xf] }
  0x29   : > { %v224_v43 = vld [vmem:[%s7391_s6 + $0x68] sm:$0xf]  ;;  %v226_v46 = vld [vmem:[%s7391_s6 + $0x70] sm:$0xf]  ;;  %v227_v47 = vld [vmem:[%s7391_s6 + $0x74] sm:$0xf] }
  0x2a   : > { %6705 = vmatmul.mubr.msk.bf16.gmra.mrb[8].mxu0 %vm1127_vm0, %v6230_v56  ;;  %v6064_v45 = vcombine.low %v224_v43, %v225_v44  ;;  %v6148_v48 = vld [vmem:[%s9841_s2 + $0xf4] sm:$0xf]  ;;  %v6147_v49 = vld [vmem:[%s9841_s2 + $0xf0] sm:$0xf]  ;;  %v6065_v50 = vcombine.low %v226_v46, %v227_v47  ;;  %v247_v51 = vld [vmem:[%s9841_s2 + $0x3c] sm:$0xf] }
  0x2b   : > { %2036 = vperm.xlu1 %7134, %v6134_v17   ;;  %2024 = vperm.xlu0 %7133, %v6133_v18   ;;  %v6059_v17 = vcombine.low %v214_v12, %v215_v14  ;;  %v7154_v18 = vld [vmem:[%s9840_s1] sm:$0xff]   ;;  %v246_v52 = vld [vmem:[%s9841_s2 + $0x38] sm:$0xf]  ;;  %v6150_v56 = vld [vmem:[%s9841_s2 + $0xfc] sm:$0xf]  ;;  %v272_v12 = vlaneseq }
  0x2c   : > { %6708 = vmatprep.mubr.msk.bf16.mxu0 %vm1127_vm0, %v6231_v62  ;;  %6569 = vmatmul.mubr.msk.bf16.gmra.mrb[8].mxu1 %vm1127_vm0, %v6057_v3  ;;  %v6149_v53 = vld [vmem:[%s9841_s2 + $0xf8] sm:$0xf]  ;;  %v229_v58 = vld [vmem:[%s7391_s6 + $0x7c] sm:$0xf]  ;;  %v230_v60 = vld [vmem:[%s7391_s6 + $0x80] sm:$0xf] }
  0x2d   : > { %6572 = vmatprep.mubr.msk.bf16.mxu1 %vm1127_vm0, %v6058_v13  ;;  %6592 = vmatprep.subr.bf16.mxu1 %v7154_v18  ;;  %v228_v57 = vld [vmem:[%s7391_s6 + $0x78] sm:$0xf]  ;;  %v231_v61 = vld [vmem:[%s7391_s6 + $0x84] sm:$0xf]  ;;  %v251_v63 = vld [vmem:[%s9841_s2 + $0x4c] sm:$0xf] }
  0x2e   : > { %6593 = vmatpush3.bf16.msra.mxu1 %v7154_v18  ;;  %v6066_v59 = vcombine.low %v228_v57, %v229_v58  ;;  %v6067_v62 = vcombine.low %v230_v60, %v231_v61  ;;  %v250_v0 = vld [vmem:[%s9841_s2 + $0x48] sm:$0xf]  ;;  %v255_v3 = vld [vmem:[%s9841_s2 + $0x5c] sm:$0xf]  ;;  %v254_v4 = vld [vmem:[%s9841_s2 + $0x58] sm:$0xf] }
  0x2f   : > { %2060 = vperm.xlu1 %7134, %v6136_v22   ;;  %2048 = vperm.xlu0 %7133, %v6135_v25   ;;  %v6060_v22 = vcombine.low %v216_v19, %v217_v20  ;;  %v219_v25 = vld [vmem:[%s7391_s6 + $0x54] sm:$0xf]  ;;  %v257_v6 = vld [vmem:[%s9841_s2 + $0x64] sm:$0xf]  ;;  %v7293_v10 = vmov 839922192  }
  0x30   : > { %v6061_v28 = vcombine.low %v218_v24, %v219_v25  ;;  %v7594_v5 = vld [vmem:[%s9840_s1 + $0x30] sm:$0xff]   ;;  %v270_v11 = vunpack.c.l.s4 %v7293_v10  ;;  %v262_v18 = vld [vmem:[%s9841_s2 + $0x78] sm:$0xf]  ;;  %vm2238_vm1 = vsmask.f32 256 }
  0x31   : > { %6762 = vmatprep.subr.bf16.mxu0 %v7594_v5  ;;  %v261_v13 = vld [vmem:[%s9841_s2 + $0x74] sm:$0xf]  ;;  %v260_v14 = vld [vmem:[%s9841_s2 + $0x70] sm:$0xf]  ;;  %vm2239_vm2 = vsmask.f32 4368 }
  0x32   : > { %6709 = vmatmul.mubr.msk.bf16.gmra.mrb[12].mxu0 %vm1127_vm0, %v6232_v9  ;;  %v258_v9 = vld [vmem:[%s9841_s2 + $0x68] sm:$0xf]  ;;  %v7637_v47 = vld [vmem:[%s7391_s6 + $0x10] sm:$0xf]  ;;  %vm7641_vm3 = vmor %vm2238_vm1, %vm2239_vm2  ;;  %vm2680_vm4 = vsmask.f32 7424 }
  0x33   : > { %278 = vperm.xlu1 %7134, %v233_v38   ;;  %266 = vperm.xlu0 %7133, %v232_v39   ;;  %v6063_v38 = vcombine.low %v222_v34, %v223_v35  ;;  %v6145_v39 = vld [vmem:[%s9841_s2 + $0xe8] sm:$0xf]  ;;  %v7653_v58 = vld [vmem:[%s7391_s6 + $0x18] sm:$0xf]  ;;  %vm648_vm5 = vsmask.f32 3328 }
  0x34   : > { %6573 = vmatmul.mubr.msk.bf16.gmra.mrb[12].mxu1 %vm1127_vm0, %v6059_v17  ;;  %v263_v17 = vld [vmem:[%s9841_s2 + $0x7c] sm:$0xf]  ;;  %9978 = vst [vmem:[#allocation4_spill] sm:$0xff] %v7653_v58  ;;  %vm649_vm6 = vsmask.f32 7440 }
  0x35   : > { %6576 = vmatprep.mubr.msk.bf16.mxu1 %vm1127_vm0, %v6060_v22  ;;  %vm8065_vm7 = vmor %vm648_vm5, %vm649_vm6  ;;  %vm1420_vm8 = vsmask.f32 4352 }
  0x37   : > { %302 = vperm.xlu1 %7134, %v235_v41   ;;  %290 = vperm.xlu0 %7133, %v234_v42   ;;  %v245_v41 = vld [vmem:[%s9841_s2 + $0x34] sm:$0xf]  ;;  %v6146_v42 = vld [vmem:[%s9841_s2 + $0xec] sm:$0xf] }
  0x3b   : > { %2072 = vperm.xlu1 %7134, %v6137_v54   ;;  %314 = vperm.xlu0 %7133, %v236_v55   ;;  %v248_v54 = vld [vmem:[%s9841_s2 + $0x40] sm:$0xf]  ;;  %v249_v55 = vld [vmem:[%s9841_s2 + $0x44] sm:$0xf] }
  0x3c   : > { %6577 = vmatmul.mubr.msk.bf16.gmra.mrb[16].mxu1 %vm1127_vm0, %v6061_v28 }
  0x3d   : > { %6580 = vmatprep.mubr.msk.bf16.mxu1 %vm1127_vm0, %v6062_v33 }
  0x3f   : > { %326 = vperm.xlu1 %7134, %v237_v1   ;;  %2084 = vperm.xlu0 %7133, %v6138_v2   ;;  %v253_v1 = vld [vmem:[%s9841_s2 + $0x54] sm:$0xf]  ;;  %v252_v2 = vld [vmem:[%s9841_s2 + $0x50] sm:$0xf] }
  0x43   : > { %2108 = vperm.xlu1 %7134, %v6140_v7   ;;  %2096 = vperm.xlu0 %7133, %v6139_v8   ;;  %v256_v7 = vld [vmem:[%s9841_s2 + $0x60] sm:$0xf]  ;;  %v259_v8 = vld [vmem:[%s9841_s2 + $0x6c] sm:$0xf] }
  0x44   : > { %6581 = vmatmul.mubr.msk.bf16.gmra.mrb[20].mxu1 %vm1127_vm0, %v6063_v38 }
  0x45   : > { %6584 = vmatprep.mubr.msk.bf16.mxu1 %vm1127_vm0, %v6064_v45  ;;  %v7632_v45 = vld [vmem:[%s7391_s6 + $0x8] sm:$0xf] }
  0x47   : > { %350 = vperm.xlu1 %7134, %v239_v15   ;;  %338 = vperm.xlu0 %7133, %v238_v16   ;;  %v271_v15 = vunpack.c.0.s8 %v270_v11  ;;  %v273_v16 = vshrl.u32 %v272_v12, 7  ;;  %v7827_v11 = vld [vmem:[%s7391_s6 + $0x3c] sm:$0xf] }
  0x48   : > { %9997 = vst [vmem:[#allocation23_spill] sm:$0xff] %v7827_v11 }
  0x49   : > { %v7621_v19 = vsub.s32 %v271_v15, %v273_v16 }
  0x4b   : > { %2120 = vperm.xlu1 %7134, %v6141_v21   ;;  %362 = vperm.xlu0 %7133, %v240_v23  }
  0x4c   : > { %6585 = vmatmul.mubr.msk.bf16.gmra.mrb[24].mxu1 %vm1127_vm0, %v6065_v50 }
  0x4d   : > { %6588 = vmatprep.mubr.msk.bf16.mxu1 %vm1127_vm0, %v6066_v59 }
  0x4f   : > { %374 = vperm.xlu1 %7134, %v241_v26   ;;  %2132 = vperm.xlu0 %7133, %v6142_v27  }
  0x53   : > { %2156 = vperm.xlu1 %7134, %v6144_v31   ;;  %2144 = vperm.xlu0 %7133, %v6143_v32  }
  0x54   : > { %6589 = vmatmul.mubr.msk.bf16.gmra.mrb[28].mxu1 %vm1127_vm0, %v6067_v62 }
  0x57   : > { %398 = vperm.xlu1 %7134, %v243_v36   ;;  %386 = vperm.xlu0 %7133, %v242_v37  }
  0x5b   : > { %2168 = vperm.xlu1 %7134, %v6145_v39   ;;  %410 = vperm.xlu0 %7133, %v244_v40  }
  0x5f   : > { %422 = vperm.xlu1 %7134, %v245_v41   ;;  %2180 = vperm.xlu0 %7133, %v6146_v42  }
  0x63   : > { %2204 = vperm.xlu1 %7134, %v6148_v48   ;;  %2192 = vperm.xlu0 %7133, %v6147_v49  }
  0x67   : > { %446 = vperm.xlu1 %7134, %v247_v51   ;;  %434 = vperm.xlu0 %7133, %v246_v52  }
  0x6b   : > { %2216 = vperm.xlu1 %7134, %v6149_v53   ;;  %458 = vperm.xlu0 %7133, %v248_v54  }
  0x6f   : > { %470 = vperm.xlu1 %7134, %v249_v55   ;;  %2228 = vperm.xlu0 %7133, %v6150_v56   ;;  %v7647_v55 = vld [vmem:[%s7391_s6 + $0x20] sm:$0xf]  ;;  %v7650_v56 = vld [vmem:[%s7391_s6 + $0x24] sm:$0xf] }
  0x70   : > { %9976 = vst [vmem:[#allocation2_spill] sm:$0xff] %v7647_v55  ;;  %9977 = vst [vmem:[#allocation3_spill] sm:$0xff] %v7650_v56 }
  0x73   : > { %494 = vperm.xlu1 %7134, %v251_v63   ;;  %482 = vperm.xlu0 %7133, %v250_v0   ;;  %v7660_v63 = vld [vmem:[%s7391_s6 + $0x14] sm:$0xf] }
  0x77   : > { %518 = vperm.xlu1 %7134, %v253_v1   ;;  %506 = vperm.xlu0 %7133, %v252_v2   ;;  %v7667_v1 = vld [vmem:[%s7391_s6 + $0x1c] sm:$0xf] }
  0x7b   : > { %542 = vperm.xlu1 %7134, %v255_v3   ;;  %530 = vperm.xlu0 %7133, %v254_v4  }
  0x7f   : > { %566 = vperm.xlu1 %7134, %v257_v6   ;;  %554 = vperm.xlu0 %7133, %v256_v7   ;;  %v7676_v7 = vld [vmem:[%s7391_s6 + $0x24] sm:$0xf] }
  0x80   : > { %9979 = vst [vmem:[#allocation5_spill] sm:$0xff] %v7676_v7 }
  0x83   : > { %590 = vperm.xlu1 %7134, %v259_v8   ;;  %578 = vperm.xlu0 %7133, %v258_v9   ;;  %v7679_v8 = vld [vmem:[%s7391_s6 + $0xc] sm:$0xf] }
  0x87   : > { %614 = vperm.xlu1 %7134, %v261_v13   ;;  %602 = vperm.xlu0 %7133, %v260_v14   ;;  %v7693_v14 = vld [vmem:[%s7391_s6 + $0x14] sm:$0xf] }
  0x8b   : > { %638 = vperm.xlu1 %7134, %v263_v17   ;;  %626 = vperm.xlu0 %7133, %v262_v18   ;;  %v7875_v18 = vld [vmem:[%s7391_s6 + $0x40] sm:$0xf] }
  0x8c   : > { %10002 = vst [vmem:[#allocation28_spill] sm:$0xff] %v7875_v18 }
  0x8e   : > { %v1881_v20 = vpop.permute.xlu1 %1880  ;;  %v1857_v21 = vpop.permute.xlu0 %1856 }
  0x8f   : > { %v1889_v22 = vrot.slane %v1881_v20, %v7621_v19  ;;  %v1865_v23 = vrot.slane %v1857_v21, %v7621_v19  ;;  %v3943_v21 = vld [vmem:[%s7391_s6 + $0x18] sm:$0xf] }
  0x91   : > { %v2259_v24 = vshrl.u32 %v1889_v22, 16  ;;  %v2242_v25 = vshrl.u32 %v1865_v23, 16  ;;  %v2262_v32 = vshll.u32 %v1889_v22, 16  ;;  %v2245_v38 = vshll.u32 %v1865_v23, 16 }
  0x92   : > { %v1893_v26 = vpop.permute.xlu1 %1892  ;;  %v1869_v27 = vpop.permute.xlu0 %1868 }
  0x93   : > { %v1901_v28 = vrot.slane %v1893_v26, %v7621_v19  ;;  %v1877_v29 = vrot.slane %v1869_v27, %v7621_v19  ;;  %v2261_v30 = vrot.slane %v2259_v24, 7  ;;  %v2244_v31 = vrot.slane %v2242_v25, 7  ;;  %v1792_v26 = vld [vmem:[%s7391_s6 + $0x18] sm:$0xf]  ;;  %v1793_v27 = vld [vmem:[%s7391_s6 + $0x1c] sm:$0xf] }
  0x95   : > { %v2268_v33 = vshrl.u32 %v1901_v28, 16  ;;  %v2250_v34 = vshrl.u32 %v1877_v29, 16  ;;  %v2266_v37 = vrot.slane %v2261_v30, 4  ;;  %v2271_v39 = vshll.u32 %v1901_v28, 16 }
  0x96   : > { %v1917_v35 = vpop.permute.xlu1 %1916  ;;  %v1905_v36 = vpop.permute.xlu0 %1904  ;;  %v2253_v43 = vshll.u32 %v1877_v29, 16  ;;  %v7634_v46 = vor.u32 %v2245_v38, %v2244_v31  ;;  %v2248_v57 = vrot.slane %v2244_v31, 4  ;;  %v2264_v62 = vor.u32 %v2262_v32, %v2261_v30  ;;  %v5358_v38 = vld [vmem:[%s7391_s6 + $0x2c] sm:$0xf] }
  0x97   : > { %v1925_v40 = vrot.slane %v1917_v35, %v7621_v19  ;;  %v7628_v41 = vrot.slane %v2268_v33, 7  ;;  %v2252_v42 = vrot.slane %v2250_v34, 7  ;;  %v1913_v44 = vrot.slane %v1905_v36, %v7621_v19  ;;  %v3945_v33 = vld [vmem:[%s7391_s6 + $0x20] sm:$0xf]  ;;  %v5357_v34 = vld [vmem:[%s7391_s6 + $0x28] sm:$0xf] }
  0x98   : > { %v3974_v6 = vmul.bf16 %v7637_v47, %v7634_v46 }
  0x99   : > { %v2286_v49 = vshrl.u32 %v1925_v40, 16  ;;  %v2273_v50 = vor.u32 %v2271_v39, %v7628_v41  ;;  %v2255_v51 = vor.u32 %v2253_v43, %v2252_v42  ;;  %v2257_v52 = vrot.slane %v2252_v42, 4  ;;  %v3946_v43 = vld [vmem:[%s7391_s6 + $0x24] sm:$0xf] }
  0x9a   : > { %v1941_v53 = vpop.permute.xlu1 %1940  ;;  %v1929_v54 = vpop.permute.xlu0 %1928  ;;  %v2277_v60 = vshrl.u32 %v1913_v44, 16  ;;  %v2289_v10 = vshll.u32 %v1925_v40, 16  ;;  %v2275_v12 = vrot.slane %v7628_v41, 4  ;;  %v2280_v15 = vshll.u32 %v1913_v44, 16 }
  0x9b   : > { %v7655_v59 = vrot.slane %v2286_v49, 7  ;;  %v7664_v0 = vsel %vm7641_vm3, %v2266_v37, %v2273_v50  ;;  %v1949_v2 = vrot.slane %v1941_v53, %v7621_v19  ;;  %v1937_v3 = vrot.slane %v1929_v54, %v7621_v19  ;;  %v7727_v53 = vld [vmem:[%s7391_s6 + $0x1c] sm:$0xf] }
  0x9c   : > { %v7683_v9 = vsel %vm7641_vm3, %v2248_v57, %v2255_v51  ;;  %v7690_v13 = vsel %vm7641_vm3, %v2257_v52, %v2264_v62  ;;  %v3977_v20 = vmul.bf16 %v7667_v1, %v7664_v0  ;;  %v2279_v23 = vrot.slane %v2277_v60, 7  ;;  %v7724_v52 = vld [vmem:[%s7391_s6 + $0x10] sm:$0xf]  ;;  %9982 = vst [vmem:[#allocation8_spill] sm:$0xff] %v7727_v53 }
  0x9d   : > { %9980 = vst [vmem:[#allocation6_spill] sm:$0xff] %v7690_v13  ;;  %v2291_v22 = vor.u32 %v2289_v10, %v7655_v59  ;;  %v2304_v28 = vshrl.u32 %v1949_v2, 16  ;;  %v2295_v29 = vshrl.u32 %v1937_v3, 16  ;;  %v3975_v30 = vmul.bf16 %v7693_v14, %v7683_v9  ;;  %9981 = vst [vmem:[#allocation7_spill] sm:$0xff] %v7724_v52 }
  0x9e   : > { %v1965_v16 = vpop.permute.xlu1 %1964  ;;  %v1953_v17 = vpop.permute.xlu0 %1952  ;;  %v2282_v31 = vor.u32 %v2280_v15, %v2279_v23  ;;  %v2284_v32 = vrot.slane %v2279_v23, 4  ;;  %v3976_v36 = vmul.bf16 %v3943_v21, %v7690_v13  ;;  %v2293_v37 = vrot.slane %v7655_v59, 4 }
  0x9f   : > { %v1973_v35 = vrot.slane %v1965_v16, %v7621_v19  ;;  %v7715_v39 = vrot.slane %v2304_v28, 7  ;;  %v2297_v40 = vrot.slane %v2295_v29, 7  ;;  %v2307_v44 = vshll.u32 %v1949_v2, 16  ;;  %v7731_v2 = vld [vmem:[%s7391_s6 + $0x20] sm:$0xf] }
  0xa0   : > { %v2283_v41 = vsel %vm7641_vm3, %v2275_v12, %v2282_v31  ;;  %v2292_v42 = vsel %vm7641_vm3, %v2284_v32, %v2291_v22  ;;  %v1961_v49 = vrot.slane %v1953_v17, %v7621_v19  ;;  %v2298_v59 = vshll.u32 %v1937_v3, 16  ;;  %9983 = vst [vmem:[#allocation9_spill] sm:$0xff] %v7731_v2  ;;  %v7820_v32 = vld [vmem:[%s7391_s6 + $0x34] sm:$0xf]  ;;  %v7851_v3 = vld [vmem:[%s7391_s6 + $0x30] sm:$0xf] }
  0xa1   : > { %v2565_v54 = vmul.bf16 %v2283_v41, %v1792_v26  ;;  %v2566_v57 = vmul.bf16 %v2292_v42, %v1793_v27  ;;  %v2322_v60 = vshrl.u32 %v1973_v35, 16  ;;  %v3978_v62 = vmul.bf16 %v3945_v33, %v2283_v41  ;;  %v7742_v26 = vld [vmem:[%s7391_s6 + $0x20] sm:$0xf]  ;;  %v7755_v33 = vld [vmem:[%s7391_s6 + $0x24] sm:$0xf]  ;;  %9998 = vst [vmem:[#allocation24_spill] sm:$0xff] %v7851_v3 }
  0xa2   : > { %v1989_v50 = vpop.permute.xlu1 %1988  ;;  %v1977_v51 = vpop.permute.xlu0 %1976  ;;  %v5390_v1 = vmul.bf16 %v5357_v34, %v2283_v41  ;;  %v5391_v10 = vmul.bf16 %v5358_v38, %v2292_v42  ;;  %v2309_v12 = vor.u32 %v2307_v44, %v7715_v39  ;;  %v3979_v15 = vmul.bf16 %v3946_v43, %v2292_v42  ;;  %9986 = vst [vmem:[#allocation12_spill] sm:$0xff] %v7742_v26  ;;  %v7772_v44 = vld [vmem:[%s7391_s6 + $0x28] sm:$0xf] }
  0xa3   : > { %v7733_v14 = vcombine.low %v2565_v54, %v2566_v57  ;;  %v2300_v16 = vor.u32 %v2298_v59, %v2297_v40  ;;  %v2302_v17 = vrot.slane %v2297_v40, 4  ;;  %v2313_v23 = vshrl.u32 %v1961_v49, 16  ;;  %9988 = vst [vmem:[#allocation14_spill] sm:$0xff] %v7755_v33  ;;  %v7777_v57 = vld [vmem:[%s7391_s6 + $0x2c] sm:$0xf] }
  0xa4   : > { %v7739_v22 = vcombine.low %v5390_v1, %v5391_v10  ;;  %v7748_v28 = vrot.slane %v2322_v60, 7  ;;  %v1997_v29 = vrot.slane %v1989_v50, %v7621_v19  ;;  %v1985_v31 = vrot.slane %v1977_v51, %v7621_v19 }
  0xa5   : > { %9984 = vst [vmem:[#allocation10_spill] sm:$0xff] %v7733_v14  ;;  %v7746_v27 = vsel %vm7641_vm3, %v2293_v37, %v2300_v16  ;;  %v7759_v34 = vsel %vm7641_vm3, %v2302_v17, %v2309_v12  ;;  %v7764_v40 = vcombine.low %v3974_v6, %v3975_v30  ;;  %v7766_v41 = vcombine.low %v3976_v36, %v3977_v20  ;;  %v7782_v20 = vld [vmem:[%s7391_s6 + $0x30] sm:$0xf]  ;;  %v7785_v30 = vld [vmem:[%s7391_s6 + $0x34] sm:$0xf] }
  0xa6   : > { %9985 = vst [vmem:[#allocation11_spill] sm:$0xff] %v7739_v22  ;;  %9987 = vst [vmem:[#allocation13_spill] sm:$0xff] %v7746_v27  ;;  %v2013_v38 = vpop.permute.xlu1 %2012  ;;  %v2001_v37 = vpop.permute.xlu0 %2000  ;;  %v7768_v42 = vcombine.low %v3978_v62, %v3979_v15  ;;  %v2311_v43 = vrot.slane %v7715_v39, 4  ;;  %v2325_v50 = vshll.u32 %v1973_v35, 16  ;;  %v2316_v51 = vshll.u32 %v1961_v49, 16 }
  0xa7   : > { %9989 = vst [vmem:[#allocation15_spill] sm:$0xff] %v7759_v34  ;;  %v2315_v59 = vrot.slane %v2313_v23, 7  ;;  %v2340_v60 = vshrl.u32 %v1997_v29, 16  ;;  %v2331_v47 = vshrl.u32 %v1985_v31, 16  ;;  %9990 = vst [vmem:[#allocation16_spill] sm:$0xff] %v7782_v20  ;;  %v2021_v36 = vrot.slane %v2013_v38, %v7621_v19 }
  0xa8   : > { %9991 = vst [vmem:[#allocation17_spill] sm:$0xff] %v7785_v30  ;;  %v2327_v35 = vor.u32 %v2325_v50, %v7748_v28  ;;  %v2009_v39 = vrot.slane %v2001_v37, %v7621_v19  ;;  %v3980_v12 = vmul.bf16 %v7772_v44, %v7746_v27  ;;  %v3981_v15 = vmul.bf16 %v7777_v57, %v7759_v34  ;;  %v7801_v37 = vld [vmem:[%s7391_s6 + $0x28] sm:$0xf]  ;;  %v7804_v50 = vld [vmem:[%s7391_s6 + $0x2c] sm:$0xf] }
  0xa9   : > { %v2318_v49 = vor.u32 %v2316_v51, %v2315_v59  ;;  %v2320_v62 = vrot.slane %v2315_v59, 4  ;;  %v7790_v1 = vrot.slane %v2340_v60, 7  ;;  %v2333_v10 = vrot.slane %v2331_v47, 7  ;;  %9992 = vst [vmem:[#allocation18_spill] sm:$0xff] %v7801_v37  ;;  %9993 = vst [vmem:[#allocation19_spill] sm:$0xff] %v7804_v50 }
  0xaa   : > { %v2358_v16 = vshrl.u32 %v2021_v36, 16  ;;  %v2349_v17 = vshrl.u32 %v2009_v39, 16  ;;  %v2343_v51 = vshll.u32 %v1997_v29, 16  ;;  %v2334_v44 = vshll.u32 %v1985_v31, 16  ;;  %v7812_v60 = vld [vmem:[%s7391_s6 + $0x30] sm:$0xf] }
  0xab   : > { %v2329_v57 = vrot.slane %v7748_v28, 4  ;;  %v7809_v59 = vsel %vm7641_vm3, %v2311_v43, %v2318_v49  ;;  %v2361_v47 = vshll.u32 %v2021_v36, 16  ;;  %v4094_v23 = vshrl.u32 %v7764_v40, 16  ;;  %v7823_v29 = vld [vmem:[%s7391_s6 + $0x38] sm:$0xf] }
  0xac   : > { %9994 = vst [vmem:[#allocation20_spill] sm:$0xff] %v7809_v59  ;;  %v7817_v38 = vsel %vm7641_vm3, %v2320_v62, %v2327_v35  ;;  %9996 = vst [vmem:[#allocation22_spill] sm:$0xff] %v7823_v29  ;;  %v2345_v31 = vor.u32 %v2343_v51, %v7790_v1  ;;  %v2336_v28 = vor.u32 %v2334_v44, %v2333_v10  ;;  %v2338_v24 = vrot.slane %v2333_v10, 4  ;;  %v2037_v62 = vpop.permute.xlu1 %2036  ;;  %v7856_v6 = vld [vmem:[%s7391_s6 + $0x34] sm:$0xf] }
  0xad   : > { %9995 = vst [vmem:[#allocation21_spill] sm:$0xff] %v7817_v38  ;;  %v7829_v43 = vrot.slane %v2358_v16, 7  ;;  %v2351_v36 = vrot.slane %v2349_v17, 7  ;;  %v4096_v49 = vshll.u32 %v7764_v40, 16  ;;  %v4101_v35 = vshll.u32 %v7766_v41, 16  ;;  %v2025_v16 = vpop.permute.xlu0 %2024  ;;  %v7840_v17 = vld [vmem:[%s9840_s1 + $0x10] sm:$0xff]  }
  0xae   : > { %v2347_v51 = vrot.slane %v7790_v1, 4  ;;  %v2352_v44 = vshll.u32 %v2009_v39, 16  ;;  %v4109_v10 = vshll.u32 %v7768_v42, 16  ;;  %v3982_v61 = vmul.bf16 %v7812_v60, %v7809_v59  ;;  %9999 = vst [vmem:[#allocation25_spill] sm:$0xff] %v7856_v6  ;;  %6626 = vmatprep.subr.bf16.mxu1 %v7840_v17  ;;  %v7872_v39 = vld [vmem:[%s7391_s6 + $0x3c] sm:$0xf] }
  0xaf   : > { %v3983_v1 = vmul.bf16 %v7820_v32, %v7817_v38  ;;  %v7860_v40 = vsel %vm7641_vm3, %v2329_v57, %v2336_v28  ;;  %v7864_v60 = vsel %vm7641_vm3, %v2338_v24, %v2345_v31  ;;  %v7867_v32 = vld [vmem:[%s7391_s6 + $0x38] sm:$0xf]  ;;  %v4105_v21 = vshrl.u32 %v7766_v41, 16  ;;  %v7879_v28 = vld [vmem:[%s7391_s6 + $0x44] sm:$0xf] }
  0xb0   : > { %10000 = vst [vmem:[#allocation26_spill] sm:$0xff] %v7860_v40  ;;  %10001 = vst [vmem:[#allocation27_spill] sm:$0xff] %v7864_v60  ;;  %v2363_v54 = vor.u32 %v2361_v47, %v7829_v43  ;;  %v2354_v4 = vor.u32 %v2352_v44, %v2351_v36  ;;  %v4098_v25 = vrot.slane %v4096_v49, 1  ;;  %v4103_v57 = vrot.slane %v4101_v35, 1  ;;  %v2061_v2 = vpop.permute.xlu1 %2060  ;;  %v7907_v35 = vld [vmem:[%s7391_s6 + $0x38] sm:$0xf] }
  0xb1   : > { %10003 = vst [vmem:[#allocation29_spill] sm:$0xff] %v7879_v28  ;;  %v2356_v29 = vrot.slane %v2351_v36, 4  ;;  %v4111_v24 = vrot.slane %v4109_v10, 1  ;;  %v2045_v31 = vrot.slane %v2037_v62, %v7621_v19  ;;  %v2033_v11 = vrot.slane %v2025_v16, %v7621_v19  ;;  %v2049_v62 = vpop.permute.xlu0 %2048  ;;  %10006 = vst [vmem:[#allocation32_spill] sm:$0xff] %v7907_v35  ;;  %v7931_v49 = vld [vmem:[%s7391_s6 + $0x48] sm:$0xf] }
  0xb2   : > { %v4099_v20 = vor.u32 %v4098_v25, %v4094_v23  ;;  %v4107_v30 = vor.u32 %v4105_v21, %v4103_v57  ;;  %v6263_v22 = vcombine.low %v3980_v12, %v3981_v15  ;;  %v7897_v21 = vsel %vm7641_vm3, %v2347_v51, %v2354_v4  ;;  %v7910_v25 = vld [vmem:[%s7391_s6 + $0x3c] sm:$0xf]  ;;  %10008 = vst [vmem:[#allocation34_spill] sm:$0xff] %v7931_v49  ;;  %v7221_v34 = vld [vmem:[%s7391_s6 + $0x48] sm:$0xf] }
  0xb3   : > { %10004 = vst [vmem:[#allocation30_spill] sm:$0xff] %v7897_v21  ;;  %v7903_v23 = vsel %vm7641_vm3, %v2356_v29, %v2363_v54  ;;  %v2376_v44 = vshrl.u32 %v2045_v31, 16  ;;  %v2379_v10 = vshll.u32 %v2045_v31, 16  ;;  %v2367_v16 = vshrl.u32 %v2033_v11, 16  ;;  %10007 = vst [vmem:[#allocation33_spill] sm:$0xff] %v7910_v25 }
  0xb4   : > { %v4104_v12 = vsel %vm2680_vm4, %v4099_v20, %v4103_v57  ;;  %v4112_v15 = vsel %vm2680_vm4, %v4107_v30, %v4111_v24  ;;  %10005 = vst [vmem:[#allocation31_spill] sm:$0xff] %v7903_v23  ;;  %v4113_v4 = vshrl.u32 %v7768_v42, 16  ;;  %v4117_v20 = vshll.u32 %v6263_v22, 16  ;;  %v7917_v29 = vld [vmem:[%s7391_s6 + $0x40] sm:$0xf]  ;;  %v279_v36 = vpop.permute.xlu1 %278 }
  0xb5   : > { %6730 = vmatprep.mubr.msk.bf16.mxu0 %vm1127_vm0, %v4104_v12  ;;  %v2069_v30 = vrot.slane %v2061_v2, %v7621_v19  ;;  %v2057_v54 = vrot.slane %v2049_v62, %v7621_v19  ;;  %v7919_v51 = vrot.slane %v2376_v44, 7  ;;  %v2369_v57 = vrot.slane %v2367_v16, 7  ;;  %v7926_v42 = vld [vmem:[%s7391_s6 + $0x44] sm:$0xf]  ;;  %v7934_v44 = vld [vmem:[%s7391_s6 + $0x4c] sm:$0xf] }
  0xb6   : > { %6731 = vmatmul.mubr.msk.bf16.vlgmr.msra.gmra.mrb[0].mxu0 %vm1127_vm0, %v4112_v15  ;;  %v2370_v31 = vshll.u32 %v2033_v11, 16  ;;  %v7921_v12 = vcombine.low %v3982_v61, %v3983_v1  ;;  %v2365_v15 = vrot.slane %v7829_v43, 4  ;;  %v4115_v41 = vor.u32 %v4113_v4, %v4111_v24  ;;  %10009 = vst [vmem:[#allocation35_spill] sm:$0xff] %v7934_v44  ;;  %v7956_v1 = vld [vmem:[%s7391_s6 + $0x44] sm:$0xf] }
  0xb7   : > { %6763 = vmatpush3.bf16.msra.mxu0 %v7594_v5  ;;  %v4119_v47 = vrot.slane %v4117_v20, 1  ;;  %v2394_v2 = vshrl.u32 %v2069_v30, 16  ;;  %v2381_v61 = vor.u32 %v2379_v10, %v7919_v51  ;;  %v2374_v11 = vrot.slane %v2369_v57, 4  ;;  %10011 = vst [vmem:[#allocation37_spill] sm:$0xff] %v7956_v1  ;;  %v4486_v14 = vld [vmem:[%s7391_s6 + $0x4c] sm:$0xf] }
  0xb8   : > { %v2372_v5 = vor.u32 %v2370_v31, %v2369_v57  ;;  %v2385_v16 = vshrl.u32 %v2057_v54, 16  ;;  %v4121_v10 = vshrl.u32 %v6263_v22, 16  ;;  %v4125_v31 = vshll.u32 %v7921_v12, 16  ;;  %v267_v57 = vpop.permute.xlu0 %266  ;;  %v303_v7 = vpop.permute.xlu1 %302 }
  0xb9   : > { %v4120_v24 = vsel %vm2680_vm4, %v4115_v41, %v4119_v47  ;;  %v7945_v20 = vrot.slane %v2394_v2, 7  ;;  %v7953_v41 = vld [vmem:[%s7391_s6 + $0x40] sm:$0xf]  ;;  %v7964_v22 = vsel %vm7641_vm3, %v2374_v11, %v2381_v61  ;;  %v2397_v62 = vshll.u32 %v2069_v30, 16  ;;  %v7989_v11 = vld [vmem:[%s7391_s6 + $0x50] sm:$0xf] }
  0xba   : > { %6734 = vmatprep.mubr.msk.bf16.mxu0 %vm1127_vm0, %v4120_v24  ;;  %10010 = vst [vmem:[#allocation36_spill] sm:$0xff] %v7953_v41  ;;  %v7960_v2 = vsel %vm7641_vm3, %v2365_v15, %v2372_v5  ;;  %10013 = vst [vmem:[#allocation39_spill] sm:$0xff] %v7964_v22  ;;  %v2383_v24 = vrot.slane %v7919_v51, 4  ;;  %v2388_v4 = vshll.u32 %v2057_v54, 16  ;;  %v4123_v43 = vor.u32 %v4121_v10, %v4119_v47  ;;  %v7974_v5 = vld [vmem:[%s7391_s6 + $0x48] sm:$0xf] }
  0xbb   : > { %10012 = vst [vmem:[#allocation38_spill] sm:$0xff] %v7960_v2  ;;  %v2387_v49 = vrot.slane %v2385_v16, 7  ;;  %v4127_v44 = vrot.slane %v4125_v31, 1  ;;  %v287_v18 = vrot.slane %v279_v36, %v7621_v19  ;;  %v275_v28 = vrot.slane %v267_v57, %v7621_v19  ;;  %v7977_v51 = vld [vmem:[%s7391_s6 + $0x4c] sm:$0xf]  ;;  %10016 = vst [vmem:[#allocation40_spill] sm:$0xff] %v7989_v11 }
  0xbc   : > { %v2399_v30 = vor.u32 %v2397_v62, %v7945_v20  ;;  %v10014_v47 = vmul.bf16 %v7872_v39, %v7864_v60  ;;  %v10015_v36 = vmul.bf16 %v7867_v32, %v7860_v40  ;;  %v311_v39 = vrot.slane %v303_v7, %v7621_v19  ;;  %v291_v58 = vpop.permute.xlu0 %290  ;;  %v7201_v60 = vld [vmem:[%s7391_s6 + $0x20] sm:$0xf] }
  0xbd   : > { %v2390_v16 = vor.u32 %v2388_v4, %v2387_v49  ;;  %v2392_v10 = vrot.slane %v2387_v49, 4  ;;  %v4128_v31 = vsel %vm2680_vm4, %v4123_v43, %v4127_v44  ;;  %v661_v62 = vshll.u32 %v287_v18, 16 }
  0xbe   : > { %v7986_v54 = vcombine.low %v10015_v36, %v10014_v47  ;;  %6735 = vmatmul.mubr.msk.bf16.gmra.mrb[4].mxu0 %vm1127_vm0, %v4128_v31  ;;  %v665_v57 = vshrl.u32 %v287_v18, 16  ;;  %v652_v15 = vshll.u32 %v275_v28, 16  ;;  %v655_v61 = vshrl.u32 %v275_v28, 16  ;;  %v7999_v47 = vld [vmem:[%s7391_s6 + $0x54] sm:$0xf] }
  0xbf   : > { %10017 = vst [vmem:[#allocation41_spill] sm:$0xff] %v7999_v47  ;;  %v4129_v49 = vshrl.u32 %v7921_v12, 16  ;;  %v8006_v36 = vld [vmem:[%s7391_s6 + $0x48] sm:$0xf]  ;;  %v8009_v28 = vld [vmem:[%s7391_s6 + $0x4c] sm:$0xf]  ;;  %v8013_v7 = vsel %vm7641_vm3, %v2383_v24, %v2390_v16  ;;  %v8017_v31 = vsel %vm7641_vm3, %v2392_v10, %v2399_v30  ;;  %v299_v11 = vrot.slane %v291_v58, %v7621_v19  ;;  %v2073_v58 = vpop.permute.xlu1 %2072 }
  0xc0   : > { %v4133_v43 = vshll.u32 %v7986_v54, 16  ;;  %10018 = vst [vmem:[#allocation42_spill] sm:$0xff] %v8006_v36  ;;  %10019 = vst [vmem:[#allocation43_spill] sm:$0xff] %v8009_v28  ;;  %v663_v12 = vrot.slane %v661_v62, 5  ;;  %v667_v32 = vrot.slane %v665_v57, 4  ;;  %v8019_v4 = vrot.slane %v652_v15, 5 }
  0xc1   : > { %10020 = vst [vmem:[#allocation44_spill] sm:$0xff] %v8013_v7  ;;  %10021 = vst [vmem:[#allocation45_spill] sm:$0xff] %v8017_v31  ;;  %v4131_v18 = vor.u32 %v4129_v49, %v4127_v44  ;;  %v657_v53 = vrot.slane %v655_v61, 4  ;;  %v681_v1 = vshll.u32 %v311_v39, 16  ;;  %v685_v35 = vshrl.u32 %v311_v39, 16 }
  0xc2   : > { %v4135_v41 = vrot.slane %v4133_v43, 1  ;;  %v8030_v10 = vld [vmem:[%s7391_s6 + $0x50] sm:$0xf]  ;;  %v8033_v44 = vld [vmem:[%s7391_s6 + $0x54] sm:$0xf]  ;;  %v668_v62 = vor.u32 %v667_v32, %v663_v12  ;;  %v315_v43 = vpop.permute.xlu0 %314  ;;  %v671_v15 = vshll.u32 %v299_v11, 16  ;;  %v10024_v47 = vmul.bf16 %v7926_v42, %v7903_v23 }
  0xc3   : > { %v8036_v61 = vld [vmem:[%s7391_s6 + $0x58] sm:$0xf]  ;;  %v658_v57 = vor.u32 %v657_v53, %v8019_v4  ;;  %v683_v49 = vrot.slane %v681_v1, 5  ;;  %v8041_v24 = vld [vmem:[%s7391_s6 + $0x5c] sm:$0xf]  ;;  %v687_v30 = vrot.slane %v685_v35, 4  ;;  %v10025_v32 = vmul.bf16 %v7917_v29, %v7897_v21  ;;  %v327_v3 = vpop.permute.xlu1 %326 }
  0xc4   : > { %10022 = vst [vmem:[#allocation46_spill] sm:$0xff] %v8036_v61  ;;  %v4136_v39 = vsel %vm2680_vm4, %v4131_v18, %v4135_v41  ;;  %10023 = vst [vmem:[#allocation47_spill] sm:$0xff] %v8041_v24  ;;  %v675_v16 = vshrl.u32 %v299_v11, 16  ;;  %v8057_v18 = vld [vmem:[%s7391_s6 + $0x4] sm:$0x8]  ;;  %v2081_v11 = vrot.slane %v2073_v58, %v7621_v19  ;;  %v323_v1 = vrot.slane %v315_v43, %v7621_v19 }
  0xc5   : > { %6738 = vmatprep.mubr.msk.bf16.mxu0 %vm1127_vm0, %v4136_v39  ;;  %v8050_v36 = vcombine.low %v10025_v32, %v10024_v47  ;;  %v659_v39 = vrot.slane %v658_v57, 4  ;;  %v8060_v35 = vld [vmem:[%s7391_s6 + $0xc] sm:$0x8]  ;;  %v8070_v29 = vld [vmem:[%s7391_s6 + $0x14] sm:$0x8]  ;;  %v673_v47 = vrot.slane %v671_v15, 5  ;;  %v688_v15 = vor.u32 %v687_v30, %v683_v49 }
  0xc6   : > { %10026 = vst [vmem:[#allocation48_spill] sm:$0xff] %v8060_v35  ;;  %v677_v32 = vrot.slane %v675_v16, 4  ;;  %v669_v28 = vrot.slane %v668_v62, 4  ;;  %v4137_v58 = vshrl.u32 %v7986_v54, 16  ;;  %v2403_v21 = vshrl.u32 %v2081_v11, 16 }
  0xc7   : > { %v4141_v53 = vshll.u32 %v8050_v36, 16  ;;  %v8085_v43 = vsel %vm8065_vm7, %v659_v39, %v663_v12  ;;  %v2406_v24 = vshll.u32 %v2081_v11, 16  ;;  %v691_v23 = vshll.u32 %v323_v1, 16  ;;  %v4474_v12 = vld [vmem:[%s7391_s6 + $0x1c] sm:$0xf] }
  0xc8   : > { %v678_v62 = vor.u32 %v677_v32, %v673_v47  ;;  %v4139_v57 = vor.u32 %v4137_v58, %v4135_v41  ;;  %v8089_v25 = vrot.slane %v2403_v21, 7  ;;  %v8093_v30 = vsel %vm8065_vm7, %v669_v28, %v673_v47  ;;  %v8105_v11 = vld [vmem:[%s7391_s6 + $0x18] sm:$0xf] }
  0xc9   : > { %v4143_v61 = vrot.slane %v4141_v53, 1  ;;  %v695_v39 = vshrl.u32 %v323_v1, 16  ;;  %v10029_v54 = vmul.bf16 %v7977_v51, %v7964_v22  ;;  %v10030_v41 = vmul.bf16 %v7974_v5, %v7960_v2  ;;  %v2085_v53 = vpop.permute.xlu0 %2084  ;;  %v8110_v1 = vld [vmem:[%s7391_s6 + $0x8] sm:$0xf]  ;;  %v7197_v22 = vld [vmem:[%s7391_s6 + $0x10] sm:$0xf] }
  0xca   : > { %v679_v16 = vrot.slane %v678_v62, 4  ;;  %v689_v32 = vrot.slane %v688_v15, 4  ;;  %v2408_v47 = vor.u32 %v2406_v24, %v8089_v25  ;;  %v693_v58 = vrot.slane %v691_v23, 5  ;;  %v7194_v23 = vld [vmem:[%s7391_s6 + $0x18] sm:$0xf] }
  0xcb   : > { %v8102_v21 = vcombine.low %v10030_v41, %v10029_v54  ;;  %v4144_v28 = vsel %vm2680_vm4, %v4139_v57, %v4143_v61  ;;  %v697_v54 = vrot.slane %v695_v39, 4  ;;  %v7193_v57 = vld [vmem:[%s7391_s6 + $0x14] sm:$0xf]  ;;  %v4507_v41 = vmul.bf16 %v4474_v12, %v8093_v30 }
  0xcc   : > { %v8116_v5 = vsel %vm8065_vm7, %v679_v16, %v683_v49  ;;  %6739 = vmatmul.mubr.msk.bf16.gmra.mrb[8].mxu0 %vm1127_vm0, %v4144_v28  ;;  %v3095_v24 = vmul.bf16 %v7193_v57, %v8093_v30  ;;  %v8128_v49 = vld [vmem:[%s7391_s6 + $0x10] sm:$0xf]  ;;  %v8135_v28 = vld [vmem:[%s7391_s6 + $0xc] sm:$0xf]  ;;  %v10034_v2 = vrot.slane %v7945_v20, 4  ;;  %v2410_v57 = vrot.slane %v8089_v25, 4 }
  0xcd   : > { %v4149_v15 = vshll.u32 %v8102_v21, 16  ;;  %v3096_v62 = vmul.bf16 %v7194_v23, %v8116_v5  ;;  %v4508_v51 = vmul.bf16 %v7647_v55, %v8116_v5  ;;  %10031 = vst [vmem:[#allocation49_spill] sm:$0xff] %v8128_v49  ;;  %v4145_v23 = vshrl.u32 %v8050_v36, 16  ;;  %v8145_v55 = vld [vmem:[%s7391_s6 + $0x50] sm:$0xf]  ;;  %v2109_v49 = vpop.permute.xlu1 %2108 }
  0xce   : > { %10033 = vst [vmem:[#allocation51_spill] sm:$0xff] %v8145_v55  ;;  %v8151_v16 = vsel %vm7641_vm3, %v10034_v2, %v2408_v47  ;;  %v698_v39 = vor.u32 %v697_v54, %v693_v58  ;;  %v1006_v40 = vmul.bf16 %v7197_v22, %v8116_v5  ;;  %v335_v20 = vrot.slane %v327_v3, %v7621_v19  ;;  %v7198_v5 = vld [vmem:[%s7391_s6 + $0x14] sm:$0xf] }
  0xcf   : > { %v8140_v35 = vcombine.low %v3095_v24, %v3096_v62  ;;  %v8142_v12 = vcombine.low %v4507_v41, %v4508_v51  ;;  %10035 = vst [vmem:[#allocation52_spill] sm:$0xff] %v8151_v16  ;;  %v4147_v36 = vor.u32 %v4145_v23, %v4143_v61  ;;  %v4151_v24 = vrot.slane %v4149_v15, 1  ;;  %v2097_v51 = vpop.permute.xlu0 %2096 }
  0xd0   : > { %v694_v62 = vsel %vm8065_vm7, %v689_v32, %v693_v58  ;;  %v2093_v41 = vrot.slane %v2085_v53, %v7621_v19  ;;  %v10036_v2 = vmul.bf16 %v8033_v44, %v8017_v31  ;;  %v10037_v47 = vmul.bf16 %v8030_v10, %v8013_v7 }
  0xd1   : > { %10032 = vst [vmem:[#allocation50_spill] sm:$0xff] %v8140_v35  ;;  %v699_v61 = vrot.slane %v698_v39, 4  ;;  %v4152_v32 = vsel %vm2680_vm4, %v4147_v36, %v4151_v24  ;;  %v2117_v3 = vrot.slane %v2109_v49, %v7621_v19  ;;  %v701_v53 = vshll.u32 %v335_v20, 16  ;;  %v8180_v35 = vld [vmem:[%s7391_s6 + $0x58] sm:$0xf]  ;;  %v351_v7 = vpop.permute.xlu1 %350 }
  0xd2   : > { %v8166_v22 = vcombine.low %v10037_v47, %v10036_v2  ;;  %6742 = vmatprep.mubr.msk.bf16.mxu0 %vm1127_vm0, %v4152_v32  ;;  %v705_v44 = vshrl.u32 %v335_v20, 16  ;;  %v2412_v58 = vshrl.u32 %v2093_v41, 16  ;;  %v2105_v10 = vrot.slane %v2097_v51, %v7621_v19  ;;  %v7199_v2 = vld [vmem:[%s7391_s6 + $0x1c] sm:$0xf]  ;;  %v4477_v47 = vld [vmem:[%s7391_s6 + $0x28] sm:$0xf] }
  0xd3   : > { %v1007_v54 = vmul.bf16 %v7198_v5, %v694_v62  ;;  %v4153_v15 = vshrl.u32 %v8102_v21, 16  ;;  %v2430_v23 = vshrl.u32 %v2117_v3, 16  ;;  %v3097_v36 = vmul.bf16 %v7199_v2, %v694_v62  ;;  %v8183_v20 = vld [vmem:[%s7391_s6 + $0x60] sm:$0xf] }
  0xd4   : > { %v4157_v39 = vshll.u32 %v8166_v22, 16  ;;  %v703_v49 = vrot.slane %v701_v53, 5  ;;  %v2414_v32 = vrot.slane %v2412_v58, 7  ;;  %v2415_v25 = vshll.u32 %v2093_v41, 16  ;;  %10038 = vst [vmem:[#allocation53_spill] sm:$0xff] %v8183_v20 }
  0xd5   : > { %v4509_v51 = vmul.bf16 %v7650_v56, %v694_v62  ;;  %v707_v5 = vrot.slane %v705_v44, 4  ;;  %v4155_v55 = vor.u32 %v4153_v15, %v4151_v24  ;;  %v8190_v53 = vrot.slane %v2430_v23, 7  ;;  %v7200_v58 = vld [vmem:[%s7391_s6 + $0x18] sm:$0xf]  ;;  %v339_v15 = vpop.permute.xlu0 %338 }
  0xd6   : > { %v8186_v21 = vrot.slane %v4157_v39, 1  ;;  %v704_v2 = vsel %vm8065_vm7, %v699_v61, %v703_v49  ;;  %v2417_v31 = vor.u32 %v2415_v25, %v2414_v32  ;;  %v2421_v6 = vshrl.u32 %v2105_v10, 16 }
  0xd7   : > { %v1008_v41 = vmul.bf16 %v7200_v58, %v704_v2  ;;  %v3098_v37 = vmul.bf16 %v7201_v60, %v704_v2  ;;  %v4510_v59 = vmul.bf16 %v4477_v47, %v704_v2  ;;  %v2433_v25 = vshll.u32 %v2117_v3, 16  ;;  %v8208_v58 = vld [vmem:[%s7391_s6 + $0x54] sm:$0xf]  ;;  %v8215_v3 = vld [vmem:[%s7391_s6 + $0x5c] sm:$0xf] }
  0xd8   : > { %v4160_v24 = vsel %vm2680_vm4, %v4155_v55, %v8186_v21  ;;  %v359_v44 = vrot.slane %v351_v7, %v7621_v19  ;;  %v708_v39 = vor.u32 %v707_v5, %v703_v49  ;;  %v10039_v55 = vmul.bf16 %v8135_v28, %v8093_v30  ;;  %10040 = vst [vmem:[#allocation54_spill] sm:$0xff] %v8208_v58 }
  0xd9   : > { %6743 = vmatmul.mubr.msk.bf16.gmra.mrb[12].mxu0 %vm1127_vm0, %v4160_v24  ;;  %v6087_v60 = vcombine.low %v1007_v54, %v1008_v41  ;;  %v6191_v23 = vcombine.low %v3097_v36, %v3098_v37  ;;  %v6298_v47 = vcombine.low %v4509_v51, %v4510_v59  ;;  %v8212_v61 = vsel %vm7641_vm3, %v2410_v57, %v2417_v31  ;;  %v8218_v37 = vld [vmem:[%s7391_s6 + $0x64] sm:$0xf] }
  0xda   : > { %v8205_v2 = vcombine.low %v10039_v55, %v1006_v40  ;;  %10041 = vst [vmem:[#allocation55_spill] sm:$0xff] %v8212_v61  ;;  %v2423_v24 = vrot.slane %v2421_v6, 7  ;;  %v2424_v7 = vshll.u32 %v2105_v10, 16  ;;  %10042 = vst [vmem:[#allocation56_spill] sm:$0xff] %v8218_v37  ;;  %v2435_v59 = vor.u32 %v2433_v25, %v8190_v53  ;;  %v8244_v10 = vld [vmem:[%s7391_s6 + $0x5c] sm:$0xf] }
  0xdb   : > { %v1439_v62 = vshrl.u32 %v6087_v60, 16  ;;  %v1442_v49 = vshll.u32 %v6087_v60, 16  ;;  %v3230_v54 = vshrl.u32 %v6191_v23, 16  ;;  %v3233_v30 = vshll.u32 %v6191_v23, 16  ;;  %v2121_v60 = vpop.permute.xlu1 %2120  ;;  %v363_v23 = vpop.permute.xlu0 %362  ;;  %10047 = vst [vmem:[#allocation61_spill] sm:$0xff] %v8244_v10 }
  0xdc   : > { %v2426_v40 = vor.u32 %v2424_v7, %v2423_v24  ;;  %v2428_v28 = vrot.slane %v2423_v24, 4  ;;  %v721_v36 = vshll.u32 %v359_v44, 16  ;;  %v709_v51 = vrot.slane %v708_v39, 4 }
  0xdd   : > { %v4642_v31 = vshrl.u32 %v6298_v47, 16  ;;  %v2419_v57 = vrot.slane %v2414_v32, 4  ;;  %v4645_v6 = vshll.u32 %v6298_v47, 16  ;;  %v8228_v55 = vrot.slane %v1439_v62, 3  ;;  %v8235_v47 = vld [vmem:[%s7391_s6 + $0x58] sm:$0xf] }
  0xde   : > { %v8230_v39 = vrot.slane %v1442_v49, 4  ;;  %v8232_v32 = vrot.slane %v3230_v54, 3  ;;  %10044 = vst [vmem:[#allocation58_spill] sm:$0xff] %v8235_v47  ;;  %v8241_v7 = vrot.slane %v3233_v30, 4  ;;  %v8248_v25 = vsel %vm7641_vm3, %v2428_v28, %v2435_v59  ;;  %v8253_v54 = vld [vmem:[%s7391_s6 + $0x60] sm:$0xf] }
  0xdf   : > { %v8239_v24 = vsel %vm7641_vm3, %v2419_v57, %v2426_v40  ;;  %10048 = vst [vmem:[#allocation62_spill] sm:$0xff] %v8248_v25  ;;  %v723_v62 = vrot.slane %v721_v36, 5  ;;  %v725_v49 = vshrl.u32 %v359_v44, 16  ;;  %v8250_v41 = vrot.slane %v4642_v31, 3  ;;  %v8263_v28 = vld [vmem:[%s7391_s6 + $0x64] sm:$0xf] }
  0xe0   : > { %10043 = vst [vmem:[#allocation57_spill] sm:$0xff] %v8232_v32  ;;  %10045 = vst [vmem:[#allocation59_spill] sm:$0xff] %v8239_v24  ;;  %v347_v5 = vrot.slane %v339_v15, %v7621_v19  ;;  %v2129_v40 = vrot.slane %v2121_v60, %v7621_v19  ;;  %v371_v30 = vrot.slane %v363_v23, %v7621_v19  ;;  %v8258_v57 = vrot.slane %v4645_v6, 4  ;;  %v8276_v59 = vld [vmem:[%s7391_s6 + $0x68] sm:$0xf]  ;;  %v375_v32 = vpop.permute.xlu1 %374 }
  0xe1   : > { %10046 = vst [vmem:[#allocation60_spill] sm:$0xff] %v8241_v7  ;;  %v727_v44 = vrot.slane %v725_v49, 4  ;;  %v10049_v36 = vmul.bf16 %v8110_v1, %v8085_v43  ;;  %v10050_v31 = vmul.bf16 %v8019_v4, %v8057_v18  ;;  %10051 = vst [vmem:[#allocation63_spill] sm:$0xff] %v8276_v59  ;;  %v8281_v18 = vld [vmem:[%s7391_s6 + $0x6c] sm:$0xf] }
  0xe2   : > { %v711_v23 = vshll.u32 %v347_v5, 16  ;;  %v715_v6 = vshrl.u32 %v347_v5, 16  ;;  %v2439_v20 = vshrl.u32 %v2129_v40, 16  ;;  %v731_v49 = vshll.u32 %v371_v30, 16  ;;  %10052 = vst [vmem:[#allocation64_spill] sm:$0xff] %v8281_v18 }
  0xe3   : > { %v6085_v15 = vcombine.low %v10050_v31, %v10049_v36  ;;  %v728_v56 = vor.u32 %v727_v44, %v723_v62  ;;  %v735_v7 = vshrl.u32 %v371_v30, 16  ;;  %v2442_v5 = vshll.u32 %v2129_v40, 16  ;;  %v4478_v40 = vld [vmem:[%s7391_s6 + $0x2c] sm:$0xf] }
  0xe4   : > { %v713_v36 = vrot.slane %v711_v23, 5  ;;  %v717_v31 = vrot.slane %v715_v6, 4  ;;  %v8283_v60 = vrot.slane %v2439_v20, 7  ;;  %v733_v47 = vrot.slane %v731_v49, 5  ;;  %v7203_v20 = vld [vmem:[%s7391_s6 + $0x24] sm:$0xf]  ;;  %v2157_v18 = vpop.permute.xlu1 %2156 }
  0xe5   : > { %v737_v37 = vrot.slane %v735_v7, 4  ;;  %v1422_v10 = vshrl.u32 %v6085_v15, 16  ;;  %v729_v44 = vrot.slane %v728_v56, 4  ;;  %v1425_v58 = vshll.u32 %v6085_v15, 16  ;;  %v4479_v56 = vld [vmem:[%s7391_s6 + $0x30] sm:$0xf]  ;;  %v2133_v15 = vpop.permute.xlu0 %2132 }
  0xe6   : > { %v8287_v30 = vsel %vm8065_vm7, %v709_v51, %v713_v36  ;;  %v718_v1 = vor.u32 %v717_v31, %v713_v36  ;;  %v2444_v7 = vor.u32 %v2442_v5, %v8283_v60  ;;  %v1430_v6 = vshrl.u32 %v8205_v2, 16  ;;  %v8300_v31 = vld [vmem:[%s7391_s6 + $0x1c] sm:$0xf]  ;;  %v7204_v23 = vld [vmem:[%s7391_s6 + $0x28] sm:$0xf] }
  0xe7   : > { %v738_v50 = vor.u32 %v737_v37, %v733_v47  ;;  %v1433_v51 = vshll.u32 %v8205_v2, 16  ;;  %v383_v36 = vrot.slane %v375_v32, %v7621_v19  ;;  %v3099_v5 = vmul.bf16 %v7203_v20, %v8287_v30 }
  0xe8   : > { %v719_v49 = vrot.slane %v718_v1, 4  ;;  %v1424_v1 = vrot.slane %v1422_v10, 3  ;;  %v4511_v2 = vmul.bf16 %v4478_v40, %v8287_v30  ;;  %v8314_v32 = vsel %vm8065_vm7, %v729_v44, %v733_v47  ;;  %v7167_v44 = vld [vmem:[%s9840_s1 + $0x38] sm:$0xff]  }
  0xe9   : > { %v1427_v38 = vrot.slane %v1425_v58, 4  ;;  %v10053_v10 = vrot.slane %v8190_v53, 4  ;;  %v1432_v40 = vrot.slane %v1430_v6, 3  ;;  %v1435_v27 = vrot.slane %v1433_v51, 4  ;;  %6796 = vmatprep.subr.bf16.mxu0 %v7167_v44 }
  0xea   : > { %v8309_v37 = vsel %vm8065_vm7, %v719_v49, %v723_v62  ;;  %v4480_v62 = vld [vmem:[%s7391_s6 + $0x34] sm:$0xf]  ;;  %v739_v49 = vrot.slane %v738_v50, 4  ;;  %v741_v47 = vshll.u32 %v383_v36, 16  ;;  %v745_v58 = vshrl.u32 %v383_v36, 16 }
  0xeb   : > { %v3100_v26 = vmul.bf16 %v7204_v23, %v8309_v37  ;;  %v4512_v20 = vmul.bf16 %v4479_v56, %v8309_v37  ;;  %v8323_v59 = vsel %vm7641_vm3, %v10053_v10, %v2444_v7  ;;  %v8334_v56 = vld [vmem:[%s7391_s6 + $0x24] sm:$0xf]  ;;  %v2141_v50 = vrot.slane %v2133_v15, %v7621_v19  ;;  %v4481_v36 = vld [vmem:[%s7391_s6 + $0x38] sm:$0xf] }
  0xec   : > { %10054 = vst [vmem:[#allocation65_spill] sm:$0xff] %v8323_v59  ;;  %v1428_v6 = vor.u32 %v1427_v38, %v1424_v1  ;;  %v1436_v51 = vor.u32 %v1435_v27, %v1432_v40  ;;  %v8339_v10 = vrot.slane %v741_v47, 5  ;;  %v4513_v15 = vmul.bf16 %v4480_v62, %v8314_v32 }
  0xed   : > { %v8329_v23 = vcombine.low %v3099_v5, %v3100_v26  ;;  %v8331_v53 = vcombine.low %v4511_v2, %v4512_v20  ;;  %v8344_v26 = vor.u32 %v8230_v39, %v8228_v55  ;;  %v2145_v5 = vpop.permute.xlu0 %2144  ;;  %v8347_v2 = vld [vmem:[%s7391_s6 + $0x60] sm:$0xf]  ;;  %v7206_v20 = vld [vmem:[%s7391_s6 + $0x2c] sm:$0xf]  ;;  %v2448_v38 = vshrl.u32 %v2141_v50, 16  ;;  %v399_v55 = vpop.permute.xlu1 %398 }
  0xee   : > { %10056 = vst [vmem:[#allocation67_spill] sm:$0xff] %v8347_v2  ;;  %v3101_v7 = vmul.bf16 %v7206_v20, %v8314_v32  ;;  %v10057_v27 = vmul.bf16 %v8215_v3, %v8212_v61  ;;  %v10058_v1 = vmul.bf16 %v8180_v35, %v8151_v16  ;;  %v8359_v39 = vld [vmem:[%s7391_s6 + $0x68] sm:$0xf]  ;;  %v1437_v47 = vsel %vm1420_vm8, %v1428_v6, %v1436_v51  ;;  %v8372_v3 = vld [vmem:[%s7391_s6 + $0x70] sm:$0xf] }
  0xef   : > { %10055 = vst [vmem:[#allocation66_spill] sm:$0xff] %v8329_v23  ;;  %v8365_v44 = vsel %vm8065_vm7, %v739_v49, %v8339_v10  ;;  %v8367_v20 = vrot.slane %v745_v58, 4  ;;  %v1446_v62 = vsel %vm1420_vm8, %v1436_v51, %v8344_v26  ;;  %10059 = vst [vmem:[#allocation68_spill] sm:$0xff] %v8372_v3  ;;  %6594 = vmatprep.mubr.msk.bf16.mxu1 %vm1127_vm0, %v1437_v47  ;;  %v7207_v35 = vld [vmem:[%s7391_s6 + $0x30] sm:$0xf]  ;;  %v2450_v6 = vrot.slane %v2448_v38, 7 }
  0xf0   : > { %v6269_v40 = vcombine.low %v10058_v1, %v10057_v27  ;;  %v3102_v27 = vmul.bf16 %v7207_v35, %v8365_v44  ;;  %v4514_v1 = vmul.bf16 %v4481_v36, %v8365_v44  ;;  %v2451_v23 = vshll.u32 %v2141_v50, 16  ;;  %6595 = vmatmul.mubr.msk.bf16.vlgmr.msra.gmra.mrb[0].mxu1 %vm1127_vm0, %v1446_v62  ;;  %v8426_v38 = vld [vmem:[%s7391_s6 + $0x64] sm:$0xf] }
  0xf1   : > { %v4161_v58 = vshrl.u32 %v8166_v22, 16  ;;  %v2165_v16 = vrot.slane %v2157_v18, %v7621_v19  ;;  %6627 = vmatpush3.bf16.msra.mxu1 %v7840_v17  ;;  %v387_v2 = vpop.permute.xlu0 %386  ;;  %v7208_v18 = vld [vmem:[%s7391_s6 + $0x20] sm:$0xf]  ;;  %v10062_v17 = vmul.bf16 %v8253_v54, %v8239_v24  ;;  %10065 = vst [vmem:[#allocation71_spill] sm:$0xff] %v8426_v38  ;;  %v7211_v38 = vld [vmem:[%s7391_s6 + $0x38] sm:$0xf] }
  0xf2   : > { %v4165_v51 = vshll.u32 %v6269_v40, 16  ;;  %v8385_v35 = vcombine.low %v3101_v7, %v3102_v27  ;;  %v8387_v36 = vcombine.low %v4513_v15, %v4514_v1  ;;  %v2453_v50 = vor.u32 %v2451_v23, %v2450_v6  ;;  %v7209_v1 = vld [vmem:[%s7391_s6 + $0x28] sm:$0xf] }
  0xf3   : > { %v4163_v62 = vor.u32 %v4161_v58, %v8186_v21  ;;  %v2466_v49 = vshrl.u32 %v2165_v16, 16  ;;  %v1010_v61 = vmul.bf16 %v7208_v18, %v8309_v37  ;;  %v748_v7 = vor.u32 %v8367_v20, %v8339_v10  ;;  %v2169_v21 = vpop.permute.xlu1 %2168 }
  0xf4   : > { %10060 = vst [vmem:[#allocation69_spill] sm:$0xff] %v8385_v35  ;;  %v4167_v22 = vrot.slane %v4165_v51, 1  ;;  %v2153_v15 = vrot.slane %v2145_v5, %v7621_v19  ;;  %v10061_v23 = vmul.bf16 %v8263_v28, %v8248_v25  ;;  %v1012_v58 = vmul.bf16 %v7209_v1, %v8365_v44 }
  0xf5   : > { %v2455_v51 = vrot.slane %v2450_v6, 4  ;;  %v2469_v18 = vshll.u32 %v2165_v16, 16  ;;  %v10063_v10 = vrot.slane %v8283_v60, 4  ;;  %v8416_v28 = vrot.slane %v2466_v49, 7 }
  0xf6   : > { %v8404_v27 = vcombine.low %v10062_v17, %v10061_v23  ;;  %v4168_v37 = vsel %vm2680_vm4, %v4163_v62, %v4167_v22  ;;  %v2457_v54 = vshrl.u32 %v2153_v15, 16  ;;  %v4169_v20 = vshrl.u32 %v6269_v40, 16 }
  0xf7   : > { %v8413_v5 = vsel %vm7641_vm3, %v10063_v10, %v2453_v50  ;;  %6746 = vmatprep.mubr.msk.bf16.mxu0 %vm1127_vm0, %v4168_v37  ;;  %v407_v44 = vrot.slane %v399_v55, %v7621_v19  ;;  %v395_v6 = vrot.slane %v387_v2, %v7621_v19  ;;  %v2177_v16 = vrot.slane %v2169_v21, %v7621_v19  ;;  %v411_v10 = vpop.permute.xlu0 %410  ;;  %v8429_v21 = vld [vmem:[%s7391_s6 + $0x6c] sm:$0xf] }
  0xf8   : > { %10064 = vst [vmem:[#allocation70_spill] sm:$0xff] %v8413_v5  ;;  %v4173_v23 = vshll.u32 %v8404_v27, 16  ;;  %v2471_v60 = vor.u32 %v2469_v18, %v8416_v28  ;;  %v2459_v50 = vrot.slane %v2457_v54, 7  ;;  %v2460_v62 = vshll.u32 %v2153_v15, 16 }
  0xf9   : > { %v4171_v17 = vor.u32 %v4169_v20, %v4167_v22  ;;  %v761_v49 = vshll.u32 %v407_v44, 16  ;;  %v765_v40 = vshrl.u32 %v407_v44, 16  ;;  %v751_v37 = vshll.u32 %v395_v6, 16  ;;  %v8437_v44 = vld [vmem:[%s7391_s6 + $0x68] sm:$0xf] }
  0xfa   : > { %v8423_v1 = vrot.slane %v4173_v23, 1  ;;  %v2462_v55 = vor.u32 %v2460_v62, %v2459_v50  ;;  %v2464_v2 = vrot.slane %v2459_v50, 4  ;;  %v755_v47 = vshrl.u32 %v395_v6, 16  ;;  %v8434_v23 = vld [vmem:[%s7391_s6 + $0x74] sm:$0xf]  ;;  %10067 = vst [vmem:[#allocation73_spill] sm:$0xff] %v8437_v44 }
  0xfb   : > { %v2475_v3 = vshrl.u32 %v2177_v16, 16  ;;  %v763_v15 = vrot.slane %v761_v49, 5  ;;  %v767_v18 = vrot.slane %v765_v40, 4  ;;  %v753_v54 = vrot.slane %v751_v37, 5  ;;  %10066 = vst [vmem:[#allocation72_spill] sm:$0xff] %v8434_v23 }
  0xfc   : > { %v4176_v22 = vsel %vm2680_vm4, %v4171_v17, %v8423_v1  ;;  %v749_v20 = vrot.slane %v748_v7, 4  ;;  %v8441_v62 = vsel %vm7641_vm3, %v2455_v51, %v2462_v55  ;;  %v757_v6 = vrot.slane %v755_v47, 4  ;;  %v8456_v37 = vld [vmem:[%s7391_s6 + $0x6c] sm:$0xf]  ;;  %v4482_v55 = vld [vmem:[%s7391_s6 + $0x3c] sm:$0xf]  ;;  %v423_v51 = vpop.permute.xlu1 %422 }
  0xfd   : > { %10068 = vst [vmem:[#allocation74_spill] sm:$0xff] %v8441_v62  ;;  %6747 = vmatmul.mubr.msk.bf16.gmra.mrb[16].mxu0 %vm1127_vm0, %v4176_v22  ;;  %v419_v50 = vrot.slane %v411_v10, %v7621_v19  ;;  %v10069_v17 = vmul.bf16 %v8300_v31, %v8287_v30  ;;  %v10070_v7 = vmul.bf16 %v8334_v56, %v8314_v32  ;;  %10071 = vst [vmem:[#allocation75_spill] sm:$0xff] %v8456_v37  ;;  %v8479_v22 = vld [vmem:[%s7391_s6 + $0x70] sm:$0xf]  ;;  %v4483_v56 = vld [vmem:[%s7391_s6 + $0x40] sm:$0xf]  ;;  %v2181_v30 = vpop.permute.xlu0 %2180 }
  0xfe   : > { %v8460_v47 = vsel %vm7641_vm3, %v2464_v2, %v2471_v60  ;;  %v8466_v31 = vsel %vm8065_vm7, %v749_v20, %v753_v54  ;;  %v8468_v32 = vrot.slane %v2475_v3, 7  ;;  %v758_v10 = vor.u32 %v757_v6, %v753_v54  ;;  %v7210_v3 = vld [vmem:[%s7391_s6 + $0x34] sm:$0xf]  ;;  %v8488_v23 = vld [vmem:[%s7391_s6 + $0x78] sm:$0xf] }
  0xff   : > { %v6088_v49 = vcombine.low %v10069_v17, %v1010_v61  ;;  %v8451_v40 = vcombine.low %v10070_v7, %v1012_v58  ;;  %10072 = vst [vmem:[#allocation76_spill] sm:$0xff] %v8460_v47  ;;  %v768_v61 = vor.u32 %v767_v18, %v763_v15  ;;  %v2473_v58 = vrot.slane %v8416_v28, 4  ;;  %v8482_v18 = vld [vmem:[%s7391_s6 + $0x74] sm:$0xf]  ;;  %10073 = vst [vmem:[#allocation77_spill] sm:$0xff] %v8488_v23 }
 0x100   : > { %v3103_v20 = vmul.bf16 %v7210_v3, %v8466_v31  ;;  %v2478_v17 = vshll.u32 %v2177_v16, 16  ;;  %v771_v7 = vshll.u32 %v419_v50, 16  ;;  %v759_v28 = vrot.slane %v758_v10, 4  ;;  %v8491_v2 = vld [vmem:[%s7391_s6 + $0x7c] sm:$0xf] }
 0x101   : > { %v775_v60 = vshrl.u32 %v419_v50, 16  ;;  %v1448_v54 = vshrl.u32 %v6088_v49, 16  ;;  %v1451_v6 = vshll.u32 %v6088_v49, 16  ;;  %10074 = vst [vmem:[#allocation78_spill] sm:$0xff] %v8491_v2  ;;  %v769_v35 = vrot.slane %v768_v61, 4 }
 0x102   : > { %v4515_v44 = vmul.bf16 %v4482_v55, %v8466_v31  ;;  %v2480_v3 = vor.u32 %v2478_v17, %v8468_v32  ;;  %v773_v16 = vrot.slane %v771_v7, 5  ;;  %v8497_v10 = vsel %vm8065_vm7, %v759_v28, %v763_v15  ;;  %v8513_v7 = vld [vmem:[%s7391_s6 + $0x2c] sm:$0xf]  ;;  %v8531_v17 = vld [vmem:[%s7391_s6 + $0x70] sm:$0xf] }
 0x103   : > { %v777_v50 = vrot.slane %v775_v60, 4  ;;  %v1450_v37 = vrot.slane %v1448_v54, 3  ;;  %v1453_v49 = vrot.slane %v1451_v6, 4  ;;  %v3104_v24 = vmul.bf16 %v7211_v38, %v8497_v10  ;;  %10077 = vst [vmem:[#allocation81_spill] sm:$0xff] %v8531_v17 }
 0x104   : > { %v4516_v25 = vmul.bf16 %v4483_v56, %v8497_v10  ;;  %v431_v61 = vrot.slane %v423_v51, %v7621_v19  ;;  %v2189_v55 = vrot.slane %v2181_v30, %v7621_v19  ;;  %v8523_v54 = vsel %vm7641_vm3, %v2473_v58, %v2480_v3 }
 0x105   : > { %v8517_v30 = vcombine.low %v3103_v20, %v3104_v24  ;;  %v778_v28 = vor.u32 %v777_v50, %v773_v16  ;;  %10076 = vst [vmem:[#allocation80_spill] sm:$0xff] %v8523_v54  ;;  %v2482_v6 = vrot.slane %v8468_v32, 4  ;;  %v8528_v60 = vsel %vm8065_vm7, %v769_v35, %v773_v16  ;;  %v4484_v32 = vld [vmem:[%s7391_s6 + $0x44] sm:$0xf]  ;;  %v2205_v16 = vpop.permute.xlu1 %2204  ;;  %v2193_v50 = vpop.permute.xlu0 %2192 }
 0x106   : > { %v8519_v56 = vcombine.low %v4515_v44, %v4516_v25  ;;  %v1454_v38 = vor.u32 %v1453_v49, %v1450_v37  ;;  %v781_v24 = vshll.u32 %v431_v61, 16  ;;  %v785_v20 = vshrl.u32 %v431_v61, 16  ;;  %v8534_v44 = vld [vmem:[%s7391_s6 + $0x30] sm:$0xf] }
 0x107   : > { %10075 = vst [vmem:[#allocation79_spill] sm:$0xff] %v8517_v30  ;;  %v779_v51 = vrot.slane %v778_v28, 4  ;;  %v2484_v25 = vshrl.u32 %v2189_v55, 16  ;;  %v1457_v37 = vshrl.u32 %v8451_v40, 16  ;;  %v1460_v3 = vshll.u32 %v8451_v40, 16  ;;  %v7168_v40 = vld [vmem:[%s9840_s1 + $0x18] sm:$0xff]  }
 0x108   : > { %v1455_v35 = vsel %vm1420_vm8, %v8344_v26, %v1454_v38  ;;  %v783_v49 = vrot.slane %v781_v24, 5  ;;  %v787_v61 = vrot.slane %v785_v20, 4  ;;  %v4485_v28 = vld [vmem:[%s7391_s6 + $0x48] sm:$0xf]  ;;  %v10078_v58 = vmul.bf16 %v8429_v21, %v8413_v5  ;;  %v8559_v24 = vld [vmem:[%s7391_s6 + $0x78] sm:$0xf]  ;;  %6660 = vmatprep.subr.bf16.mxu1 %v7168_v40 }
 0x109   : > { %6598 = vmatprep.mubr.msk.bf16.mxu1 %vm1127_vm0, %v1455_v35  ;;  %v8545_v15 = vrot.slane %v2484_v25, 7  ;;  %v10079_v26 = vmul.bf16 %v8359_v39, %v8323_v59  ;;  %v7214_v20 = vld [vmem:[%s7391_s6 + $0x3c] sm:$0xf]  ;;  %v1459_v2 = vrot.slane %v1457_v37, 3  ;;  %v1462_v30 = vrot.slane %v1460_v3, 4 }
 0x10a   : > { %v3105_v25 = vmul.bf16 %v7214_v20, %v8528_v60  ;;  %v4517_v21 = vmul.bf16 %v4484_v32, %v8528_v60  ;;  %v8566_v39 = vsel %vm8065_vm7, %v779_v51, %v783_v49  ;;  %v788_v59 = vor.u32 %v787_v61, %v783_v49  ;;  %v7215_v35 = vld [vmem:[%s7391_s6 + $0x40] sm:$0xf]  ;;  %v7216_v5 = vld [vmem:[%s7391_s6 + $0x34] sm:$0xf] }
 0x10b   : > { %v6271_v23 = vcombine.low %v10079_v26, %v10078_v58  ;;  %v2487_v58 = vshll.u32 %v2189_v55, 16  ;;  %v2213_v26 = vrot.slane %v2205_v16, %v7621_v19  ;;  %v3106_v17 = vmul.bf16 %v7215_v35, %v8566_v39 }
 0x10c   : > { %v4518_v20 = vmul.bf16 %v4485_v28, %v8566_v39  ;;  %v8572_v37 = vor.u32 %v1462_v30, %v1459_v2  ;;  %v4177_v51 = vshrl.u32 %v8404_v27, 16  ;;  %v1015_v16 = vmul.bf16 %v7216_v5, %v8528_v60  ;;  %v447_v28 = vpop.permute.xlu1 %446  ;;  %v435_v2 = vpop.permute.xlu0 %434  ;;  %v7217_v30 = vld [vmem:[%s7391_s6 + $0x38] sm:$0xf] }
 0x10d   : > { %v2489_v3 = vor.u32 %v2487_v58, %v8545_v15  ;;  %v4181_v55 = vshll.u32 %v6271_v23, 16  ;;  %v8580_v49 = vcombine.low %v3105_v25, %v3106_v17  ;;  %v2491_v40 = vrot.slane %v8545_v15, 4 }
 0x10e   : > { %v8582_v61 = vcombine.low %v4517_v21, %v4518_v20  ;;  %v1016_v35 = vmul.bf16 %v7217_v30, %v8566_v39  ;;  %v1464_v58 = vsel %vm1420_vm8, %v1454_v38, %v8572_v37  ;;  %v4179_v27 = vor.u32 %v4177_v51, %v8423_v1 }
 0x10f   : > { %10080 = vst [vmem:[#allocation82_spill] sm:$0xff] %v8580_v49  ;;  %v4183_v32 = vrot.slane %v4181_v55, 1  ;;  %v789_v33 = vrot.slane %v788_v59, 4  ;;  %6599 = vmatmul.mubr.msk.bf16.gmra.mrb[4].mxu1 %vm1127_vm0, %v1464_v58  ;;  %v2502_v5 = vshrl.u32 %v2213_v26, 16  ;;  %v2201_v17 = vrot.slane %v2193_v50, %v7621_v19  ;;  %v8612_v55 = vld [vmem:[%s7391_s6 + $0x80] sm:$0xf] }
 0x110   : > { %v10081_v15 = vmul.bf16 %v8482_v18, %v8460_v47  ;;  %v10082_v60 = vmul.bf16 %v8479_v22, %v8441_v62  ;;  %v8602_v38 = vsel %vm7641_vm3, %v2482_v6, %v2489_v3  ;;  %v455_v1 = vrot.slane %v447_v28, %v7621_v19  ;;  %10084 = vst [vmem:[#allocation84_spill] sm:$0xff] %v8612_v55  ;;  %v8621_v49 = vld [vmem:[%s7391_s6 + $0x7c] sm:$0xf] }
 0x111   : > { %10083 = vst [vmem:[#allocation83_spill] sm:$0xff] %v8602_v38  ;;  %v4184_v59 = vsel %vm2680_vm4, %v4179_v27, %v4183_v32  ;;  %v443_v21 = vrot.slane %v435_v2, %v7621_v19  ;;  %v8608_v50 = vrot.slane %v2502_v5, 7  ;;  %v2493_v18 = vshrl.u32 %v2201_v17, 16  ;;  %v2217_v27 = vpop.permute.xlu1 %2216  ;;  %v459_v5 = vpop.permute.xlu0 %458 }
 0x112   : > { %v8598_v25 = vcombine.low %v10082_v60, %v10081_v15  ;;  %6750 = vmatprep.mubr.msk.bf16.mxu0 %vm1127_vm0, %v4184_v59  ;;  %v4185_v39 = vshrl.u32 %v6271_v23, 16  ;;  %v2505_v20 = vshll.u32 %v2213_v26, 16  ;;  %v801_v51 = vshll.u32 %v455_v1, 16  ;;  %v8617_v15 = vld [vmem:[%s7391_s6 + $0x74] sm:$0xf] }
 0x113   : > { %v805_v6 = vshrl.u32 %v455_v1, 16  ;;  %v791_v3 = vshll.u32 %v443_v21, 16  ;;  %v2495_v28 = vrot.slane %v2493_v18, 7  ;;  %v2496_v30 = vshll.u32 %v2201_v17, 16  ;;  %10085 = vst [vmem:[#allocation85_spill] sm:$0xff] %v8617_v15 }
 0x114   : > { %v4189_v22 = vshll.u32 %v8598_v25, 16  ;;  %v4187_v2 = vor.u32 %v4185_v39, %v4183_v32  ;;  %v2507_v23 = vor.u32 %v2505_v20, %v8608_v50  ;;  %v803_v60 = vrot.slane %v801_v51, 5  ;;  %v8624_v1 = vld [vmem:[%s7391_s6 + $0x84] sm:$0xf]  ;;  %v8689_v15 = vld [vmem:[%s7391_s6 + $0x8c] sm:$0xf] }
 0x115   : > { %v793_v26 = vrot.slane %v791_v3, 5  ;;  %v795_v59 = vshrl.u32 %v443_v21, 16  ;;  %10086 = vst [vmem:[#allocation86_spill] sm:$0xff] %v8624_v1  ;;  %v2498_v62 = vor.u32 %v2496_v30, %v2495_v28  ;;  %v2500_v18 = vrot.slane %v2495_v28, 4  ;;  %v2229_v55 = vpop.permute.xlu0 %2228  ;;  %10094 = vst [vmem:[#allocation92_spill] sm:$0xff] %v8689_v15 }
 0x116   : > { %v8614_v58 = vrot.slane %v4189_v22, 1  ;;  %v807_v17 = vrot.slane %v805_v6, 4  ;;  %v2225_v21 = vrot.slane %v2217_v27, %v7621_v19  ;;  %v467_v20 = vrot.slane %v459_v5, %v7621_v19  ;;  %v7218_v27 = vld [vmem:[%s7391_s6 + $0x3c] sm:$0xf]  ;;  %v8673_v6 = vld [vmem:[%s7391_s6 + $0x80] sm:$0xf] }
 0x117   : > { %v8631_v39 = vsel %vm8065_vm7, %v789_v33, %v793_v26  ;;  %v797_v22 = vrot.slane %v795_v59, 4  ;;  %v10087_v51 = vmul.bf16 %v8534_v44, %v8497_v10  ;;  %v10088_v3 = vmul.bf16 %v8513_v7, %v8466_v31  ;;  %v8646_v33 = vld [vmem:[%s7391_s6 + $0x78] sm:$0xf]  ;;  %v8676_v7 = vld [vmem:[%s7391_s6 + $0x84] sm:$0xf]  ;;  %v471_v31 = vpop.permute.xlu1 %470 }
 0x118   : > { %v4192_v32 = vsel %vm2680_vm4, %v4187_v2, %v8614_v58  ;;  %v8643_v30 = vcombine.low %v1015_v16, %v1016_v35  ;;  %10089 = vst [vmem:[#allocation87_spill] sm:$0xff] %v8646_v33  ;;  %v8650_v2 = vsel %vm7641_vm3, %v2491_v40, %v2498_v62  ;;  %v2509_v44 = vrot.slane %v8608_v50, 4  ;;  %v8660_v16 = vld [vmem:[%s7391_s6 + $0x7c] sm:$0xf] }
 0x119   : > { %6751 = vmatmul.mubr.msk.bf16.gmra.mrb[20].mxu0 %vm1127_vm0, %v4192_v32  ;;  %v6090_v28 = vcombine.low %v10088_v3, %v10087_v51  ;;  %10090 = vst [vmem:[#allocation88_spill] sm:$0xff] %v8650_v2  ;;  %10091 = vst [vmem:[#allocation89_spill] sm:$0xff] %v8660_v16  ;;  %v8664_v35 = vsel %vm7641_vm3, %v2500_v18, %v2507_v23  ;;  %v808_v62 = vor.u32 %v807_v17, %v803_v60  ;;  %v7219_v32 = vld [vmem:[%s7391_s6 + $0x44] sm:$0xf]  ;;  %v7220_v16 = vld [vmem:[%s7391_s6 + $0x40] sm:$0xf] }
 0x11a   : > { %10092 = vst [vmem:[#allocation90_spill] sm:$0xff] %v8664_v35  ;;  %v798_v40 = vor.u32 %v797_v22, %v793_v26  ;;  %v1017_v5 = vmul.bf16 %v7218_v27, %v8631_v39  ;;  %v3107_v51 = vmul.bf16 %v7219_v32, %v8631_v39  ;;  %v2511_v3 = vshrl.u32 %v2225_v21, 16  ;;  %v8681_v27 = vld [vmem:[%s7391_s6 + $0x88] sm:$0xf] }
 0x11b   : > { %v811_v50 = vshll.u32 %v467_v20, 16  ;;  %v815_v18 = vshrl.u32 %v467_v20, 16  ;;  %v1466_v26 = vshrl.u32 %v6090_v28, 16  ;;  %v1469_v17 = vshll.u32 %v6090_v28, 16  ;;  %10093 = vst [vmem:[#allocation91_spill] sm:$0xff] %v8681_v27 }
 0x11c   : > { %v799_v23 = vrot.slane %v798_v40, 4  ;;  %v8683_v32 = vrot.slane %v2511_v3, 7  ;;  %v2514_v59 = vshll.u32 %v2225_v21, 16  ;;  %v4487_v20 = vld [vmem:[%s7391_s6 + $0x50] sm:$0xf]  ;;  %v809_v22 = vrot.slane %v808_v62, 4 }
 0x11d   : > { %v813_v10 = vrot.slane %v811_v50, 5  ;;  %v817_v1 = vrot.slane %v815_v18, 4  ;;  %v1468_v33 = vrot.slane %v1466_v26, 3  ;;  %v1471_v28 = vrot.slane %v1469_v17, 4 }
 0x11e   : > { %v804_v40 = vsel %vm8065_vm7, %v799_v23, %v803_v60  ;;  %v2516_v21 = vor.u32 %v2514_v59, %v8683_v32  ;;  %v479_v60 = vrot.slane %v471_v31, %v7621_v19  ;;  %v2237_v23 = vrot.slane %v2229_v55, %v7621_v19  ;;  %v8714_v59 = vld [vmem:[%s7391_s6 + $0x80] sm:$0xf] }
 0x11f   : > { %v1018_v47 = vmul.bf16 %v7220_v16, %v804_v40  ;;  %v3108_v3 = vmul.bf16 %v7221_v34, %v804_v40  ;;  %v818_v50 = vor.u32 %v817_v1, %v813_v10  ;;  %v8695_v52 = vor.u32 %v1471_v28, %v1468_v33  ;;  %10096 = vst [vmem:[#allocation94_spill] sm:$0xff] %v8714_v59 }
 0x120   : > { %v4520_v34 = vmul.bf16 %v4487_v20, %v804_v40  ;;  %v4519_v33 = vmul.bf16 %v4486_v14, %v8631_v39  ;;  %v8722_v17 = vsel %vm8065_vm7, %v809_v22, %v813_v10  ;;  %v495_v14 = vpop.permute.xlu1 %494  ;;  %v2520_v20 = vshrl.u32 %v2237_v23, 16 }
 0x121   : > { %v8703_v16 = vcombine.low %v3107_v51, %v3108_v3  ;;  %v8711_v31 = vcombine.low %v1017_v5, %v1018_v47  ;;  %v8718_v51 = vsel %vm7641_vm3, %v2509_v44, %v2516_v21  ;;  %v1473_v40 = vsel %vm1420_vm8, %v8572_v37, %v8695_v52  ;;  %v8731_v44 = vld [vmem:[%s7391_s6 + $0x88] sm:$0xf] }
 0x122   : > { %10097 = vst [vmem:[#allocation95_spill] sm:$0xff] %v8718_v51  ;;  %v819_v39 = vrot.slane %v818_v50, 4  ;;  %6602 = vmatprep.mubr.msk.bf16.mxu1 %vm1127_vm0, %v1473_v40  ;;  %v821_v47 = vshll.u32 %v479_v60, 16  ;;  %v825_v5 = vshrl.u32 %v479_v60, 16  ;;  %v8728_v28 = vcombine.low %v4519_v33, %v4520_v34  ;;  %v483_v50 = vpop.permute.xlu0 %482  ;;  %v3077_v40 = vld [vmem:[%s7391_s6 + $0x50] sm:$0xf] }
 0x123   : > { %10095 = vst [vmem:[#allocation93_spill] sm:$0xff] %v8703_v16  ;;  %v1475_v10 = vshrl.u32 %v8643_v30, 16  ;;  %v1478_v22 = vshll.u32 %v8643_v30, 16  ;;  %v10098_v37 = vmul.bf16 %v8621_v49, %v8602_v38  ;;  %v10099_v3 = vmul.bf16 %v8559_v24, %v8523_v54  ;;  %v7222_v24 = vld [vmem:[%s7391_s6 + $0x44] sm:$0xf] }
 0x124   : > { %v823_v34 = vrot.slane %v821_v47, 5  ;;  %v827_v33 = vrot.slane %v825_v5, 4  ;;  %v503_v26 = vrot.slane %v495_v14, %v7621_v19  ;;  %v2522_v1 = vrot.slane %v2520_v20, 7  ;;  %v7223_v5 = vld [vmem:[%s7391_s6 + $0x4c] sm:$0xf]  ;;  %v519_v54 = vpop.permute.xlu1 %518 }
 0x125   : > { %v6273_v21 = vcombine.low %v10099_v3, %v10098_v37  ;;  %v1477_v30 = vrot.slane %v1475_v10, 3  ;;  %v1480_v55 = vrot.slane %v1478_v22, 4  ;;  %v1019_v37 = vmul.bf16 %v7222_v24, %v8722_v17  ;;  %v4488_v3 = vld [vmem:[%s7391_s6 + $0x54] sm:$0xf]  ;;  %v4489_v10 = vld [vmem:[%s7391_s6 + $0x58] sm:$0xf] }
 0x126   : > { %v824_v60 = vsel %vm8065_vm7, %v819_v39, %v823_v34  ;;  %v4193_v47 = vshrl.u32 %v8598_v25, 16  ;;  %v3109_v14 = vmul.bf16 %v7223_v5, %v8722_v17  ;;  %v2523_v22 = vshll.u32 %v2237_v23, 16  ;;  %v507_v38 = vpop.permute.xlu0 %506  ;;  %v7224_v5 = vld [vmem:[%s7391_s6 + $0x48] sm:$0xf] }
 0x127   : > { %v4197_v18 = vshll.u32 %v6273_v21, 16  ;;  %v3110_v20 = vmul.bf16 %v3077_v40, %v824_v60  ;;  %v8756_v62 = vor.u32 %v1480_v55, %v1477_v30  ;;  %v828_v27 = vor.u32 %v827_v33, %v823_v34 }
 0x128   : > { %v4195_v49 = vor.u32 %v4193_v47, %v8614_v58  ;;  %v841_v24 = vshll.u32 %v503_v26, 16  ;;  %v4521_v16 = vmul.bf16 %v4488_v3, %v8722_v17  ;;  %v2525_v39 = vor.u32 %v2523_v22, %v2522_v1 }
 0x129   : > { %v4199_v15 = vrot.slane %v4197_v18, 1  ;;  %v8760_v59 = vcombine.low %v3109_v14, %v3110_v20  ;;  %v8762_v25 = vrot.slane %v2522_v1, 4  ;;  %v1020_v40 = vmul.bf16 %v7224_v5, %v824_v60  ;;  %v8795_v5 = vld [vmem:[%s7391_s6 + $0x8c] sm:$0xf] }
 0x12a   : > { %v4522_v13 = vmul.bf16 %v4489_v10, %v824_v60  ;;  %v1482_v23 = vsel %vm1420_vm8, %v8695_v52, %v8756_v62  ;;  %v843_v18 = vrot.slane %v841_v24, 5  ;;  %v845_v55 = vshrl.u32 %v503_v26, 16  ;;  %v8784_v10 = vld [vmem:[%s7391_s6 + $0x84] sm:$0xf] }
 0x12b   : > { %10100 = vst [vmem:[#allocation96_spill] sm:$0xff] %v8760_v59  ;;  %10101 = vst [vmem:[#allocation97_spill] sm:$0xff] %v8762_v25  ;;  %v4200_v58 = vsel %vm2680_vm4, %v4195_v49, %v4199_v15  ;;  %6603 = vmatmul.mubr.msk.bf16.gmra.mrb[8].mxu1 %vm1127_vm0, %v1482_v23  ;;  %v491_v1 = vrot.slane %v483_v50, %v7621_v19  ;;  %v10102_v17 = vmul.bf16 %v8676_v7, %v8664_v35 }
 0x12c   : > { %6754 = vmatprep.mubr.msk.bf16.mxu0 %vm1127_vm0, %v4200_v58  ;;  %v10103_v60 = vmul.bf16 %v8673_v6, %v8650_v2  ;;  %v829_v52 = vrot.slane %v828_v27, 4  ;;  %v4201_v33 = vshrl.u32 %v6273_v21, 16  ;;  %v527_v30 = vrot.slane %v519_v54, %v7621_v19  ;;  %10104 = vst [vmem:[#allocation98_spill] sm:$0xff] %v8784_v10 }
 0x12d   : > { %v515_v49 = vrot.slane %v507_v38, %v7621_v19  ;;  %v847_v3 = vrot.slane %v845_v55, 4  ;;  %v831_v47 = vshll.u32 %v491_v1, 16  ;;  %v835_v26 = vshrl.u32 %v491_v1, 16  ;;  %v543_v55 = vpop.permute.xlu1 %542 }
 0x12e   : > { %v8778_v34 = vcombine.low %v10103_v60, %v10102_v17  ;;  %v4203_v14 = vor.u32 %v4201_v33, %v4199_v15  ;;  %v861_v20 = vshll.u32 %v527_v30, 16  ;;  %v865_v7 = vshrl.u32 %v527_v30, 16  ;;  %v3078_v60 = vld [vmem:[%s7391_s6 + $0x54] sm:$0xf]  ;;  %v4490_v33 = vld [vmem:[%s7391_s6 + $0x5c] sm:$0xf] }
 0x12f   : > { %v851_v6 = vshll.u32 %v515_v49, 16  ;;  %v848_v27 = vor.u32 %v847_v3, %v843_v18  ;;  %v833_v21 = vrot.slane %v831_v47, 5  ;;  %v837_v22 = vrot.slane %v835_v26, 4  ;;  %v3079_v26 = vld [vmem:[%s7391_s6 + $0x58] sm:$0xf] }
 0x130   : > { %v4205_v50 = vshll.u32 %v8778_v34, 16  ;;  %v10105_v38 = vrot.slane %v8683_v32, 4  ;;  %v863_v15 = vrot.slane %v861_v20, 5  ;;  %v867_v23 = vrot.slane %v865_v7, 4 }
 0x131   : > { %v855_v58 = vshrl.u32 %v515_v49, 16  ;;  %v834_v1 = vsel %vm8065_vm7, %v829_v52, %v833_v21  ;;  %v838_v17 = vor.u32 %v837_v22, %v833_v21  ;;  %v853_v48 = vrot.slane %v851_v6, 5 }
 0x132   : > { %v8786_v54 = vrot.slane %v4205_v50, 1  ;;  %v8792_v24 = vsel %vm7641_vm3, %v10105_v38, %v2525_v39  ;;  %v8803_v39 = vcombine.low %v1019_v37, %v1020_v40  ;;  %v8805_v30 = vcombine.low %v4521_v16, %v4522_v13  ;;  %v7225_v16 = vld [vmem:[%s7391_s6 + $0x4c] sm:$0xf] }
 0x133   : > { %10106 = vst [vmem:[#allocation99_spill] sm:$0xff] %v8792_v24  ;;  %v849_v3 = vrot.slane %v848_v27, 4  ;;  %v868_v49 = vor.u32 %v867_v23, %v863_v15  ;;  %v839_v47 = vrot.slane %v838_v17, 4  ;;  %v857_v50 = vrot.slane %v855_v58, 4  ;;  %v4491_v27 = vld [vmem:[%s7391_s6 + $0x60] sm:$0xf] }
 0x134   : > { %v4208_v32 = vsel %vm2680_vm4, %v4203_v14, %v8786_v54  ;;  %v551_v20 = vrot.slane %v543_v55, %v7621_v19  ;;  %v531_v14 = vpop.permute.xlu0 %530  ;;  %v1021_v37 = vmul.bf16 %v7225_v16, %v834_v1  ;;  %v3111_v40 = vmul.bf16 %v3078_v60, %v834_v1  ;;  %v3080_v17 = vld [vmem:[%s7391_s6 + $0x5c] sm:$0xf]  ;;  %v7226_v16 = vld [vmem:[%s7391_s6 + $0x50] sm:$0xf] }
 0x135   : > { %6755 = vmatmul.mubr.msk.bf16.gmra.mrb[24].mxu0 %vm1127_vm0, %v4208_v32  ;;  %v4523_v7 = vmul.bf16 %v4490_v33, %v834_v1  ;;  %v844_v6 = vsel %vm8065_vm7, %v839_v47, %v843_v18  ;;  %v858_v21 = vor.u32 %v857_v50, %v853_v48  ;;  %v869_v58 = vrot.slane %v868_v49, 4  ;;  %v3081_v32 = vld [vmem:[%s7391_s6 + $0x60] sm:$0xf]  ;;  %v8827_v18 = vld [vmem:[%s7391_s6 + $0x64] sm:$0xf] }
 0x136   : > { %v881_v22 = vshll.u32 %v551_v20, 16  ;;  %v885_v38 = vshrl.u32 %v551_v20, 16  ;;  %v3112_v23 = vmul.bf16 %v3079_v26, %v844_v6  ;;  %v8820_v55 = vsel %vm8065_vm7, %v849_v3, %v853_v48  ;;  %v567_v3 = vpop.permute.xlu1 %566 }
 0x137   : > { %v539_v60 = vrot.slane %v531_v14, %v7621_v19  ;;  %v1022_v1 = vmul.bf16 %v7226_v16, %v844_v6  ;;  %v859_v33 = vrot.slane %v858_v21, 4  ;;  %v4524_v49 = vmul.bf16 %v4491_v27, %v844_v6  ;;  %v7227_v14 = vld [vmem:[%s7391_s6 + $0x54] sm:$0xf]  ;;  %v4493_v6 = vld [vmem:[%s7391_s6 + $0x68] sm:$0xf] }
 0x138   : > { %v883_v47 = vrot.slane %v881_v22, 5  ;;  %v887_v50 = vrot.slane %v885_v38, 4  ;;  %v8829_v20 = vcombine.low %v3111_v40, %v3112_v23  ;;  %v1484_v48 = vshrl.u32 %v8711_v31, 16 }
 0x139   : > { %v871_v26 = vshll.u32 %v539_v60, 16  ;;  %v8834_v52 = vsel %vm8065_vm7, %v859_v33, %v863_v15  ;;  %v1023_v16 = vmul.bf16 %v7227_v14, %v8820_v55  ;;  %v875_v13 = vshrl.u32 %v539_v60, 16 }
 0x13a   : > { %10107 = vst [vmem:[#allocation100_spill] sm:$0xff] %v8829_v20  ;;  %v888_v21 = vor.u32 %v887_v50, %v883_v47  ;;  %v3113_v22 = vmul.bf16 %v3080_v17, %v8820_v55  ;;  %v3114_v40 = vmul.bf16 %v3081_v32, %v8834_v52  ;;  %v4525_v27 = vmul.bf16 %v8827_v18, %v8820_v55  ;;  %v555_v50 = vpop.permute.xlu0 %554  ;;  %v3082_v32 = vld [vmem:[%s7391_s6 + $0x64] sm:$0xf]  ;;  %v7228_v18 = vld [vmem:[%s7391_s6 + $0x58] sm:$0xf] }
 0x13b   : > { %v873_v38 = vrot.slane %v871_v26, 5  ;;  %v8843_v23 = vcombine.low %v1021_v37, %v1022_v1  ;;  %v877_v15 = vrot.slane %v875_v13, 4  ;;  %v1487_v33 = vshll.u32 %v8711_v31, 16  ;;  %v3083_v26 = vld [vmem:[%s7391_s6 + $0x68] sm:$0xf] }
 0x13c   : > { %v575_v14 = vrot.slane %v567_v3, %v7621_v19  ;;  %v8847_v60 = vcombine.low %v4523_v7, %v4524_v49  ;;  %v8849_v20 = vcombine.low %v3113_v22, %v3114_v40  ;;  %v1486_v55 = vrot.slane %v1484_v48, 3 }
 0x13d   : > { %v874_v17 = vsel %vm8065_vm7, %v869_v58, %v873_v38  ;;  %v1024_v37 = vmul.bf16 %v7228_v18, %v8834_v52  ;;  %v4526_v13 = vmul.bf16 %v4493_v6, %v8834_v52  ;;  %v889_v1 = vrot.slane %v888_v21, 4  ;;  %v4495_v58 = vld [vmem:[%s7391_s6 + $0x70] sm:$0xf] }
 0x13e   : > { %10108 = vst [vmem:[#allocation101_spill] sm:$0xff] %v8849_v20  ;;  %v878_v31 = vor.u32 %v877_v15, %v873_v38  ;;  %v1489_v3 = vrot.slane %v1487_v33, 4  ;;  %v901_v7 = vshll.u32 %v575_v14, 16  ;;  %v905_v49 = vshrl.u32 %v575_v14, 16  ;;  %v8865_v38 = vld [vmem:[%s7391_s6 + $0x6c] sm:$0xf] }
 0x13f   : > { %v563_v22 = vrot.slane %v555_v50, %v7621_v19  ;;  %v3115_v20 = vmul.bf16 %v3082_v32, %v874_v17  ;;  %v1493_v48 = vshrl.u32 %v8803_v39, 16  ;;  %v1496_v59 = vshll.u32 %v8803_v39, 16  ;;  %v7229_v50 = vld [vmem:[%s7391_s6 + $0x60] sm:$0xf] }
 0x140   : > { %v879_v40 = vrot.slane %v878_v31, 4  ;;  %v1490_v18 = vor.u32 %v1489_v3, %v1486_v55  ;;  %v903_v10 = vrot.slane %v901_v7, 5  ;;  %v907_v52 = vrot.slane %v905_v49, 4 }
 0x141   : > { %v891_v21 = vshll.u32 %v563_v22, 16  ;;  %v895_v15 = vshrl.u32 %v563_v22, 16  ;;  %v1495_v33 = vrot.slane %v1493_v48, 3  ;;  %v1498_v14 = vrot.slane %v1496_v59, 4  ;;  %v591_v48 = vpop.permute.xlu1 %590 }
 0x142   : > { %v884_v6 = vsel %vm8065_vm7, %v879_v40, %v883_v47  ;;  %v1491_v39 = vsel %vm1420_vm8, %v8756_v62, %v1490_v18  ;;  %v10109_v47 = vmul.bf16 %v8795_v5, %v8792_v24  ;;  %v10110_v59 = vmul.bf16 %v8731_v44, %v8718_v51 }
 0x143   : > { %v1026_v32 = vmul.bf16 %v7229_v50, %v884_v6  ;;  %v3116_v31 = vmul.bf16 %v3083_v26, %v884_v6  ;;  %v4528_v2 = vmul.bf16 %v4495_v58, %v884_v6  ;;  %6606 = vmatprep.mubr.msk.bf16.mxu1 %vm1127_vm0, %v1491_v39  ;;  %v893_v55 = vrot.slane %v891_v21, 5  ;;  %v7230_v26 = vld [vmem:[%s7391_s6 + $0x5c] sm:$0xf]  ;;  %v579_v21 = vpop.permute.xlu0 %578 }
 0x144   : > { %v897_v3 = vrot.slane %v895_v15, 4  ;;  %v8871_v7 = vor.u32 %v1498_v14, %v1495_v33  ;;  %v8879_v49 = vcombine.low %v10110_v59, %v10109_v47  ;;  %v1025_v22 = vmul.bf16 %v7230_v26, %v874_v17  ;;  %v3973_v33 = vld [vmem:[%s7391_s6 + $0x90] sm:$0x1]  ;;  %v7231_v26 = vld [vmem:[%s7391_s6 + $0x68] sm:$0xf] }
 0x145   : > { %v8882_v40 = vcombine.low %v3115_v20, %v3116_v31  ;;  %v4527_v62 = vmul.bf16 %v8865_v38, %v874_v17  ;;  %v908_v58 = vor.u32 %v907_v52, %v903_v10  ;;  %v8885_v6 = vcombine.low %v1023_v16, %v1024_v37  ;;  %v3084_v37 = vld [vmem:[%s7391_s6 + $0x6c] sm:$0xf] }
 0x146   : > { %v8887_v15 = vcombine.low %v4525_v27, %v4526_v13  ;;  %v898_v5 = vor.u32 %v897_v3, %v893_v55  ;;  %v1500_v44 = vsel %vm1420_vm8, %v1490_v18, %v8871_v7  ;;  %v8892_v14 = vcombine.low %v1025_v22, %v1026_v32  ;;  %v3085_v13 = vld [vmem:[%s7391_s6 + $0x70] sm:$0xf] }
 0x147   : > { %v8894_v20 = vcombine.low %v4527_v62, %v4528_v2  ;;  %v8898_v17 = vsel %vm8065_vm7, %v889_v1, %v893_v55  ;;  %6607 = vmatmul.mubr.msk.bf16.gmra.mrb[12].mxu1 %vm1127_vm0, %v1500_v44  ;;  %v4209_v16 = vshrl.u32 %v8778_v34, 16  ;;  %v4213_v18 = vshll.u32 %v8879_v49, 16 }
 0x148   : > { %v899_v27 = vrot.slane %v898_v5, 4  ;;  %v599_v52 = vrot.slane %v591_v48, %v7621_v19  ;;  %v587_v2 = vrot.slane %v579_v21, %v7621_v19  ;;  %v909_v50 = vrot.slane %v908_v58, 4  ;;  %v4497_v48 = vld [vmem:[%s7391_s6 + $0x78] sm:$0xf] }
 0x149   : > { %v4211_v1 = vor.u32 %v4209_v16, %v8786_v54  ;;  %v4006_v32 = vmul.bf16 %v3973_v33, %v8762_v25  ;;  %v10111_v31 = vmul.bf16 %v8105_v11, %v8085_v43  ;;  %v10112_v34 = vmul.bf16 %v8070_v29, %v8019_v4  ;;  %v4496_v11 = vld [vmem:[%s7391_s6 + $0x74] sm:$0xf] }
 0x14a   : > { %v8917_v55 = vsel %vm8065_vm7, %v899_v27, %v903_v10  ;;  %v4215_v3 = vrot.slane %v4213_v18, 1  ;;  %v921_v47 = vshll.u32 %v599_v52, 16  ;;  %v925_v59 = vshrl.u32 %v599_v52, 16  ;;  %v7232_v10 = vld [vmem:[%s7391_s6 + $0x64] sm:$0xf] }
 0x14b   : > { %v6296_v39 = vcombine.low %v10112_v34, %v10111_v31  ;;  %v1028_v54 = vmul.bf16 %v7231_v26, %v8917_v55  ;;  %v3117_v22 = vmul.bf16 %v3084_v37, %v8898_v17  ;;  %v3118_v62 = vmul.bf16 %v3085_v13, %v8917_v55  ;;  %v603_v26 = vpop.permute.xlu0 %602 }
 0x14c   : > { %v911_v58 = vshll.u32 %v587_v2, 16  ;;  %v4216_v29 = vsel %vm2680_vm4, %v4211_v1, %v4215_v3  ;;  %v923_v21 = vrot.slane %v921_v47, 5  ;;  %v927_v5 = vrot.slane %v925_v59, 4  ;;  %v615_v59 = vpop.permute.xlu1 %614 }
 0x14d   : > { %v915_v44 = vshrl.u32 %v587_v2, 16  ;;  %v1027_v33 = vmul.bf16 %v7232_v10, %v8898_v17  ;;  %v8928_v16 = vcombine.low %v3117_v22, %v3118_v62  ;;  %6758 = vmatprep.mubr.msk.bf16.mxu0 %vm1127_vm0, %v4216_v29  ;;  %v4633_v37 = vshrl.u32 %v8142_v12, 16 }
 0x14e   : > { %v913_v27 = vrot.slane %v911_v58, 5  ;;  %v4529_v13 = vmul.bf16 %v4496_v11, %v8898_v17  ;;  %v6276_v52 = vcombine.low %v4006_v32, %v4006_v32  ;;  %v4217_v1 = vshrl.u32 %v8879_v49, 16  ;;  %v3086_v17 = vld [vmem:[%s7391_s6 + $0x74] sm:$0xf] }
 0x14f   : > { %v917_v18 = vrot.slane %v915_v44, 4  ;;  %v4530_v31 = vmul.bf16 %v4497_v48, %v8917_v55  ;;  %v928_v2 = vor.u32 %v927_v5, %v923_v21  ;;  %v4625_v34 = vshrl.u32 %v6296_v39, 16  ;;  %v3087_v48 = vld [vmem:[%s7391_s6 + $0x78] sm:$0xf] }
 0x150   : > { %v4628_v47 = vshll.u32 %v6296_v39, 16  ;;  %v8935_v22 = vcombine.low %v1027_v33, %v1028_v54  ;;  %v8939_v62 = vsel %vm8065_vm7, %v909_v50, %v913_v27  ;;  %v4219_v11 = vor.u32 %v4217_v1, %v4215_v3 }
 0x151   : > { %v918_v58 = vor.u32 %v917_v18, %v913_v27  ;;  %v4221_v32 = vshll.u32 %v6276_v52, 16  ;;  %v4627_v29 = vrot.slane %v4625_v34, 3  ;;  %v4635_v44 = vrot.slane %v4633_v37, 3 }
 0x152   : > { %v4630_v49 = vrot.slane %v4628_v47, 4  ;;  %v4636_v5 = vshll.u32 %v8142_v12, 16  ;;  %v623_v39 = vrot.slane %v615_v59, %v7621_v19  ;;  %v611_v54 = vrot.slane %v603_v26, %v7621_v19 }
 0x153   : > { %v919_v55 = vrot.slane %v918_v58, 4  ;;  %v929_v10 = vrot.slane %v928_v2, 4  ;;  %v3119_v33 = vmul.bf16 %v3086_v17, %v8939_v62  ;;  %v4223_v50 = vrot.slane %v4221_v32, 1  ;;  %v639_v58 = vpop.permute.xlu1 %638  ;;  %v627_v17 = vpop.permute.xlu0 %626 }
 0x154   : > { %v1502_v27 = vshrl.u32 %v8843_v23, 16  ;;  %v4638_v37 = vrot.slane %v4636_v5, 4  ;;  %v941_v18 = vshll.u32 %v623_v39, 16  ;;  %v945_v52 = vshrl.u32 %v623_v39, 16 }
 0x155   : > { %v8950_v3 = vsel %vm8065_vm7, %v919_v55, %v923_v21  ;;  %v4224_v1 = vsel %vm2680_vm4, %v4219_v11, %v4223_v50  ;;  %v4631_v34 = vor.u32 %v4630_v49, %v4627_v29  ;;  %v1505_v2 = vshll.u32 %v8843_v23, 16  ;;  %v7233_v55 = vld [vmem:[%s7391_s6 + $0x6c] sm:$0xf]  ;;  %v4499_v29 = vld [vmem:[%s7391_s6 + $0x80] sm:$0xf] }
 0x156   : > { %v3120_v12 = vmul.bf16 %v3087_v48, %v8950_v3  ;;  %6759 = vmatmul.mubr.msk.bf16.gmra.mrb[28].mxu0 %vm1127_vm0, %v4224_v1  ;;  %v4639_v47 = vor.u32 %v4638_v37, %v4635_v44  ;;  %v943_v59 = vrot.slane %v941_v18, 5  ;;  %v947_v26 = vrot.slane %v945_v52, 4  ;;  %v3088_v44 = vld [vmem:[%s7391_s6 + $0x7c] sm:$0xf]  ;;  %v7234_v52 = vld [vmem:[%s7391_s6 + $0x70] sm:$0xf] }
 0x157   : > { %v931_v21 = vshll.u32 %v611_v54, 16  ;;  %v8956_v32 = vcombine.low %v4529_v13, %v4530_v31  ;;  %v1029_v48 = vmul.bf16 %v7233_v55, %v8939_v62  ;;  %v935_v11 = vshrl.u32 %v611_v54, 16 }
 0x158   : > { %v8960_v5 = vcombine.low %v3119_v33, %v3120_v12  ;;  %v4640_v23 = vsel %vm1420_vm8, %v4631_v34, %v4639_v47  ;;  %v948_v49 = vor.u32 %v947_v26, %v943_v59  ;;  %v1504_v50 = vrot.slane %v1502_v27, 3 }
 0x159   : > { %v933_v39 = vrot.slane %v931_v21, 5  ;;  %6764 = vmatprep.mubr.msk.bf16.mxu0 %vm1127_vm0, %v4640_v23  ;;  %v937_v37 = vrot.slane %v935_v11, 4  ;;  %v1507_v13 = vrot.slane %v1505_v2, 4  ;;  %v647_v31 = vrot.slane %v639_v58, %v7621_v19  ;;  %v8990_v23 = vld [vmem:[%s7391_s6 + $0x7c] sm:$0xf] }
 0x15a   : > { %v635_v18 = vrot.slane %v627_v17, %v7621_v19  ;;  %v1030_v54 = vmul.bf16 %v7234_v52, %v8950_v3  ;;  %v8974_v12 = vor.u32 %v8258_v57, %v8250_v41  ;;  %v4651_v27 = vshrl.u32 %v8331_v53, 16  ;;  %v3089_v19 = vld [vmem:[%s7391_s6 + $0x80] sm:$0xf]  ;;  %10113 = vst [vmem:[#allocation102_spill] sm:$0xff] %v8990_v23  ;;  %v7236_v52 = vld [vmem:[%s7391_s6 + $0x78] sm:$0xf] }
 0x15b   : > { %v934_v33 = vsel %vm8065_vm7, %v929_v10, %v933_v39  ;;  %v4532_v1 = vmul.bf16 %v4499_v29, %v8950_v3  ;;  %v949_v34 = vrot.slane %v948_v49, 4  ;;  %v938_v2 = vor.u32 %v937_v37, %v933_v39  ;;  %v8984_v41 = vld [vmem:[%s9840_s1 + $0x40] sm:$0xff]   ;;  %v4501_v10 = vld [vmem:[%s7391_s6 + $0x88] sm:$0xf] }
 0x15c   : > { %v3121_v26 = vmul.bf16 %v3088_v44, %v934_v33  ;;  %v8979_v21 = vor.u32 %v1507_v13, %v1504_v50  ;;  %v961_v58 = vshll.u32 %v647_v31, 16  ;;  %v965_v17 = vshrl.u32 %v647_v31, 16  ;;  %v4500_v13 = vld [vmem:[%s7391_s6 + $0x84] sm:$0xf] }
 0x15d   : > { %v951_v55 = vshll.u32 %v635_v18, 16  ;;  %v939_v57 = vrot.slane %v938_v2, 4  ;;  %v955_v11 = vshrl.u32 %v635_v18, 16  ;;  %v4649_v3 = vsel %vm1420_vm8, %v4639_v47, %v8974_v12 }
 0x15e   : > { %v4653_v29 = vrot.slane %v4651_v27, 3  ;;  %v1509_v49 = vsel %vm1420_vm8, %v8871_v7, %v8979_v21  ;;  %v963_v39 = vrot.slane %v961_v58, 5  ;;  %v967_v44 = vrot.slane %v965_v17, 4  ;;  %6765 = vmatmul.mubr.msk.bf16.vlgmr.msra.gmra.mrb[0].mxu0 %vm1127_vm0, %v4649_v3  ;;  %v7235_v7 = vld [vmem:[%s9840_s1 + $0x38] sm:$0xff]  }
 0x15f   : > { %v953_v50 = vrot.slane %v951_v55, 5  ;;  %v944_v37 = vsel %vm8065_vm7, %v939_v57, %v943_v59  ;;  %6610 = vmatprep.mubr.msk.bf16.mxu1 %vm1127_vm0, %v1509_v49  ;;  %v957_v47 = vrot.slane %v955_v11, 4  ;;  %v4654_v31 = vshll.u32 %v8331_v53, 16  ;;  %6797 = vmatpush3.bf16.msra.mxu0 %v7235_v7  ;;  %v7237_v11 = vld [vmem:[%s7391_s6 + $0x74] sm:$0xf] }
 0x160   : > { %v1511_v18 = vshrl.u32 %v8885_v6, 16  ;;  %v1032_v27 = vmul.bf16 %v7236_v52, %v944_v37  ;;  %v3122_v2 = vmul.bf16 %v3089_v19, %v944_v37  ;;  %v4534_v58 = vmul.bf16 %v4501_v10, %v944_v37  ;;  %6830 = vmatprep.subr.bf16.mxu0 %v8984_v41  ;;  %v9024_v37 = vld [vmem:[%s7391_s6 + $0x8c] sm:$0xf]  ;;  %v3091_v7 = vld [vmem:[%s7391_s6 + $0x88] sm:$0xf] }
 0x161   : > { %v968_v59 = vor.u32 %v967_v44, %v963_v39  ;;  %v9007_v17 = vcombine.low %v1029_v48, %v1030_v54  ;;  %v4531_v53 = vmul.bf16 %v8990_v23, %v8939_v62  ;;  %v958_v55 = vor.u32 %v957_v47, %v953_v50  ;;  %v3090_v54 = vld [vmem:[%s7391_s6 + $0x84] sm:$0xf]  ;;  %10114 = vst [vmem:[#allocation103_spill] sm:$0xff] %v9024_v37 }
 0x162   : > { %v4656_v57 = vrot.slane %v4654_v31, 4  ;;  %v1031_v3 = vmul.bf16 %v7237_v11, %v934_v33  ;;  %v9012_v49 = vcombine.low %v3121_v26, %v3122_v2  ;;  %v4533_v19 = vmul.bf16 %v4500_v13, %v934_v33  ;;  %v7238_v33 = vld [vmem:[%s7391_s6 + $0x84] sm:$0xf] }
 0x163   : > { %v9014_v10 = vrot.slane %v968_v59, 4  ;;  %v9016_v44 = vcombine.low %v4531_v53, %v4532_v1  ;;  %v9020_v48 = vsel %vm8065_vm7, %v949_v34, %v953_v50  ;;  %v959_v62 = vrot.slane %v958_v55, 4  ;;  %v3092_v1 = vld [vmem:[%s7391_s6 + $0x8c] sm:$0xf]  ;;  %v7240_v59 = vld [vmem:[%s7391_s6 + $0x80] sm:$0xf] }
 0x164   : > { %v1513_v47 = vrot.slane %v1511_v18, 3  ;;  %v9026_v31 = vcombine.low %v1031_v3, %v1032_v27  ;;  %v9028_v26 = vcombine.low %v4533_v19, %v4534_v58  ;;  %v4657_v52 = vor.u32 %v4656_v57, %v4653_v29  ;;  %v7239_v27 = vld [vmem:[%s7391_s6 + $0x7c] sm:$0xf] }
 0x165   : > { %v1035_v13 = vmul.bf16 %v7238_v33, %v9014_v10  ;;  %v9036_v34 = vsel %vm8065_vm7, %v959_v62, %v963_v39  ;;  %v1514_v50 = vshll.u32 %v8885_v6, 16  ;;  %v1520_v2 = vshrl.u32 %v8892_v14, 16 }
 0x166   : > { %v1523_v18 = vshll.u32 %v8892_v14, 16  ;;  %v1033_v58 = vmul.bf16 %v7239_v27, %v9020_v48  ;;  %v1034_v53 = vmul.bf16 %v7240_v59, %v9036_v34  ;;  %v3123_v55 = vmul.bf16 %v3090_v54, %v9020_v48 }
 0x167   : > { %v4535_v29 = vmul.bf16 %v9024_v37, %v9020_v48  ;;  %v9049_v42 = vmul.bf16 %v3092_v1, %v9014_v10  ;;  %v3124_v6 = vmul.bf16 %v3091_v7, %v9036_v34  ;;  %v4658_v39 = vsel %vm1420_vm8, %v8974_v12, %v4657_v52 }
 0x168   : > { %v1516_v14 = vrot.slane %v1514_v50, 4  ;;  %v9054_v57 = vcombine.low %v1035_v13, %v1035_v13  ;;  %6768 = vmatprep.mubr.msk.bf16.mxu0 %vm1127_vm0, %v4658_v39  ;;  %v1522_v11 = vrot.slane %v1520_v2, 3  ;;  %v1525_v3 = vrot.slane %v1523_v18, 4 }
 0x169   : > { %v4660_v19 = vshrl.u32 %v8387_v36, 16  ;;  %v6100_v62 = vcombine.low %v1033_v58, %v1034_v53  ;;  %v9058_v54 = vcombine.low %v3123_v55, %v3124_v6  ;;  %v4663_v1 = vshll.u32 %v8387_v36, 16 }
 0x16a   : > { %v1517_v33 = vor.u32 %v1516_v14, %v1513_v47  ;;  %v1526_v27 = vor.u32 %v1525_v3, %v1522_v11  ;;  %v4669_v59 = vshrl.u32 %v8519_v56, 16  ;;  %v4672_v12 = vshll.u32 %v8519_v56, 16 }
 0x16b   : > { %v4662_v7 = vrot.slane %v4660_v19, 3  ;;  %v4665_v50 = vrot.slane %v4663_v1, 4  ;;  %v1529_v2 = vshrl.u32 %v8935_v22, 16  ;;  %v1532_v18 = vshll.u32 %v8935_v22, 16 }
 0x16c   : > { %v1518_v13 = vsel %vm1420_vm8, %v8979_v21, %v1517_v33  ;;  %v1527_v47 = vsel %vm1420_vm8, %v1517_v33, %v1526_v27  ;;  %v4671_v58 = vrot.slane %v4669_v59, 3  ;;  %v4674_v36 = vrot.slane %v4672_v12, 4 }
 0x16d   : > { %6611 = vmatmul.mubr.msk.bf16.gmra.mrb[16].mxu1 %vm1127_vm0, %v1518_v13  ;;  %v1538_v53 = vshrl.u32 %v9007_v17, 16  ;;  %v4666_v55 = vor.u32 %v4665_v50, %v4662_v7  ;;  %v1531_v56 = vrot.slane %v1529_v2, 3  ;;  %v1534_v6 = vrot.slane %v1532_v18, 4 }
 0x16e   : > { %6614 = vmatprep.mubr.msk.bf16.mxu1 %vm1127_vm0, %v1527_v47  ;;  %v1541_v21 = vshll.u32 %v9007_v17, 16  ;;  %v4675_v39 = vor.u32 %v4674_v36, %v4671_v58  ;;  %v4678_v11 = vshrl.u32 %v8582_v61, 16  ;;  %v4681_v22 = vshll.u32 %v8582_v61, 16  ;;  %v9084_v36 = vld [vmem:[%s7391_s6 + $0x94] sm:$0xf] }
 0x16f   : > { %v1540_v14 = vrot.slane %v1538_v53, 3  ;;  %v4667_v3 = vsel %vm1420_vm8, %v4657_v52, %v4666_v55  ;;  %v1535_v19 = vor.u32 %v1534_v6, %v1531_v56  ;;  %v4687_v1 = vshrl.u32 %v8728_v28, 16  ;;  %10115 = vst [vmem:[#allocation104_spill] sm:$0xff] %v9084_v36 }
 0x170   : > { %v1543_v33 = vrot.slane %v1541_v21, 4  ;;  %6769 = vmatmul.mubr.msk.bf16.gmra.mrb[4].mxu0 %vm1127_vm0, %v4667_v3  ;;  %v4676_v7 = vsel %vm1420_vm8, %v4666_v55, %v4675_v39  ;;  %v4680_v59 = vrot.slane %v4678_v11, 3  ;;  %v4683_v12 = vrot.slane %v4681_v22, 4 }
 0x171   : > { %v4690_v17 = vshll.u32 %v8728_v28, 16  ;;  %6772 = vmatprep.mubr.msk.bf16.mxu0 %vm1127_vm0, %v4676_v7  ;;  %v1536_v13 = vsel %vm1420_vm8, %v1526_v27, %v1535_v19  ;;  %v4689_v50 = vrot.slane %v4687_v1, 3  ;;  %v1547_v52 = vshrl.u32 %v9026_v31, 16 }
 0x172   : > { %v1544_v61 = vor.u32 %v1543_v33, %v1540_v14  ;;  %v4684_v2 = vor.u32 %v4683_v12, %v4680_v59  ;;  %v1550_v47 = vshll.u32 %v9026_v31, 16  ;;  %v1556_v58 = vshrl.u32 %v6100_v62, 16 }
 0x173   : > { %v4692_v18 = vrot.slane %v4690_v17, 4  ;;  %v1549_v55 = vrot.slane %v1547_v52, 3  ;;  %v1559_v56 = vshll.u32 %v6100_v62, 16  ;;  %v4696_v28 = vshrl.u32 %v8805_v30, 16 }
 0x174   : > { %v1545_v53 = vsel %vm1420_vm8, %v1535_v19, %v1544_v61  ;;  %v4685_v27 = vsel %vm1420_vm8, %v4675_v39, %v4684_v2  ;;  %v1552_v21 = vrot.slane %v1550_v47, 4  ;;  %v1558_v14 = vrot.slane %v1556_v58, 3  ;;  %v9098_v39 = vld [vmem:[%s7391_s6 + $0x90] sm:$0xf] }
 0x175   : > { %6615 = vmatmul.mubr.msk.bf16.gmra.mrb[20].mxu1 %vm1127_vm0, %v1536_v13  ;;  %v4693_v6 = vor.u32 %v4692_v18, %v4689_v50  ;;  %v1561_v31 = vrot.slane %v1559_v56, 4  ;;  %v4698_v11 = vrot.slane %v4696_v28, 3  ;;  %v4699_v22 = vshll.u32 %v8805_v30, 16  ;;  %10116 = vst [vmem:[#allocation105_spill] sm:$0xff] %v9098_v39 }
 0x176   : > { %6618 = vmatprep.mubr.msk.bf16.mxu1 %vm1127_vm0, %v1545_v53  ;;  %v4705_v3 = vshrl.u32 %v8847_v60, 16  ;;  %v4537_v62 = vmul.bf16 %v9084_v36, %v9014_v10  ;;  %v1553_v19 = vor.u32 %v1552_v21, %v1549_v55  ;;  %v4708_v33 = vshll.u32 %v8847_v60, 16  ;;  %v10120_v53 = vld [vmem:[#allocation6_spill] sm:$0xff] }
 0x177   : > { %v1565_v1 = vshrl.u32 %v9054_v57, 16  ;;  %v1562_v7 = vor.u32 %v1561_v31, %v1558_v14  ;;  %v4701_v59 = vrot.slane %v4699_v22, 4  ;;  %v1568_v17 = vshll.u32 %v9054_v57, 16  ;;  %v10168_v36 = vld [vmem:[#allocation62_spill] sm:$0xff] }
 0x178   : > { %v4707_v12 = vrot.slane %v4705_v3, 3  ;;  %6773 = vmatmul.mubr.msk.bf16.gmra.mrb[8].mxu0 %vm1127_vm0, %v4685_v27  ;;  %v4694_v30 = vsel %vm1420_vm8, %v4684_v2, %v4693_v6  ;;  %v4710_v13 = vrot.slane %v4708_v33, 4  ;;  %v10117_v10 = vmul.bf16 %v7683_v9, %v7679_v8  ;;  %v10121_v2 = vld [vmem:[#allocation7_spill] sm:$0xff] }
 0x179   : > { %v1567_v50 = vrot.slane %v1565_v1, 3  ;;  %v10118_v60 = vmul.bf16 %v7634_v46, %v7632_v45  ;;  %6776 = vmatprep.mubr.msk.bf16.mxu0 %vm1127_vm0, %v4694_v30  ;;  %v1554_v18 = vsel %vm1420_vm8, %v1544_v61, %v1553_v19  ;;  %v4702_v47 = vor.u32 %v4701_v59, %v4698_v11  ;;  %v10124_v30 = vld [vmem:[#allocation15_spill] sm:$0xff] }
 0x17a   : > { %v1570_v58 = vrot.slane %v1568_v17, 4  ;;  %v10119_v57 = vmul.bf16 %v7664_v0, %v7660_v63  ;;  %v10122_v55 = vmul.bf16 %v10120_v53, %v10121_v2  ;;  %v4536_v8 = vmul.bf16 %v9098_v39, %v9036_v34  ;;  %v10163_v39 = vld [vmem:[#allocation52_spill] sm:$0xff] }
 0x17b   : > { %v6153_v52 = vcombine.low %v10118_v60, %v10117_v10  ;;  %v1563_v28 = vsel %vm1420_vm8, %v1553_v19, %v1562_v7  ;;  %v4714_v27 = vshrl.u32 %v8887_v15, 16  ;;  %v4703_v21 = vsel %vm1420_vm8, %v4693_v6, %v4702_v47  ;;  %v10128_v60 = vld [vmem:[#allocation12_spill] sm:$0xff] }
 0x17c   : > { %v6154_v56 = vcombine.low %v10122_v55, %v10119_v57  ;;  %v4711_v61 = vor.u32 %v4710_v13, %v4707_v12  ;;  %v1571_v63 = vor.u32 %v1570_v58, %v1567_v50  ;;  %v4717_v3 = vshll.u32 %v8887_v15, 16  ;;  %v10123_v12 = vld [vmem:[#allocation10_spill] sm:$0xff]  ;;  %v10127_v50 = vld [vmem:[#allocation13_spill] sm:$0xff] }
 0x17d   : > { %v2684_v45 = vshll.u32 %v6153_v52, 16  ;;  %v2682_v14 = vshrl.u32 %v6153_v52, 16  ;;  %6619 = vmatmul.mubr.msk.bf16.gmra.mrb[24].mxu1 %vm1127_vm0, %v1554_v18  ;;  %v4716_v33 = vrot.slane %v4714_v27, 3  ;;  %v4723_v19 = vshrl.u32 %v8894_v20, 16  ;;  %v10125_v13 = vld [vmem:[#allocation14_spill] sm:$0xff] }
 0x17e   : > { %v2689_v31 = vshll.u32 %v6154_v56, 16  ;;  %v2693_v22 = vshrl.u32 %v6154_v56, 16  ;;  %6622 = vmatprep.mubr.msk.bf16.mxu1 %vm1127_vm0, %v1563_v28  ;;  %v4726_v1 = vshll.u32 %v8894_v20, 16  ;;  %v4719_v6 = vrot.slane %v4717_v3, 4 }
 0x17f   : > { %v2686_v11 = vrot.slane %v2684_v45, 1  ;;  %v2697_v17 = vshll.u32 %v10123_v12, 16  ;;  %v10126_v10 = vmul.bf16 %v10124_v30, %v10125_v13  ;;  %v10129_v52 = vmul.bf16 %v10127_v50, %v10128_v60  ;;  %v10134_v13 = vld [vmem:[#allocation18_spill] sm:$0xff]  ;;  %v10136_v60 = vld [vmem:[#allocation27_spill] sm:$0xff] }
 0x180   : > { %v2691_v34 = vrot.slane %v2689_v31, 1  ;;  %v4712_v15 = vsel %vm1420_vm8, %v4702_v47, %v4711_v61  ;;  %v4725_v57 = vrot.slane %v4723_v19, 3  ;;  %v4728_v2 = vrot.slane %v4726_v1, 4  ;;  %6777 = vmatmul.mubr.msk.bf16.gmra.mrb[12].mxu0 %vm1127_vm0, %v4703_v21 }
 0x181   : > { %v2687_v59 = vor.u32 %v2686_v11, %v2682_v14  ;;  %v6156_v18 = vcombine.low %v10129_v52, %v10126_v10  ;;  %v2699_v55 = vrot.slane %v2697_v17, 1  ;;  %v2701_v56 = vshrl.u32 %v10123_v12, 16  ;;  %6780 = vmatprep.mubr.msk.bf16.mxu0 %vm1127_vm0, %v4712_v15  ;;  %v10133_v17 = vld [vmem:[#allocation20_spill] sm:$0xff]  ;;  %v10137_v52 = vld [vmem:[#allocation25_spill] sm:$0xff] }
 0x182   : > { %v2695_v58 = vor.u32 %v2693_v22, %v2691_v34  ;;  %v9138_v45 = vcombine.low %v4537_v62, %v4537_v62  ;;  %v4720_v27 = vor.u32 %v4719_v6, %v4716_v33  ;;  %v4732_v14 = vshrl.u32 %v8956_v32, 16  ;;  %v10131_v6 = vld [vmem:[#allocation19_spill] sm:$0xff] }
 0x183   : > { %v2692_v20 = vsel %vm2680_vm4, %v2687_v59, %v2691_v34  ;;  %v2705_v28 = vshll.u32 %v6156_v18, 16  ;;  %v4735_v47 = vshll.u32 %v8956_v32, 16  ;;  %v2703_v11 = vor.u32 %v2701_v56, %v2699_v55  ;;  %v10130_v59 = vld [vmem:[#allocation21_spill] sm:$0xff] }
 0x184   : > { %v2700_v31 = vsel %vm2680_vm4, %v2695_v58, %v2699_v55  ;;  %v4741_v21 = vshrl.u32 %v9016_v44, 16  ;;  %v1572_v3 = vsel %vm1420_vm8, %v1562_v7, %v1571_v63  ;;  %v4729_v34 = vor.u32 %v4728_v2, %v4725_v57 }
 0x185   : > { %v2707_v22 = vrot.slane %v2705_v28, 1  ;;  %v4734_v19 = vrot.slane %v4732_v14, 3  ;;  %v4737_v1 = vrot.slane %v4735_v47, 4  ;;  %v6311_v62 = vcombine.low %v4535_v29, %v4536_v8  ;;  %6623 = vmatmul.mubr.msk.bf16.gmra.mrb[28].mxu1 %vm1127_vm0, %v1572_v3  ;;  %v10139_v29 = vld [vmem:[#allocation26_spill] sm:$0xff]  ;;  %v10140_v8 = vld [vmem:[#allocation24_spill] sm:$0xff] }
 0x186   : > { %v4744_v32 = vshll.u32 %v9016_v44, 16  ;;  %v10132_v12 = vmul.bf16 %v10130_v59, %v10131_v6  ;;  %v10135_v10 = vmul.bf16 %v10133_v17, %v10134_v13  ;;  %6628 = vmatprep.mubr.msk.bf16.mxu1 %vm1127_vm0, %v2692_v20  ;;  %v2709_v63 = vshrl.u32 %v6156_v18, 16 }
 0x187   : > { %v2708_v33 = vsel %vm2680_vm4, %v2703_v11, %v2707_v22  ;;  %v10138_v48 = vmul.bf16 %v10136_v60, %v10137_v52  ;;  %v10141_v15 = vmul.bf16 %v10139_v29, %v10140_v8  ;;  %v4750_v57 = vshrl.u32 %v9028_v26, 16  ;;  %v10145_v52 = vld [vmem:[#allocation30_spill] sm:$0xff] }
 0x188   : > { %v6157_v7 = vcombine.low %v10135_v10, %v10132_v12  ;;  %v4753_v44 = vshll.u32 %v9028_v26, 16  ;;  %v4721_v2 = vsel %vm1420_vm8, %v4711_v61, %v4720_v27  ;;  %v4743_v55 = vrot.slane %v4741_v21, 3  ;;  %v10142_v61 = vld [vmem:[#allocation31_spill] sm:$0xff]  ;;  %v10143_v21 = vld [vmem:[#allocation33_spill] sm:$0xff] }
 0x189   : > { %v6158_v58 = vcombine.low %v10141_v15, %v10138_v48  ;;  %v4746_v56 = vrot.slane %v4744_v32, 4  ;;  %v4730_v14 = vsel %vm1420_vm8, %v4720_v27, %v4729_v34  ;;  %v4738_v20 = vor.u32 %v4737_v1, %v4734_v19  ;;  %6781 = vmatmul.mubr.msk.bf16.gmra.mrb[16].mxu0 %vm1127_vm0, %v4721_v2  ;;  %v10146_v48 = vld [vmem:[#allocation32_spill] sm:$0xff] }
 0x18a   : > { %v2713_v28 = vshll.u32 %v6157_v7, 16  ;;  %v2711_v18 = vor.u32 %v2709_v63, %v2707_v22  ;;  %v2717_v3 = vshrl.u32 %v6157_v7, 16  ;;  %v4759_v6 = vshrl.u32 %v6311_v62, 16  ;;  %6784 = vmatprep.mubr.msk.bf16.mxu0 %vm1127_vm0, %v4730_v14  ;;  %v10149_v14 = vld [vmem:[#allocation37_spill] sm:$0xff] }
 0x18b   : > { %v2721_v47 = vshll.u32 %v6158_v58, 16  ;;  %v4762_v12 = vshll.u32 %v6311_v62, 16  ;;  %v4752_v26 = vrot.slane %v4750_v57, 3  ;;  %v4755_v10 = vrot.slane %v4753_v44, 4 }
 0x18c   : > { %v2715_v11 = vrot.slane %v2713_v28, 1  ;;  %v10144_v32 = vmul.bf16 %v10142_v61, %v10143_v21  ;;  %v10147_v27 = vmul.bf16 %v10145_v52, %v10146_v48  ;;  %v4747_v22 = vor.u32 %v4746_v56, %v4743_v55  ;;  %v10148_v28 = vld [vmem:[#allocation39_spill] sm:$0xff]  ;;  %v10151_v21 = vld [vmem:[#allocation38_spill] sm:$0xff] }
 0x18d   : > { %v2723_v13 = vrot.slane %v2721_v47, 1  ;;  %v2725_v8 = vshrl.u32 %v6158_v58, 16  ;;  %v4739_v7 = vsel %vm1420_vm8, %v4729_v34, %v4738_v20  ;;  %v4761_v62 = vrot.slane %v4759_v6, 3  ;;  %6629 = vmatmul.mubr.msk.bf16.vlgmr.msra.gmra.mrb[0].mxu1 %vm1127_vm0, %v2700_v31  ;;  %v7241_v34 = vld [vmem:[%s9840_s1 + $0x18] sm:$0xff]   ;;  %v10155_v6 = vld [vmem:[#allocation43_spill] sm:$0xff]  ;;  %v10158_v48 = vld [vmem:[#allocation42_spill] sm:$0xff] }
 0x18e   : > { %v6159_v19 = vcombine.low %v10147_v27, %v10144_v32  ;;  %v2716_v1 = vsel %vm2680_vm4, %v2711_v18, %v2715_v11  ;;  %v2719_v63 = vor.u32 %v2717_v3, %v2715_v11  ;;  %v4764_v15 = vrot.slane %v4762_v12, 4  ;;  %v10152_v32 = vld [vmem:[#allocation36_spill] sm:$0xff]  ;;  %6661 = vmatpush3.bf16.msra.mxu1 %v7241_v34  ;;  %6632 = vmatprep.mubr.msk.bf16.mxu1 %vm1127_vm0, %v2708_v33  ;;  %v10154_v3 = vld [vmem:[#allocation45_spill] sm:$0xff]  ;;  %v10164_v33 = vld [vmem:[#allocation51_spill] sm:$0xff] }
 0x18f   : > { %v2727_v44 = vor.u32 %v2725_v8, %v2723_v13  ;;  %v10150_v47 = vmul.bf16 %v10148_v28, %v10149_v14  ;;  %v10153_v55 = vmul.bf16 %v10151_v21, %v10152_v32  ;;  %v4768_v18 = vshrl.u32 %v9138_v45, 16  ;;  %v10160_v32 = vld [vmem:[#allocation55_spill] sm:$0xff] }
 0x190   : > { %v2729_v2 = vshll.u32 %v6159_v19, 16  ;;  %v2724_v57 = vsel %vm2680_vm4, %v2719_v63, %v2723_v13  ;;  %v2733_v58 = vshrl.u32 %v6159_v19, 16  ;;  %v4771_v11 = vshll.u32 %v9138_v45, 16  ;;  %v10157_v13 = vld [vmem:[#allocation44_spill] sm:$0xff]  ;;  %v9209_v45 = vld [vmem:[%s9840_s1 + $0x20] sm:$0xff]  }
 0x191   : > { %v6160_v56 = vcombine.low %v10153_v55, %v10150_v47  ;;  %v10156_v12 = vmul.bf16 %v10154_v3, %v10155_v6  ;;  %v10159_v27 = vmul.bf16 %v10157_v13, %v10158_v48  ;;  %v4748_v8 = vsel %vm1420_vm8, %v4738_v20, %v4747_v22  ;;  %v10161_v55 = vld [vmem:[#allocation54_spill] sm:$0xff]  ;;  %10166 = vst [vmem:[#allocation6_spill] sm:$0xff] %v9209_v45 }
 0x192   : > { %v2731_v31 = vrot.slane %v2729_v2, 1  ;;  %v4756_v14 = vor.u32 %v4755_v10, %v4752_v26  ;;  %v10162_v34 = vmul.bf16 %v10160_v32, %v10161_v55  ;;  %v10165_v2 = vmul.bf16 %v10163_v39, %v10164_v33  ;;  %6864 = vmatprep.subr.bf16.mxu1 %v9209_v45  ;;  %6785 = vmatmul.mubr.msk.bf16.gmra.mrb[20].mxu0 %vm1127_vm0, %v4739_v7  ;;  %v10174_v39 = vld [vmem:[#allocation70_spill] sm:$0xff] }
 0x193   : > { %v6161_v63 = vcombine.low %v10159_v27, %v10156_v12  ;;  %v2737_v47 = vshll.u32 %v6160_v56, 16  ;;  %v4770_v26 = vrot.slane %v4768_v18, 3  ;;  %v2741_v10 = vshrl.u32 %v6160_v56, 16  ;;  %6788 = vmatprep.mubr.msk.bf16.mxu0 %vm1127_vm0, %v4748_v8  ;;  %v10172_v18 = vld [vmem:[#allocation58_spill] sm:$0xff]  ;;  %v10175_v8 = vld [vmem:[#allocation71_spill] sm:$0xff] }
 0x194   : > { %v6162_v19 = vcombine.low %v10165_v2, %v10162_v34  ;;  %v9213_v6 = vsel %vm2680_vm4, %v2727_v44, %v2731_v31  ;;  %v2735_v20 = vor.u32 %v2733_v58, %v2731_v31  ;;  %v4773_v48 = vrot.slane %v4771_v11, 4  ;;  %v10169_v44 = vld [vmem:[#allocation61_spill] sm:$0xff]  ;;  %v10171_v31 = vld [vmem:[#allocation59_spill] sm:$0xff] }
 0x195   : > { %v2739_v12 = vrot.slane %v2737_v47, 1  ;;  %v2745_v27 = vshll.u32 %v6161_v63, 16  ;;  %v9218_v34 = vcombine.low %v9049_v42, %v9049_v42  ;;  %v4765_v33 = vor.u32 %v4764_v15, %v4761_v62  ;;  %v10177_v15 = vld [vmem:[#allocation65_spill] sm:$0xff]  ;;  %6633 = vmatmul.mubr.msk.bf16.gmra.mrb[4].mxu1 %vm1127_vm0, %v2716_v1 }
 0x196   : > { %v2753_v55 = vshll.u32 %v6162_v19, 16  ;;  %v2749_v2 = vshrl.u32 %v6161_v63, 16  ;;  %v10170_v37 = vmul.bf16 %v10168_v36, %v10169_v44  ;;  %v10173_v56 = vmul.bf16 %v10171_v31, %v10172_v18  ;;  %v10178_v63 = vld [vmem:[#allocation67_spill] sm:$0xff]  ;;  %6636 = vmatprep.mubr.msk.bf16.mxu1 %vm1127_vm0, %v2724_v57  ;;  %v9364_v31 = vld [vmem:[%s7391_s6 + $0x5c] sm:$0xf] }
 0x197   : > { %10167 = vst [vmem:[#allocation7_spill] sm:$0xff] %v9218_v34  ;;  %v2740_v7 = vsel %vm2680_vm4, %v2735_v20, %v2739_v12  ;;  %v2743_v11 = vor.u32 %v2741_v10, %v2739_v12  ;;  %v2747_v47 = vrot.slane %v2745_v27, 1  ;;  %v4757_v23 = vsel %vm1420_vm8, %v4747_v22, %v4756_v14  ;;  %v10180_v27 = vld [vmem:[#allocation76_spill] sm:$0xff]  ;;  %10210 = vst [vmem:[#allocation15_spill] sm:$0xff] %v9364_v31  ;;  %v10211_v36 = vld [vmem:[#allocation69_spill] sm:$0xff] }
 0x198   : > { %v6163_v58 = vcombine.low %v10173_v56, %v10170_v37  ;;  %v2755_v45 = vrot.slane %v2753_v55, 1  ;;  %v2757_v42 = vshrl.u32 %v6162_v19, 16  ;;  %v10176_v62 = vmul.bf16 %v10174_v39, %v10175_v8  ;;  %v10181_v55 = vld [vmem:[#allocation75_spill] sm:$0xff]  ;;  %v10183_v8 = vld [vmem:[#allocation74_spill] sm:$0xff] }
 0x199   : > { %v10179_v32 = vmul.bf16 %v10177_v15, %v10178_v63  ;;  %v4774_v18 = vor.u32 %v4773_v48, %v4770_v26  ;;  %v9237_v37 = vsel %vm2680_vm4, %v2743_v11, %v2747_v47  ;;  %v2751_v20 = vor.u32 %v2749_v2, %v2747_v47  ;;  %v10187_v11 = vld [vmem:[#allocation85_spill] sm:$0xff]  ;;  %v10189_v47 = vld [vmem:[#allocation80_spill] sm:$0xff]  ;;  %v10217_v31 = vld [vmem:[#allocation3_spill] sm:$0xff] }
 0x19a   : > { %v2761_v34 = vshll.u32 %v6163_v58, 16  ;;  %v2765_v10 = vshrl.u32 %v6163_v58, 16  ;;  %v2759_v22 = vor.u32 %v2757_v42, %v2755_v45  ;;  %v10182_v56 = vmul.bf16 %v10180_v27, %v10181_v55  ;;  %v10186_v58 = vld [vmem:[#allocation83_spill] sm:$0xff]  ;;  %v10190_v42 = vld [vmem:[#allocation81_spill] sm:$0xff]  ;;  %6789 = vmatmul.mubr.msk.bf16.gmra.mrb[24].mxu0 %vm1127_vm0, %v4757_v23  ;;  %v10207_v27 = vld [vmem:[#allocation60_spill] sm:$0xff] }
 0x19b   : > { %v6164_v44 = vcombine.low %v10179_v32, %v10176_v62  ;;  %v10184_v32 = vld [vmem:[#allocation73_spill] sm:$0xff]  ;;  %v4766_v26 = vsel %vm1420_vm8, %v4756_v14, %v4765_v33  ;;  %v9248_v48 = vsel %vm2680_vm4, %v2751_v20, %v2755_v45  ;;  %v10188_v57 = vmul.bf16 %v10186_v58, %v10187_v11 }
 0x19c   : > { %v2763_v19 = vrot.slane %v2761_v34, 1  ;;  %v10185_v62 = vmul.bf16 %v10183_v8, %v10184_v32  ;;  %v10191_v34 = vmul.bf16 %v10189_v47, %v10190_v42  ;;  %v4775_v14 = vsel %vm1420_vm8, %v4765_v33, %v4774_v18  ;;  %v7243_v45 = vld [vmem:[%s7391_s6 + $0x1c] sm:$0xf]  ;;  %v10194_v42 = vld [vmem:[#allocation88_spill] sm:$0xff]  ;;  %6792 = vmatprep.mubr.msk.bf16.mxu0 %vm1127_vm0, %v4766_v26  ;;  %v9281_v26 = vld [vmem:[%s7391_s6 + $0x28] sm:$0xf] }
 0x19d   : > { %v2769_v12 = vshll.u32 %v6164_v44, 16  ;;  %v2773_v2 = vshrl.u32 %v6164_v44, 16  ;;  %v7244_v44 = vld [vmem:[%s7391_s6 + $0x18] sm:$0xf]  ;;  %6637 = vmatmul.mubr.msk.bf16.gmra.mrb[8].mxu1 %vm1127_vm0, %v9213_v6 }
 0x19e   : > { %v6165_v1 = vcombine.low %v10185_v62, %v10182_v56  ;;  %v6166_v63 = vcombine.low %v10191_v34, %v10188_v57  ;;  %v9257_v15 = vsel %vm2680_vm4, %v2759_v22, %v2763_v19  ;;  %v2767_v55 = vor.u32 %v2765_v10, %v2763_v19  ;;  %v10192_v11 = vld [vmem:[#allocation89_spill] sm:$0xff]  ;;  %v10195_v22 = vld [vmem:[#allocation87_spill] sm:$0xff]  ;;  %6640 = vmatprep.mubr.msk.bf16.mxu1 %vm1127_vm0, %v2740_v7 }
 0x19f   : > { %v2771_v32 = vrot.slane %v2769_v12, 1  ;;  %v6332_v20 = vcombine.low %v7244_v44, %v7243_v45  ;;  %v10193_v57 = vmul.bf16 %v8664_v35, %v10192_v11  ;;  %v10196_v34 = vmul.bf16 %v10194_v42, %v10195_v22  ;;  %v1820_v19 = vld [vmem:[%s7391_s6 + $0x88] sm:$0x1]  ;;  %v10197_v11 = vld [vmem:[#allocation98_spill] sm:$0xff]  ;;  %v10201_v6 = vld [vmem:[#allocation49_spill] sm:$0xff] }
 0x1a0   : > { %v2777_v56 = vshll.u32 %v6165_v1, 16  ;;  %v2785_v62 = vshll.u32 %v6166_v63, 16  ;;  %v2781_v18 = vshrl.u32 %v6165_v1, 16  ;;  %v2789_v45 = vshrl.u32 %v6166_v63, 16  ;;  %v10199_v22 = vld [vmem:[#allocation94_spill] sm:$0xff]  ;;  %v10206_v8 = vld [vmem:[#allocation57_spill] sm:$0xff] }
 0x1a1   : > { %v6167_v47 = vcombine.low %v10196_v34, %v10193_v57  ;;  %v9271_v10 = vsel %vm2680_vm4, %v2767_v55, %v2771_v32  ;;  %v2775_v23 = vor.u32 %v2773_v2, %v2771_v32  ;;  %v10198_v35 = vmul.bf16 %v8792_v24, %v10197_v11  ;;  %v9284_v55 = vld [vmem:[%s7391_s6 + $0x2c] sm:$0xf]  ;;  %v10208_v24 = vld [vmem:[#allocation66_spill] sm:$0xff] }
 0x1a2   : > { %v2779_v33 = vrot.slane %v2777_v56, 1  ;;  %v2787_v12 = vrot.slane %v2785_v62, 1  ;;  %v10200_v57 = vmul.bf16 %v8718_v51, %v10199_v22  ;;  %v9296_v22 = vld [vmem:[%s7391_s6 + $0x30] sm:$0xf]  ;;  %6793 = vmatmul.mubr.msk.bf16.gmra.mrb[28].mxu0 %vm1127_vm0, %v4775_v14  ;;  %v9338_v14 = vld [vmem:[%s7391_s6 + $0x48] sm:$0xf]  ;;  %v3236_v39 = vor.u32 %v10207_v27, %v10206_v8 }
 0x1a3   : > { %v2793_v44 = vshll.u32 %v6167_v47, 16  ;;  %v2797_v32 = vshrl.u32 %v6167_v47, 16  ;;  %6798 = vmatprep.mubr.msk.bf16.mxu0 %vm1127_vm0, %v6332_v20  ;;  %v3242_v20 = vshll.u32 %v10208_v24, 16 }
 0x1a4   : > { %v6168_v34 = vcombine.low %v10200_v57, %v10198_v35  ;;  %v9289_v2 = vsel %vm2680_vm4, %v2775_v23, %v2779_v33  ;;  %v2783_v63 = vor.u32 %v2781_v18, %v2779_v33  ;;  %v2791_v56 = vor.u32 %v2789_v45, %v2787_v12  ;;  %v9299_v57 = vld [vmem:[%s7391_s6 + $0x34] sm:$0xf]  ;;  %v10205_v45 = vld [vmem:[#allocation50_spill] sm:$0xff] }
 0x1a5   : > { %v2795_v62 = vrot.slane %v2793_v44, 1  ;;  %v2593_v35 = vmul.bf16 %v8762_v25, %v1820_v19  ;;  %v10202_v33 = vmul.bf16 %v10201_v6, %v8085_v43  ;;  %v10203_v18 = vld [vmem:[#allocation48_spill] sm:$0xff]  ;;  %v3221_v44 = vshrl.u32 %v10205_v45, 16  ;;  %v9322_v6 = vld [vmem:[%s7391_s6 + $0x3c] sm:$0xf]  ;;  %6641 = vmatmul.mubr.msk.bf16.gmra.mrb[12].mxu1 %vm1127_vm0, %v9237_v37 }
 0x1a6   : > { %v2801_v11 = vshll.u32 %v6168_v34, 16  ;;  %v9304_v47 = vsel %vm2680_vm4, %v2783_v63, %v2787_v12  ;;  %v10204_v19 = vmul.bf16 %v10203_v18, %v8019_v4  ;;  %v3224_v43 = vshll.u32 %v10205_v45, 16  ;;  %v9319_v4 = vld [vmem:[%s7391_s6 + $0x38] sm:$0xf]  ;;  %6644 = vmatprep.mubr.msk.bf16.mxu1 %vm1127_vm0, %v9248_v48 }
 0x1a7   : > { %v9314_v1 = vsel %vm2680_vm4, %v2791_v56, %v2795_v62  ;;  %v2799_v25 = vor.u32 %v2797_v32, %v2795_v62  ;;  %v6169_v42 = vcombine.low %v2593_v35, %v2593_v35  ;;  %v3223_v58 = vrot.slane %v3221_v44, 3  ;;  %v9327_v32 = vld [vmem:[%s7391_s6 + $0x40] sm:$0xf]  ;;  %v9330_v62 = vld [vmem:[%s7391_s6 + $0x44] sm:$0xf] }
 0x1a8   : > { %v6189_v7 = vcombine.low %v10204_v19, %v10202_v33  ;;  %v2803_v23 = vrot.slane %v2801_v11, 1  ;;  %v9341_v33 = vld [vmem:[%s7391_s6 + $0x4c] sm:$0xf]  ;;  %v2805_v19 = vshrl.u32 %v6168_v34, 16  ;;  %v3226_v44 = vrot.slane %v3224_v43, 4 }
 0x1a9   : > { %v9347_v56 = vld [vmem:[%s7391_s6 + $0x50] sm:$0xf]  ;;  %v9350_v11 = vld [vmem:[%s7391_s6 + $0x54] sm:$0xf]  ;;  %v3239_v18 = vshrl.u32 %v10208_v24, 16  ;;  %v2809_v34 = vshll.u32 %v6169_v42, 16 }
 0x1aa   : > { %v3213_v12 = vshrl.u32 %v6189_v7, 16  ;;  %v3216_v63 = vshll.u32 %v6189_v7, 16  ;;  %v9335_v35 = vsel %vm2680_vm4, %v2799_v25, %v2803_v23  ;;  %v2807_v51 = vor.u32 %v2805_v19, %v2803_v23  ;;  %v9361_v43 = vld [vmem:[%s7391_s6 + $0x58] sm:$0xf]  ;;  %v10214_v23 = vld [vmem:[#allocation79_spill] sm:$0xff] }
 0x1ab   : > { %10209 = vst [vmem:[#allocation10_spill] sm:$0xff] %v9361_v43  ;;  %v3241_v8 = vrot.slane %v3239_v18, 3  ;;  %v3244_v25 = vrot.slane %v3242_v20, 4  ;;  %v3248_v24 = vshrl.u32 %v10211_v36, 16  ;;  %v3251_v37 = vshll.u32 %v10211_v36, 16  ;;  %v10216_v36 = vld [vmem:[#allocation2_spill] sm:$0xff] }
 0x1ac   : > { %v3215_v7 = vrot.slane %v3213_v12, 3  ;;  %v3218_v45 = vrot.slane %v3216_v63, 4  ;;  %v3227_v63 = vor.u32 %v3226_v44, %v3223_v58  ;;  %v3257_v19 = vshrl.u32 %v10214_v23, 16 }
 0x1ad   : > { %v3245_v44 = vor.u32 %v3244_v25, %v3241_v8  ;;  %v3250_v48 = vrot.slane %v3248_v24, 3  ;;  %v3260_v20 = vshll.u32 %v10214_v23, 16  ;;  %v3253_v27 = vrot.slane %v3251_v37, 4  ;;  %v10219_v25 = vld [vmem:[#allocation93_spill] sm:$0xff]  ;;  %v9404_v24 = vld [vmem:[%s7391_s6 + $0x68] sm:$0xf]  ;;  %6645 = vmatmul.mubr.msk.bf16.gmra.mrb[16].mxu1 %vm1127_vm0, %v9257_v15 }
 0x1ae   : > { %v3219_v12 = vor.u32 %v3218_v45, %v3215_v7  ;;  %v9375_v58 = vsel %vm1420_vm8, %v3227_v63, %v3236_v39  ;;  %v9380_v7 = vld [vmem:[%s7391_s6 + $0x60] sm:$0xf]  ;;  %v9383_v45 = vld [vmem:[%s7391_s6 + $0x64] sm:$0xf]  ;;  %v10218_v43 = vcombine.low %v10216_v36, %v10217_v31  ;;  %v3275_v8 = vshrl.u32 %v10219_v25, 16  ;;  %6648 = vmatprep.mubr.msk.bf16.mxu1 %vm1127_vm0, %v9271_v10 }
 0x1af   : > { %10213 = vst [vmem:[#allocation13_spill] sm:$0xff] %v9375_v58  ;;  %v10215_v58 = vld [vmem:[#allocation82_spill] sm:$0xff]  ;;  %v9394_v13 = vsel %vm1420_vm8, %v3236_v39, %v3245_v44  ;;  %v3262_v3 = vrot.slane %v3260_v20, 4  ;;  %v3278_v37 = vshll.u32 %v10219_v25, 16  ;;  %v10227_v25 = vld [vmem:[#allocation9_spill] sm:$0xff]  ;;  %v10231_v10 = vcombine.low %v9296_v22, %v9299_v57 }
 0x1b0   : > { %v9372_v42 = vsel %vm1420_vm8, %v3219_v12, %v3227_v63  ;;  %v2811_v12 = vrot.slane %v2809_v34, 1  ;;  %v3259_v63 = vrot.slane %v3257_v19, 3  ;;  %6799 = vmatmul.mubr.msk.bf16.vlgmr.msra.gmra.mrb[0].mxu0 %vm1127_vm0, %v10218_v43  ;;  %v3269_v18 = vshll.u32 %v10215_v58, 16 }
 0x1b1   : > { %10212 = vst [vmem:[#allocation14_spill] sm:$0xff] %v9372_v42  ;;  %v3266_v42 = vshrl.u32 %v10215_v58, 16  ;;  %6831 = vmatpush3.bf16.msra.mxu0 %v8984_v41  ;;  %v10220_v34 = vcombine.low %v9281_v26, %v9284_v55  ;;  %v3254_v43 = vor.u32 %v3253_v27, %v3250_v48  ;;  %v3277_v41 = vrot.slane %v3275_v8, 3  ;;  %v10221_v55 = vld [vmem:[#allocation8_spill] sm:$0xff] }
 0x1b2   : > { %v9410_v58 = vsel %vm2680_vm4, %v2807_v51, %v2811_v12  ;;  %v3263_v23 = vor.u32 %v3262_v3, %v3259_v63  ;;  %v3271_v19 = vrot.slane %v3269_v18, 4  ;;  %v3280_v26 = vrot.slane %v3278_v37, 4  ;;  %v10229_v12 = vld [vmem:[#allocation96_spill] sm:$0xff] }
 0x1b3   : > { %6802 = vmatprep.mubr.msk.bf16.mxu0 %vm1127_vm0, %v10220_v34  ;;  %v3268_v39 = vrot.slane %v3266_v42, 3  ;;  %v9413_v20 = vsel %vm1420_vm8, %v3245_v44, %v3254_v43  ;;  %v10222_v36 = vmul.bf16 %v10221_v55, %v7683_v9  ;;  %v10223_v34 = vld [vmem:[#allocation4_spill] sm:$0xff]  ;;  %v10225_v42 = vld [vmem:[#allocation5_spill] sm:$0xff]  ;;  %v10228_v51 = vmul.bf16 %v10227_v25, %v10120_v53 }
 0x1b4   : > { %v10224_v31 = vmul.bf16 %v10223_v34, %v7634_v46  ;;  %v10226_v48 = vmul.bf16 %v10225_v42, %v7664_v0  ;;  %v9430_v18 = vsel %vm1420_vm8, %v3254_v43, %v3263_v23  ;;  %v3284_v9 = vshrl.u32 %v10229_v12, 16  ;;  %v10233_v42 = vld [vmem:[#allocation17_spill] sm:$0xff]  ;;  %v10235_v25 = vld [vmem:[#allocation16_spill] sm:$0xff] }
 0x1b5   : > { %v3272_v44 = vor.u32 %v3271_v19, %v3268_v39  ;;  %v3287_v63 = vshll.u32 %v10229_v12, 16  ;;  %v3281_v46 = vor.u32 %v3280_v26, %v3277_v41  ;;  %6649 = vmatmul.mubr.msk.bf16.gmra.mrb[20].mxu1 %vm1127_vm0, %v9289_v2  ;;  %v10239_v2 = vld [vmem:[#allocation23_spill] sm:$0xff] }
 0x1b6   : > { %v6367_v27 = vcombine.low %v10224_v31, %v10222_v36  ;;  %v6368_v3 = vcombine.low %v10228_v51, %v10226_v48  ;;  %v3286_v15 = vrot.slane %v3284_v9, 3  ;;  %v10230_v36 = vld [vmem:[#allocation100_spill] sm:$0xff]  ;;  %v10234_v48 = vmul.bf16 %v10233_v42, %v10124_v30  ;;  %6652 = vmatprep.mubr.msk.bf16.mxu1 %vm1127_vm0, %v9304_v47  ;;  %v10241_v42 = vld [vmem:[#allocation22_spill] sm:$0xff] }
 0x1b7   : > { %v9437_v53 = vsel %vm1420_vm8, %v3263_v23, %v3272_v44  ;;  %v3289_v55 = vrot.slane %v3287_v63, 4  ;;  %v9440_v43 = vsel %vm1420_vm8, %v3272_v44, %v3281_v46  ;;  %v3293_v34 = vshrl.u32 %v10230_v36, 16  ;;  %v10232_v23 = vld [vmem:[#allocation11_spill] sm:$0xff] }
 0x1b8   : > { %v5506_v0 = vshrl.u32 %v6367_v27, 16  ;;  %v5508_v8 = vshll.u32 %v6367_v27, 16  ;;  %v5513_v31 = vshll.u32 %v6368_v3, 16  ;;  %v5517_v37 = vshrl.u32 %v6368_v3, 16  ;;  %6803 = vmatmul.mubr.msk.bf16.gmra.mrb[4].mxu0 %vm1127_vm0, %v10231_v10 }
 0x1b9   : > { %v3290_v41 = vor.u32 %v3289_v55, %v3286_v15  ;;  %v3296_v26 = vshll.u32 %v10230_v36, 16  ;;  %v5521_v27 = vshll.u32 %v10232_v23, 16  ;;  %v10236_v51 = vmul.bf16 %v10235_v25, %v10127_v50  ;;  %v10238_v50 = vld [vmem:[#allocation101_spill] sm:$0xff] }
 0x1ba   : > { %v5510_v39 = vrot.slane %v5508_v8, 1  ;;  %v5515_v19 = vrot.slane %v5513_v31, 1  ;;  %v10237_v44 = vcombine.low %v9319_v4, %v9322_v6  ;;  %v3295_v12 = vrot.slane %v3293_v34, 3 }
 0x1bb   : > { %v6370_v3 = vcombine.low %v10236_v51, %v10234_v48  ;;  %v5525_v9 = vshrl.u32 %v10232_v23, 16  ;;  %v9461_v63 = vsel %vm1420_vm8, %v3281_v46, %v3290_v41  ;;  %v3298_v8 = vrot.slane %v3296_v26, 4 }
 0x1bc   : > { %6806 = vmatprep.mubr.msk.bf16.mxu0 %vm1127_vm0, %v10237_v44  ;;  %v5511_v22 = vor.u32 %v5510_v39, %v5506_v0  ;;  %v5519_v57 = vor.u32 %v5517_v37, %v5515_v19  ;;  %v5523_v31 = vrot.slane %v5521_v27, 1  ;;  %v3302_v55 = vshrl.u32 %v10238_v50, 16 }
 0x1bd   : > { %v5529_v30 = vshll.u32 %v6370_v3, 16  ;;  %v3305_v4 = vshll.u32 %v10238_v50, 16  ;;  %v3311_v6 = vshrl.u32 %v8882_v40, 16  ;;  %v3299_v0 = vor.u32 %v3298_v8, %v3295_v12  ;;  %6653 = vmatmul.mubr.msk.bf16.gmra.mrb[24].mxu1 %vm1127_vm0, %v9314_v1 }
 0x1be   : > { %v9464_v15 = vsel %vm2680_vm4, %v5511_v22, %v5515_v19  ;;  %v9472_v37 = vsel %vm2680_vm4, %v5519_v57, %v5523_v31  ;;  %v5527_v46 = vor.u32 %v5525_v9, %v5523_v31  ;;  %v3304_v19 = vrot.slane %v3302_v55, 3  ;;  %v10243_v22 = vld [vmem:[#allocation29_spill] sm:$0xff]  ;;  %6656 = vmatprep.mubr.msk.bf16.mxu1 %vm1127_vm0, %v9335_v35 }
 0x1bf   : > { %v5531_v39 = vrot.slane %v5529_v30, 1  ;;  %v3307_v36 = vrot.slane %v3305_v4, 4  ;;  %v3313_v34 = vrot.slane %v3311_v6, 3  ;;  %v3314_v10 = vshll.u32 %v8882_v40, 16  ;;  %v10245_v40 = vld [vmem:[#allocation28_spill] sm:$0xff] }
 0x1c0   : > { %v9478_v26 = vsel %vm1420_vm8, %v3290_v41, %v3299_v0  ;;  %v10240_v27 = vmul.bf16 %v10239_v2, %v10130_v59  ;;  %v10242_v48 = vmul.bf16 %v10241_v42, %v10133_v17  ;;  %v5533_v51 = vshrl.u32 %v6370_v3, 16 }
 0x1c1   : > { %v9481_v23 = vsel %vm2680_vm4, %v5527_v46, %v5531_v39  ;;  %v3308_v47 = vor.u32 %v3307_v36, %v3304_v19  ;;  %v3316_v44 = vrot.slane %v3314_v10, 4  ;;  %v10244_v57 = vmul.bf16 %v10243_v22, %v10136_v60 }
 0x1c2   : > { %v6371_v25 = vcombine.low %v10242_v48, %v10240_v27  ;;  %v10246_v41 = vmul.bf16 %v10245_v40, %v10139_v29  ;;  %v3320_v9 = vshrl.u32 %v8928_v16, 16  ;;  %v10247_v8 = vcombine.low %v9327_v32, %v9330_v62  ;;  %v10253_v48 = vld [vmem:[#allocation41_spill] sm:$0xff] }
 0x1c3   : > { %v5535_v59 = vor.u32 %v5533_v51, %v5531_v39  ;;  %v3323_v3 = vshll.u32 %v8928_v16, 16  ;;  %v10248_v30 = vcombine.low %v9338_v14, %v9341_v33  ;;  %v9506_v60 = vsel %vm1420_vm8, %v3299_v0, %v3308_v47  ;;  %v10249_v39 = vld [vmem:[#allocation35_spill] sm:$0xff]  ;;  %v10251_v33 = vld [vmem:[#allocation34_spill] sm:$0xff] }
 0x1c4   : > { %v6372_v12 = vcombine.low %v10246_v41, %v10244_v57  ;;  %6807 = vmatmul.mubr.msk.bf16.gmra.mrb[8].mxu0 %vm1127_vm0, %v10247_v8  ;;  %v5537_v17 = vshll.u32 %v6371_v25, 16  ;;  %v5541_v31 = vshrl.u32 %v6371_v25, 16  ;;  %v3317_v29 = vor.u32 %v3316_v44, %v3313_v34  ;;  %v10255_v25 = vld [vmem:[#allocation40_spill] sm:$0xff] }
 0x1c5   : > { %6810 = vmatprep.mubr.msk.bf16.mxu0 %vm1127_vm0, %v10248_v30  ;;  %v3322_v55 = vrot.slane %v3320_v9, 3  ;;  %v3325_v32 = vrot.slane %v3323_v3, 4  ;;  %v3329_v62 = vshrl.u32 %v8960_v5, 16  ;;  %v3332_v6 = vshll.u32 %v8960_v5, 16  ;;  %v10261_v3 = vld [vmem:[#allocation46_spill] sm:$0xff]  ;;  %v10262_v30 = vld [vmem:[#allocation44_spill] sm:$0xff]  ;;  %6657 = vmatmul.mubr.msk.bf16.gmra.mrb[28].mxu1 %vm1127_vm0, %v9410_v58 }
 0x1c6   : > { %v5545_v50 = vshll.u32 %v6372_v12, 16  ;;  %v5539_v4 = vrot.slane %v5537_v17, 1  ;;  %v9511_v46 = vsel %vm1420_vm8, %v3308_v47, %v3317_v29  ;;  %v10250_v14 = vmul.bf16 %v10249_v39, %v10142_v61  ;;  %v10259_v17 = vld [vmem:[#allocation45_spill] sm:$0xff] }
 0x1c7   : > { %v10252_v0 = vmul.bf16 %v10251_v33, %v10145_v52  ;;  %v5549_v36 = vshrl.u32 %v6372_v12, 16  ;;  %v3326_v5 = vor.u32 %v3325_v32, %v3322_v55  ;;  %v3331_v2 = vrot.slane %v3329_v62, 3  ;;  %v10264_v55 = vld [vmem:[#allocation10_spill] sm:$0xff] }
 0x1c8   : > { %v5547_v16 = vrot.slane %v5545_v50, 1  ;;  %v9522_v34 = vsel %vm2680_vm4, %v5535_v59, %v5539_v4  ;;  %v5543_v10 = vor.u32 %v5541_v31, %v5539_v4  ;;  %v3334_v27 = vrot.slane %v3332_v6, 4  ;;  %v10258_v59 = vld [vmem:[#allocation47_spill] sm:$0xff] }
 0x1c9   : > { %v6373_v19 = vcombine.low %v10252_v0, %v10250_v14  ;;  %v10254_v52 = vmul.bf16 %v10253_v48, %v10148_v28  ;;  %v10256_v51 = vmul.bf16 %v10255_v25, %v10151_v21  ;;  %v9536_v44 = vsel %vm1420_vm8, %v3317_v29, %v3326_v5  ;;  %v10265_v4 = vld [vmem:[#allocation15_spill] sm:$0xff]  ;;  %v5383_v14 = vld [vmem:[%s7391_s6 + $0x90] sm:$0xf] }
 0x1ca   : > { %v5551_v42 = vor.u32 %v5549_v36, %v5547_v16  ;;  %v9533_v1 = vsel %vm2680_vm4, %v5543_v10, %v5547_v16  ;;  %v3338_v57 = vshrl.u32 %v9012_v49, 16  ;;  %v3335_v35 = vor.u32 %v3334_v27, %v3331_v2  ;;  %v10268_v36 = vld [vmem:[#allocation55_spill] sm:$0xff]  ;;  %v10271_v2 = vld [vmem:[#allocation52_spill] sm:$0xff] }
 0x1cb   : > { %v5553_v61 = vshll.u32 %v6373_v19, 16  ;;  %v6374_v47 = vcombine.low %v10256_v51, %v10254_v52  ;;  %v5557_v22 = vshrl.u32 %v6373_v19, 16  ;;  %v3341_v12 = vshll.u32 %v9012_v49, 16  ;;  %v10267_v19 = vld [vmem:[#allocation56_spill] sm:$0xff]  ;;  %v10273_v51 = vld [vmem:[#allocation7_spill] sm:$0xff] }
 0x1cc   : > { %v10257_v28 = vcombine.low %v9347_v56, %v9350_v11  ;;  %v3340_v21 = vrot.slane %v3338_v57, 3  ;;  %v3347_v9 = vshrl.u32 %v9058_v54, 16  ;;  %v3350_v8 = vshll.u32 %v9058_v54, 16  ;;  %v10274_v57 = vld [vmem:[#allocation14_spill] sm:$0xff] }
 0x1cd   : > { %v5555_v40 = vrot.slane %v5553_v61, 1  ;;  %v5561_v41 = vshll.u32 %v6374_v47, 16  ;;  %v10260_v31 = vmul.bf16 %v10258_v59, %v10259_v17  ;;  %v10263_v29 = vmul.bf16 %v10261_v3, %v10262_v30  ;;  %6662 = vmatprep.mubr.msk.bf16.mxu1 %vm1127_vm0, %v10274_v57  ;;  %v10278_v59 = vld [vmem:[#allocation63_spill] sm:$0xff] }
 0x1ce   : > { %6811 = vmatmul.mubr.msk.bf16.gmra.mrb[12].mxu0 %vm1127_vm0, %v10257_v28  ;;  %v10266_v49 = vcombine.low %v10264_v55, %v10265_v4  ;;  %v9557_v56 = vsel %vm1420_vm8, %v3326_v5, %v3335_v35  ;;  %v3343_v62 = vrot.slane %v3341_v12, 4  ;;  %v3349_v6 = vrot.slane %v3347_v9, 3  ;;  %v10270_v5 = vld [vmem:[#allocation53_spill] sm:$0xff]  ;;  %v10275_v28 = vld [vmem:[#allocation64_spill] sm:$0xff]  ;;  %v10276_v9 = vld [vmem:[#allocation62_spill] sm:$0xff] }
 0x1cf   : > { %v6375_v50 = vcombine.low %v10263_v29, %v10260_v31  ;;  %v9560_v11 = vsel %vm2680_vm4, %v5551_v42, %v5555_v40  ;;  %v5559_v32 = vor.u32 %v5557_v22, %v5555_v40  ;;  %v5563_v54 = vrot.slane %v5561_v41, 1  ;;  %v5384_v22 = vld [vmem:[%s7391_s6 + $0x94] sm:$0xf]  ;;  %v10279_v17 = vld [vmem:[#allocation59_spill] sm:$0xff] }
 0x1d0   : > { %6814 = vmatprep.mubr.msk.bf16.mxu0 %vm1127_vm0, %v10266_v49  ;;  %v3352_v16 = vrot.slane %v3350_v8, 4  ;;  %v5565_v39 = vshrl.u32 %v6374_v47, 16  ;;  %v10269_v10 = vmul.bf16 %v10267_v19, %v10268_v36  ;;  %v10272_v27 = vmul.bf16 %v10270_v5, %v10271_v2  ;;  %v10287_v19 = vld [vmem:[#allocation68_spill] sm:$0xff]  ;;  %v10288_v36 = vld [vmem:[#allocation65_spill] sm:$0xff] }
 0x1d1   : > { %v9564_v33 = vsel %vm2680_vm4, %v5559_v32, %v5563_v54  ;;  %v5569_v0 = vshll.u32 %v6375_v50, 16  ;;  %v5573_v61 = vshrl.u32 %v6375_v50, 16  ;;  %v3344_v48 = vor.u32 %v3343_v62, %v3340_v21  ;;  %v10281_v21 = vld [vmem:[#allocation95_spill] sm:$0xff] }
 0x1d2   : > { %v6376_v42 = vcombine.low %v10272_v27, %v10269_v10  ;;  %v3353_v52 = vor.u32 %v3352_v16, %v3349_v6  ;;  %v5567_v25 = vor.u32 %v5565_v39, %v5563_v54  ;;  %v3356_v47 = vshrl.u32 %v10273_v51, 16  ;;  %v10282_v54 = vld [vmem:[#allocation99_spill] sm:$0xff]  ;;  %v10284_v39 = vld [vmem:[#allocation72_spill] sm:$0xff] }
 0x1d3   : > { %v5571_v40 = vrot.slane %v5569_v0, 1  ;;  %v3359_v12 = vshll.u32 %v10273_v51, 16  ;;  %v10277_v8 = vmul.bf16 %v10275_v28, %v10276_v9  ;;  %v10280_v31 = vmul.bf16 %v10278_v59, %v10279_v17  ;;  %v7262_v27 = vld [vmem:[%s7391_s6 + $0x70] sm:$0xf]  ;;  %v10297_v9 = vld [vmem:[#allocation102_spill] sm:$0xff] }
 0x1d4   : > { %v5577_v41 = vshll.u32 %v6376_v42, 16  ;;  %v5416_v3 = vmul.bf16 %v5383_v14, %v10281_v21  ;;  %v9587_v30 = vsel %vm1420_vm8, %v3335_v35, %v3344_v48  ;;  %v9590_v29 = vsel %vm1420_vm8, %v3344_v48, %v3353_v52  ;;  %v10285_v14 = vld [vmem:[#allocation70_spill] sm:$0xff]  ;;  %v10299_v21 = vld [vmem:[#allocation83_spill] sm:$0xff] }
 0x1d5   : > { %v6377_v58 = vcombine.low %v10280_v31, %v10277_v8  ;;  %v3358_v50 = vrot.slane %v3356_v47, 3  ;;  %v9593_v55 = vsel %vm2680_vm4, %v5567_v25, %v5571_v40  ;;  %v5575_v4 = vor.u32 %v5573_v61, %v5571_v40  ;;  %v7263_v61 = vld [vmem:[%s7391_s6 + $0x74] sm:$0xf]  ;;  %v10291_v48 = vld [vmem:[#allocation78_spill] sm:$0xff]  ;;  %v10294_v47 = vld [vmem:[#allocation77_spill] sm:$0xff] }
 0x1d6   : > { %v5579_v49 = vrot.slane %v5577_v41, 1  ;;  %v3361_v32 = vrot.slane %v3359_v12, 4  ;;  %v5417_v62 = vmul.bf16 %v5384_v22, %v10282_v54  ;;  %v10283_v6 = vcombine.low %v9380_v7, %v9383_v45  ;;  %v10292_v25 = vld [vmem:[#allocation76_spill] sm:$0xff]  ;;  %v10295_v22 = vld [vmem:[#allocation74_spill] sm:$0xff] }
 0x1d7   : > { %v5581_v35 = vshrl.u32 %v6376_v42, 16  ;;  %v5585_v16 = vshll.u32 %v6377_v58, 16  ;;  %v10286_v0 = vmul.bf16 %v10284_v39, %v10285_v14  ;;  %v10289_v10 = vmul.bf16 %v10287_v19, %v10288_v36  ;;  %v10298_v31 = vld [vmem:[#allocation86_spill] sm:$0xff]  ;;  %v10304_v39 = vld [vmem:[#allocation13_spill] sm:$0xff]  ;;  %v10306_v36 = vld [vmem:[#allocation92_spill] sm:$0xff] }
 0x1d8   : > { %6815 = vmatmul.mubr.msk.bf16.gmra.mrb[16].mxu0 %vm1127_vm0, %v10283_v6  ;;  %v10290_v2 = vcombine.low %v9404_v24, %v8865_v38  ;;  %v6343_v7 = vcombine.low %v7262_v27, %v7263_v61  ;;  %v9613_v45 = vsel %vm2680_vm4, %v5575_v4, %v5579_v49  ;;  %v3362_v42 = vor.u32 %v3361_v32, %v3358_v50  ;;  %v7264_v24 = vld [vmem:[%s7391_s6 + $0x78] sm:$0xf]  ;;  %v10301_v4 = vld [vmem:[#allocation84_spill] sm:$0xff]  ;;  %v10305_v14 = vld [vmem:[#allocation6_spill] sm:$0xff] }
 0x1d9   : > { %v6378_v5 = vcombine.low %v10289_v10, %v10286_v0  ;;  %v10293_v51 = vmul.bf16 %v10291_v48, %v10292_v25  ;;  %v10296_v57 = vmul.bf16 %v10294_v47, %v10295_v22  ;;  %v5583_v41 = vor.u32 %v5581_v35, %v5579_v49  ;;  %v10302_v32 = vld [vmem:[#allocation80_spill] sm:$0xff]  ;;  %6663 = vmatmul.mubr.msk.bf16.vlgmr.msra.gmra.mrb[0].mxu1 %vm1127_vm0, %v10304_v39  ;;  %v10307_v10 = vld [vmem:[#allocation90_spill] sm:$0xff]  ;;  %v10309_v27 = vld [vmem:[#allocation91_spill] sm:$0xff] }
 0x1da   : > { %6818 = vmatprep.mubr.msk.bf16.mxu0 %vm1127_vm0, %v10290_v2  ;;  %v5587_v12 = vrot.slane %v5585_v16, 1  ;;  %v5589_v28 = vshrl.u32 %v6377_v58, 16  ;;  %v6344_v8 = vcombine.low %v7264_v24, %v10297_v9  ;;  %v9624_v59 = vsel %vm1420_vm8, %v3353_v52, %v3362_v42  ;;  %6865 = vmatpush3.bf16.msra.mxu1 %v10305_v14  ;;  %v10310_v61 = vld [vmem:[#allocation88_spill] sm:$0xff] }
 0x1db   : > { %v6379_v40 = vcombine.low %v10296_v57, %v10293_v51  ;;  %v5593_v38 = vshll.u32 %v6378_v5, 16  ;;  %v10300_v50 = vmul.bf16 %v10298_v31, %v10299_v21  ;;  %v10303_v54 = vmul.bf16 %v10301_v4, %v10302_v32  ;;  %6666 = vmatprep.mubr.msk.bf16.mxu1 %vm1127_vm0, %v9394_v13  ;;  %v10312_v21 = vld [vmem:[#allocation103_spill] sm:$0xff]  ;;  %v10314_v32 = vld [vmem:[#allocation105_spill] sm:$0xff] }
 0x1dc   : > { %v9635_v58 = vsel %vm2680_vm4, %v5583_v41, %v5587_v12  ;;  %v5591_v49 = vor.u32 %v5589_v28, %v5587_v12  ;;  %v5597_v16 = vshrl.u32 %v6378_v5, 16  ;;  %v10308_v2 = vmul.bf16 %v10306_v36, %v10307_v10  ;;  %v7283_v36 = vld [vmem:[%s7391_s6 + $0x88] sm:$0xf] }
 0x1dd   : > { %v5601_v17 = vshll.u32 %v6379_v40, 16  ;;  %v6380_v6 = vcombine.low %v10303_v54, %v10300_v50  ;;  %v5595_v35 = vrot.slane %v5593_v38, 1  ;;  %v5605_v0 = vshrl.u32 %v6379_v40, 16 }
 0x1de   : > { %v10311_v42 = vmul.bf16 %v10309_v27, %v10310_v61  ;;  %v9647_v47 = vcombine.low %v5416_v3, %v5417_v62 }
 0x1df   : > { %v5603_v52 = vrot.slane %v5601_v17, 1  ;;  %v5609_v19 = vshll.u32 %v6380_v6, 16  ;;  %v5596_v25 = vsel %vm2680_vm4, %v5591_v49, %v5595_v35  ;;  %v5599_v51 = vor.u32 %v5597_v16, %v5595_v35  ;;  %v7266_v17 = vld [vmem:[%s7391_s6 + $0x84] sm:$0xf]  ;;  %v7280_v49 = vld [vmem:[%s7391_s6 + $0x80] sm:$0xf] }
 0x1e0   : > { %v6381_v48 = vcombine.low %v10311_v42, %v10308_v2  ;;  %v5613_v13 = vshrl.u32 %v6380_v6, 16  ;;  %6819 = vmatmul.mubr.msk.bf16.gmra.mrb[20].mxu0 %vm1127_vm0, %v6343_v7  ;;  %v5625_v41 = vshll.u32 %v9647_v47, 16  ;;  %v7265_v7 = vld [vmem:[%s7391_s6 + $0x80] sm:$0xf]  ;;  %v5629_v39 = vshrl.u32 %v9647_v47, 16 }
 0x1e1   : > { %v5607_v5 = vor.u32 %v5605_v0, %v5603_v52  ;;  %v5611_v22 = vrot.slane %v5609_v19, 1  ;;  %v5604_v40 = vsel %vm2680_vm4, %v5599_v51, %v5603_v52  ;;  %6822 = vmatprep.mubr.msk.bf16.mxu0 %vm1127_vm0, %v6344_v8  ;;  %6667 = vmatmul.mubr.msk.bf16.gmra.mrb[4].mxu1 %vm1127_vm0, %v9413_v20  ;;  %v6345_v31 = vcombine.low %v7265_v7, %v7266_v17  ;;  %v7267_v8 = vld [vmem:[%s7391_s6 + $0x88] sm:$0xf]  ;;  %v10313_v20 = vld [vmem:[#allocation104_spill] sm:$0xff]  ;;  %v7281_v35 = vld [vmem:[%s7391_s6 + $0x84] sm:$0xf] }
 0x1e2   : > { %v5617_v57 = vshll.u32 %v6381_v48, 16  ;;  %v5621_v62 = vshrl.u32 %v6381_v48, 16  ;;  %v9654_v38 = vrot.slane %v5625_v41, 1  ;;  %6670 = vmatprep.mubr.msk.bf16.mxu1 %vm1127_vm0, %v9430_v18  ;;  %v6346_v50 = vcombine.low %v7267_v8, %v10312_v21  ;;  %v7268_v18 = vld [vmem:[%s7391_s6 + $0x50] sm:$0xf] }
 0x1e3   : > { %v5612_v12 = vsel %vm2680_vm4, %v5607_v5, %v5611_v22  ;;  %v5615_v28 = vor.u32 %v5613_v13, %v5611_v22  ;;  %v6347_v54 = vcombine.low %v10314_v32, %v10313_v20  ;;  %v6239_v16 = vcombine.low %v7280_v49, %v7281_v35  ;;  %v7282_v19 = vld [vmem:[%s7391_s6 + $0x8c] sm:$0xf] }
 0x1e4   : > { %v5619_v3 = vrot.slane %v5617_v57, 1  ;;  %v5631_v14 = vor.u32 %v5629_v39, %v9654_v38  ;;  %v6240_v10 = vcombine.low %v7283_v36, %v7282_v19 }
 0x1e6   : > { %v5620_v24 = vsel %vm2680_vm4, %v5615_v28, %v5619_v3  ;;  %v5623_v9 = vor.u32 %v5621_v62, %v5619_v3  ;;  %v9760_v62 = vld [vmem:[%s9842_s3] ss:$0 sm:$0xff] }
 0x1e8   : > { %v5628_v4 = vsel %vm2680_vm4, %v5623_v9, %v9654_v38  ;;  %6823 = vmatmul.mubr.msk.bf16.gmra.mrb[24].mxu0 %vm1127_vm0, %v6345_v31 }
 0x1e9   : > { %6826 = vmatprep.mubr.msk.bf16.mxu0 %vm1127_vm0, %v6346_v50  ;;  %6671 = vmatmul.mubr.msk.bf16.gmra.mrb[8].mxu1 %vm1127_vm0, %v9437_v53  ;;  %v7269_v53 = vld [vmem:[%s7391_s6 + $0x54] sm:$0xf] }
 0x1ea   : > { %6674 = vmatprep.mubr.msk.bf16.mxu1 %vm1127_vm0, %v9440_v43  ;;  %v6233_v43 = vcombine.low %v7268_v18, %v7269_v53 }
 0x1f0   : > { %6827 = vmatmul.mubr.msk.bf16.gmra.mrb[28].mxu0 %vm1127_vm0, %v6347_v54 }
 0x1f1   : > { %6832 = vmatprep.mubr.msk.bf16.mxu0 %vm1127_vm0, %v9464_v15  ;;  %6675 = vmatmul.mubr.msk.bf16.gmra.mrb[12].mxu1 %vm1127_vm0, %v9461_v63  ;;  %v7270_v63 = vld [vmem:[%s7391_s6 + $0x58] sm:$0xf]  ;;  %v7271_v15 = vld [vmem:[%s7391_s6 + $0x5c] sm:$0xf] }
 0x1f2   : > { %6678 = vmatprep.mubr.msk.bf16.mxu1 %vm1127_vm0, %v9478_v26  ;;  %v7272_v26 = vld [vmem:[%s7391_s6 + $0x60] sm:$0xf] }
 0x1f8   : > { %6833 = vmatmul.mubr.msk.bf16.vlgmr.msra.gmra.mrb[0].mxu0 %vm1127_vm0, %v9472_v37  ;;  %v6234_v37 = vcombine.low %v7270_v63, %v7271_v15 }
 0x1f9   : > { %6836 = vmatprep.mubr.msk.bf16.mxu0 %vm1127_vm0, %v9481_v23  ;;  %6679 = vmatmul.mubr.msk.bf16.gmra.mrb[16].mxu1 %vm1127_vm0, %v9506_v60  ;;  %v7273_v23 = vld [vmem:[%s7391_s6 + $0x64] sm:$0xf] }
 0x1fa   : > { %6682 = vmatprep.mubr.msk.bf16.mxu1 %vm1127_vm0, %v9511_v46  ;;  %v6235_v60 = vcombine.low %v7272_v26, %v7273_v23  ;;  %v5385_v46 = vld [vmem:[%s7391_s6 + $0x98] sm:$0x1] }
 0x200   : > { %6837 = vmatmul.mubr.msk.bf16.gmra.mrb[4].mxu0 %vm1127_vm0, %v9522_v34  ;;  %v7274_v34 = vld [vmem:[%s7391_s6 + $0x68] sm:$0xf] }
 0x201   : > { %6840 = vmatprep.mubr.msk.bf16.mxu0 %vm1127_vm0, %v9533_v1  ;;  %6683 = vmatmul.mubr.msk.bf16.gmra.mrb[20].mxu1 %vm1127_vm0, %v9536_v44  ;;  %v7275_v1 = vld [vmem:[%s7391_s6 + $0x6c] sm:$0xf] }
 0x202   : > { %6686 = vmatprep.mubr.msk.bf16.mxu1 %vm1127_vm0, %v9557_v56  ;;  %v6236_v44 = vcombine.low %v7274_v34, %v7275_v1  ;;  %v7276_v56 = vld [vmem:[%s7391_s6 + $0x70] sm:$0xf] }
 0x208   : > { %6841 = vmatmul.mubr.msk.bf16.gmra.mrb[8].mxu0 %vm1127_vm0, %v9560_v11  ;;  %v7277_v11 = vld [vmem:[%s7391_s6 + $0x74] sm:$0xf] }
 0x209   : > { %6844 = vmatprep.mubr.msk.bf16.mxu0 %vm1127_vm0, %v9564_v33  ;;  %6687 = vmatmul.mubr.msk.bf16.gmra.mrb[24].mxu1 %vm1127_vm0, %v9587_v30  ;;  %v6237_v33 = vcombine.low %v7276_v56, %v7277_v11  ;;  %v10315_v30 = vld [vmem:[#allocation97_spill] sm:$0xff] }
 0x20a   : > { %6690 = vmatprep.mubr.msk.bf16.mxu1 %vm1127_vm0, %v9590_v29  ;;  %v5418_v29 = vmul.bf16 %v5385_v46, %v10315_v30 }
 0x210   : > { %6845 = vmatmul.mubr.msk.bf16.gmra.mrb[12].mxu0 %vm1127_vm0, %v9593_v55  ;;  %v6383_v55 = vcombine.low %v5418_v29, %v5418_v29 }
 0x211   : > { %6848 = vmatprep.mubr.msk.bf16.mxu0 %vm1127_vm0, %v9613_v45  ;;  %6691 = vmatmul.mubr.msk.bf16.gmra.mrb[28].mxu1 %vm1127_vm0, %v9624_v59  ;;  %v7278_v45 = vld [vmem:[%s7391_s6 + $0x78] sm:$0xf]  ;;  %v7279_v59 = vld [vmem:[%s7391_s6 + $0x7c] sm:$0xf] }
 0x212   : > { %6712 = vmatprep.mubr.msk.bf16.mxu1 %vm1127_vm0, %v6233_v43  ;;  %v6238_v6 = vcombine.low %v7278_v45, %v7279_v59 }
 0x218   : > { %6849 = vmatmul.mubr.msk.bf16.gmra.mrb[16].mxu0 %vm1127_vm0, %v9635_v58  ;;  %v5633_v58 = vshll.u32 %v6383_v55, 16 }
 0x219   : > { %6852 = vmatprep.mubr.msk.bf16.mxu0 %vm1127_vm0, %v5596_v25  ;;  %6713 = vmatmul.mubr.msk.bf16.vlgmr.msra.gmra.mrb[16].mxu1 %vm1127_vm0, %v6234_v37 }
 0x21a   : > { %6716 = vmatprep.mubr.msk.bf16.mxu1 %vm1127_vm0, %v6235_v60  ;;  %v5635_v52 = vrot.slane %v5633_v58, 1 }
 0x21c   : > { %v5636_v0 = vsel %vm2680_vm4, %v5631_v14, %v5635_v52 }
 0x220   : > { %6853 = vmatmul.mubr.msk.bf16.gmra.mrb[20].mxu0 %vm1127_vm0, %v5604_v40 }
 0x221   : > { %6856 = vmatprep.mubr.msk.bf16.mxu0 %vm1127_vm0, %v5612_v12  ;;  %6717 = vmatmul.mubr.msk.bf16.gmra.mrb[20].mxu1 %vm1127_vm0, %v6236_v44 }
 0x222   : > { %6720 = vmatprep.mubr.msk.bf16.mxu1 %vm1127_vm0, %v6237_v33 }
 0x228   : > { %6857 = vmatmul.mubr.msk.bf16.gmra.mrb[24].mxu0 %vm1127_vm0, %v5620_v24 }
 0x229   : > { %6860 = vmatprep.mubr.msk.bf16.mxu0 %vm1127_vm0, %v5628_v4  ;;  %6721 = vmatmul.mubr.msk.bf16.gmra.mrb[24].mxu1 %vm1127_vm0, %v6238_v6 }
 0x22a   : > { %6724 = vmatprep.mubr.msk.bf16.mxu1 %vm1127_vm0, %v6239_v16 }
 0x230   : > { %6861 = vmatmul.mubr.msk.bf16.gmra.mrb[28].mxu0 %vm1127_vm0, %v5636_v0 }
 0x231   : > { %6725 = vmatmul.mubr.msk.bf16.gmra.mrb[28].mxu1 %vm1127_vm0, %v6240_v10 }
 0x2ac   : > { %v6664_v2 = vpop.f32.mrb[0].mxu1 }
 0x2ad   : > { %v3452_v27 = vpop.f32.mrb[1].mxu1 }
 0x2ae   : > { %v6665_v61 = vpop.f32.mrb[2].mxu1 }
 0x2af   : > { %v3455_v42 = vpop.f32.mrb[3].mxu1 }
 0x2b4   : > { %v6668_v48 = vpop.f32.mrb[4].mxu1 }
 0x2b5   : > { %v3468_v25 = vpop.f32.mrb[5].mxu1 }
 0x2b6   : > { %v6669_v51 = vpop.f32.mrb[6].mxu1 }
 0x2b7   : > { %v3471_v47 = vpop.f32.mrb[7].mxu1 }
 0x2bc   : > { %v6672_v5 = vpop.f32.mrb[8].mxu1 }
 0x2bd   : > { %v3484_v22 = vpop.f32.mrb[9].mxu1 }
 0x2be   : > { %v6673_v13 = vpop.f32.mrb[10].mxu1 }
 0x2bf   : > { %v3487_v57 = vpop.f32.mrb[11].mxu1 }
 0x2c4   : > { %v9749_v40 = vpop.f32.mrb[12].mxu1 }
 0x2c5   : > { %v9751_v41 = vpop.f32.mrb[13].mxu1 }
 0x2c6   : > { %v9753_v12 = vpop.f32.mrb[14].mxu1 }
 0x2c7   : > { %v9755_v28 = vpop.f32.mrb[15].mxu1 }
 0x2cb   : > { %v6834_v3 = vpop.f32.mrb[0].mxu0 }
 0x2cc   : > { %v6866_v38 = vadd.f32 %v6834_v3, %v6664_v2  ;;  %v5725_v24 = vpop.f32.mrb[1].mxu0 }
 0x2cd   : > { %v6867_v9 = vadd.f32 %v5725_v24, %v3452_v27  ;;  %v6835_v7 = vpop.f32.mrb[2].mxu0 }
 0x2ce   : > { %v5893_v17 = vadd.f32 %v6866_v38, %v9760_v62  ;;  %v6868_v31 = vadd.f32 %v6835_v7, %v6665_v61  ;;  %v5728_v8 = vpop.f32.mrb[3].mxu0 }
 0x2cf   : > { %v5891_v21 = vadd.f32 %v6867_v9, %v9760_v62  ;;  %v6869_v50 = vadd.f32 %v5728_v8, %v3455_v42 }
 0x2d0   : > { %v5925_v4 = vmax.f32 %v5893_v17, 0.0  ;;  %v5894_v20 = vadd.f32 %v6868_v31, %v9760_v62 }
 0x2d1   : > { %v5923_v32 = vmax.f32 %v5891_v21, 0.0  ;;  %v5892_v54 = vadd.f32 %v6869_v50, %v9760_v62 }
 0x2d2   : > { %5957 = vst [vmem:[%s9767_s12 + $0x10] sm:$0xff] %v5925_v4  ;;  %v5926_v18 = vmax.f32 %v5894_v20, 0.0 }
 0x2d3   : > { %5955 = vst [vmem:[%s9767_s12] sm:$0xff] %v5923_v32  ;;  %v5924_v53 = vmax.f32 %v5892_v54, 0.0  ;;  %v6838_v43 = vpop.f32.mrb[4].mxu0 }
 0x2d4   : > { %5958 = vst [vmem:[%s9767_s12 + $0x18] sm:$0xff] %v5926_v18  ;;  %v6870_v63 = vadd.f32 %v6838_v43, %v6668_v48  ;;  %v5741_v15 = vpop.f32.mrb[5].mxu0 }
 0x2d5   : > { %5956 = vst [vmem:[%s9767_s12 + $0x8] sm:$0xff] %v5924_v53  ;;  %v6871_v37 = vadd.f32 %v5741_v15, %v3468_v25  ;;  %v6839_v26 = vpop.f32.mrb[6].mxu0 }
 0x2d6   : > { %v5897_v23 = vadd.f32 %v6870_v63, %v9760_v62  ;;  %v6872_v60 = vadd.f32 %v6839_v26, %v6669_v51  ;;  %v5744_v46 = vpop.f32.mrb[7].mxu0 }
 0x2d7   : > { %v5895_v34 = vadd.f32 %v6871_v37, %v9760_v62  ;;  %v6873_v1 = vadd.f32 %v5744_v46, %v3471_v47 }
 0x2d8   : > { %v5929_v44 = vmax.f32 %v5897_v23, 0.0  ;;  %v5898_v56 = vadd.f32 %v6872_v60, %v9760_v62 }
 0x2d9   : > { %v5927_v11 = vmax.f32 %v5895_v34, 0.0  ;;  %v5896_v33 = vadd.f32 %v6873_v1, %v9760_v62 }
 0x2da   : > { %5961 = vst [vmem:[%s9767_s12 + $0x30] sm:$0xff] %v5929_v44  ;;  %v5930_v30 = vmax.f32 %v5898_v56, 0.0 }
 0x2db   : > { %5959 = vst [vmem:[%s9767_s12 + $0x20] sm:$0xff] %v5927_v11  ;;  %v5928_v29 = vmax.f32 %v5896_v33, 0.0  ;;  %v6842_v55 = vpop.f32.mrb[8].mxu0 }
 0x2dc   : > { %5962 = vst [vmem:[%s9767_s12 + $0x38] sm:$0xff] %v5930_v30  ;;  %v6874_v45 = vadd.f32 %v6842_v55, %v6672_v5  ;;  %v5757_v59 = vpop.f32.mrb[9].mxu0 }
 0x2dd   : > { %5960 = vst [vmem:[%s9767_s12 + $0x28] sm:$0xff] %v5928_v29  ;;  %v6875_v6 = vadd.f32 %v5757_v59, %v3484_v22  ;;  %v6843_v39 = vpop.f32.mrb[10].mxu0 }
 0x2de   : > { %v5901_v58 = vadd.f32 %v6874_v45, %v9760_v62  ;;  %v6876_v49 = vadd.f32 %v6843_v39, %v6673_v13  ;;  %v5760_v35 = vpop.f32.mrb[11].mxu0 }
 0x2df   : > { %v5899_v16 = vadd.f32 %v6875_v6, %v9760_v62  ;;  %v6877_v14 = vadd.f32 %v5760_v35, %v3487_v57 }
 0x2e0   : > { %v5933_v52 = vmax.f32 %v5901_v58, 0.0  ;;  %v5902_v0 = vadd.f32 %v6876_v49, %v9760_v62 }
 0x2e1   : > { %v5931_v19 = vmax.f32 %v5899_v16, 0.0  ;;  %v5900_v36 = vadd.f32 %v6877_v14, %v9760_v62 }
 0x2e2   : > { %5965 = vst [vmem:[%s9767_s12 + $0x50] sm:$0xff] %v5933_v52  ;;  %v5934_v10 = vmax.f32 %v5902_v0, 0.0 }
 0x2e3   : > { %5963 = vst [vmem:[%s9767_s12 + $0x40] sm:$0xff] %v5931_v19  ;;  %v5932_v2 = vmax.f32 %v5900_v36, 0.0  ;;  %v6846_v27 = vpop.f32.mrb[12].mxu0 }
 0x2e4   : > { %5966 = vst [vmem:[%s9767_s12 + $0x58] sm:$0xff] %v5934_v10  ;;  %v6878_v61 = vadd.f32 %v6846_v27, %v9749_v40  ;;  %v5773_v42 = vpop.f32.mrb[13].mxu0 }
 0x2e5   : > { %5964 = vst [vmem:[%s9767_s12 + $0x48] sm:$0xff] %v5932_v2  ;;  %v6879_v48 = vadd.f32 %v5773_v42, %v9751_v41  ;;  %v6847_v25 = vpop.f32.mrb[14].mxu0 }
 0x2e6   : > { %v5905_v51 = vadd.f32 %v6878_v61, %v9760_v62  ;;  %v6880_v47 = vadd.f32 %v6847_v25, %v9753_v12  ;;  %v5776_v5 = vpop.f32.mrb[15].mxu0 }
 0x2e7   : > { %v5903_v22 = vadd.f32 %v6879_v48, %v9760_v62  ;;  %v6881_v13 = vadd.f32 %v5776_v5, %v9755_v28 }
 0x2e8   : > { %v5937_v57 = vmax.f32 %v5905_v51, 0.0  ;;  %v5906_v40 = vadd.f32 %v6880_v47, %v9760_v62 }
 0x2e9   : > { %v5935_v3 = vmax.f32 %v5903_v22, 0.0  ;;  %v5904_v38 = vadd.f32 %v6881_v13, %v9760_v62 }
 0x2ea   : > { %5969 = vst [vmem:[%s9767_s12 + $0x70] sm:$0xff] %v5937_v57  ;;  %v5938_v41 = vmax.f32 %v5906_v40, 0.0 }
 0x2eb   : > { %5967 = vst [vmem:[%s9767_s12 + $0x60] sm:$0xff] %v5935_v3  ;;  %v5936_v24 = vmax.f32 %v5904_v38, 0.0  ;;  %v6850_v9 = vpop.f32.mrb[16].mxu0 }
 0x2ec   : > { %5970 = vst [vmem:[%s9767_s12 + $0x78] sm:$0xff] %v5938_v41  ;;  %v5789_v7 = vpop.f32.mrb[17].mxu0  ;;  %v6714_v31 = vpop.f32.mrb[16].mxu1 }
 0x2ed   : > { %5968 = vst [vmem:[%s9767_s12 + $0x68] sm:$0xff] %v5936_v24  ;;  %v6851_v12 = vpop.f32.mrb[18].mxu0  ;;  %v6882_v8 = vadd.f32 %v6850_v9, %v6714_v31  ;;  %v3846_v28 = vpop.f32.mrb[17].mxu1 }
 0x2ee   : > { %v5792_v17 = vpop.f32.mrb[19].mxu0  ;;  %v6883_v21 = vadd.f32 %v5789_v7, %v3846_v28  ;;  %v6715_v50 = vpop.f32.mrb[18].mxu1 }
 0x2ef   : > { %v5909_v4 = vadd.f32 %v6882_v8, %v9760_v62  ;;  %v6884_v20 = vadd.f32 %v6851_v12, %v6715_v50  ;;  %v3849_v32 = vpop.f32.mrb[19].mxu1 }
 0x2f0   : > { %v5907_v54 = vadd.f32 %v6883_v21, %v9760_v62  ;;  %v6885_v18 = vadd.f32 %v5792_v17, %v3849_v32 }
 0x2f1   : > { %v5941_v43 = vmax.f32 %v5909_v4, 0.0  ;;  %v5910_v63 = vadd.f32 %v6884_v20, %v9760_v62 }
 0x2f2   : > { %v5939_v37 = vmax.f32 %v5907_v54, 0.0  ;;  %v5908_v26 = vadd.f32 %v6885_v18, %v9760_v62 }
 0x2f3   : > { %v6854_v53 = vpop.f32.mrb[20].mxu0  ;;  %5973 = vst [vmem:[%s9767_s12 + $0x90] sm:$0xff] %v5941_v43  ;;  %v5942_v60 = vmax.f32 %v5910_v63, 0.0 }
 0x2f4   : > { %v5805_v15 = vpop.f32.mrb[21].mxu0  ;;  %5971 = vst [vmem:[%s9767_s12 + $0x80] sm:$0xff] %v5939_v37  ;;  %v5940_v34 = vmax.f32 %v5908_v26, 0.0  ;;  %v6718_v1 = vpop.f32.mrb[20].mxu1 }
 0x2f5   : > { %v6855_v23 = vpop.f32.mrb[22].mxu0  ;;  %5974 = vst [vmem:[%s9767_s12 + $0x98] sm:$0xff] %v5942_v60  ;;  %v6886_v44 = vadd.f32 %v6854_v53, %v6718_v1  ;;  %v3862_v56 = vpop.f32.mrb[21].mxu1 }
 0x2f6   : > { %v5808_v46 = vpop.f32.mrb[23].mxu0  ;;  %5972 = vst [vmem:[%s9767_s12 + $0x88] sm:$0xff] %v5940_v34  ;;  %v6887_v11 = vadd.f32 %v5805_v15, %v3862_v56  ;;  %v6719_v33 = vpop.f32.mrb[22].mxu1 }
 0x2f7   : > { %v5913_v30 = vadd.f32 %v6886_v44, %v9760_v62  ;;  %v6888_v29 = vadd.f32 %v6855_v23, %v6719_v33  ;;  %v3865_v55 = vpop.f32.mrb[23].mxu1 }
 0x2f8   : > { %v5911_v45 = vadd.f32 %v6887_v11, %v9760_v62  ;;  %v6889_v59 = vadd.f32 %v5808_v46, %v3865_v55 }
 0x2f9   : > { %v5945_v39 = vmax.f32 %v5913_v30, 0.0  ;;  %v5914_v58 = vadd.f32 %v6888_v29, %v9760_v62 }
 0x2fa   : > { %v5943_v35 = vmax.f32 %v5911_v45, 0.0  ;;  %v5912_v16 = vadd.f32 %v6889_v59, %v9760_v62 }
 0x2fb   : > { %v6858_v6 = vpop.f32.mrb[24].mxu0  ;;  %5977 = vst [vmem:[%s9767_s12 + $0xb0] sm:$0xff] %v5945_v39  ;;  %v5946_v52 = vmax.f32 %v5914_v58, 0.0 }
 0x2fc   : > { %v5821_v49 = vpop.f32.mrb[25].mxu0  ;;  %5975 = vst [vmem:[%s9767_s12 + $0xa0] sm:$0xff] %v5943_v35  ;;  %v5944_v19 = vmax.f32 %v5912_v16, 0.0  ;;  %v6722_v36 = vpop.f32.mrb[24].mxu1 }
 0x2fd   : > { %v6859_v14 = vpop.f32.mrb[26].mxu0  ;;  %5978 = vst [vmem:[%s9767_s12 + $0xb8] sm:$0xff] %v5946_v52  ;;  %v6890_v10 = vadd.f32 %v6858_v6, %v6722_v36  ;;  %v3878_v2 = vpop.f32.mrb[25].mxu1 }
 0x2fe   : > { %v5824_v0 = vpop.f32.mrb[27].mxu0  ;;  %5976 = vst [vmem:[%s9767_s12 + $0xa8] sm:$0xff] %v5944_v19  ;;  %v6891_v27 = vadd.f32 %v5821_v49, %v3878_v2  ;;  %v6723_v61 = vpop.f32.mrb[26].mxu1 }
 0x2ff   : > { %v5917_v42 = vadd.f32 %v6890_v10, %v9760_v62  ;;  %v6892_v48 = vadd.f32 %v6859_v14, %v6723_v61  ;;  %v3881_v25 = vpop.f32.mrb[27].mxu1 }
 0x300   : > { %v5915_v51 = vadd.f32 %v6891_v27, %v9760_v62  ;;  %v6893_v47 = vadd.f32 %v5824_v0, %v3881_v25 }
 0x301   : > { %v5949_v22 = vmax.f32 %v5917_v42, 0.0  ;;  %v5918_v13 = vadd.f32 %v6892_v48, %v9760_v62 }
 0x302   : > { %v5947_v40 = vmax.f32 %v5915_v51, 0.0  ;;  %v5916_v3 = vadd.f32 %v6893_v47, %v9760_v62 }
 0x303   : > { %v6862_v5 = vpop.f32.mrb[28].mxu0  ;;  %5981 = vst [vmem:[%s9767_s12 + $0xd0] sm:$0xff] %v5949_v22  ;;  %v5950_v41 = vmax.f32 %v5918_v13, 0.0 }
 0x304   : > { %v5837_v57 = vpop.f32.mrb[29].mxu0  ;;  %5979 = vst [vmem:[%s9767_s12 + $0xc0] sm:$0xff] %v5947_v40  ;;  %v5948_v9 = vmax.f32 %v5916_v3, 0.0  ;;  %v6726_v7 = vpop.f32.mrb[28].mxu1 }
 0x305   : > { %v6863_v38 = vpop.f32.mrb[30].mxu0  ;;  %5982 = vst [vmem:[%s9767_s12 + $0xd8] sm:$0xff] %v5950_v41  ;;  %v6894_v12 = vadd.f32 %v6862_v5, %v6726_v7  ;;  %v3894_v17 = vpop.f32.mrb[29].mxu1 }
 0x306   : > { %v5840_v24 = vpop.f32.mrb[31].mxu0  ;;  %5980 = vst [vmem:[%s9767_s12 + $0xc8] sm:$0xff] %v5948_v9  ;;  %v6895_v31 = vadd.f32 %v5837_v57, %v3894_v17  ;;  %v6727_v8 = vpop.f32.mrb[30].mxu1 }
 0x307   : > { %v5921_v28 = vadd.f32 %v6894_v12, %v9760_v62  ;;  %v6896_v21 = vadd.f32 %v6863_v38, %v6727_v8  ;;  %v3897_v50 = vpop.f32.mrb[31].mxu1 }
 0x308   : > { %v5919_v4 = vadd.f32 %v6895_v31, %v9760_v62  ;;  %v6897_v20 = vadd.f32 %v5840_v24, %v3897_v50 }
 0x309   : > { %v5953_v32 = vmax.f32 %v5921_v28, 0.0  ;;  %v5922_v54 = vadd.f32 %v6896_v21, %v9760_v62 }
 0x30a   : > { %v5951_v18 = vmax.f32 %v5919_v4, 0.0  ;;  %v5920_v53 = vadd.f32 %v6897_v20, %v9760_v62 }
 0x30b   : > { %5985 = vst [vmem:[%s9767_s12 + $0xf0] sm:$0xff] %v5953_v32  ;;  %v5954_v43 = vmax.f32 %v5922_v54, 0.0 }
 0x30c   : > { %5983 = vst [vmem:[%s9767_s12 + $0xe0] sm:$0xff] %v5951_v18  ;;  %v5952_v63 = vmax.f32 %v5920_v53, 0.0 }
 0x30d   : > { %5986 = vst [vmem:[%s9767_s12 + $0xf8] sm:$0xff] %v5954_v43 }
 0x30e   : > { %5984 = vst [vmem:[%s9767_s12 + $0xe8] sm:$0xff] %v5952_v63 }
 0x30f PF: > { %s14_s15 = sadd.s32 1, %s7290_s15  }
 0x310   : > { %p11_p4 = scmp.ge.s32.totalorder %s14_s15, 4  }
 0x312   :  { %13 = sbr.rel (!%p11_p4) target bundleno = 1 (0x1), region = 75 }

</bundles_post_ra>
